<compile_context>
chip_gen: v7x
topology: tpu7x:2x2x1
jax: 0.10.0
libtpu: 0.0.40
codegen_flags: <defaults>
</compile_context>

<pallas_src>
import functools

import jax
import jax.numpy as jnp
import numpy as np
from jax.experimental import pallas as pl
from jax.experimental.pallas import tpu as pltpu

ACT_DTYPE = jnp.bfloat16   # inter-layer activation storage / MXU operand dtype
BLOCK_SLOPE = 0.01         # nn.LeakyReLU() default inside BottleNeck
STEM_SLOPE = 0.1           # nn.LeakyReLU(0.1) in ResNet.forward
EXPANSION = 4
BN_EPS = 1e-5


# ----------------------------------------------------------------------------
# Small helpers
# ----------------------------------------------------------------------------
def _leaky(x, slope):
    return jnp.where(x >= 0, x, jnp.float32(slope) * x)


def _pick_tm(m):
    """Largest row tile: whole array unless it is big enough to split for megacore."""
    if m % 256 == 0 and m > 256:
        return 256
    return m


def _nbytes(x):
    return int(x.size) * int(x.dtype.itemsize)


def _compiler_params(total_bytes):
    # Explicit, budget-aware VMEM limit: double-buffered operand bytes + headroom,
    # clamped to 32 MiB so it is safe on v7x (64 MiB physical / 32 MiB scoped).
    vmem = int(min(32 << 20, max(16 << 20, 2 * total_bytes + (2 << 20))))
    return pltpu.CompilerParams(
        dimension_semantics=("parallel",),
        vmem_limit_bytes=vmem,
    )


def im2col(x, kh, kw, stride, padding):
    """x: [N, H, W, C] -> [N, Ho, Wo, kh*kw*C], tap ordering (dy, dx, c)."""
    n, h, w, c = x.shape
    xp = jnp.pad(x, ((0, 0), (padding, padding), (padding, padding), (0, 0)))
    ho = (h + 2 * padding - kh) // stride + 1
    wo = (w + 2 * padding - kw) // stride + 1
    cols = []
    for dy in range(kh):
        for dx in range(kw):
            cols.append(xp[:, dy:dy + ho * stride:stride, dx:dx + wo * stride:stride, :])
    return jnp.concatenate(cols, axis=-1)


def _make_pool_matrix(n, ho, wo):
    """Row-gather matrix implementing AvgPool2d(2) over (n, h, w)-ordered rows."""
    hp, wp = ho // 2, wo // 2
    pm = np.zeros((n * hp * wp, n * ho * wo), np.float32)
    r = 0
    for b in range(n):
        for ph in range(hp):
            for pw in range(wp):
                for dy in range(2):
                    for dx in range(2):
                        src = (b * ho + 2 * ph + dy) * wo + (2 * pw + dx)
                        pm[r, src] = 0.25
                r += 1
    return jnp.asarray(pm)


# ----------------------------------------------------------------------------
# Pallas kernels
# ----------------------------------------------------------------------------
def stem_conv1_call(patches, w_stem, b_stem, w1, b1):
    """Fused: stem 7x7 conv (+folded conv-bias and 2x BN) + LeakyReLU(0.1) -> x0,
       plus block-0's 1x1 conv (+folded BN) + LeakyReLU -> y1.  One pallas_call."""
    m, k = patches.shape
    n1 = w_stem.shape[1]
    n2 = w1.shape[1]
    tm = _pick_tm(m)
    grid = (m // tm,)

    def kernel(p_ref, ws_ref, bs_ref, w1_ref, b1_ref, x0_ref, y1_ref):
        z = jnp.dot(p_ref[...], ws_ref[...], preferred_element_type=jnp.float32)
        x0 = _leaky(z + bs_ref[...], STEM_SLOPE)
        x0_ref[...] = x0.astype(x0_ref.dtype)
        z1 = jnp.dot(x0.astype(ACT_DTYPE), w1_ref[...],
                     preferred_element_type=jnp.float32)
        y1_ref[...] = _leaky(z1 + b1_ref[...], BLOCK_SLOPE).astype(y1_ref.dtype)

    args = (patches, w_stem, b_stem, w1, b1)
    flops = 2 * m * k * n1 + 2 * m * n1 * n2
    total_bytes = sum(_nbytes(a) for a in args) + m * (n1 + n2) * 2

    return pl.pallas_call(
        kernel,
        out_shape=(jax.ShapeDtypeStruct((m, n1), ACT_DTYPE),
                   jax.ShapeDtypeStruct((m, n2), ACT_DTYPE)),
        grid=grid,
        in_specs=[
            pl.BlockSpec((tm, k), lambda i: (i, 0)),
            pl.BlockSpec((k, n1), lambda i: (0, 0)),
            pl.BlockSpec((1, n1), lambda i: (0, 0)),
            pl.BlockSpec((n1, n2), lambda i: (0, 0)),
            pl.BlockSpec((1, n2), lambda i: (0, 0)),
        ],
        out_specs=(pl.BlockSpec((tm, n1), lambda i: (i, 0)),
                   pl.BlockSpec((tm, n2), lambda i: (i, 0))),
        compiler_params=_compiler_params(total_bytes),
        cost_estimate=pl.CostEstimate(flops=flops, transcendentals=0,
                                      bytes_accessed=total_bytes),
    )(*args)


def bottleneck_tail_call(patches, res, w2, b2, w3, b3,
                         wd=None, w1_next=None, b1_next=None, pool_mat=None):
    """One fused pallas_call per bottleneck:
         y2   = leaky(patches @ w2 + b2)                 3x3 conv (BN folded)
         acc  = y2 @ w3 + b3 + (res @ wd | res)          conv3 + downsample / identity
         out  = leaky(acc)
       plus, fused in the same kernel, either
         y1n  = leaky(out @ w1_next + b1_next)           next block's 1x1 conv
       or
         pooled = pool_mat @ out                         final AvgPool2d(2).
    """
    m, k2 = patches.shape
    p = w2.shape[1]
    c4 = w3.shape[1]
    cr = res.shape[1]
    has_down = wd is not None
    has_next = w1_next is not None
    do_pool = pool_mat is not None
    assert not (has_next and do_pool)

    tm = m if do_pool else _pick_tm(m)   # pooling mixes rows -> single tile
    grid = (m // tm,)

    def kernel(*refs):
        it = iter(refs)
        p_ref = next(it)
        r_ref = next(it)
        w2_ref = next(it)
        b2_ref = next(it)
        w3_ref = next(it)
        b3_ref = next(it)
        wd_ref = next(it) if has_down else None
        w1n_ref = next(it) if has_next else None
        b1n_ref = next(it) if has_next else None
        pm_ref = next(it) if do_pool else None
        if do_pool:
            pooled_ref = next(it)
        else:
            out_ref = next(it)
            y1n_ref = next(it) if has_next else None

        y2 = jnp.dot(p_ref[...], w2_ref[...], preferred_element_type=jnp.float32)
        y2 = _leaky(y2 + b2_ref[...], BLOCK_SLOPE)
        acc = jnp.dot(y2.astype(ACT_DTYPE), w3_ref[...],
                      preferred_element_type=jnp.float32) + b3_ref[...]
        if has_down:
            acc = acc + jnp.dot(r_ref[...], wd_ref[...],
                                preferred_element_type=jnp.float32)
        else:
            acc = acc + r_ref[...].astype(jnp.float32)
        out = _leaky(acc, BLOCK_SLOPE)

        if do_pool:
            pooled_ref[...] = jnp.dot(pm_ref[...], out,
                                      preferred_element_type=jnp.float32)
        else:
            out_ref[...] = out.astype(out_ref.dtype)
            if has_next:
                z = jnp.dot(out.astype(ACT_DTYPE), w1n_ref[...],
                            preferred_element_type=jnp.float32)
                y1n_ref[...] = _leaky(z + b1n_ref[...],
                                      BLOCK_SLOPE).astype(y1n_ref.dtype)

    in_specs = [
        pl.BlockSpec((tm, k2), lambda i: (i, 0)),
        pl.BlockSpec((tm, cr), lambda i: (i, 0)),
        pl.BlockSpec((k2, p), lambda i: (0, 0)),
        pl.BlockSpec((1, p), lambda i: (0, 0)),
        pl.BlockSpec((p, c4), lambda i: (0, 0)),
        pl.BlockSpec((1, c4), lambda i: (0, 0)),
    ]
    args = [patches, res, w2, b2, w3, b3]
    flops = 2 * m * k2 * p + 2 * m * p * c4
    if has_down:
        in_specs.append(pl.BlockSpec((cr, c4), lambda i: (0, 0)))
        args.append(wd)
        flops += 2 * m * cr * c4
    if has_next:
        pn = w1_next.shape[1]
        in_specs += [pl.BlockSpec((c4, pn), lambda i: (0, 0)),
                     pl.BlockSpec((1, pn), lambda i: (0, 0))]
        args += [w1_next, b1_next]
        flops += 2 * m * c4 * pn
    if do_pool:
        rp = pool_mat.shape[0]
        in_specs.append(pl.BlockSpec((rp, m), lambda i: (0, 0)))
        args.append(pool_mat)
        flops += 2 * rp * m * c4
        out_shape = jax.ShapeDtypeStruct((rp, c4), jnp.float32)
        out_specs = pl.BlockSpec((rp, c4), lambda i: (0, 0))
        out_bytes = rp * c4 * 4
    elif has_next:
        out_shape = (jax.ShapeDtypeStruct((m, c4), ACT_DTYPE),
                     jax.ShapeDtypeStruct((m, pn), ACT_DTYPE))
        out_specs = (pl.BlockSpec((tm, c4), lambda i: (i, 0)),
                     pl.BlockSpec((tm, pn), lambda i: (i, 0)))
        out_bytes = m * (c4 + pn) * 2
    else:
        out_shape = jax.ShapeDtypeStruct((m, c4), ACT_DTYPE)
        out_specs = pl.BlockSpec((tm, c4), lambda i: (i, 0))
        out_bytes = m * c4 * 2

    total_bytes = sum(_nbytes(a) for a in args) + out_bytes
    return pl.pallas_call(
        kernel,
        out_shape=out_shape,
        grid=grid,
        in_specs=in_specs,
        out_specs=out_specs,
        compiler_params=_compiler_params(total_bytes),
        cost_estimate=pl.CostEstimate(flops=flops, transcendentals=0,
                                      bytes_accessed=total_bytes),
    )(*args)


# ----------------------------------------------------------------------------
# Parameter construction (deterministic, synthetic) with BN folded into weights
# ----------------------------------------------------------------------------
def _fold_bn(gamma, beta, mean, var, eps=BN_EPS):
    scale = gamma / jnp.sqrt(var + eps)
    return scale, beta - mean * scale


def init_params(key, depth=38):
    n = (depth - 2) // 9  # = 4 blocks per layer for depth 38
    keys = iter(jax.random.split(key, 1024))

    def nk():
        return next(keys)

    def conv_w(kh, kw, cin, cout):
        fan_in = kh * kw * cin
        bound = 1.0 / (fan_in ** 0.5)
        return jax.random.uniform(nk(), (kh, kw, cin, cout), jnp.float32, -bound, bound)

    def bn(c):
        gamma = 1.0 + 0.1 * jax.random.normal(nk(), (c,), jnp.float32)
        beta = 0.1 * jax.random.normal(nk(), (c,), jnp.float32)
        mean = 0.1 * jax.random.normal(nk(), (c,), jnp.float32)
        var = 1.0 + 0.1 * jnp.abs(jax.random.normal(nk(), (c,), jnp.float32))
        return gamma, beta, mean, var

    params = {}

    # Stem: Conv2d(1,16,7,pad=3,bias=True) -> BN -> BN(self.bn1) -> LeakyReLU(0.1)
    stem_w = conv_w(7, 7, 1, 16).reshape(49, 16)
    stem_b = 0.1 * jax.random.normal(nk(), (16,), jnp.float32)
    s_a, t_a = _fold_bn(*bn(16))
    s_1, t_1 = _fold_bn(*bn(16))
    params["stem_w"] = (stem_w * (s_a * s_1)[None, :]).astype(ACT_DTYPE)
    params["stem_b"] = (s_1 * (s_a * stem_b + t_a) + t_1).reshape(1, 16)

    def make_block(inplanes, planes, stride, with_down):
        w1 = conv_w(1, 1, inplanes, planes).reshape(inplanes, planes)
        s1, t1 = _fold_bn(*bn(planes))
        w2 = conv_w(3, 3, planes, planes).reshape(9 * planes, planes)
        s2, t2 = _fold_bn(*bn(planes))
        w3 = conv_w(1, 1, planes, planes * EXPANSION).reshape(planes, planes * EXPANSION)
        s3, t3 = _fold_bn(*bn(planes * EXPANSION))
        blk = {
            "stride": stride, "planes": planes, "inplanes": inplanes,
            "w1": (w1 * s1[None, :]).astype(ACT_DTYPE), "b1": t1.reshape(1, -1),
            "w2": (w2 * s2[None, :]).astype(ACT_DTYPE), "b2": t2.reshape(1, -1),
            "w3": (w3 * s3[None, :]).astype(ACT_DTYPE),
            "wd": None,
        }
        b3 = t3
        if with_down:
            wdm = conv_w(1, 1, inplanes, planes * EXPANSION).reshape(
                inplanes, planes * EXPANSION)
            sd, td = _fold_bn(*bn(planes * EXPANSION))
            blk["wd"] = (wdm * sd[None, :]).astype(ACT_DTYPE)
            b3 = b3 + td  # downsample BN bias folds into the shared post-add bias
        blk["b3"] = b3.reshape(1, -1)
        return blk

    blocks = []
    inplanes = 16
    for planes, stride in ((16, 1), (32, 2), (64, 2)):
        with_down = (stride != 1) or (inplanes != planes * EXPANSION)
        blocks.append(make_block(inplanes, planes, stride, with_down))
        inplanes = planes * EXPANSION
        for _ in range(1, n):
            blocks.append(make_block(inplanes, planes, 1, False))
    params["blocks"] = blocks
    return params


# ----------------------------------------------------------------------------
# Forward (matches PyTorch ResNet.forward: conv1 -> bn1 -> relu -> layers -> avgpool)
# ----------------------------------------------------------------------------
def resnet_forward(x_nchw, params):
    n, cin, h, w = x_nchw.shape
    assert cin == 1
    x = jnp.transpose(x_nchw, (0, 2, 3, 1)).astype(ACT_DTYPE)  # NCHW -> NHWC

    blocks = params["blocks"]

    # Stem 7x7 conv fused with block-0's conv1 in one pallas_call.
    p7 = im2col(x, 7, 7, 1, 3).reshape(n * h * w, 49)
    x_cur, y1 = stem_conv1_call(p7, params["stem_w"], params["stem_b"],
                                blocks[0]["w1"], blocks[0]["b1"])
    hc, wc = h, w

    for b, blk in enumerate(blocks):
        s = blk["stride"]
        planes = blk["planes"]
        inplanes = blk["inplanes"]
        ho, wo = hc // s, wc // s
        mo = n * ho * wo

        patches = im2col(y1.reshape(n, hc, wc, planes), 3, 3, s, 1).reshape(mo, 9 * planes)
        if blk["wd"] is not None:
            res = x_cur.reshape(n, hc, wc, inplanes)[:, ::s, ::s, :].reshape(mo, inplanes)
        else:
            res = x_cur  # identity residual (same rows, same channels)

        last = b == len(blocks) - 1
        if last:
            assert ho % 2 == 0 and wo % 2 == 0  # AvgPool2d(2) floors odd sizes
            pool_mat = _make_pool_matrix(n, ho, wo)
            pooled = bottleneck_tail_call(patches, res, blk["w2"], blk["b2"],
                                          blk["w3"], blk["b3"], wd=blk["wd"],
                                          pool_mat=pool_mat)
            y = pooled.reshape(n, ho // 2, wo // 2, -1)
            return jnp.transpose(y, (0, 3, 1, 2))  # NHWC -> NCHW, float32
        nxt = blocks[b + 1]
        x_cur, y1 = bottleneck_tail_call(patches, res, blk["w2"], blk["b2"],
                                         blk["w3"], blk["b3"], wd=blk["wd"],
                                         w1_next=nxt["w1"], b1_next=nxt["b1"])
        hc, wc = ho, wo


# ----------------------------------------------------------------------------
if __name__ == "__main__":
    root = jax.random.PRNGKey(0)
    pkey, xkey = jax.random.split(root)
    params = init_params(pkey, depth=38)

    # small input consistent with the module: 1 input channel, NCHW
    x = jax.random.normal(xkey, (2, 1, 16, 16), jnp.float32)

    fwd = jax.jit(functools.partial(resnet_forward, params=params))
    y = fwd(x)
    jax.block_until_ready(y)

    assert y.shape == (2, 256, 2, 2), y.shape
    assert bool(jnp.all(jnp.isfinite(y)))
    print("KERNEL_OK")
</pallas_src>

<mosaic_0001>
module attributes {stable_mosaic.version = 11 : i64} {
  func.func @kernel(%arg0: i32, %arg1: memref<256x49xbf16, #tpu.memory_space<vmem>>, %arg2: memref<49x16xbf16, #tpu.memory_space<vmem>>, %arg3: memref<1x16xf32, #tpu.memory_space<vmem>>, %arg4: memref<16x16xbf16, #tpu.memory_space<vmem>>, %arg5: memref<1x16xf32, #tpu.memory_space<vmem>>, %arg6: memref<256x16xbf16, #tpu.memory_space<vmem>>, %arg7: memref<256x16xbf16, #tpu.memory_space<vmem>>) attributes {dimension_semantics = [#tpu.dimension_semantics<parallel>], iteration_bounds = array<i64: 2>, scalar_prefetch = 0 : i64, scratch_operands = 0 : i64, tpu.core_type = #tpu.core_type<tc>, window_params = [{transform_indices = @transform_0, window_bounds = array<i64: 256, 49>}, {pipeline_mode = #tpu.pipeline_mode<synchronous>, transform_indices = @transform_1, window_bounds = array<i64: 49, 16>}, {pipeline_mode = #tpu.pipeline_mode<synchronous>, transform_indices = @transform_2, window_bounds = array<i64: 1, 16>}, {pipeline_mode = #tpu.pipeline_mode<synchronous>, transform_indices = @transform_3, window_bounds = array<i64: 16, 16>}, {pipeline_mode = #tpu.pipeline_mode<synchronous>, transform_indices = @transform_4, window_bounds = array<i64: 1, 16>}, {transform_indices = @transform_5, window_bounds = array<i64: 256, 16>}, {transform_indices = @transform_6, window_bounds = array<i64: 256, 16>}]} {
    %c0 = arith.constant 0 : index
    %c0_0 = arith.constant 0 : index
    %0 = vector.load %arg1[%c0, %c0_0] : memref<256x49xbf16, #tpu.memory_space<vmem>>, vector<256x49xbf16>
    %c0_1 = arith.constant 0 : index
    %c0_2 = arith.constant 0 : index
    %1 = vector.load %arg2[%c0_1, %c0_2] : memref<49x16xbf16, #tpu.memory_space<vmem>>, vector<49x16xbf16>
    %cst = arith.constant dense<0.000000e+00> : vector<256x16xf32>
    %2 = tpu.matmul %0, %1, %cst {dimension_numbers = #tpu.dot_dimension_numbers<[1], [0], [0], [1], [0, 0, 1, 1], [], []>} : vector<256x49xbf16>, vector<49x16xbf16>, vector<256x16xf32> -> vector<256x16xf32>
    %c0_3 = arith.constant 0 : index
    %c0_4 = arith.constant 0 : index
    %3 = vector.load %arg3[%c0_3, %c0_4] : memref<1x16xf32, #tpu.memory_space<vmem>>, vector<1x16xf32>
    %4 = vector.broadcast %3 : vector<1x16xf32> to vector<256x16xf32>
    %5 = arith.addf %2, %4 : vector<256x16xf32>
    %cst_5 = arith.constant 0.000000e+00 : f32
    %6 = vector.broadcast %cst_5 : f32 to vector<256x16xf32>
    %7 = arith.cmpf oge, %5, %6 : vector<256x16xf32>
    %cst_6 = arith.constant 1.000000e-01 : f32
    %8 = vector.broadcast %cst_6 : f32 to vector<256x16xf32>
    %9 = arith.mulf %8, %5 : vector<256x16xf32>
    %10 = arith.select %7, %5, %9 : vector<256x16xi1>, vector<256x16xf32>
    %11 = arith.truncf %10 : vector<256x16xf32> to vector<256x16xbf16>
    %c0_7 = arith.constant 0 : index
    %c0_8 = arith.constant 0 : index
    %12 = vector.load %arg6[%c0_7, %c0_8] : memref<256x16xbf16, #tpu.memory_space<vmem>>, vector<256x16xbf16>
    tpu.vector_store %arg6[%c0_7, %c0_8], %11 {strides = array<i32>} : memref<256x16xbf16, #tpu.memory_space<vmem>>, vector<256x16xbf16>,
    %13 = arith.truncf %10 : vector<256x16xf32> to vector<256x16xbf16>
    %c0_9 = arith.constant 0 : index
    %c0_10 = arith.constant 0 : index
    %14 = vector.load %arg4[%c0_9, %c0_10] : memref<16x16xbf16, #tpu.memory_space<vmem>>, vector<16x16xbf16>
    %cst_11 = arith.constant dense<0.000000e+00> : vector<256x16xf32>
    %15 = tpu.matmul %13, %14, %cst_11 {dimension_numbers = #tpu.dot_dimension_numbers<[1], [0], [0], [1], [0, 0, 1, 1], [], []>} : vector<256x16xbf16>, vector<16x16xbf16>, vector<256x16xf32> -> vector<256x16xf32>
    %c0_12 = arith.constant 0 : index
    %c0_13 = arith.constant 0 : index
    %16 = vector.load %arg5[%c0_12, %c0_13] : memref<1x16xf32, #tpu.memory_space<vmem>>, vector<1x16xf32>
    %17 = vector.broadcast %16 : vector<1x16xf32> to vector<256x16xf32>
    %18 = arith.addf %15, %17 : vector<256x16xf32>
    %cst_14 = arith.constant 0.000000e+00 : f32
    %19 = vector.broadcast %cst_14 : f32 to vector<256x16xf32>
    %20 = arith.cmpf oge, %18, %19 : vector<256x16xf32>
    %cst_15 = arith.constant 0.00999999977 : f32
    %21 = vector.broadcast %cst_15 : f32 to vector<256x16xf32>
    %22 = arith.mulf %21, %18 : vector<256x16xf32>
    %23 = arith.select %20, %18, %22 : vector<256x16xi1>, vector<256x16xf32>
    %24 = arith.truncf %23 : vector<256x16xf32> to vector<256x16xbf16>
    %c0_16 = arith.constant 0 : index
    %c0_17 = arith.constant 0 : index
    %25 = vector.load %arg7[%c0_16, %c0_17] : memref<256x16xbf16, #tpu.memory_space<vmem>>, vector<256x16xbf16>
    tpu.vector_store %arg7[%c0_16, %c0_17], %24 {strides = array<i32>} : memref<256x16xbf16, #tpu.memory_space<vmem>>, vector<256x16xbf16>,
    return
  }
  func.func @transform_0(%arg0: i32) -> (i32, i32) {
    %c0_i32 = arith.constant 0 : i32
    %c0_i32_0 = arith.constant 0 : i32
    return %arg0, %c0_i32 : i32, i32
  }
  func.func @transform_1(%arg0: i32) -> (i32, i32) {
    %c0_i32 = arith.constant 0 : i32
    %c0_i32_0 = arith.constant 0 : i32
    %c0_i32_1 = arith.constant 0 : i32
    return %c0_i32, %c0_i32_0 : i32, i32
  }
  func.func @transform_2(%arg0: i32) -> (i32, i32) {
    %c0_i32 = arith.constant 0 : i32
    %c0_i32_0 = arith.constant 0 : i32
    %c0_i32_1 = arith.constant 0 : i32
    return %c0_i32, %c0_i32_0 : i32, i32
  }
  func.func @transform_3(%arg0: i32) -> (i32, i32) {
    %c0_i32 = arith.constant 0 : i32
    %c0_i32_0 = arith.constant 0 : i32
    %c0_i32_1 = arith.constant 0 : i32
    return %c0_i32, %c0_i32_0 : i32, i32
  }
  func.func @transform_4(%arg0: i32) -> (i32, i32) {
    %c0_i32 = arith.constant 0 : i32
    %c0_i32_0 = arith.constant 0 : i32
    %c0_i32_1 = arith.constant 0 : i32
    return %c0_i32, %c0_i32_0 : i32, i32
  }
  func.func @transform_5(%arg0: i32) -> (i32, i32) {
    %c0_i32 = arith.constant 0 : i32
    %c0_i32_0 = arith.constant 0 : i32
    return %arg0, %c0_i32 : i32, i32
  }
  func.func @transform_6(%arg0: i32) -> (i32, i32) {
    %c0_i32 = arith.constant 0 : i32
    %c0_i32_0 = arith.constant 0 : i32
    return %arg0, %c0_i32 : i32, i32
  }
}

module attributes {stable_mosaic.version = 11 : i64} {
  func.func @kernel(%arg0: i32, %arg1: memref<256x144xbf16, #tpu.memory_space<vmem>>, %arg2: memref<256x16xbf16, #tpu.memory_space<vmem>>, %arg3: memref<144x16xbf16, #tpu.memory_space<vmem>>, %arg4: memref<1x16xf32, #tpu.memory_space<vmem>>, %arg5: memref<16x64xbf16, #tpu.memory_space<vmem>>, %arg6: memref<1x64xf32, #tpu.memory_space<vmem>>, %arg7: memref<16x64xbf16, #tpu.memory_space<vmem>>, %arg8: memref<64x16xbf16, #tpu.memory_space<vmem>>, %arg9: memref<1x16xf32, #tpu.memory_space<vmem>>, %arg10: memref<256x64xbf16, #tpu.memory_space<vmem>>, %arg11: memref<256x16xbf16, #tpu.memory_space<vmem>>) attributes {dimension_semantics = [#tpu.dimension_semantics<parallel>], iteration_bounds = array<i64: 2>, scalar_prefetch = 0 : i64, scratch_operands = 0 : i64, tpu.core_type = #tpu.core_type<tc>, window_params = [{transform_indices = @transform_0, window_bounds = array<i64: 256, 144>}, {transform_indices = @transform_1, window_bounds = array<i64: 256, 16>}, {pipeline_mode = #tpu.pipeline_mode<synchronous>, transform_indices = @transform_2, window_bounds = array<i64: 144, 16>}, {pipeline_mode = #tpu.pipeline_mode<synchronous>, transform_indices = @transform_3, window_bounds = array<i64: 1, 16>}, {pipeline_mode = #tpu.pipeline_mode<synchronous>, transform_indices = @transform_4, window_bounds = array<i64: 16, 64>}, {pipeline_mode = #tpu.pipeline_mode<synchronous>, transform_indices = @transform_5, window_bounds = array<i64: 1, 64>}, {pipeline_mode = #tpu.pipeline_mode<synchronous>, transform_indices = @transform_6, window_bounds = array<i64: 16, 64>}, {pipeline_mode = #tpu.pipeline_mode<synchronous>, transform_indices = @transform_7, window_bounds = array<i64: 64, 16>}, {pipeline_mode = #tpu.pipeline_mode<synchronous>, transform_indices = @transform_8, window_bounds = array<i64: 1, 16>}, {transform_indices = @transform_9, window_bounds = array<i64: 256, 64>}, {transform_indices = @transform_10, window_bounds = array<i64: 256, 16>}]} {
    %c0 = arith.constant 0 : index
    %c0_0 = arith.constant 0 : index
    %0 = vector.load %arg1[%c0, %c0_0] : memref<256x144xbf16, #tpu.memory_space<vmem>>, vector<256x144xbf16>
    %c0_1 = arith.constant 0 : index
    %c0_2 = arith.constant 0 : index
    %1 = vector.load %arg3[%c0_1, %c0_2] : memref<144x16xbf16, #tpu.memory_space<vmem>>, vector<144x16xbf16>
    %cst = arith.constant dense<0.000000e+00> : vector<256x16xf32>
    %2 = tpu.matmul %0, %1, %cst {dimension_numbers = #tpu.dot_dimension_numbers<[1], [0], [0], [1], [0, 0, 1, 1], [], []>} : vector<256x144xbf16>, vector<144x16xbf16>, vector<256x16xf32> -> vector<256x16xf32>
    %c0_3 = arith.constant 0 : index
    %c0_4 = arith.constant 0 : index
    %3 = vector.load %arg4[%c0_3, %c0_4] : memref<1x16xf32, #tpu.memory_space<vmem>>, vector<1x16xf32>
    %4 = vector.broadcast %3 : vector<1x16xf32> to vector<256x16xf32>
    %5 = arith.addf %2, %4 : vector<256x16xf32>
    %cst_5 = arith.constant 0.000000e+00 : f32
    %6 = vector.broadcast %cst_5 : f32 to vector<256x16xf32>
    %7 = arith.cmpf oge, %5, %6 : vector<256x16xf32>
    %cst_6 = arith.constant 0.00999999977 : f32
    %8 = vector.broadcast %cst_6 : f32 to vector<256x16xf32>
    %9 = arith.mulf %8, %5 : vector<256x16xf32>
    %10 = arith.select %7, %5, %9 : vector<256x16xi1>, vector<256x16xf32>
    %11 = arith.truncf %10 : vector<256x16xf32> to vector<256x16xbf16>
    %c0_7 = arith.constant 0 : index
    %c0_8 = arith.constant 0 : index
    %12 = vector.load %arg5[%c0_7, %c0_8] : memref<16x64xbf16, #tpu.memory_space<vmem>>, vector<16x64xbf16>
    %cst_9 = arith.constant dense<0.000000e+00> : vector<256x64xf32>
    %13 = tpu.matmul %11, %12, %cst_9 {dimension_numbers = #tpu.dot_dimension_numbers<[1], [0], [0], [1], [0, 0, 1, 1], [], []>} : vector<256x16xbf16>, vector<16x64xbf16>, vector<256x64xf32> -> vector<256x64xf32>
    %c0_10 = arith.constant 0 : index
    %c0_11 = arith.constant 0 : index
    %14 = vector.load %arg6[%c0_10, %c0_11] : memref<1x64xf32, #tpu.memory_space<vmem>>, vector<1x64xf32>
    %15 = vector.broadcast %14 : vector<1x64xf32> to vector<256x64xf32>
    %16 = arith.addf %13, %15 : vector<256x64xf32>
    %c0_12 = arith.constant 0 : index
    %c0_13 = arith.constant 0 : index
    %17 = vector.load %arg2[%c0_12, %c0_13] : memref<256x16xbf16, #tpu.memory_space<vmem>>, vector<256x16xbf16>
    %c0_14 = arith.constant 0 : index
    %c0_15 = arith.constant 0 : index
    %18 = vector.load %arg7[%c0_14, %c0_15] : memref<16x64xbf16, #tpu.memory_space<vmem>>, vector<16x64xbf16>
    %cst_16 = arith.constant dense<0.000000e+00> : vector<256x64xf32>
    %19 = tpu.matmul %17, %18, %cst_16 {dimension_numbers = #tpu.dot_dimension_numbers<[1], [0], [0], [1], [0, 0, 1, 1], [], []>} : vector<256x16xbf16>, vector<16x64xbf16>, vector<256x64xf32> -> vector<256x64xf32>
    %20 = arith.addf %16, %19 : vector<256x64xf32>
    %cst_17 = arith.constant 0.000000e+00 : f32
    %21 = vector.broadcast %cst_17 : f32 to vector<256x64xf32>
    %22 = arith.cmpf oge, %20, %21 : vector<256x64xf32>
    %cst_18 = arith.constant 0.00999999977 : f32
    %23 = vector.broadcast %cst_18 : f32 to vector<256x64xf32>
    %24 = arith.mulf %23, %20 : vector<256x64xf32>
    %25 = arith.select %22, %20, %24 : vector<256x64xi1>, vector<256x64xf32>
    %26 = arith.truncf %25 : vector<256x64xf32> to vector<256x64xbf16>
    %c0_19 = arith.constant 0 : index
    %c0_20 = arith.constant 0 : index
    %27 = vector.load %arg10[%c0_19, %c0_20] : memref<256x64xbf16, #tpu.memory_space<vmem>>, vector<256x64xbf16>
    tpu.vector_store %arg10[%c0_19, %c0_20], %26 {strides = array<i32>} : memref<256x64xbf16, #tpu.memory_space<vmem>>, vector<256x64xbf16>,
    %28 = arith.truncf %25 : vector<256x64xf32> to vector<256x64xbf16>
    %c0_21 = arith.constant 0 : index
    %c0_22 = arith.constant 0 : index
    %29 = vector.load %arg8[%c0_21, %c0_22] : memref<64x16xbf16, #tpu.memory_space<vmem>>, vector<64x16xbf16>
    %cst_23 = arith.constant dense<0.000000e+00> : vector<256x16xf32>
    %30 = tpu.matmul %28, %29, %cst_23 {dimension_numbers = #tpu.dot_dimension_numbers<[1], [0], [0], [1], [0, 0, 1, 1], [], []>} : vector<256x64xbf16>, vector<64x16xbf16>, vector<256x16xf32> -> vector<256x16xf32>
    %c0_24 = arith.constant 0 : index
    %c0_25 = arith.constant 0 : index
    %31 = vector.load %arg9[%c0_24, %c0_25] : memref<1x16xf32, #tpu.memory_space<vmem>>, vector<1x16xf32>
    %32 = vector.broadcast %31 : vector<1x16xf32> to vector<256x16xf32>
    %33 = arith.addf %30, %32 : vector<256x16xf32>
    %cst_26 = arith.constant 0.000000e+00 : f32
    %34 = vector.broadcast %cst_26 : f32 to vector<256x16xf32>
    %35 = arith.cmpf oge, %33, %34 : vector<256x16xf32>
    %cst_27 = arith.constant 0.00999999977 : f32
    %36 = vector.broadcast %cst_27 : f32 to vector<256x16xf32>
    %37 = arith.mulf %36, %33 : vector<256x16xf32>
    %38 = arith.select %35, %33, %37 : vector<256x16xi1>, vector<256x16xf32>
    %39 = arith.truncf %38 : vector<256x16xf32> to vector<256x16xbf16>
    %c0_28 = arith.constant 0 : index
    %c0_29 = arith.constant 0 : index
    %40 = vector.load %arg11[%c0_28, %c0_29] : memref<256x16xbf16, #tpu.memory_space<vmem>>, vector<256x16xbf16>
    tpu.vector_store %arg11[%c0_28, %c0_29], %39 {strides = array<i32>} : memref<256x16xbf16, #tpu.memory_space<vmem>>, vector<256x16xbf16>,
    return
  }
  func.func @transform_0(%arg0: i32) -> (i32, i32) {
    %c0_i32 = arith.constant 0 : i32
    %c0_i32_0 = arith.constant 0 : i32
    return %arg0, %c0_i32 : i32, i32
  }
  func.func @transform_1(%arg0: i32) -> (i32, i32) {
    %c0_i32 = arith.constant 0 : i32
    %c0_i32_0 = arith.constant 0 : i32
    return %arg0, %c0_i32 : i32, i32
  }
  func.func @transform_2(%arg0: i32) -> (i32, i32) {
    %c0_i32 = arith.constant 0 : i32
    %c0_i32_0 = arith.constant 0 : i32
    %c0_i32_1 = arith.constant 0 : i32
    return %c0_i32, %c0_i32_0 : i32, i32
  }
  func.func @transform_3(%arg0: i32) -> (i32, i32) {
    %c0_i32 = arith.constant 0 : i32
    %c0_i32_0 = arith.constant 0 : i32
    %c0_i32_1 = arith.constant 0 : i32
    return %c0_i32, %c0_i32_0 : i32, i32
  }
  func.func @transform_4(%arg0: i32) -> (i32, i32) {
    %c0_i32 = arith.constant 0 : i32
    %c0_i32_0 = arith.constant 0 : i32
    %c0_i32_1 = arith.constant 0 : i32
    return %c0_i32, %c0_i32_0 : i32, i32
  }
  func.func @transform_5(%arg0: i32) -> (i32, i32) {
    %c0_i32 = arith.constant 0 : i32
    %c0_i32_0 = arith.constant 0 : i32
    %c0_i32_1 = arith.constant 0 : i32
    return %c0_i32, %c0_i32_0 : i32, i32
  }
  func.func @transform_6(%arg0: i32) -> (i32, i32) {
    %c0_i32 = arith.constant 0 : i32
    %c0_i32_0 = arith.constant 0 : i32
    %c0_i32_1 = arith.constant 0 : i32
    return %c0_i32, %c0_i32_0 : i32, i32
  }
  func.func @transform_7(%arg0: i32) -> (i32, i32) {
    %c0_i32 = arith.constant 0 : i32
    %c0_i32_0 = arith.constant 0 : i32
    %c0_i32_1 = arith.constant 0 : i32
    return %c0_i32, %c0_i32_0 : i32, i32
  }
  func.func @transform_8(%arg0: i32) -> (i32, i32) {
    %c0_i32 = arith.constant 0 : i32
    %c0_i32_0 = arith.constant 0 : i32
    %c0_i32_1 = arith.constant 0 : i32
    return %c0_i32, %c0_i32_0 : i32, i32
  }
  func.func @transform_9(%arg0: i32) -> (i32, i32) {
    %c0_i32 = arith.constant 0 : i32
    %c0_i32_0 = arith.constant 0 : i32
    return %arg0, %c0_i32 : i32, i32
  }
  func.func @transform_10(%arg0: i32) -> (i32, i32) {
    %c0_i32 = arith.constant 0 : i32
    %c0_i32_0 = arith.constant 0 : i32
    return %arg0, %c0_i32 : i32, i32
  }
}

module attributes {stable_mosaic.version = 11 : i64} {
  func.func @kernel(%arg0: i32, %arg1: memref<256x144xbf16, #tpu.memory_space<vmem>>, %arg2: memref<256x64xbf16, #tpu.memory_space<vmem>>, %arg3: memref<144x16xbf16, #tpu.memory_space<vmem>>, %arg4: memref<1x16xf32, #tpu.memory_space<vmem>>, %arg5: memref<16x64xbf16, #tpu.memory_space<vmem>>, %arg6: memref<1x64xf32, #tpu.memory_space<vmem>>, %arg7: memref<64x16xbf16, #tpu.memory_space<vmem>>, %arg8: memref<1x16xf32, #tpu.memory_space<vmem>>, %arg9: memref<256x64xbf16, #tpu.memory_space<vmem>>, %arg10: memref<256x16xbf16, #tpu.memory_space<vmem>>) attributes {dimension_semantics = [#tpu.dimension_semantics<parallel>], iteration_bounds = array<i64: 2>, scalar_prefetch = 0 : i64, scratch_operands = 0 : i64, tpu.core_type = #tpu.core_type<tc>, window_params = [{transform_indices = @transform_0, window_bounds = array<i64: 256, 144>}, {transform_indices = @transform_1, window_bounds = array<i64: 256, 64>}, {pipeline_mode = #tpu.pipeline_mode<synchronous>, transform_indices = @transform_2, window_bounds = array<i64: 144, 16>}, {pipeline_mode = #tpu.pipeline_mode<synchronous>, transform_indices = @transform_3, window_bounds = array<i64: 1, 16>}, {pipeline_mode = #tpu.pipeline_mode<synchronous>, transform_indices = @transform_4, window_bounds = array<i64: 16, 64>}, {pipeline_mode = #tpu.pipeline_mode<synchronous>, transform_indices = @transform_5, window_bounds = array<i64: 1, 64>}, {pipeline_mode = #tpu.pipeline_mode<synchronous>, transform_indices = @transform_6, window_bounds = array<i64: 64, 16>}, {pipeline_mode = #tpu.pipeline_mode<synchronous>, transform_indices = @transform_7, window_bounds = array<i64: 1, 16>}, {transform_indices = @transform_8, window_bounds = array<i64: 256, 64>}, {transform_indices = @transform_9, window_bounds = array<i64: 256, 16>}]} {
    %c0 = arith.constant 0 : index
    %c0_0 = arith.constant 0 : index
    %0 = vector.load %arg1[%c0, %c0_0] : memref<256x144xbf16, #tpu.memory_space<vmem>>, vector<256x144xbf16>
    %c0_1 = arith.constant 0 : index
    %c0_2 = arith.constant 0 : index
    %1 = vector.load %arg3[%c0_1, %c0_2] : memref<144x16xbf16, #tpu.memory_space<vmem>>, vector<144x16xbf16>
    %cst = arith.constant dense<0.000000e+00> : vector<256x16xf32>
    %2 = tpu.matmul %0, %1, %cst {dimension_numbers = #tpu.dot_dimension_numbers<[1], [0], [0], [1], [0, 0, 1, 1], [], []>} : vector<256x144xbf16>, vector<144x16xbf16>, vector<256x16xf32> -> vector<256x16xf32>
    %c0_3 = arith.constant 0 : index
    %c0_4 = arith.constant 0 : index
    %3 = vector.load %arg4[%c0_3, %c0_4] : memref<1x16xf32, #tpu.memory_space<vmem>>, vector<1x16xf32>
    %4 = vector.broadcast %3 : vector<1x16xf32> to vector<256x16xf32>
    %5 = arith.addf %2, %4 : vector<256x16xf32>
    %cst_5 = arith.constant 0.000000e+00 : f32
    %6 = vector.broadcast %cst_5 : f32 to vector<256x16xf32>
    %7 = arith.cmpf oge, %5, %6 : vector<256x16xf32>
    %cst_6 = arith.constant 0.00999999977 : f32
    %8 = vector.broadcast %cst_6 : f32 to vector<256x16xf32>
    %9 = arith.mulf %8, %5 : vector<256x16xf32>
    %10 = arith.select %7, %5, %9 : vector<256x16xi1>, vector<256x16xf32>
    %11 = arith.truncf %10 : vector<256x16xf32> to vector<256x16xbf16>
    %c0_7 = arith.constant 0 : index
    %c0_8 = arith.constant 0 : index
    %12 = vector.load %arg5[%c0_7, %c0_8] : memref<16x64xbf16, #tpu.memory_space<vmem>>, vector<16x64xbf16>
    %cst_9 = arith.constant dense<0.000000e+00> : vector<256x64xf32>
    %13 = tpu.matmul %11, %12, %cst_9 {dimension_numbers = #tpu.dot_dimension_numbers<[1], [0], [0], [1], [0, 0, 1, 1], [], []>} : vector<256x16xbf16>, vector<16x64xbf16>, vector<256x64xf32> -> vector<256x64xf32>
    %c0_10 = arith.constant 0 : index
    %c0_11 = arith.constant 0 : index
    %14 = vector.load %arg6[%c0_10, %c0_11] : memref<1x64xf32, #tpu.memory_space<vmem>>, vector<1x64xf32>
    %15 = vector.broadcast %14 : vector<1x64xf32> to vector<256x64xf32>
    %16 = arith.addf %13, %15 : vector<256x64xf32>
    %c0_12 = arith.constant 0 : index
    %c0_13 = arith.constant 0 : index
    %17 = vector.load %arg2[%c0_12, %c0_13] : memref<256x64xbf16, #tpu.memory_space<vmem>>, vector<256x64xbf16>
    %18 = arith.extf %17 : vector<256x64xbf16> to vector<256x64xf32>
    %19 = arith.addf %16, %18 : vector<256x64xf32>
    %cst_14 = arith.constant 0.000000e+00 : f32
    %20 = vector.broadcast %cst_14 : f32 to vector<256x64xf32>
    %21 = arith.cmpf oge, %19, %20 : vector<256x64xf32>
    %cst_15 = arith.constant 0.00999999977 : f32
    %22 = vector.broadcast %cst_15 : f32 to vector<256x64xf32>
    %23 = arith.mulf %22, %19 : vector<256x64xf32>
    %24 = arith.select %21, %19, %23 : vector<256x64xi1>, vector<256x64xf32>
    %25 = arith.truncf %24 : vector<256x64xf32> to vector<256x64xbf16>
    %c0_16 = arith.constant 0 : index
    %c0_17 = arith.constant 0 : index
    %26 = vector.load %arg9[%c0_16, %c0_17] : memref<256x64xbf16, #tpu.memory_space<vmem>>, vector<256x64xbf16>
    tpu.vector_store %arg9[%c0_16, %c0_17], %25 {strides = array<i32>} : memref<256x64xbf16, #tpu.memory_space<vmem>>, vector<256x64xbf16>,
    %27 = arith.truncf %24 : vector<256x64xf32> to vector<256x64xbf16>
    %c0_18 = arith.constant 0 : index
    %c0_19 = arith.constant 0 : index
    %28 = vector.load %arg7[%c0_18, %c0_19] : memref<64x16xbf16, #tpu.memory_space<vmem>>, vector<64x16xbf16>
    %cst_20 = arith.constant dense<0.000000e+00> : vector<256x16xf32>
    %29 = tpu.matmul %27, %28, %cst_20 {dimension_numbers = #tpu.dot_dimension_numbers<[1], [0], [0], [1], [0, 0, 1, 1], [], []>} : vector<256x64xbf16>, vector<64x16xbf16>, vector<256x16xf32> -> vector<256x16xf32>
    %c0_21 = arith.constant 0 : index
    %c0_22 = arith.constant 0 : index
    %30 = vector.load %arg8[%c0_21, %c0_22] : memref<1x16xf32, #tpu.memory_space<vmem>>, vector<1x16xf32>
    %31 = vector.broadcast %30 : vector<1x16xf32> to vector<256x16xf32>
    %32 = arith.addf %29, %31 : vector<256x16xf32>
    %cst_23 = arith.constant 0.000000e+00 : f32
    %33 = vector.broadcast %cst_23 : f32 to vector<256x16xf32>
    %34 = arith.cmpf oge, %32, %33 : vector<256x16xf32>
    %cst_24 = arith.constant 0.00999999977 : f32
    %35 = vector.broadcast %cst_24 : f32 to vector<256x16xf32>
    %36 = arith.mulf %35, %32 : vector<256x16xf32>
    %37 = arith.select %34, %32, %36 : vector<256x16xi1>, vector<256x16xf32>
    %38 = arith.truncf %37 : vector<256x16xf32> to vector<256x16xbf16>
    %c0_25 = arith.constant 0 : index
    %c0_26 = arith.constant 0 : index
    %39 = vector.load %arg10[%c0_25, %c0_26] : memref<256x16xbf16, #tpu.memory_space<vmem>>, vector<256x16xbf16>
    tpu.vector_store %arg10[%c0_25, %c0_26], %38 {strides = array<i32>} : memref<256x16xbf16, #tpu.memory_space<vmem>>, vector<256x16xbf16>,
    return
  }
  func.func @transform_0(%arg0: i32) -> (i32, i32) {
    %c0_i32 = arith.constant 0 : i32
    %c0_i32_0 = arith.constant 0 : i32
    return %arg0, %c0_i32 : i32, i32
  }
  func.func @transform_1(%arg0: i32) -> (i32, i32) {
    %c0_i32 = arith.constant 0 : i32
    %c0_i32_0 = arith.constant 0 : i32
    return %arg0, %c0_i32 : i32, i32
  }
  func.func @transform_2(%arg0: i32) -> (i32, i32) {
    %c0_i32 = arith.constant 0 : i32
    %c0_i32_0 = arith.constant 0 : i32
    %c0_i32_1 = arith.constant 0 : i32
    return %c0_i32, %c0_i32_0 : i32, i32
  }
  func.func @transform_3(%arg0: i32) -> (i32, i32) {
    %c0_i32 = arith.constant 0 : i32
    %c0_i32_0 = arith.constant 0 : i32
    %c0_i32_1 = arith.constant 0 : i32
    return %c0_i32, %c0_i32_0 : i32, i32
  }
  func.func @transform_4(%arg0: i32) -> (i32, i32) {
    %c0_i32 = arith.constant 0 : i32
    %c0_i32_0 = arith.constant 0 : i32
    %c0_i32_1 = arith.constant 0 : i32
    return %c0_i32, %c0_i32_0 : i32, i32
  }
  func.func @transform_5(%arg0: i32) -> (i32, i32) {
    %c0_i32 = arith.constant 0 : i32
    %c0_i32_0 = arith.constant 0 : i32
    %c0_i32_1 = arith.constant 0 : i32
    return %c0_i32, %c0_i32_0 : i32, i32
  }
  func.func @transform_6(%arg0: i32) -> (i32, i32) {
    %c0_i32 = arith.constant 0 : i32
    %c0_i32_0 = arith.constant 0 : i32
    %c0_i32_1 = arith.constant 0 : i32
    return %c0_i32, %c0_i32_0 : i32, i32
  }
  func.func @transform_7(%arg0: i32) -> (i32, i32) {
    %c0_i32 = arith.constant 0 : i32
    %c0_i32_0 = arith.constant 0 : i32
    %c0_i32_1 = arith.constant 0 : i32
    return %c0_i32, %c0_i32_0 : i32, i32
  }
  func.func @transform_8(%arg0: i32) -> (i32, i32) {
    %c0_i32 = arith.constant 0 : i32
    %c0_i32_0 = arith.constant 0 : i32
    return %arg0, %c0_i32 : i32, i32
  }
  func.func @transform_9(%arg0: i32) -> (i32, i32) {
    %c0_i32 = arith.constant 0 : i32
    %c0_i32_0 = arith.constant 0 : i32
    return %arg0, %c0_i32 : i32, i32
  }
}

module attributes {stable_mosaic.version = 11 : i64} {
  func.func @kernel(%arg0: i32, %arg1: memref<256x144xbf16, #tpu.memory_space<vmem>>, %arg2: memref<256x64xbf16, #tpu.memory_space<vmem>>, %arg3: memref<144x16xbf16, #tpu.memory_space<vmem>>, %arg4: memref<1x16xf32, #tpu.memory_space<vmem>>, %arg5: memref<16x64xbf16, #tpu.memory_space<vmem>>, %arg6: memref<1x64xf32, #tpu.memory_space<vmem>>, %arg7: memref<64x32xbf16, #tpu.memory_space<vmem>>, %arg8: memref<1x32xf32, #tpu.memory_space<vmem>>, %arg9: memref<256x64xbf16, #tpu.memory_space<vmem>>, %arg10: memref<256x32xbf16, #tpu.memory_space<vmem>>) attributes {dimension_semantics = [#tpu.dimension_semantics<parallel>], iteration_bounds = array<i64: 2>, scalar_prefetch = 0 : i64, scratch_operands = 0 : i64, tpu.core_type = #tpu.core_type<tc>, window_params = [{transform_indices = @transform_0, window_bounds = array<i64: 256, 144>}, {transform_indices = @transform_1, window_bounds = array<i64: 256, 64>}, {pipeline_mode = #tpu.pipeline_mode<synchronous>, transform_indices = @transform_2, window_bounds = array<i64: 144, 16>}, {pipeline_mode = #tpu.pipeline_mode<synchronous>, transform_indices = @transform_3, window_bounds = array<i64: 1, 16>}, {pipeline_mode = #tpu.pipeline_mode<synchronous>, transform_indices = @transform_4, window_bounds = array<i64: 16, 64>}, {pipeline_mode = #tpu.pipeline_mode<synchronous>, transform_indices = @transform_5, window_bounds = array<i64: 1, 64>}, {pipeline_mode = #tpu.pipeline_mode<synchronous>, transform_indices = @transform_6, window_bounds = array<i64: 64, 32>}, {pipeline_mode = #tpu.pipeline_mode<synchronous>, transform_indices = @transform_7, window_bounds = array<i64: 1, 32>}, {transform_indices = @transform_8, window_bounds = array<i64: 256, 64>}, {transform_indices = @transform_9, window_bounds = array<i64: 256, 32>}]} {
    %c0 = arith.constant 0 : index
    %c0_0 = arith.constant 0 : index
    %0 = vector.load %arg1[%c0, %c0_0] : memref<256x144xbf16, #tpu.memory_space<vmem>>, vector<256x144xbf16>
    %c0_1 = arith.constant 0 : index
    %c0_2 = arith.constant 0 : index
    %1 = vector.load %arg3[%c0_1, %c0_2] : memref<144x16xbf16, #tpu.memory_space<vmem>>, vector<144x16xbf16>
    %cst = arith.constant dense<0.000000e+00> : vector<256x16xf32>
    %2 = tpu.matmul %0, %1, %cst {dimension_numbers = #tpu.dot_dimension_numbers<[1], [0], [0], [1], [0, 0, 1, 1], [], []>} : vector<256x144xbf16>, vector<144x16xbf16>, vector<256x16xf32> -> vector<256x16xf32>
    %c0_3 = arith.constant 0 : index
    %c0_4 = arith.constant 0 : index
    %3 = vector.load %arg4[%c0_3, %c0_4] : memref<1x16xf32, #tpu.memory_space<vmem>>, vector<1x16xf32>
    %4 = vector.broadcast %3 : vector<1x16xf32> to vector<256x16xf32>
    %5 = arith.addf %2, %4 : vector<256x16xf32>
    %cst_5 = arith.constant 0.000000e+00 : f32
    %6 = vector.broadcast %cst_5 : f32 to vector<256x16xf32>
    %7 = arith.cmpf oge, %5, %6 : vector<256x16xf32>
    %cst_6 = arith.constant 0.00999999977 : f32
    %8 = vector.broadcast %cst_6 : f32 to vector<256x16xf32>
    %9 = arith.mulf %8, %5 : vector<256x16xf32>
    %10 = arith.select %7, %5, %9 : vector<256x16xi1>, vector<256x16xf32>
    %11 = arith.truncf %10 : vector<256x16xf32> to vector<256x16xbf16>
    %c0_7 = arith.constant 0 : index
    %c0_8 = arith.constant 0 : index
    %12 = vector.load %arg5[%c0_7, %c0_8] : memref<16x64xbf16, #tpu.memory_space<vmem>>, vector<16x64xbf16>
    %cst_9 = arith.constant dense<0.000000e+00> : vector<256x64xf32>
    %13 = tpu.matmul %11, %12, %cst_9 {dimension_numbers = #tpu.dot_dimension_numbers<[1], [0], [0], [1], [0, 0, 1, 1], [], []>} : vector<256x16xbf16>, vector<16x64xbf16>, vector<256x64xf32> -> vector<256x64xf32>
    %c0_10 = arith.constant 0 : index
    %c0_11 = arith.constant 0 : index
    %14 = vector.load %arg6[%c0_10, %c0_11] : memref<1x64xf32, #tpu.memory_space<vmem>>, vector<1x64xf32>
    %15 = vector.broadcast %14 : vector<1x64xf32> to vector<256x64xf32>
    %16 = arith.addf %13, %15 : vector<256x64xf32>
    %c0_12 = arith.constant 0 : index
    %c0_13 = arith.constant 0 : index
    %17 = vector.load %arg2[%c0_12, %c0_13] : memref<256x64xbf16, #tpu.memory_space<vmem>>, vector<256x64xbf16>
    %18 = arith.extf %17 : vector<256x64xbf16> to vector<256x64xf32>
    %19 = arith.addf %16, %18 : vector<256x64xf32>
    %cst_14 = arith.constant 0.000000e+00 : f32
    %20 = vector.broadcast %cst_14 : f32 to vector<256x64xf32>
    %21 = arith.cmpf oge, %19, %20 : vector<256x64xf32>
    %cst_15 = arith.constant 0.00999999977 : f32
    %22 = vector.broadcast %cst_15 : f32 to vector<256x64xf32>
    %23 = arith.mulf %22, %19 : vector<256x64xf32>
    %24 = arith.select %21, %19, %23 : vector<256x64xi1>, vector<256x64xf32>
    %25 = arith.truncf %24 : vector<256x64xf32> to vector<256x64xbf16>
    %c0_16 = arith.constant 0 : index
    %c0_17 = arith.constant 0 : index
    %26 = vector.load %arg9[%c0_16, %c0_17] : memref<256x64xbf16, #tpu.memory_space<vmem>>, vector<256x64xbf16>
    tpu.vector_store %arg9[%c0_16, %c0_17], %25 {strides = array<i32>} : memref<256x64xbf16, #tpu.memory_space<vmem>>, vector<256x64xbf16>,
    %27 = arith.truncf %24 : vector<256x64xf32> to vector<256x64xbf16>
    %c0_18 = arith.constant 0 : index
    %c0_19 = arith.constant 0 : index
    %28 = vector.load %arg7[%c0_18, %c0_19] : memref<64x32xbf16, #tpu.memory_space<vmem>>, vector<64x32xbf16>
    %cst_20 = arith.constant dense<0.000000e+00> : vector<256x32xf32>
    %29 = tpu.matmul %27, %28, %cst_20 {dimension_numbers = #tpu.dot_dimension_numbers<[1], [0], [0], [1], [0, 0, 1, 1], [], []>} : vector<256x64xbf16>, vector<64x32xbf16>, vector<256x32xf32> -> vector<256x32xf32>
    %c0_21 = arith.constant 0 : index
    %c0_22 = arith.constant 0 : index
    %30 = vector.load %arg8[%c0_21, %c0_22] : memref<1x32xf32, #tpu.memory_space<vmem>>, vector<1x32xf32>
    %31 = vector.broadcast %30 : vector<1x32xf32> to vector<256x32xf32>
    %32 = arith.addf %29, %31 : vector<256x32xf32>
    %cst_23 = arith.constant 0.000000e+00 : f32
    %33 = vector.broadcast %cst_23 : f32 to vector<256x32xf32>
    %34 = arith.cmpf oge, %32, %33 : vector<256x32xf32>
    %cst_24 = arith.constant 0.00999999977 : f32
    %35 = vector.broadcast %cst_24 : f32 to vector<256x32xf32>
    %36 = arith.mulf %35, %32 : vector<256x32xf32>
    %37 = arith.select %34, %32, %36 : vector<256x32xi1>, vector<256x32xf32>
    %38 = arith.truncf %37 : vector<256x32xf32> to vector<256x32xbf16>
    %c0_25 = arith.constant 0 : index
    %c0_26 = arith.constant 0 : index
    %39 = vector.load %arg10[%c0_25, %c0_26] : memref<256x32xbf16, #tpu.memory_space<vmem>>, vector<256x32xbf16>
    tpu.vector_store %arg10[%c0_25, %c0_26], %38 {strides = array<i32>} : memref<256x32xbf16, #tpu.memory_space<vmem>>, vector<256x32xbf16>,
    return
  }
  func.func @transform_0(%arg0: i32) -> (i32, i32) {
    %c0_i32 = arith.constant 0 : i32
    %c0_i32_0 = arith.constant 0 : i32
    return %arg0, %c0_i32 : i32, i32
  }
  func.func @transform_1(%arg0: i32) -> (i32, i32) {
    %c0_i32 = arith.constant 0 : i32
    %c0_i32_0 = arith.constant 0 : i32
    return %arg0, %c0_i32 : i32, i32
  }
  func.func @transform_2(%arg0: i32) -> (i32, i32) {
    %c0_i32 = arith.constant 0 : i32
    %c0_i32_0 = arith.constant 0 : i32
    %c0_i32_1 = arith.constant 0 : i32
    return %c0_i32, %c0_i32_0 : i32, i32
  }
  func.func @transform_3(%arg0: i32) -> (i32, i32) {
    %c0_i32 = arith.constant 0 : i32
    %c0_i32_0 = arith.constant 0 : i32
    %c0_i32_1 = arith.constant 0 : i32
    return %c0_i32, %c0_i32_0 : i32, i32
  }
  func.func @transform_4(%arg0: i32) -> (i32, i32) {
    %c0_i32 = arith.constant 0 : i32
    %c0_i32_0 = arith.constant 0 : i32
    %c0_i32_1 = arith.constant 0 : i32
    return %c0_i32, %c0_i32_0 : i32, i32
  }
  func.func @transform_5(%arg0: i32) -> (i32, i32) {
    %c0_i32 = arith.constant 0 : i32
    %c0_i32_0 = arith.constant 0 : i32
    %c0_i32_1 = arith.constant 0 : i32
    return %c0_i32, %c0_i32_0 : i32, i32
  }
  func.func @transform_6(%arg0: i32) -> (i32, i32) {
    %c0_i32 = arith.constant 0 : i32
    %c0_i32_0 = arith.constant 0 : i32
    %c0_i32_1 = arith.constant 0 : i32
    return %c0_i32, %c0_i32_0 : i32, i32
  }
  func.func @transform_7(%arg0: i32) -> (i32, i32) {
    %c0_i32 = arith.constant 0 : i32
    %c0_i32_0 = arith.constant 0 : i32
    %c0_i32_1 = arith.constant 0 : i32
    return %c0_i32, %c0_i32_0 : i32, i32
  }
  func.func @transform_8(%arg0: i32) -> (i32, i32) {
    %c0_i32 = arith.constant 0 : i32
    %c0_i32_0 = arith.constant 0 : i32
    return %arg0, %c0_i32 : i32, i32
  }
  func.func @transform_9(%arg0: i32) -> (i32, i32) {
    %c0_i32 = arith.constant 0 : i32
    %c0_i32_0 = arith.constant 0 : i32
    return %arg0, %c0_i32 : i32, i32
  }
}

module attributes {stable_mosaic.version = 11 : i64} {
  func.func @kernel(%arg0: i32, %arg1: memref<128x288xbf16, #tpu.memory_space<vmem>>, %arg2: memref<128x64xbf16, #tpu.memory_space<vmem>>, %arg3: memref<288x32xbf16, #tpu.memory_space<vmem>>, %arg4: memref<1x32xf32, #tpu.memory_space<vmem>>, %arg5: memref<32x128xbf16, #tpu.memory_space<vmem>>, %arg6: memref<1x128xf32, #tpu.memory_space<vmem>>, %arg7: memref<64x128xbf16, #tpu.memory_space<vmem>>, %arg8: memref<128x32xbf16, #tpu.memory_space<vmem>>, %arg9: memref<1x32xf32, #tpu.memory_space<vmem>>, %arg10: memref<128x128xbf16, #tpu.memory_space<vmem>>, %arg11: memref<128x32xbf16, #tpu.memory_space<vmem>>) attributes {dimension_semantics = [#tpu.dimension_semantics<parallel>], iteration_bounds = array<i64: 1>, scalar_prefetch = 0 : i64, scratch_operands = 0 : i64, tpu.core_type = #tpu.core_type<tc>, window_params = [{transform_indices = @transform_0, window_bounds = array<i64: 128, 288>}, {transform_indices = @transform_1, window_bounds = array<i64: 128, 64>}, {pipeline_mode = #tpu.pipeline_mode<synchronous>, transform_indices = @transform_2, window_bounds = array<i64: 288, 32>}, {pipeline_mode = #tpu.pipeline_mode<synchronous>, transform_indices = @transform_3, window_bounds = array<i64: 1, 32>}, {pipeline_mode = #tpu.pipeline_mode<synchronous>, transform_indices = @transform_4, window_bounds = array<i64: 32, 128>}, {pipeline_mode = #tpu.pipeline_mode<synchronous>, transform_indices = @transform_5, window_bounds = array<i64: 1, 128>}, {pipeline_mode = #tpu.pipeline_mode<synchronous>, transform_indices = @transform_6, window_bounds = array<i64: 64, 128>}, {pipeline_mode = #tpu.pipeline_mode<synchronous>, transform_indices = @transform_7, window_bounds = array<i64: 128, 32>}, {pipeline_mode = #tpu.pipeline_mode<synchronous>, transform_indices = @transform_8, window_bounds = array<i64: 1, 32>}, {transform_indices = @transform_9, window_bounds = array<i64: 128, 128>}, {transform_indices = @transform_10, window_bounds = array<i64: 128, 32>}]} {
    %c0 = arith.constant 0 : index
    %c0_0 = arith.constant 0 : index
    %0 = vector.load %arg1[%c0, %c0_0] : memref<128x288xbf16, #tpu.memory_space<vmem>>, vector<128x288xbf16>
    %c0_1 = arith.constant 0 : index
    %c0_2 = arith.constant 0 : index
    %1 = vector.load %arg3[%c0_1, %c0_2] : memref<288x32xbf16, #tpu.memory_space<vmem>>, vector<288x32xbf16>
    %cst = arith.constant dense<0.000000e+00> : vector<128x32xf32>
    %2 = tpu.matmul %0, %1, %cst {dimension_numbers = #tpu.dot_dimension_numbers<[1], [0], [0], [1], [0, 0, 1, 1], [], []>} : vector<128x288xbf16>, vector<288x32xbf16>, vector<128x32xf32> -> vector<128x32xf32>
    %c0_3 = arith.constant 0 : index
    %c0_4 = arith.constant 0 : index
    %3 = vector.load %arg4[%c0_3, %c0_4] : memref<1x32xf32, #tpu.memory_space<vmem>>, vector<1x32xf32>
    %4 = vector.broadcast %3 : vector<1x32xf32> to vector<128x32xf32>
    %5 = arith.addf %2, %4 : vector<128x32xf32>
    %cst_5 = arith.constant 0.000000e+00 : f32
    %6 = vector.broadcast %cst_5 : f32 to vector<128x32xf32>
    %7 = arith.cmpf oge, %5, %6 : vector<128x32xf32>
    %cst_6 = arith.constant 0.00999999977 : f32
    %8 = vector.broadcast %cst_6 : f32 to vector<128x32xf32>
    %9 = arith.mulf %8, %5 : vector<128x32xf32>
    %10 = arith.select %7, %5, %9 : vector<128x32xi1>, vector<128x32xf32>
    %11 = arith.truncf %10 : vector<128x32xf32> to vector<128x32xbf16>
    %c0_7 = arith.constant 0 : index
    %c0_8 = arith.constant 0 : index
    %12 = vector.load %arg5[%c0_7, %c0_8] : memref<32x128xbf16, #tpu.memory_space<vmem>>, vector<32x128xbf16>
    %cst_9 = arith.constant dense<0.000000e+00> : vector<128x128xf32>
    %13 = tpu.matmul %11, %12, %cst_9 {dimension_numbers = #tpu.dot_dimension_numbers<[1], [0], [0], [1], [0, 0, 1, 1], [], []>} : vector<128x32xbf16>, vector<32x128xbf16>, vector<128x128xf32> -> vector<128x128xf32>
    %c0_10 = arith.constant 0 : index
    %c0_11 = arith.constant 0 : index
    %14 = vector.load %arg6[%c0_10, %c0_11] : memref<1x128xf32, #tpu.memory_space<vmem>>, vector<1x128xf32>
    %15 = vector.broadcast %14 : vector<1x128xf32> to vector<128x128xf32>
    %16 = arith.addf %13, %15 : vector<128x128xf32>
    %c0_12 = arith.constant 0 : index
    %c0_13 = arith.constant 0 : index
    %17 = vector.load %arg2[%c0_12, %c0_13] : memref<128x64xbf16, #tpu.memory_space<vmem>>, vector<128x64xbf16>
    %c0_14 = arith.constant 0 : index
    %c0_15 = arith.constant 0 : index
    %18 = vector.load %arg7[%c0_14, %c0_15] : memref<64x128xbf16, #tpu.memory_space<vmem>>, vector<64x128xbf16>
    %cst_16 = arith.constant dense<0.000000e+00> : vector<128x128xf32>
    %19 = tpu.matmul %17, %18, %cst_16 {dimension_numbers = #tpu.dot_dimension_numbers<[1], [0], [0], [1], [0, 0, 1, 1], [], []>} : vector<128x64xbf16>, vector<64x128xbf16>, vector<128x128xf32> -> vector<128x128xf32>
    %20 = arith.addf %16, %19 : vector<128x128xf32>
    %cst_17 = arith.constant 0.000000e+00 : f32
    %21 = vector.broadcast %cst_17 : f32 to vector<128x128xf32>
    %22 = arith.cmpf oge, %20, %21 : vector<128x128xf32>
    %cst_18 = arith.constant 0.00999999977 : f32
    %23 = vector.broadcast %cst_18 : f32 to vector<128x128xf32>
    %24 = arith.mulf %23, %20 : vector<128x128xf32>
    %25 = arith.select %22, %20, %24 : vector<128x128xi1>, vector<128x128xf32>
    %26 = arith.truncf %25 : vector<128x128xf32> to vector<128x128xbf16>
    %c0_19 = arith.constant 0 : index
    %c0_20 = arith.constant 0 : index
    %27 = vector.load %arg10[%c0_19, %c0_20] : memref<128x128xbf16, #tpu.memory_space<vmem>>, vector<128x128xbf16>
    tpu.vector_store %arg10[%c0_19, %c0_20], %26 {strides = array<i32>} : memref<128x128xbf16, #tpu.memory_space<vmem>>, vector<128x128xbf16>,
    %28 = arith.truncf %25 : vector<128x128xf32> to vector<128x128xbf16>
    %c0_21 = arith.constant 0 : index
    %c0_22 = arith.constant 0 : index
    %29 = vector.load %arg8[%c0_21, %c0_22] : memref<128x32xbf16, #tpu.memory_space<vmem>>, vector<128x32xbf16>
    %cst_23 = arith.constant dense<0.000000e+00> : vector<128x32xf32>
    %30 = tpu.matmul %28, %29, %cst_23 {dimension_numbers = #tpu.dot_dimension_numbers<[1], [0], [0], [1], [0, 0, 1, 1], [], []>} : vector<128x128xbf16>, vector<128x32xbf16>, vector<128x32xf32> -> vector<128x32xf32>
    %c0_24 = arith.constant 0 : index
    %c0_25 = arith.constant 0 : index
    %31 = vector.load %arg9[%c0_24, %c0_25] : memref<1x32xf32, #tpu.memory_space<vmem>>, vector<1x32xf32>
    %32 = vector.broadcast %31 : vector<1x32xf32> to vector<128x32xf32>
    %33 = arith.addf %30, %32 : vector<128x32xf32>
    %cst_26 = arith.constant 0.000000e+00 : f32
    %34 = vector.broadcast %cst_26 : f32 to vector<128x32xf32>
    %35 = arith.cmpf oge, %33, %34 : vector<128x32xf32>
    %cst_27 = arith.constant 0.00999999977 : f32
    %36 = vector.broadcast %cst_27 : f32 to vector<128x32xf32>
    %37 = arith.mulf %36, %33 : vector<128x32xf32>
    %38 = arith.select %35, %33, %37 : vector<128x32xi1>, vector<128x32xf32>
    %39 = arith.truncf %38 : vector<128x32xf32> to vector<128x32xbf16>
    %c0_28 = arith.constant 0 : index
    %c0_29 = arith.constant 0 : index
    %40 = vector.load %arg11[%c0_28, %c0_29] : memref<128x32xbf16, #tpu.memory_space<vmem>>, vector<128x32xbf16>
    tpu.vector_store %arg11[%c0_28, %c0_29], %39 {strides = array<i32>} : memref<128x32xbf16, #tpu.memory_space<vmem>>, vector<128x32xbf16>,
    return
  }
  func.func @transform_0(%arg0: i32) -> (i32, i32) {
    %c0_i32 = arith.constant 0 : i32
    %c0_i32_0 = arith.constant 0 : i32
    return %arg0, %c0_i32 : i32, i32
  }
  func.func @transform_1(%arg0: i32) -> (i32, i32) {
    %c0_i32 = arith.constant 0 : i32
    %c0_i32_0 = arith.constant 0 : i32
    return %arg0, %c0_i32 : i32, i32
  }
  func.func @transform_2(%arg0: i32) -> (i32, i32) {
    %c0_i32 = arith.constant 0 : i32
    %c0_i32_0 = arith.constant 0 : i32
    %c0_i32_1 = arith.constant 0 : i32
    return %c0_i32, %c0_i32_0 : i32, i32
  }
  func.func @transform_3(%arg0: i32) -> (i32, i32) {
    %c0_i32 = arith.constant 0 : i32
    %c0_i32_0 = arith.constant 0 : i32
    %c0_i32_1 = arith.constant 0 : i32
    return %c0_i32, %c0_i32_0 : i32, i32
  }
  func.func @transform_4(%arg0: i32) -> (i32, i32) {
    %c0_i32 = arith.constant 0 : i32
    %c0_i32_0 = arith.constant 0 : i32
    %c0_i32_1 = arith.constant 0 : i32
    return %c0_i32, %c0_i32_0 : i32, i32
  }
  func.func @transform_5(%arg0: i32) -> (i32, i32) {
    %c0_i32 = arith.constant 0 : i32
    %c0_i32_0 = arith.constant 0 : i32
    %c0_i32_1 = arith.constant 0 : i32
    return %c0_i32, %c0_i32_0 : i32, i32
  }
  func.func @transform_6(%arg0: i32) -> (i32, i32) {
    %c0_i32 = arith.constant 0 : i32
    %c0_i32_0 = arith.constant 0 : i32
    %c0_i32_1 = arith.constant 0 : i32
    return %c0_i32, %c0_i32_0 : i32, i32
  }
  func.func @transform_7(%arg0: i32) -> (i32, i32) {
    %c0_i32 = arith.constant 0 : i32
    %c0_i32_0 = arith.constant 0 : i32
    %c0_i32_1 = arith.constant 0 : i32
    return %c0_i32, %c0_i32_0 : i32, i32
  }
  func.func @transform_8(%arg0: i32) -> (i32, i32) {
    %c0_i32 = arith.constant 0 : i32
    %c0_i32_0 = arith.constant 0 : i32
    %c0_i32_1 = arith.constant 0 : i32
    return %c0_i32, %c0_i32_0 : i32, i32
  }
  func.func @transform_9(%arg0: i32) -> (i32, i32) {
    %c0_i32 = arith.constant 0 : i32
    %c0_i32_0 = arith.constant 0 : i32
    return %arg0, %c0_i32 : i32, i32
  }
  func.func @transform_10(%arg0: i32) -> (i32, i32) {
    %c0_i32 = arith.constant 0 : i32
    %c0_i32_0 = arith.constant 0 : i32
    return %arg0, %c0_i32 : i32, i32
  }
}

module attributes {stable_mosaic.version = 11 : i64} {
  func.func @kernel(%arg0: i32, %arg1: memref<128x288xbf16, #tpu.memory_space<vmem>>, %arg2: memref<128x128xbf16, #tpu.memory_space<vmem>>, %arg3: memref<288x32xbf16, #tpu.memory_space<vmem>>, %arg4: memref<1x32xf32, #tpu.memory_space<vmem>>, %arg5: memref<32x128xbf16, #tpu.memory_space<vmem>>, %arg6: memref<1x128xf32, #tpu.memory_space<vmem>>, %arg7: memref<128x32xbf16, #tpu.memory_space<vmem>>, %arg8: memref<1x32xf32, #tpu.memory_space<vmem>>, %arg9: memref<128x128xbf16, #tpu.memory_space<vmem>>, %arg10: memref<128x32xbf16, #tpu.memory_space<vmem>>) attributes {dimension_semantics = [#tpu.dimension_semantics<parallel>], iteration_bounds = array<i64: 1>, scalar_prefetch = 0 : i64, scratch_operands = 0 : i64, tpu.core_type = #tpu.core_type<tc>, window_params = [{transform_indices = @transform_0, window_bounds = array<i64: 128, 288>}, {transform_indices = @transform_1, window_bounds = array<i64: 128, 128>}, {pipeline_mode = #tpu.pipeline_mode<synchronous>, transform_indices = @transform_2, window_bounds = array<i64: 288, 32>}, {pipeline_mode = #tpu.pipeline_mode<synchronous>, transform_indices = @transform_3, window_bounds = array<i64: 1, 32>}, {pipeline_mode = #tpu.pipeline_mode<synchronous>, transform_indices = @transform_4, window_bounds = array<i64: 32, 128>}, {pipeline_mode = #tpu.pipeline_mode<synchronous>, transform_indices = @transform_5, window_bounds = array<i64: 1, 128>}, {pipeline_mode = #tpu.pipeline_mode<synchronous>, transform_indices = @transform_6, window_bounds = array<i64: 128, 32>}, {pipeline_mode = #tpu.pipeline_mode<synchronous>, transform_indices = @transform_7, window_bounds = array<i64: 1, 32>}, {transform_indices = @transform_8, window_bounds = array<i64: 128, 128>}, {transform_indices = @transform_9, window_bounds = array<i64: 128, 32>}]} {
    %c0 = arith.constant 0 : index
    %c0_0 = arith.constant 0 : index
    %0 = vector.load %arg1[%c0, %c0_0] : memref<128x288xbf16, #tpu.memory_space<vmem>>, vector<128x288xbf16>
    %c0_1 = arith.constant 0 : index
    %c0_2 = arith.constant 0 : index
    %1 = vector.load %arg3[%c0_1, %c0_2] : memref<288x32xbf16, #tpu.memory_space<vmem>>, vector<288x32xbf16>
    %cst = arith.constant dense<0.000000e+00> : vector<128x32xf32>
    %2 = tpu.matmul %0, %1, %cst {dimension_numbers = #tpu.dot_dimension_numbers<[1], [0], [0], [1], [0, 0, 1, 1], [], []>} : vector<128x288xbf16>, vector<288x32xbf16>, vector<128x32xf32> -> vector<128x32xf32>
    %c0_3 = arith.constant 0 : index
    %c0_4 = arith.constant 0 : index
    %3 = vector.load %arg4[%c0_3, %c0_4] : memref<1x32xf32, #tpu.memory_space<vmem>>, vector<1x32xf32>
    %4 = vector.broadcast %3 : vector<1x32xf32> to vector<128x32xf32>
    %5 = arith.addf %2, %4 : vector<128x32xf32>
    %cst_5 = arith.constant 0.000000e+00 : f32
    %6 = vector.broadcast %cst_5 : f32 to vector<128x32xf32>
    %7 = arith.cmpf oge, %5, %6 : vector<128x32xf32>
    %cst_6 = arith.constant 0.00999999977 : f32
    %8 = vector.broadcast %cst_6 : f32 to vector<128x32xf32>
    %9 = arith.mulf %8, %5 : vector<128x32xf32>
    %10 = arith.select %7, %5, %9 : vector<128x32xi1>, vector<128x32xf32>
    %11 = arith.truncf %10 : vector<128x32xf32> to vector<128x32xbf16>
    %c0_7 = arith.constant 0 : index
    %c0_8 = arith.constant 0 : index
    %12 = vector.load %arg5[%c0_7, %c0_8] : memref<32x128xbf16, #tpu.memory_space<vmem>>, vector<32x128xbf16>
    %cst_9 = arith.constant dense<0.000000e+00> : vector<128x128xf32>
    %13 = tpu.matmul %11, %12, %cst_9 {dimension_numbers = #tpu.dot_dimension_numbers<[1], [0], [0], [1], [0, 0, 1, 1], [], []>} : vector<128x32xbf16>, vector<32x128xbf16>, vector<128x128xf32> -> vector<128x128xf32>
    %c0_10 = arith.constant 0 : index
    %c0_11 = arith.constant 0 : index
    %14 = vector.load %arg6[%c0_10, %c0_11] : memref<1x128xf32, #tpu.memory_space<vmem>>, vector<1x128xf32>
    %15 = vector.broadcast %14 : vector<1x128xf32> to vector<128x128xf32>
    %16 = arith.addf %13, %15 : vector<128x128xf32>
    %c0_12 = arith.constant 0 : index
    %c0_13 = arith.constant 0 : index
    %17 = vector.load %arg2[%c0_12, %c0_13] : memref<128x128xbf16, #tpu.memory_space<vmem>>, vector<128x128xbf16>
    %18 = arith.extf %17 : vector<128x128xbf16> to vector<128x128xf32>
    %19 = arith.addf %16, %18 : vector<128x128xf32>
    %cst_14 = arith.constant 0.000000e+00 : f32
    %20 = vector.broadcast %cst_14 : f32 to vector<128x128xf32>
    %21 = arith.cmpf oge, %19, %20 : vector<128x128xf32>
    %cst_15 = arith.constant 0.00999999977 : f32
    %22 = vector.broadcast %cst_15 : f32 to vector<128x128xf32>
    %23 = arith.mulf %22, %19 : vector<128x128xf32>
    %24 = arith.select %21, %19, %23 : vector<128x128xi1>, vector<128x128xf32>
    %25 = arith.truncf %24 : vector<128x128xf32> to vector<128x128xbf16>
    %c0_16 = arith.constant 0 : index
    %c0_17 = arith.constant 0 : index
    %26 = vector.load %arg9[%c0_16, %c0_17] : memref<128x128xbf16, #tpu.memory_space<vmem>>, vector<128x128xbf16>
    tpu.vector_store %arg9[%c0_16, %c0_17], %25 {strides = array<i32>} : memref<128x128xbf16, #tpu.memory_space<vmem>>, vector<128x128xbf16>,
    %27 = arith.truncf %24 : vector<128x128xf32> to vector<128x128xbf16>
    %c0_18 = arith.constant 0 : index
    %c0_19 = arith.constant 0 : index
    %28 = vector.load %arg7[%c0_18, %c0_19] : memref<128x32xbf16, #tpu.memory_space<vmem>>, vector<128x32xbf16>
    %cst_20 = arith.constant dense<0.000000e+00> : vector<128x32xf32>
    %29 = tpu.matmul %27, %28, %cst_20 {dimension_numbers = #tpu.dot_dimension_numbers<[1], [0], [0], [1], [0, 0, 1, 1], [], []>} : vector<128x128xbf16>, vector<128x32xbf16>, vector<128x32xf32> -> vector<128x32xf32>
    %c0_21 = arith.constant 0 : index
    %c0_22 = arith.constant 0 : index
    %30 = vector.load %arg8[%c0_21, %c0_22] : memref<1x32xf32, #tpu.memory_space<vmem>>, vector<1x32xf32>
    %31 = vector.broadcast %30 : vector<1x32xf32> to vector<128x32xf32>
    %32 = arith.addf %29, %31 : vector<128x32xf32>
    %cst_23 = arith.constant 0.000000e+00 : f32
    %33 = vector.broadcast %cst_23 : f32 to vector<128x32xf32>
    %34 = arith.cmpf oge, %32, %33 : vector<128x32xf32>
    %cst_24 = arith.constant 0.00999999977 : f32
    %35 = vector.broadcast %cst_24 : f32 to vector<128x32xf32>
    %36 = arith.mulf %35, %32 : vector<128x32xf32>
    %37 = arith.select %34, %32, %36 : vector<128x32xi1>, vector<128x32xf32>
    %38 = arith.truncf %37 : vector<128x32xf32> to vector<128x32xbf16>
    %c0_25 = arith.constant 0 : index
    %c0_26 = arith.constant 0 : index
    %39 = vector.load %arg10[%c0_25, %c0_26] : memref<128x32xbf16, #tpu.memory_space<vmem>>, vector<128x32xbf16>
    tpu.vector_store %arg10[%c0_25, %c0_26], %38 {strides = array<i32>} : memref<128x32xbf16, #tpu.memory_space<vmem>>, vector<128x32xbf16>,
    return
  }
  func.func @transform_0(%arg0: i32) -> (i32, i32) {
    %c0_i32 = arith.constant 0 : i32
    %c0_i32_0 = arith.constant 0 : i32
    return %arg0, %c0_i32 : i32, i32
  }
  func.func @transform_1(%arg0: i32) -> (i32, i32) {
    %c0_i32 = arith.constant 0 : i32
    %c0_i32_0 = arith.constant 0 : i32
    return %arg0, %c0_i32 : i32, i32
  }
  func.func @transform_2(%arg0: i32) -> (i32, i32) {
    %c0_i32 = arith.constant 0 : i32
    %c0_i32_0 = arith.constant 0 : i32
    %c0_i32_1 = arith.constant 0 : i32
    return %c0_i32, %c0_i32_0 : i32, i32
  }
  func.func @transform_3(%arg0: i32) -> (i32, i32) {
    %c0_i32 = arith.constant 0 : i32
    %c0_i32_0 = arith.constant 0 : i32
    %c0_i32_1 = arith.constant 0 : i32
    return %c0_i32, %c0_i32_0 : i32, i32
  }
  func.func @transform_4(%arg0: i32) -> (i32, i32) {
    %c0_i32 = arith.constant 0 : i32
    %c0_i32_0 = arith.constant 0 : i32
    %c0_i32_1 = arith.constant 0 : i32
    return %c0_i32, %c0_i32_0 : i32, i32
  }
  func.func @transform_5(%arg0: i32) -> (i32, i32) {
    %c0_i32 = arith.constant 0 : i32
    %c0_i32_0 = arith.constant 0 : i32
    %c0_i32_1 = arith.constant 0 : i32
    return %c0_i32, %c0_i32_0 : i32, i32
  }
  func.func @transform_6(%arg0: i32) -> (i32, i32) {
    %c0_i32 = arith.constant 0 : i32
    %c0_i32_0 = arith.constant 0 : i32
    %c0_i32_1 = arith.constant 0 : i32
    return %c0_i32, %c0_i32_0 : i32, i32
  }
  func.func @transform_7(%arg0: i32) -> (i32, i32) {
    %c0_i32 = arith.constant 0 : i32
    %c0_i32_0 = arith.constant 0 : i32
    %c0_i32_1 = arith.constant 0 : i32
    return %c0_i32, %c0_i32_0 : i32, i32
  }
  func.func @transform_8(%arg0: i32) -> (i32, i32) {
    %c0_i32 = arith.constant 0 : i32
    %c0_i32_0 = arith.constant 0 : i32
    return %arg0, %c0_i32 : i32, i32
  }
  func.func @transform_9(%arg0: i32) -> (i32, i32) {
    %c0_i32 = arith.constant 0 : i32
    %c0_i32_0 = arith.constant 0 : i32
    return %arg0, %c0_i32 : i32, i32
  }
}

module attributes {stable_mosaic.version = 11 : i64} {
  func.func @kernel(%arg0: i32, %arg1: memref<128x288xbf16, #tpu.memory_space<vmem>>, %arg2: memref<128x128xbf16, #tpu.memory_space<vmem>>, %arg3: memref<288x32xbf16, #tpu.memory_space<vmem>>, %arg4: memref<1x32xf32, #tpu.memory_space<vmem>>, %arg5: memref<32x128xbf16, #tpu.memory_space<vmem>>, %arg6: memref<1x128xf32, #tpu.memory_space<vmem>>, %arg7: memref<128x64xbf16, #tpu.memory_space<vmem>>, %arg8: memref<1x64xf32, #tpu.memory_space<vmem>>, %arg9: memref<128x128xbf16, #tpu.memory_space<vmem>>, %arg10: memref<128x64xbf16, #tpu.memory_space<vmem>>) attributes {dimension_semantics = [#tpu.dimension_semantics<parallel>], iteration_bounds = array<i64: 1>, scalar_prefetch = 0 : i64, scratch_operands = 0 : i64, tpu.core_type = #tpu.core_type<tc>, window_params = [{transform_indices = @transform_0, window_bounds = array<i64: 128, 288>}, {transform_indices = @transform_1, window_bounds = array<i64: 128, 128>}, {pipeline_mode = #tpu.pipeline_mode<synchronous>, transform_indices = @transform_2, window_bounds = array<i64: 288, 32>}, {pipeline_mode = #tpu.pipeline_mode<synchronous>, transform_indices = @transform_3, window_bounds = array<i64: 1, 32>}, {pipeline_mode = #tpu.pipeline_mode<synchronous>, transform_indices = @transform_4, window_bounds = array<i64: 32, 128>}, {pipeline_mode = #tpu.pipeline_mode<synchronous>, transform_indices = @transform_5, window_bounds = array<i64: 1, 128>}, {pipeline_mode = #tpu.pipeline_mode<synchronous>, transform_indices = @transform_6, window_bounds = array<i64: 128, 64>}, {pipeline_mode = #tpu.pipeline_mode<synchronous>, transform_indices = @transform_7, window_bounds = array<i64: 1, 64>}, {transform_indices = @transform_8, window_bounds = array<i64: 128, 128>}, {transform_indices = @transform_9, window_bounds = array<i64: 128, 64>}]} {
    %c0 = arith.constant 0 : index
    %c0_0 = arith.constant 0 : index
    %0 = vector.load %arg1[%c0, %c0_0] : memref<128x288xbf16, #tpu.memory_space<vmem>>, vector<128x288xbf16>
    %c0_1 = arith.constant 0 : index
    %c0_2 = arith.constant 0 : index
    %1 = vector.load %arg3[%c0_1, %c0_2] : memref<288x32xbf16, #tpu.memory_space<vmem>>, vector<288x32xbf16>
    %cst = arith.constant dense<0.000000e+00> : vector<128x32xf32>
    %2 = tpu.matmul %0, %1, %cst {dimension_numbers = #tpu.dot_dimension_numbers<[1], [0], [0], [1], [0, 0, 1, 1], [], []>} : vector<128x288xbf16>, vector<288x32xbf16>, vector<128x32xf32> -> vector<128x32xf32>
    %c0_3 = arith.constant 0 : index
    %c0_4 = arith.constant 0 : index
    %3 = vector.load %arg4[%c0_3, %c0_4] : memref<1x32xf32, #tpu.memory_space<vmem>>, vector<1x32xf32>
    %4 = vector.broadcast %3 : vector<1x32xf32> to vector<128x32xf32>
    %5 = arith.addf %2, %4 : vector<128x32xf32>
    %cst_5 = arith.constant 0.000000e+00 : f32
    %6 = vector.broadcast %cst_5 : f32 to vector<128x32xf32>
    %7 = arith.cmpf oge, %5, %6 : vector<128x32xf32>
    %cst_6 = arith.constant 0.00999999977 : f32
    %8 = vector.broadcast %cst_6 : f32 to vector<128x32xf32>
    %9 = arith.mulf %8, %5 : vector<128x32xf32>
    %10 = arith.select %7, %5, %9 : vector<128x32xi1>, vector<128x32xf32>
    %11 = arith.truncf %10 : vector<128x32xf32> to vector<128x32xbf16>
    %c0_7 = arith.constant 0 : index
    %c0_8 = arith.constant 0 : index
    %12 = vector.load %arg5[%c0_7, %c0_8] : memref<32x128xbf16, #tpu.memory_space<vmem>>, vector<32x128xbf16>
    %cst_9 = arith.constant dense<0.000000e+00> : vector<128x128xf32>
    %13 = tpu.matmul %11, %12, %cst_9 {dimension_numbers = #tpu.dot_dimension_numbers<[1], [0], [0], [1], [0, 0, 1, 1], [], []>} : vector<128x32xbf16>, vector<32x128xbf16>, vector<128x128xf32> -> vector<128x128xf32>
    %c0_10 = arith.constant 0 : index
    %c0_11 = arith.constant 0 : index
    %14 = vector.load %arg6[%c0_10, %c0_11] : memref<1x128xf32, #tpu.memory_space<vmem>>, vector<1x128xf32>
    %15 = vector.broadcast %14 : vector<1x128xf32> to vector<128x128xf32>
    %16 = arith.addf %13, %15 : vector<128x128xf32>
    %c0_12 = arith.constant 0 : index
    %c0_13 = arith.constant 0 : index
    %17 = vector.load %arg2[%c0_12, %c0_13] : memref<128x128xbf16, #tpu.memory_space<vmem>>, vector<128x128xbf16>
    %18 = arith.extf %17 : vector<128x128xbf16> to vector<128x128xf32>
    %19 = arith.addf %16, %18 : vector<128x128xf32>
    %cst_14 = arith.constant 0.000000e+00 : f32
    %20 = vector.broadcast %cst_14 : f32 to vector<128x128xf32>
    %21 = arith.cmpf oge, %19, %20 : vector<128x128xf32>
    %cst_15 = arith.constant 0.00999999977 : f32
    %22 = vector.broadcast %cst_15 : f32 to vector<128x128xf32>
    %23 = arith.mulf %22, %19 : vector<128x128xf32>
    %24 = arith.select %21, %19, %23 : vector<128x128xi1>, vector<128x128xf32>
    %25 = arith.truncf %24 : vector<128x128xf32> to vector<128x128xbf16>
    %c0_16 = arith.constant 0 : index
    %c0_17 = arith.constant 0 : index
    %26 = vector.load %arg9[%c0_16, %c0_17] : memref<128x128xbf16, #tpu.memory_space<vmem>>, vector<128x128xbf16>
    tpu.vector_store %arg9[%c0_16, %c0_17], %25 {strides = array<i32>} : memref<128x128xbf16, #tpu.memory_space<vmem>>, vector<128x128xbf16>,
    %27 = arith.truncf %24 : vector<128x128xf32> to vector<128x128xbf16>
    %c0_18 = arith.constant 0 : index
    %c0_19 = arith.constant 0 : index
    %28 = vector.load %arg7[%c0_18, %c0_19] : memref<128x64xbf16, #tpu.memory_space<vmem>>, vector<128x64xbf16>
    %cst_20 = arith.constant dense<0.000000e+00> : vector<128x64xf32>
    %29 = tpu.matmul %27, %28, %cst_20 {dimension_numbers = #tpu.dot_dimension_numbers<[1], [0], [0], [1], [0, 0, 1, 1], [], []>} : vector<128x128xbf16>, vector<128x64xbf16>, vector<128x64xf32> -> vector<128x64xf32>
    %c0_21 = arith.constant 0 : index
    %c0_22 = arith.constant 0 : index
    %30 = vector.load %arg8[%c0_21, %c0_22] : memref<1x64xf32, #tpu.memory_space<vmem>>, vector<1x64xf32>
    %31 = vector.broadcast %30 : vector<1x64xf32> to vector<128x64xf32>
    %32 = arith.addf %29, %31 : vector<128x64xf32>
    %cst_23 = arith.constant 0.000000e+00 : f32
    %33 = vector.broadcast %cst_23 : f32 to vector<128x64xf32>
    %34 = arith.cmpf oge, %32, %33 : vector<128x64xf32>
    %cst_24 = arith.constant 0.00999999977 : f32
    %35 = vector.broadcast %cst_24 : f32 to vector<128x64xf32>
    %36 = arith.mulf %35, %32 : vector<128x64xf32>
    %37 = arith.select %34, %32, %36 : vector<128x64xi1>, vector<128x64xf32>
    %38 = arith.truncf %37 : vector<128x64xf32> to vector<128x64xbf16>
    %c0_25 = arith.constant 0 : index
    %c0_26 = arith.constant 0 : index
    %39 = vector.load %arg10[%c0_25, %c0_26] : memref<128x64xbf16, #tpu.memory_space<vmem>>, vector<128x64xbf16>
    tpu.vector_store %arg10[%c0_25, %c0_26], %38 {strides = array<i32>} : memref<128x64xbf16, #tpu.memory_space<vmem>>, vector<128x64xbf16>,
    return
  }
  func.func @transform_0(%arg0: i32) -> (i32, i32) {
    %c0_i32 = arith.constant 0 : i32
    %c0_i32_0 = arith.constant 0 : i32
    return %arg0, %c0_i32 : i32, i32
  }
  func.func @transform_1(%arg0: i32) -> (i32, i32) {
    %c0_i32 = arith.constant 0 : i32
    %c0_i32_0 = arith.constant 0 : i32
    return %arg0, %c0_i32 : i32, i32
  }
  func.func @transform_2(%arg0: i32) -> (i32, i32) {
    %c0_i32 = arith.constant 0 : i32
    %c0_i32_0 = arith.constant 0 : i32
    %c0_i32_1 = arith.constant 0 : i32
    return %c0_i32, %c0_i32_0 : i32, i32
  }
  func.func @transform_3(%arg0: i32) -> (i32, i32) {
    %c0_i32 = arith.constant 0 : i32
    %c0_i32_0 = arith.constant 0 : i32
    %c0_i32_1 = arith.constant 0 : i32
    return %c0_i32, %c0_i32_0 : i32, i32
  }
  func.func @transform_4(%arg0: i32) -> (i32, i32) {
    %c0_i32 = arith.constant 0 : i32
    %c0_i32_0 = arith.constant 0 : i32
    %c0_i32_1 = arith.constant 0 : i32
    return %c0_i32, %c0_i32_0 : i32, i32
  }
  func.func @transform_5(%arg0: i32) -> (i32, i32) {
    %c0_i32 = arith.constant 0 : i32
    %c0_i32_0 = arith.constant 0 : i32
    %c0_i32_1 = arith.constant 0 : i32
    return %c0_i32, %c0_i32_0 : i32, i32
  }
  func.func @transform_6(%arg0: i32) -> (i32, i32) {
    %c0_i32 = arith.constant 0 : i32
    %c0_i32_0 = arith.constant 0 : i32
    %c0_i32_1 = arith.constant 0 : i32
    return %c0_i32, %c0_i32_0 : i32, i32
  }
  func.func @transform_7(%arg0: i32) -> (i32, i32) {
    %c0_i32 = arith.constant 0 : i32
    %c0_i32_0 = arith.constant 0 : i32
    %c0_i32_1 = arith.constant 0 : i32
    return %c0_i32, %c0_i32_0 : i32, i32
  }
  func.func @transform_8(%arg0: i32) -> (i32, i32) {
    %c0_i32 = arith.constant 0 : i32
    %c0_i32_0 = arith.constant 0 : i32
    return %arg0, %c0_i32 : i32, i32
  }
  func.func @transform_9(%arg0: i32) -> (i32, i32) {
    %c0_i32 = arith.constant 0 : i32
    %c0_i32_0 = arith.constant 0 : i32
    return %arg0, %c0_i32 : i32, i32
  }
}

module attributes {stable_mosaic.version = 11 : i64} {
  func.func @kernel(%arg0: i32, %arg1: memref<32x576xbf16, #tpu.memory_space<vmem>>, %arg2: memref<32x128xbf16, #tpu.memory_space<vmem>>, %arg3: memref<576x64xbf16, #tpu.memory_space<vmem>>, %arg4: memref<1x64xf32, #tpu.memory_space<vmem>>, %arg5: memref<64x256xbf16, #tpu.memory_space<vmem>>, %arg6: memref<1x256xf32, #tpu.memory_space<vmem>>, %arg7: memref<128x256xbf16, #tpu.memory_space<vmem>>, %arg8: memref<256x64xbf16, #tpu.memory_space<vmem>>, %arg9: memref<1x64xf32, #tpu.memory_space<vmem>>, %arg10: memref<32x256xbf16, #tpu.memory_space<vmem>>, %arg11: memref<32x64xbf16, #tpu.memory_space<vmem>>) attributes {dimension_semantics = [#tpu.dimension_semantics<parallel>], iteration_bounds = array<i64: 1>, scalar_prefetch = 0 : i64, scratch_operands = 0 : i64, tpu.core_type = #tpu.core_type<tc>, window_params = [{transform_indices = @transform_0, window_bounds = array<i64: 32, 576>}, {transform_indices = @transform_1, window_bounds = array<i64: 32, 128>}, {pipeline_mode = #tpu.pipeline_mode<synchronous>, transform_indices = @transform_2, window_bounds = array<i64: 576, 64>}, {pipeline_mode = #tpu.pipeline_mode<synchronous>, transform_indices = @transform_3, window_bounds = array<i64: 1, 64>}, {pipeline_mode = #tpu.pipeline_mode<synchronous>, transform_indices = @transform_4, window_bounds = array<i64: 64, 256>}, {pipeline_mode = #tpu.pipeline_mode<synchronous>, transform_indices = @transform_5, window_bounds = array<i64: 1, 256>}, {pipeline_mode = #tpu.pipeline_mode<synchronous>, transform_indices = @transform_6, window_bounds = array<i64: 128, 256>}, {pipeline_mode = #tpu.pipeline_mode<synchronous>, transform_indices = @transform_7, window_bounds = array<i64: 256, 64>}, {pipeline_mode = #tpu.pipeline_mode<synchronous>, transform_indices = @transform_8, window_bounds = array<i64: 1, 64>}, {transform_indices = @transform_9, window_bounds = array<i64: 32, 256>}, {transform_indices = @transform_10, window_bounds = array<i64: 32, 64>}]} {
    %c0 = arith.constant 0 : index
    %c0_0 = arith.constant 0 : index
    %0 = vector.load %arg1[%c0, %c0_0] : memref<32x576xbf16, #tpu.memory_space<vmem>>, vector<32x576xbf16>
    %c0_1 = arith.constant 0 : index
    %c0_2 = arith.constant 0 : index
    %1 = vector.load %arg3[%c0_1, %c0_2] : memref<576x64xbf16, #tpu.memory_space<vmem>>, vector<576x64xbf16>
    %cst = arith.constant dense<0.000000e+00> : vector<32x64xf32>
    %2 = tpu.matmul %0, %1, %cst {dimension_numbers = #tpu.dot_dimension_numbers<[1], [0], [0], [1], [0, 0, 1, 1], [], []>} : vector<32x576xbf16>, vector<576x64xbf16>, vector<32x64xf32> -> vector<32x64xf32>
    %c0_3 = arith.constant 0 : index
    %c0_4 = arith.constant 0 : index
    %3 = vector.load %arg4[%c0_3, %c0_4] : memref<1x64xf32, #tpu.memory_space<vmem>>, vector<1x64xf32>
    %4 = vector.broadcast %3 : vector<1x64xf32> to vector<32x64xf32>
    %5 = arith.addf %2, %4 : vector<32x64xf32>
    %cst_5 = arith.constant 0.000000e+00 : f32
    %6 = vector.broadcast %cst_5 : f32 to vector<32x64xf32>
    %7 = arith.cmpf oge, %5, %6 : vector<32x64xf32>
    %cst_6 = arith.constant 0.00999999977 : f32
    %8 = vector.broadcast %cst_6 : f32 to vector<32x64xf32>
    %9 = arith.mulf %8, %5 : vector<32x64xf32>
    %10 = arith.select %7, %5, %9 : vector<32x64xi1>, vector<32x64xf32>
    %11 = arith.truncf %10 : vector<32x64xf32> to vector<32x64xbf16>
    %c0_7 = arith.constant 0 : index
    %c0_8 = arith.constant 0 : index
    %12 = vector.load %arg5[%c0_7, %c0_8] : memref<64x256xbf16, #tpu.memory_space<vmem>>, vector<64x256xbf16>
    %cst_9 = arith.constant dense<0.000000e+00> : vector<32x256xf32>
    %13 = tpu.matmul %11, %12, %cst_9 {dimension_numbers = #tpu.dot_dimension_numbers<[1], [0], [0], [1], [0, 0, 1, 1], [], []>} : vector<32x64xbf16>, vector<64x256xbf16>, vector<32x256xf32> -> vector<32x256xf32>
    %c0_10 = arith.constant 0 : index
    %c0_11 = arith.constant 0 : index
    %14 = vector.load %arg6[%c0_10, %c0_11] : memref<1x256xf32, #tpu.memory_space<vmem>>, vector<1x256xf32>
    %15 = vector.broadcast %14 : vector<1x256xf32> to vector<32x256xf32>
    %16 = arith.addf %13, %15 : vector<32x256xf32>
    %c0_12 = arith.constant 0 : index
    %c0_13 = arith.constant 0 : index
    %17 = vector.load %arg2[%c0_12, %c0_13] : memref<32x128xbf16, #tpu.memory_space<vmem>>, vector<32x128xbf16>
    %c0_14 = arith.constant 0 : index
    %c0_15 = arith.constant 0 : index
    %18 = vector.load %arg7[%c0_14, %c0_15] : memref<128x256xbf16, #tpu.memory_space<vmem>>, vector<128x256xbf16>
    %cst_16 = arith.constant dense<0.000000e+00> : vector<32x256xf32>
    %19 = tpu.matmul %17, %18, %cst_16 {dimension_numbers = #tpu.dot_dimension_numbers<[1], [0], [0], [1], [0, 0, 1, 1], [], []>} : vector<32x128xbf16>, vector<128x256xbf16>, vector<32x256xf32> -> vector<32x256xf32>
    %20 = arith.addf %16, %19 : vector<32x256xf32>
    %cst_17 = arith.constant 0.000000e+00 : f32
    %21 = vector.broadcast %cst_17 : f32 to vector<32x256xf32>
    %22 = arith.cmpf oge, %20, %21 : vector<32x256xf32>
    %cst_18 = arith.constant 0.00999999977 : f32
    %23 = vector.broadcast %cst_18 : f32 to vector<32x256xf32>
    %24 = arith.mulf %23, %20 : vector<32x256xf32>
    %25 = arith.select %22, %20, %24 : vector<32x256xi1>, vector<32x256xf32>
    %26 = arith.truncf %25 : vector<32x256xf32> to vector<32x256xbf16>
    %c0_19 = arith.constant 0 : index
    %c0_20 = arith.constant 0 : index
    %27 = vector.load %arg10[%c0_19, %c0_20] : memref<32x256xbf16, #tpu.memory_space<vmem>>, vector<32x256xbf16>
    tpu.vector_store %arg10[%c0_19, %c0_20], %26 {strides = array<i32>} : memref<32x256xbf16, #tpu.memory_space<vmem>>, vector<32x256xbf16>,
    %28 = arith.truncf %25 : vector<32x256xf32> to vector<32x256xbf16>
    %c0_21 = arith.constant 0 : index
    %c0_22 = arith.constant 0 : index
    %29 = vector.load %arg8[%c0_21, %c0_22] : memref<256x64xbf16, #tpu.memory_space<vmem>>, vector<256x64xbf16>
    %cst_23 = arith.constant dense<0.000000e+00> : vector<32x64xf32>
    %30 = tpu.matmul %28, %29, %cst_23 {dimension_numbers = #tpu.dot_dimension_numbers<[1], [0], [0], [1], [0, 0, 1, 1], [], []>} : vector<32x256xbf16>, vector<256x64xbf16>, vector<32x64xf32> -> vector<32x64xf32>
    %c0_24 = arith.constant 0 : index
    %c0_25 = arith.constant 0 : index
    %31 = vector.load %arg9[%c0_24, %c0_25] : memref<1x64xf32, #tpu.memory_space<vmem>>, vector<1x64xf32>
    %32 = vector.broadcast %31 : vector<1x64xf32> to vector<32x64xf32>
    %33 = arith.addf %30, %32 : vector<32x64xf32>
    %cst_26 = arith.constant 0.000000e+00 : f32
    %34 = vector.broadcast %cst_26 : f32 to vector<32x64xf32>
    %35 = arith.cmpf oge, %33, %34 : vector<32x64xf32>
    %cst_27 = arith.constant 0.00999999977 : f32
    %36 = vector.broadcast %cst_27 : f32 to vector<32x64xf32>
    %37 = arith.mulf %36, %33 : vector<32x64xf32>
    %38 = arith.select %35, %33, %37 : vector<32x64xi1>, vector<32x64xf32>
    %39 = arith.truncf %38 : vector<32x64xf32> to vector<32x64xbf16>
    %c0_28 = arith.constant 0 : index
    %c0_29 = arith.constant 0 : index
    %40 = vector.load %arg11[%c0_28, %c0_29] : memref<32x64xbf16, #tpu.memory_space<vmem>>, vector<32x64xbf16>
    tpu.vector_store %arg11[%c0_28, %c0_29], %39 {strides = array<i32>} : memref<32x64xbf16, #tpu.memory_space<vmem>>, vector<32x64xbf16>,
    return
  }
  func.func @transform_0(%arg0: i32) -> (i32, i32) {
    %c0_i32 = arith.constant 0 : i32
    %c0_i32_0 = arith.constant 0 : i32
    return %arg0, %c0_i32 : i32, i32
  }
  func.func @transform_1(%arg0: i32) -> (i32, i32) {
    %c0_i32 = arith.constant 0 : i32
    %c0_i32_0 = arith.constant 0 : i32
    return %arg0, %c0_i32 : i32, i32
  }
  func.func @transform_2(%arg0: i32) -> (i32, i32) {
    %c0_i32 = arith.constant 0 : i32
    %c0_i32_0 = arith.constant 0 : i32
    %c0_i32_1 = arith.constant 0 : i32
    return %c0_i32, %c0_i32_0 : i32, i32
  }
  func.func @transform_3(%arg0: i32) -> (i32, i32) {
    %c0_i32 = arith.constant 0 : i32
    %c0_i32_0 = arith.constant 0 : i32
    %c0_i32_1 = arith.constant 0 : i32
    return %c0_i32, %c0_i32_0 : i32, i32
  }
  func.func @transform_4(%arg0: i32) -> (i32, i32) {
    %c0_i32 = arith.constant 0 : i32
    %c0_i32_0 = arith.constant 0 : i32
    %c0_i32_1 = arith.constant 0 : i32
    return %c0_i32, %c0_i32_0 : i32, i32
  }
  func.func @transform_5(%arg0: i32) -> (i32, i32) {
    %c0_i32 = arith.constant 0 : i32
    %c0_i32_0 = arith.constant 0 : i32
    %c0_i32_1 = arith.constant 0 : i32
    return %c0_i32, %c0_i32_0 : i32, i32
  }
  func.func @transform_6(%arg0: i32) -> (i32, i32) {
    %c0_i32 = arith.constant 0 : i32
    %c0_i32_0 = arith.constant 0 : i32
    %c0_i32_1 = arith.constant 0 : i32
    return %c0_i32, %c0_i32_0 : i32, i32
  }
  func.func @transform_7(%arg0: i32) -> (i32, i32) {
    %c0_i32 = arith.constant 0 : i32
    %c0_i32_0 = arith.constant 0 : i32
    %c0_i32_1 = arith.constant 0 : i32
    return %c0_i32, %c0_i32_0 : i32, i32
  }
  func.func @transform_8(%arg0: i32) -> (i32, i32) {
    %c0_i32 = arith.constant 0 : i32
    %c0_i32_0 = arith.constant 0 : i32
    %c0_i32_1 = arith.constant 0 : i32
    return %c0_i32, %c0_i32_0 : i32, i32
  }
  func.func @transform_9(%arg0: i32) -> (i32, i32) {
    %c0_i32 = arith.constant 0 : i32
    %c0_i32_0 = arith.constant 0 : i32
    return %arg0, %c0_i32 : i32, i32
  }
  func.func @transform_10(%arg0: i32) -> (i32, i32) {
    %c0_i32 = arith.constant 0 : i32
    %c0_i32_0 = arith.constant 0 : i32
    return %arg0, %c0_i32 : i32, i32
  }
}

module attributes {stable_mosaic.version = 11 : i64} {
  func.func @kernel(%arg0: i32, %arg1: memref<32x576xbf16, #tpu.memory_space<vmem>>, %arg2: memref<32x256xbf16, #tpu.memory_space<vmem>>, %arg3: memref<576x64xbf16, #tpu.memory_space<vmem>>, %arg4: memref<1x64xf32, #tpu.memory_space<vmem>>, %arg5: memref<64x256xbf16, #tpu.memory_space<vmem>>, %arg6: memref<1x256xf32, #tpu.memory_space<vmem>>, %arg7: memref<256x64xbf16, #tpu.memory_space<vmem>>, %arg8: memref<1x64xf32, #tpu.memory_space<vmem>>, %arg9: memref<32x256xbf16, #tpu.memory_space<vmem>>, %arg10: memref<32x64xbf16, #tpu.memory_space<vmem>>) attributes {dimension_semantics = [#tpu.dimension_semantics<parallel>], iteration_bounds = array<i64: 1>, scalar_prefetch = 0 : i64, scratch_operands = 0 : i64, tpu.core_type = #tpu.core_type<tc>, window_params = [{transform_indices = @transform_0, window_bounds = array<i64: 32, 576>}, {transform_indices = @transform_1, window_bounds = array<i64: 32, 256>}, {pipeline_mode = #tpu.pipeline_mode<synchronous>, transform_indices = @transform_2, window_bounds = array<i64: 576, 64>}, {pipeline_mode = #tpu.pipeline_mode<synchronous>, transform_indices = @transform_3, window_bounds = array<i64: 1, 64>}, {pipeline_mode = #tpu.pipeline_mode<synchronous>, transform_indices = @transform_4, window_bounds = array<i64: 64, 256>}, {pipeline_mode = #tpu.pipeline_mode<synchronous>, transform_indices = @transform_5, window_bounds = array<i64: 1, 256>}, {pipeline_mode = #tpu.pipeline_mode<synchronous>, transform_indices = @transform_6, window_bounds = array<i64: 256, 64>}, {pipeline_mode = #tpu.pipeline_mode<synchronous>, transform_indices = @transform_7, window_bounds = array<i64: 1, 64>}, {transform_indices = @transform_8, window_bounds = array<i64: 32, 256>}, {transform_indices = @transform_9, window_bounds = array<i64: 32, 64>}]} {
    %c0 = arith.constant 0 : index
    %c0_0 = arith.constant 0 : index
    %0 = vector.load %arg1[%c0, %c0_0] : memref<32x576xbf16, #tpu.memory_space<vmem>>, vector<32x576xbf16>
    %c0_1 = arith.constant 0 : index
    %c0_2 = arith.constant 0 : index
    %1 = vector.load %arg3[%c0_1, %c0_2] : memref<576x64xbf16, #tpu.memory_space<vmem>>, vector<576x64xbf16>
    %cst = arith.constant dense<0.000000e+00> : vector<32x64xf32>
    %2 = tpu.matmul %0, %1, %cst {dimension_numbers = #tpu.dot_dimension_numbers<[1], [0], [0], [1], [0, 0, 1, 1], [], []>} : vector<32x576xbf16>, vector<576x64xbf16>, vector<32x64xf32> -> vector<32x64xf32>
    %c0_3 = arith.constant 0 : index
    %c0_4 = arith.constant 0 : index
    %3 = vector.load %arg4[%c0_3, %c0_4] : memref<1x64xf32, #tpu.memory_space<vmem>>, vector<1x64xf32>
    %4 = vector.broadcast %3 : vector<1x64xf32> to vector<32x64xf32>
    %5 = arith.addf %2, %4 : vector<32x64xf32>
    %cst_5 = arith.constant 0.000000e+00 : f32
    %6 = vector.broadcast %cst_5 : f32 to vector<32x64xf32>
    %7 = arith.cmpf oge, %5, %6 : vector<32x64xf32>
    %cst_6 = arith.constant 0.00999999977 : f32
    %8 = vector.broadcast %cst_6 : f32 to vector<32x64xf32>
    %9 = arith.mulf %8, %5 : vector<32x64xf32>
    %10 = arith.select %7, %5, %9 : vector<32x64xi1>, vector<32x64xf32>
    %11 = arith.truncf %10 : vector<32x64xf32> to vector<32x64xbf16>
    %c0_7 = arith.constant 0 : index
    %c0_8 = arith.constant 0 : index
    %12 = vector.load %arg5[%c0_7, %c0_8] : memref<64x256xbf16, #tpu.memory_space<vmem>>, vector<64x256xbf16>
    %cst_9 = arith.constant dense<0.000000e+00> : vector<32x256xf32>
    %13 = tpu.matmul %11, %12, %cst_9 {dimension_numbers = #tpu.dot_dimension_numbers<[1], [0], [0], [1], [0, 0, 1, 1], [], []>} : vector<32x64xbf16>, vector<64x256xbf16>, vector<32x256xf32> -> vector<32x256xf32>
    %c0_10 = arith.constant 0 : index
    %c0_11 = arith.constant 0 : index
    %14 = vector.load %arg6[%c0_10, %c0_11] : memref<1x256xf32, #tpu.memory_space<vmem>>, vector<1x256xf32>
    %15 = vector.broadcast %14 : vector<1x256xf32> to vector<32x256xf32>
    %16 = arith.addf %13, %15 : vector<32x256xf32>
    %c0_12 = arith.constant 0 : index
    %c0_13 = arith.constant 0 : index
    %17 = vector.load %arg2[%c0_12, %c0_13] : memref<32x256xbf16, #tpu.memory_space<vmem>>, vector<32x256xbf16>
    %18 = arith.extf %17 : vector<32x256xbf16> to vector<32x256xf32>
    %19 = arith.addf %16, %18 : vector<32x256xf32>
    %cst_14 = arith.constant 0.000000e+00 : f32
    %20 = vector.broadcast %cst_14 : f32 to vector<32x256xf32>
    %21 = arith.cmpf oge, %19, %20 : vector<32x256xf32>
    %cst_15 = arith.constant 0.00999999977 : f32
    %22 = vector.broadcast %cst_15 : f32 to vector<32x256xf32>
    %23 = arith.mulf %22, %19 : vector<32x256xf32>
    %24 = arith.select %21, %19, %23 : vector<32x256xi1>, vector<32x256xf32>
    %25 = arith.truncf %24 : vector<32x256xf32> to vector<32x256xbf16>
    %c0_16 = arith.constant 0 : index
    %c0_17 = arith.constant 0 : index
    %26 = vector.load %arg9[%c0_16, %c0_17] : memref<32x256xbf16, #tpu.memory_space<vmem>>, vector<32x256xbf16>
    tpu.vector_store %arg9[%c0_16, %c0_17], %25 {strides = array<i32>} : memref<32x256xbf16, #tpu.memory_space<vmem>>, vector<32x256xbf16>,
    %27 = arith.truncf %24 : vector<32x256xf32> to vector<32x256xbf16>
    %c0_18 = arith.constant 0 : index
    %c0_19 = arith.constant 0 : index
    %28 = vector.load %arg7[%c0_18, %c0_19] : memref<256x64xbf16, #tpu.memory_space<vmem>>, vector<256x64xbf16>
    %cst_20 = arith.constant dense<0.000000e+00> : vector<32x64xf32>
    %29 = tpu.matmul %27, %28, %cst_20 {dimension_numbers = #tpu.dot_dimension_numbers<[1], [0], [0], [1], [0, 0, 1, 1], [], []>} : vector<32x256xbf16>, vector<256x64xbf16>, vector<32x64xf32> -> vector<32x64xf32>
    %c0_21 = arith.constant 0 : index
    %c0_22 = arith.constant 0 : index
    %30 = vector.load %arg8[%c0_21, %c0_22] : memref<1x64xf32, #tpu.memory_space<vmem>>, vector<1x64xf32>
    %31 = vector.broadcast %30 : vector<1x64xf32> to vector<32x64xf32>
    %32 = arith.addf %29, %31 : vector<32x64xf32>
    %cst_23 = arith.constant 0.000000e+00 : f32
    %33 = vector.broadcast %cst_23 : f32 to vector<32x64xf32>
    %34 = arith.cmpf oge, %32, %33 : vector<32x64xf32>
    %cst_24 = arith.constant 0.00999999977 : f32
    %35 = vector.broadcast %cst_24 : f32 to vector<32x64xf32>
    %36 = arith.mulf %35, %32 : vector<32x64xf32>
    %37 = arith.select %34, %32, %36 : vector<32x64xi1>, vector<32x64xf32>
    %38 = arith.truncf %37 : vector<32x64xf32> to vector<32x64xbf16>
    %c0_25 = arith.constant 0 : index
    %c0_26 = arith.constant 0 : index
    %39 = vector.load %arg10[%c0_25, %c0_26] : memref<32x64xbf16, #tpu.memory_space<vmem>>, vector<32x64xbf16>
    tpu.vector_store %arg10[%c0_25, %c0_26], %38 {strides = array<i32>} : memref<32x64xbf16, #tpu.memory_space<vmem>>, vector<32x64xbf16>,
    return
  }
  func.func @transform_0(%arg0: i32) -> (i32, i32) {
    %c0_i32 = arith.constant 0 : i32
    %c0_i32_0 = arith.constant 0 : i32
    return %arg0, %c0_i32 : i32, i32
  }
  func.func @transform_1(%arg0: i32) -> (i32, i32) {
    %c0_i32 = arith.constant 0 : i32
    %c0_i32_0 = arith.constant 0 : i32
    return %arg0, %c0_i32 : i32, i32
  }
  func.func @transform_2(%arg0: i32) -> (i32, i32) {
    %c0_i32 = arith.constant 0 : i32
    %c0_i32_0 = arith.constant 0 : i32
    %c0_i32_1 = arith.constant 0 : i32
    return %c0_i32, %c0_i32_0 : i32, i32
  }
  func.func @transform_3(%arg0: i32) -> (i32, i32) {
    %c0_i32 = arith.constant 0 : i32
    %c0_i32_0 = arith.constant 0 : i32
    %c0_i32_1 = arith.constant 0 : i32
    return %c0_i32, %c0_i32_0 : i32, i32
  }
  func.func @transform_4(%arg0: i32) -> (i32, i32) {
    %c0_i32 = arith.constant 0 : i32
    %c0_i32_0 = arith.constant 0 : i32
    %c0_i32_1 = arith.constant 0 : i32
    return %c0_i32, %c0_i32_0 : i32, i32
  }
  func.func @transform_5(%arg0: i32) -> (i32, i32) {
    %c0_i32 = arith.constant 0 : i32
    %c0_i32_0 = arith.constant 0 : i32
    %c0_i32_1 = arith.constant 0 : i32
    return %c0_i32, %c0_i32_0 : i32, i32
  }
  func.func @transform_6(%arg0: i32) -> (i32, i32) {
    %c0_i32 = arith.constant 0 : i32
    %c0_i32_0 = arith.constant 0 : i32
    %c0_i32_1 = arith.constant 0 : i32
    return %c0_i32, %c0_i32_0 : i32, i32
  }
  func.func @transform_7(%arg0: i32) -> (i32, i32) {
    %c0_i32 = arith.constant 0 : i32
    %c0_i32_0 = arith.constant 0 : i32
    %c0_i32_1 = arith.constant 0 : i32
    return %c0_i32, %c0_i32_0 : i32, i32
  }
  func.func @transform_8(%arg0: i32) -> (i32, i32) {
    %c0_i32 = arith.constant 0 : i32
    %c0_i32_0 = arith.constant 0 : i32
    return %arg0, %c0_i32 : i32, i32
  }
  func.func @transform_9(%arg0: i32) -> (i32, i32) {
    %c0_i32 = arith.constant 0 : i32
    %c0_i32_0 = arith.constant 0 : i32
    return %arg0, %c0_i32 : i32, i32
  }
}

module attributes {stable_mosaic.version = 11 : i64} {
  func.func @kernel(%arg0: i32, %arg1: memref<32x576xbf16, #tpu.memory_space<vmem>>, %arg2: memref<32x256xbf16, #tpu.memory_space<vmem>>, %arg3: memref<576x64xbf16, #tpu.memory_space<vmem>>, %arg4: memref<1x64xf32, #tpu.memory_space<vmem>>, %arg5: memref<64x256xbf16, #tpu.memory_space<vmem>>, %arg6: memref<1x256xf32, #tpu.memory_space<vmem>>, %arg7: memref<8x32xf32, #tpu.memory_space<vmem>>, %arg8: memref<8x256xf32, #tpu.memory_space<vmem>>) attributes {dimension_semantics = [#tpu.dimension_semantics<parallel>], iteration_bounds = array<i64: 1>, scalar_prefetch = 0 : i64, scratch_operands = 0 : i64, tpu.core_type = #tpu.core_type<tc>, window_params = [{transform_indices = @transform_0, window_bounds = array<i64: 32, 576>}, {transform_indices = @transform_1, window_bounds = array<i64: 32, 256>}, {pipeline_mode = #tpu.pipeline_mode<synchronous>, transform_indices = @transform_2, window_bounds = array<i64: 576, 64>}, {pipeline_mode = #tpu.pipeline_mode<synchronous>, transform_indices = @transform_3, window_bounds = array<i64: 1, 64>}, {pipeline_mode = #tpu.pipeline_mode<synchronous>, transform_indices = @transform_4, window_bounds = array<i64: 64, 256>}, {pipeline_mode = #tpu.pipeline_mode<synchronous>, transform_indices = @transform_5, window_bounds = array<i64: 1, 256>}, {pipeline_mode = #tpu.pipeline_mode<synchronous>, transform_indices = @transform_6, window_bounds = array<i64: 8, 32>}, {pipeline_mode = #tpu.pipeline_mode<synchronous>, transform_indices = @transform_7, window_bounds = array<i64: 8, 256>}]} {
    %c0 = arith.constant 0 : index
    %c0_0 = arith.constant 0 : index
    %0 = vector.load %arg1[%c0, %c0_0] : memref<32x576xbf16, #tpu.memory_space<vmem>>, vector<32x576xbf16>
    %c0_1 = arith.constant 0 : index
    %c0_2 = arith.constant 0 : index
    %1 = vector.load %arg3[%c0_1, %c0_2] : memref<576x64xbf16, #tpu.memory_space<vmem>>, vector<576x64xbf16>
    %cst = arith.constant dense<0.000000e+00> : vector<32x64xf32>
    %2 = tpu.matmul %0, %1, %cst {dimension_numbers = #tpu.dot_dimension_numbers<[1], [0], [0], [1], [0, 0, 1, 1], [], []>} : vector<32x576xbf16>, vector<576x64xbf16>, vector<32x64xf32> -> vector<32x64xf32>
    %c0_3 = arith.constant 0 : index
    %c0_4 = arith.constant 0 : index
    %3 = vector.load %arg4[%c0_3, %c0_4] : memref<1x64xf32, #tpu.memory_space<vmem>>, vector<1x64xf32>
    %4 = vector.broadcast %3 : vector<1x64xf32> to vector<32x64xf32>
    %5 = arith.addf %2, %4 : vector<32x64xf32>
    %cst_5 = arith.constant 0.000000e+00 : f32
    %6 = vector.broadcast %cst_5 : f32 to vector<32x64xf32>
    %7 = arith.cmpf oge, %5, %6 : vector<32x64xf32>
    %cst_6 = arith.constant 0.00999999977 : f32
    %8 = vector.broadcast %cst_6 : f32 to vector<32x64xf32>
    %9 = arith.mulf %8, %5 : vector<32x64xf32>
    %10 = arith.select %7, %5, %9 : vector<32x64xi1>, vector<32x64xf32>
    %11 = arith.truncf %10 : vector<32x64xf32> to vector<32x64xbf16>
    %c0_7 = arith.constant 0 : index
    %c0_8 = arith.constant 0 : index
    %12 = vector.load %arg5[%c0_7, %c0_8] : memref<64x256xbf16, #tpu.memory_space<vmem>>, vector<64x256xbf16>
    %cst_9 = arith.constant dense<0.000000e+00> : vector<32x256xf32>
    %13 = tpu.matmul %11, %12, %cst_9 {dimension_numbers = #tpu.dot_dimension_numbers<[1], [0], [0], [1], [0, 0, 1, 1], [], []>} : vector<32x64xbf16>, vector<64x256xbf16>, vector<32x256xf32> -> vector<32x256xf32>
    %c0_10 = arith.constant 0 : index
    %c0_11 = arith.constant 0 : index
    %14 = vector.load %arg6[%c0_10, %c0_11] : memref<1x256xf32, #tpu.memory_space<vmem>>, vector<1x256xf32>
    %15 = vector.broadcast %14 : vector<1x256xf32> to vector<32x256xf32>
    %16 = arith.addf %13, %15 : vector<32x256xf32>
    %c0_12 = arith.constant 0 : index
    %c0_13 = arith.constant 0 : index
    %17 = vector.load %arg2[%c0_12, %c0_13] : memref<32x256xbf16, #tpu.memory_space<vmem>>, vector<32x256xbf16>
    %18 = arith.extf %17 : vector<32x256xbf16> to vector<32x256xf32>
    %19 = arith.addf %16, %18 : vector<32x256xf32>
    %cst_14 = arith.constant 0.000000e+00 : f32
    %20 = vector.broadcast %cst_14 : f32 to vector<32x256xf32>
    %21 = arith.cmpf oge, %19, %20 : vector<32x256xf32>
    %cst_15 = arith.constant 0.00999999977 : f32
    %22 = vector.broadcast %cst_15 : f32 to vector<32x256xf32>
    %23 = arith.mulf %22, %19 : vector<32x256xf32>
    %24 = arith.select %21, %19, %23 : vector<32x256xi1>, vector<32x256xf32>
    %c0_16 = arith.constant 0 : index
    %c0_17 = arith.constant 0 : index
    %25 = vector.load %arg7[%c0_16, %c0_17] : memref<8x32xf32, #tpu.memory_space<vmem>>, vector<8x32xf32>
    %cst_18 = arith.constant dense<0.000000e+00> : vector<8x256xf32>
    %26 = tpu.matmul %25, %24, %cst_18 {dimension_numbers = #tpu.dot_dimension_numbers<[1], [0], [0], [1], [0, 0, 1, 1], [], []>} : vector<8x32xf32>, vector<32x256xf32>, vector<8x256xf32> -> vector<8x256xf32>
    %c0_19 = arith.constant 0 : index
    %c0_20 = arith.constant 0 : index
    %27 = vector.load %arg8[%c0_19, %c0_20] : memref<8x256xf32, #tpu.memory_space<vmem>>, vector<8x256xf32>
    tpu.vector_store %arg8[%c0_19, %c0_20], %26 {strides = array<i32>} : memref<8x256xf32, #tpu.memory_space<vmem>>, vector<8x256xf32>,
    return
  }
  func.func @transform_0(%arg0: i32) -> (i32, i32) {
    %c0_i32 = arith.constant 0 : i32
    %c0_i32_0 = arith.constant 0 : i32
    return %arg0, %c0_i32 : i32, i32
  }
  func.func @transform_1(%arg0: i32) -> (i32, i32) {
    %c0_i32 = arith.constant 0 : i32
    %c0_i32_0 = arith.constant 0 : i32
    return %arg0, %c0_i32 : i32, i32
  }
  func.func @transform_2(%arg0: i32) -> (i32, i32) {
    %c0_i32 = arith.constant 0 : i32
    %c0_i32_0 = arith.constant 0 : i32
    %c0_i32_1 = arith.constant 0 : i32
    return %c0_i32, %c0_i32_0 : i32, i32
  }
  func.func @transform_3(%arg0: i32) -> (i32, i32) {
    %c0_i32 = arith.constant 0 : i32
    %c0_i32_0 = arith.constant 0 : i32
    %c0_i32_1 = arith.constant 0 : i32
    return %c0_i32, %c0_i32_0 : i32, i32
  }
  func.func @transform_4(%arg0: i32) -> (i32, i32) {
    %c0_i32 = arith.constant 0 : i32
    %c0_i32_0 = arith.constant 0 : i32
    %c0_i32_1 = arith.constant 0 : i32
    return %c0_i32, %c0_i32_0 : i32, i32
  }
  func.func @transform_5(%arg0: i32) -> (i32, i32) {
    %c0_i32 = arith.constant 0 : i32
    %c0_i32_0 = arith.constant 0 : i32
    %c0_i32_1 = arith.constant 0 : i32
    return %c0_i32, %c0_i32_0 : i32, i32
  }
  func.func @transform_6(%arg0: i32) -> (i32, i32) {
    %c0_i32 = arith.constant 0 : i32
    %c0_i32_0 = arith.constant 0 : i32
    %c0_i32_1 = arith.constant 0 : i32
    return %c0_i32, %c0_i32_0 : i32, i32
  }
  func.func @transform_7(%arg0: i32) -> (i32, i32) {
    %c0_i32 = arith.constant 0 : i32
    %c0_i32_0 = arith.constant 0 : i32
    %c0_i32_1 = arith.constant 0 : i32
    return %c0_i32, %c0_i32_0 : i32, i32
  }
}

</mosaic_0001>

<bundles_post_ra>
// kernel: resnet_forward.13
= control target key start
LH: loop header
LB: loop body
LE: loop exit
PB: predicated region body
PF: predicated region fallthrough
CT: control target
= control target key end

     0   :  { %s1842_s21 = smov 0   ;;  %s2138_s0 = inlined_call_operand.vmem [shape: bf16[512,49], index: 0, kind: input, shape index: {}]   ;;  %s2139_s1 = inlined_call_operand.vmem [shape: bf16[49,16], index: 1, kind: input, shape index: {}]   ;;  %s2140_s2 = inlined_call_operand.vmem [shape: f32[1,16], index: 2, kind: input, shape index: {}]   ;;  %s2141_s3 = inlined_call_operand.vmem [shape: bf16[16,16], index: 3, kind: input, shape index: {}]   ;;  %s2142_s4 = inlined_call_operand.vmem [shape: f32[1,16], index: 4, kind: input, shape index: {}]   ;;  %s2143_s5 = inlined_call_operand.vmem [shape: bf16[512,16], index: 5, kind: output, shape index: {0}]   ;;  %s2144_s6 = inlined_call_operand.vmem [shape: bf16[512,16], index: 6, kind: output, shape index: {1}]  }
   0x1 LB: > { %s1461_s22 = sadd.s32 4294967295, %s1804_s21   ;;  %p1465_p0 = scmp.ge.s32.totalorder %s1804_s21, 1  ;;  %s1804_s21 = sphi %s1842_s21, %s17_s21  }
   0x2   : > { %p216_p1 = scmp.lt.s32.totalorder %s1804_s21, 3 }
   0x4   : > { %p217_p2 = pnand %p1465_p0, %p216_p1 }
   0x5   : > { %v1777_v0 = vld [vmem:[%s2139_s1] sm:$0xff] (!%p217_p2)   ;;  %v1778_v1 = vld [vmem:[%s2139_s1 + $0x8] sm:$0xff] (!%p217_p2)   ;;  %vm466_vm0 = vcmask (!%p217_p2), 1040384   ;;  %v1780_v2 = vld [vmem:[%s2139_s1 + $0x18] ss:$0 sps:$4 sm:$0x11] (!%p217_p2)  }
   0x6   : > { %220 = sbr.rel (%p217_p2) target bundleno = 524 (0x20c), region = 40  ;;  %1694 = vmatprep.subr.bf16.mxu0 (!%p217_p2), %v1777_v0  ;;  %s1466_s29 = sshll.u32 (!%p217_p2), %s1461_s22, 5  ;;  %v1779_v3 = vld [vmem:[%s2139_s1 + $0x10] sm:$0xff] (!%p217_p2)   ;;  %v1806_v4 = vmov (!%p217_p2), 0   ;;  %vm417_vm1 = vcmask (!%p217_p2), 400384   ;;  %v1797_v23 = vld [vmem:[%s2141_s3] sm:$0xff] (!%p217_p2)  }
   0x7   : > { %1695 = vmatpush3.bf16.msra.mxu0 (!%p217_p2), %v1777_v0  ;;  %p252_p3 = scmp.lt.s32.totalorder (!%p217_p2), %s1466_s29, 63  ;;  %v468_v5 = vsel (!%p217_p2), %vm466_vm0, 65535, %v1806_v4  ;;  %1734 = vmatprep.subr.bf16.mxu1 (!%p217_p2), %v1797_v23  ;;  %v1908_v24 = vld [vmem:[%s2140_s2] ss:$0 sm:$0xff] (!%p217_p2)  ;;  %vm857_vm4 = vcmask (!%p217_p2), 125952   ;;  %vm905_vm7 = vcmask (!%p217_p2), 130048  }
   0x8   : > { %1696 = vmatprep.subr.bf16.mxu0 (!%p217_p2), %v1778_v1  ;;  %v470_v6 = vand.u32 (!%p217_p2), %v1780_v2, %v468_v5  ;;  %1735 = vmatpush3.bf16.msra.mxu1 (!%p217_p2), %v1797_v23 }
   0xb   : > { %1697 = vmatpush3.bf16.msra.mxu0 (!%p217_p2), %v1778_v1 }
   0xc   : > { %1698 = vmatprep.subr.bf16.mxu0 (!%p217_p2), %v1779_v3 }
   0xd   : > { %s2146_s29 = smov (!%p252_p3, %s1466_s29), 63 }
   0xe   : > { %s1862_s8 = sshll.u32 %s2146_s29, 2 }
   0xf   : > { %s1868_s11 = scalar_lea.vmem %s2138_s0, %s1862_s8  ;;  %1699 = vmatpush3.bf16.msra.mxu0 %v1779_v3  ;;  %s1918_s18 = scalar_lea.vmem %s2143_s5, %s1862_s8 }
  0x10   : > { %v1781_v7 = vld [vmem:[%s1868_s11] sm:$0xff]   ;;  %1700 = vmatprep.subr.bf16.mxu0 %v470_v6  ;;  %v1782_v8 = vld [vmem:[%s1868_s11 + $0x8] sm:$0xff]   ;;  %v1783_v9 = vld [vmem:[%s1868_s11 + $0x10] sm:$0xff]   ;;  %s2041_s24 = scalar_lea.vmem %s2144_s6, %s1862_s8 }
  0x11   : > { %1702 = vmatprep.mubr.msk.bf16.mxu0 %vm417_vm1, %v1781_v7  ;;  %v1784_v10 = vld [vmem:[%s1868_s11 + $0x18] sm:$0xff]   ;;  %v1785_v11 = vld [vmem:[%s1868_s11 + $0x20] sm:$0xff]   ;;  %v1786_v12 = vld [vmem:[%s1868_s11 + $0x28] sm:$0xff]  }
  0x12   : > { %v1787_v13 = vld [vmem:[%s1868_s11 + $0x30] sm:$0xff]   ;;  %v1788_v14 = vld [vmem:[%s1868_s11 + $0x38] sm:$0xff]   ;;  %v1789_v15 = vld [vmem:[%s1868_s11 + $0x40] sm:$0xff]  }
  0x13   : > { %1701 = vmatpush3.bf16.msra.mxu0 %v470_v6  ;;  %v1790_v16 = vld [vmem:[%s1868_s11 + $0x48] sm:$0xff]   ;;  %v1791_v17 = vld [vmem:[%s1868_s11 + $0x50] sm:$0xff]   ;;  %v1792_v18 = vld [vmem:[%s1868_s11 + $0x58] sm:$0xff]  }
  0x14   : > { %v1793_v19 = vld [vmem:[%s1868_s11 + $0x60] sm:$0xff]   ;;  %v1794_v20 = vld [vmem:[%s1868_s11 + $0x68] sm:$0xff]   ;;  %v1795_v21 = vld [vmem:[%s1868_s11 + $0x70] sm:$0xff]  }
  0x15   : > { %v1796_v22 = vld [vmem:[%s1868_s11 + $0x78] sm:$0xff]  }
  0x16   : > { %1703 = vmatmul.mubr.msk.bf16.vlgmr.msra.gmra.mrb[0].mxu0 %vm417_vm1, %v1782_v8 }
  0x17   : > { %1706 = vmatprep.mubr.msk.bf16.mxu0 %vm417_vm1, %v1783_v9 }
  0x1e   : > { %1707 = vmatmul.mubr.msk.bf16.gmra.mrb[4].mxu0 %vm417_vm1, %v1784_v10 }
  0x1f   : > { %1710 = vmatprep.mubr.msk.bf16.mxu0 %vm417_vm1, %v1785_v11 }
  0x26   : > { %1711 = vmatmul.mubr.msk.bf16.gmra.mrb[8].mxu0 %vm417_vm1, %v1786_v12 }
  0x27   : > { %1714 = vmatprep.mubr.msk.bf16.mxu0 %vm417_vm1, %v1787_v13 }
  0x2e   : > { %1715 = vmatmul.mubr.msk.bf16.gmra.mrb[12].mxu0 %vm417_vm1, %v1788_v14 }
  0x2f   : > { %1718 = vmatprep.mubr.msk.bf16.mxu0 %vm417_vm1, %v1789_v15 }
  0x36   : > { %1719 = vmatmul.mubr.msk.bf16.gmra.mrb[16].mxu0 %vm417_vm1, %v1790_v16 }
  0x37   : > { %1722 = vmatprep.mubr.msk.bf16.mxu0 %vm417_vm1, %v1791_v17 }
  0x3e   : > { %1723 = vmatmul.mubr.msk.bf16.gmra.mrb[20].mxu0 %vm417_vm1, %v1792_v18 }
  0x3f   : > { %1726 = vmatprep.mubr.msk.bf16.mxu0 %vm417_vm1, %v1793_v19 }
  0x46   : > { %1727 = vmatmul.mubr.msk.bf16.gmra.mrb[24].mxu0 %vm417_vm1, %v1794_v20 }
  0x47   : > { %1730 = vmatprep.mubr.msk.bf16.mxu0 %vm417_vm1, %v1795_v21 }
  0x4e   : > { %1731 = vmatmul.mubr.msk.bf16.gmra.mrb[28].mxu0 %vm417_vm1, %v1796_v22 }
  0xe9   : > { %v1704_v25 = vpop.f32.mrb[0].mxu0 }
  0xea   : > { %v515_v26 = vadd.f32 %v1704_v25, %v1908_v24  ;;  %v506_v27 = vpop.f32.mrb[1].mxu0 }
  0xeb   : > { %v507_v28 = vadd.f32 %v1908_v24, %v506_v27  ;;  %v1705_v29 = vpop.f32.mrb[2].mxu0 }
  0xec   : > { %vm635_vm2 = vcmp.ge.f32.partialorder %v515_v26, 0.0  ;;  %v667_v30 = vmul.f32 0.1, %v515_v26  ;;  %v518_v31 = vadd.f32 %v1705_v29, %v1908_v24  ;;  %v509_v32 = vpop.f32.mrb[3].mxu0 }
  0xed   : > { %v665_v33 = vmul.f32 0.1, %v507_v28  ;;  %v510_v34 = vadd.f32 %v1908_v24, %v509_v32  ;;  %vm633_vm3 = vcmp.ge.f32.partialorder %v507_v28, 0.0 }
  0xee   : > { %v699_v35 = vsel %vm635_vm2, %v515_v26, %v667_v30  ;;  %vm636_vm5 = vcmp.ge.f32.partialorder %v518_v31, 0.0  ;;  %v668_v36 = vmul.f32 0.1, %v518_v31 }
  0xef   : > { %v1595_v37 = vpack.c.bf16 %v699_v35, %v699_v35  ;;  %v666_v38 = vmul.f32 0.1, %v510_v34  ;;  %vm634_vm6 = vcmp.ge.f32.partialorder %v510_v34, 0.0  ;;  %v697_v39 = vsel %vm633_vm3, %v507_v28, %v665_v33 }
  0xf0   : > { %v700_v40 = vsel %vm636_vm5, %v518_v31, %v668_v36  ;;  %v1593_v41 = vpack.c.bf16 %v697_v39, %v697_v39 }
  0xf1   : > { %860 = vst.msk [vmem:[%s1918_s18 + $0x8] sm:$0xf] %vm857_vm4, %v1595_v37  ;;  %v730_v42 = vpack.c.bf16 %v700_v40, %v699_v35  ;;  %v1596_v43 = vpack.c.bf16 %v700_v40, %v700_v40  ;;  %v1708_v44 = vpop.f32.mrb[4].mxu0  ;;  %v698_v45 = vsel %vm634_vm6, %v510_v34, %v666_v38 }
  0xf2   : > { %v531_v46 = vadd.f32 %v1708_v44, %v1908_v24  ;;  %v522_v47 = vpop.f32.mrb[5].mxu0  ;;  %v729_v48 = vpack.c.bf16 %v698_v45, %v697_v39  ;;  %v1594_v49 = vpack.c.bf16 %v698_v45, %v698_v45  ;;  %858 = vst.msk [vmem:[%s1918_s18] sm:$0xf] %vm857_vm4, %v1593_v41 }
  0xf3   : > { %861 = vst.msk [vmem:[%s1918_s18 + $0xc] sm:$0xf] %vm857_vm4, %v1596_v43  ;;  %v523_v50 = vadd.f32 %v1908_v24, %v522_v47  ;;  %v1709_v51 = vpop.f32.mrb[6].mxu0 }
  0xf4   : > { %vm639_vm8 = vcmp.ge.f32.partialorder %v531_v46, 0.0  ;;  %v671_v52 = vmul.f32 0.1, %v531_v46  ;;  %v534_v53 = vadd.f32 %v1709_v51, %v1908_v24  ;;  %v525_v54 = vpop.f32.mrb[7].mxu0  ;;  %859 = vst.msk [vmem:[%s1918_s18 + $0x4] sm:$0xf] %vm857_vm4, %v1594_v49  ;;  %1736 = vmatprep.mubr.msk.bf16.mxu1 %vm905_vm7, %v729_v48 }
  0xf5   : > { %vm637_vm9 = vcmp.ge.f32.partialorder %v523_v50, 0.0  ;;  %v669_v55 = vmul.f32 0.1, %v523_v50  ;;  %v526_v56 = vadd.f32 %v1908_v24, %v525_v54  ;;  %1737 = vmatmul.mubr.msk.bf16.vlgmr.msra.gmra.mrb[0].mxu1 %vm905_vm7, %v730_v42 }
  0xf6   : > { %v703_v57 = vsel %vm639_vm8, %v531_v46, %v671_v52  ;;  %vm640_vm10 = vcmp.ge.f32.partialorder %v534_v53, 0.0  ;;  %v672_v58 = vmul.f32 0.1, %v534_v53 }
  0xf7   : > { %v1599_v59 = vpack.c.bf16 %v703_v57, %v703_v57  ;;  %v701_v60 = vsel %vm637_vm9, %v523_v50, %v669_v55  ;;  %vm638_vm11 = vcmp.ge.f32.partialorder %v526_v56, 0.0  ;;  %v670_v61 = vmul.f32 0.1, %v526_v56 }
  0xf8   : > { %v1597_v62 = vpack.c.bf16 %v701_v60, %v701_v60  ;;  %v704_v63 = vsel %vm640_vm10, %v534_v53, %v672_v58 }
  0xf9   : > { %864 = vst.msk [vmem:[%s1918_s18 + $0x18] sm:$0xf] %vm857_vm4, %v1599_v59  ;;  %v732_v0 = vpack.c.bf16 %v704_v63, %v703_v57  ;;  %v1600_v1 = vpack.c.bf16 %v704_v63, %v704_v63  ;;  %v702_v2 = vsel %vm638_vm11, %v526_v56, %v670_v61  ;;  %v1712_v3 = vpop.f32.mrb[8].mxu0 }
  0xfa   : > { %862 = vst.msk [vmem:[%s1918_s18 + $0x10] sm:$0xf] %vm857_vm4, %v1597_v62  ;;  %v731_v4 = vpack.c.bf16 %v702_v2, %v701_v60  ;;  %v1598_v5 = vpack.c.bf16 %v702_v2, %v702_v2  ;;  %v547_v6 = vadd.f32 %v1712_v3, %v1908_v24  ;;  %v538_v7 = vpop.f32.mrb[9].mxu0 }
  0xfb   : > { %865 = vst.msk [vmem:[%s1918_s18 + $0x1c] sm:$0xf] %vm857_vm4, %v1600_v1  ;;  %v539_v8 = vadd.f32 %v1908_v24, %v538_v7  ;;  %v1713_v9 = vpop.f32.mrb[10].mxu0 }
  0xfc   : > { %863 = vst.msk [vmem:[%s1918_s18 + $0x14] sm:$0xf] %vm857_vm4, %v1598_v5  ;;  %vm643_vm12 = vcmp.ge.f32.partialorder %v547_v6, 0.0  ;;  %v675_v10 = vmul.f32 0.1, %v547_v6  ;;  %v550_v11 = vadd.f32 %v1713_v9, %v1908_v24  ;;  %v541_v12 = vpop.f32.mrb[11].mxu0  ;;  %1740 = vmatprep.mubr.msk.bf16.mxu1 %vm905_vm7, %v731_v4 }
  0xfd   : > { %vm641_vm13 = vcmp.ge.f32.partialorder %v539_v8, 0.0  ;;  %v673_v13 = vmul.f32 0.1, %v539_v8  ;;  %v542_v14 = vadd.f32 %v1908_v24, %v541_v12  ;;  %1741 = vmatmul.mubr.msk.bf16.gmra.mrb[4].mxu1 %vm905_vm7, %v732_v0 }
  0xfe   : > { %v707_v15 = vsel %vm643_vm12, %v547_v6, %v675_v10  ;;  %vm644_vm14 = vcmp.ge.f32.partialorder %v550_v11, 0.0  ;;  %v676_v16 = vmul.f32 0.1, %v550_v11 }
  0xff   : > { %v1603_v17 = vpack.c.bf16 %v707_v15, %v707_v15  ;;  %v705_v18 = vsel %vm641_vm13, %v539_v8, %v673_v13  ;;  %vm642_vm15 = vcmp.ge.f32.partialorder %v542_v14, 0.0  ;;  %v674_v19 = vmul.f32 0.1, %v542_v14 }
 0x100   : > { %v1601_v20 = vpack.c.bf16 %v705_v18, %v705_v18  ;;  %v708_v21 = vsel %vm644_vm14, %v550_v11, %v676_v16 }
 0x101   : > { %868 = vst.msk [vmem:[%s1918_s18 + $0x28] sm:$0xf] %vm857_vm4, %v1603_v17  ;;  %v734_v22 = vpack.c.bf16 %v708_v21, %v707_v15  ;;  %v1604_v23 = vpack.c.bf16 %v708_v21, %v708_v21  ;;  %v706_v25 = vsel %vm642_vm15, %v542_v14, %v674_v19  ;;  %v1716_v26 = vpop.f32.mrb[12].mxu0 }
 0x102   : > { %866 = vst.msk [vmem:[%s1918_s18 + $0x20] sm:$0xf] %vm857_vm4, %v1601_v20  ;;  %v733_v27 = vpack.c.bf16 %v706_v25, %v705_v18  ;;  %v1602_v28 = vpack.c.bf16 %v706_v25, %v706_v25  ;;  %v563_v29 = vadd.f32 %v1716_v26, %v1908_v24  ;;  %v554_v30 = vpop.f32.mrb[13].mxu0 }
 0x103   : > { %869 = vst.msk [vmem:[%s1918_s18 + $0x2c] sm:$0xf] %vm857_vm4, %v1604_v23  ;;  %v555_v31 = vadd.f32 %v1908_v24, %v554_v30  ;;  %v1717_v32 = vpop.f32.mrb[14].mxu0 }
 0x104   : > { %867 = vst.msk [vmem:[%s1918_s18 + $0x24] sm:$0xf] %vm857_vm4, %v1602_v28  ;;  %vm647_vm0 = vcmp.ge.f32.partialorder %v563_v29, 0.0  ;;  %v679_v33 = vmul.f32 0.1, %v563_v29  ;;  %v566_v34 = vadd.f32 %v1717_v32, %v1908_v24  ;;  %v557_v35 = vpop.f32.mrb[15].mxu0  ;;  %1744 = vmatprep.mubr.msk.bf16.mxu1 %vm905_vm7, %v733_v27 }
 0x105   : > { %vm645_vm1 = vcmp.ge.f32.partialorder %v555_v31, 0.0  ;;  %v677_v36 = vmul.f32 0.1, %v555_v31  ;;  %v558_v37 = vadd.f32 %v1908_v24, %v557_v35  ;;  %1745 = vmatmul.mubr.msk.bf16.gmra.mrb[8].mxu1 %vm905_vm7, %v734_v22 }
 0x106   : > { %v711_v38 = vsel %vm647_vm0, %v563_v29, %v679_v33  ;;  %vm648_vm2 = vcmp.ge.f32.partialorder %v566_v34, 0.0  ;;  %v680_v39 = vmul.f32 0.1, %v566_v34 }
 0x107   : > { %v1607_v40 = vpack.c.bf16 %v711_v38, %v711_v38  ;;  %v709_v41 = vsel %vm645_vm1, %v555_v31, %v677_v36  ;;  %vm646_vm3 = vcmp.ge.f32.partialorder %v558_v37, 0.0  ;;  %v678_v42 = vmul.f32 0.1, %v558_v37 }
 0x108   : > { %v1605_v43 = vpack.c.bf16 %v709_v41, %v709_v41  ;;  %v712_v44 = vsel %vm648_vm2, %v566_v34, %v680_v39 }
 0x109   : > { %872 = vst.msk [vmem:[%s1918_s18 + $0x38] sm:$0xf] %vm857_vm4, %v1607_v40  ;;  %v736_v45 = vpack.c.bf16 %v712_v44, %v711_v38  ;;  %v1608_v46 = vpack.c.bf16 %v712_v44, %v712_v44  ;;  %v710_v47 = vsel %vm646_vm3, %v558_v37, %v678_v42  ;;  %v1720_v48 = vpop.f32.mrb[16].mxu0 }
 0x10a   : > { %870 = vst.msk [vmem:[%s1918_s18 + $0x30] sm:$0xf] %vm857_vm4, %v1605_v43  ;;  %v735_v49 = vpack.c.bf16 %v710_v47, %v709_v41  ;;  %v1606_v50 = vpack.c.bf16 %v710_v47, %v710_v47  ;;  %v579_v51 = vadd.f32 %v1720_v48, %v1908_v24  ;;  %v570_v52 = vpop.f32.mrb[17].mxu0 }
 0x10b   : > { %873 = vst.msk [vmem:[%s1918_s18 + $0x3c] sm:$0xf] %vm857_vm4, %v1608_v46  ;;  %v571_v53 = vadd.f32 %v1908_v24, %v570_v52  ;;  %v1721_v54 = vpop.f32.mrb[18].mxu0 }
 0x10c   : > { %871 = vst.msk [vmem:[%s1918_s18 + $0x34] sm:$0xf] %vm857_vm4, %v1606_v50  ;;  %vm651_vm5 = vcmp.ge.f32.partialorder %v579_v51, 0.0  ;;  %v683_v55 = vmul.f32 0.1, %v579_v51  ;;  %v582_v56 = vadd.f32 %v1721_v54, %v1908_v24  ;;  %v573_v57 = vpop.f32.mrb[19].mxu0  ;;  %1748 = vmatprep.mubr.msk.bf16.mxu1 %vm905_vm7, %v735_v49 }
 0x10d   : > { %vm649_vm6 = vcmp.ge.f32.partialorder %v571_v53, 0.0  ;;  %v681_v58 = vmul.f32 0.1, %v571_v53  ;;  %v574_v59 = vadd.f32 %v1908_v24, %v573_v57  ;;  %1749 = vmatmul.mubr.msk.bf16.gmra.mrb[12].mxu1 %vm905_vm7, %v736_v45 }
 0x10e   : > { %v715_v60 = vsel %vm651_vm5, %v579_v51, %v683_v55  ;;  %vm652_vm8 = vcmp.ge.f32.partialorder %v582_v56, 0.0  ;;  %v684_v61 = vmul.f32 0.1, %v582_v56 }
 0x10f   : > { %v1611_v62 = vpack.c.bf16 %v715_v60, %v715_v60  ;;  %v713_v63 = vsel %vm649_vm6, %v571_v53, %v681_v58  ;;  %vm650_vm9 = vcmp.ge.f32.partialorder %v574_v59, 0.0  ;;  %v682_v0 = vmul.f32 0.1, %v574_v59 }
 0x110   : > { %v1609_v1 = vpack.c.bf16 %v713_v63, %v713_v63  ;;  %v716_v2 = vsel %vm652_vm8, %v582_v56, %v684_v61 }
 0x111   : > { %876 = vst.msk [vmem:[%s1918_s18 + $0x48] sm:$0xf] %vm857_vm4, %v1611_v62  ;;  %v738_v3 = vpack.c.bf16 %v716_v2, %v715_v60  ;;  %v1612_v4 = vpack.c.bf16 %v716_v2, %v716_v2  ;;  %v714_v5 = vsel %vm650_vm9, %v574_v59, %v682_v0  ;;  %v1724_v6 = vpop.f32.mrb[20].mxu0 }
 0x112   : > { %874 = vst.msk [vmem:[%s1918_s18 + $0x40] sm:$0xf] %vm857_vm4, %v1609_v1  ;;  %v737_v7 = vpack.c.bf16 %v714_v5, %v713_v63  ;;  %v1610_v8 = vpack.c.bf16 %v714_v5, %v714_v5  ;;  %v595_v9 = vadd.f32 %v1724_v6, %v1908_v24  ;;  %v586_v10 = vpop.f32.mrb[21].mxu0 }
 0x113   : > { %877 = vst.msk [vmem:[%s1918_s18 + $0x4c] sm:$0xf] %vm857_vm4, %v1612_v4  ;;  %v587_v11 = vadd.f32 %v1908_v24, %v586_v10  ;;  %v1725_v12 = vpop.f32.mrb[22].mxu0  ;;  %v2031_v10 = vld [vmem:[%s2142_s4] ss:$0 sm:$0xff] }
 0x114   : > { %875 = vst.msk [vmem:[%s1918_s18 + $0x44] sm:$0xf] %vm857_vm4, %v1610_v8  ;;  %vm655_vm10 = vcmp.ge.f32.partialorder %v595_v9, 0.0  ;;  %v687_v13 = vmul.f32 0.1, %v595_v9  ;;  %v598_v14 = vadd.f32 %v1725_v12, %v1908_v24  ;;  %v589_v15 = vpop.f32.mrb[23].mxu0  ;;  %1752 = vmatprep.mubr.msk.bf16.mxu1 %vm905_vm7, %v737_v7 }
 0x115   : > { %vm653_vm11 = vcmp.ge.f32.partialorder %v587_v11, 0.0  ;;  %v685_v16 = vmul.f32 0.1, %v587_v11  ;;  %v590_v17 = vadd.f32 %v1908_v24, %v589_v15  ;;  %1753 = vmatmul.mubr.msk.bf16.gmra.mrb[16].mxu1 %vm905_vm7, %v738_v3 }
 0x116   : > { %v719_v18 = vsel %vm655_vm10, %v595_v9, %v687_v13  ;;  %vm656_vm12 = vcmp.ge.f32.partialorder %v598_v14, 0.0  ;;  %v688_v19 = vmul.f32 0.1, %v598_v14 }
 0x117   : > { %v1615_v20 = vpack.c.bf16 %v719_v18, %v719_v18  ;;  %v717_v21 = vsel %vm653_vm11, %v587_v11, %v685_v16  ;;  %vm654_vm13 = vcmp.ge.f32.partialorder %v590_v17, 0.0  ;;  %v686_v22 = vmul.f32 0.1, %v590_v17 }
 0x118   : > { %v1613_v23 = vpack.c.bf16 %v717_v21, %v717_v21  ;;  %v720_v25 = vsel %vm656_vm12, %v598_v14, %v688_v19 }
 0x119   : > { %880 = vst.msk [vmem:[%s1918_s18 + $0x58] sm:$0xf] %vm857_vm4, %v1615_v20  ;;  %v740_v26 = vpack.c.bf16 %v720_v25, %v719_v18  ;;  %v1616_v27 = vpack.c.bf16 %v720_v25, %v720_v25  ;;  %v718_v28 = vsel %vm654_vm13, %v590_v17, %v686_v22  ;;  %v1728_v29 = vpop.f32.mrb[24].mxu0 }
 0x11a   : > { %878 = vst.msk [vmem:[%s1918_s18 + $0x50] sm:$0xf] %vm857_vm4, %v1613_v23  ;;  %v739_v30 = vpack.c.bf16 %v718_v28, %v717_v21  ;;  %v1614_v31 = vpack.c.bf16 %v718_v28, %v718_v28  ;;  %v611_v32 = vadd.f32 %v1728_v29, %v1908_v24  ;;  %v602_v33 = vpop.f32.mrb[25].mxu0 }
 0x11b   : > { %881 = vst.msk [vmem:[%s1918_s18 + $0x5c] sm:$0xf] %vm857_vm4, %v1616_v27  ;;  %v603_v34 = vadd.f32 %v1908_v24, %v602_v33  ;;  %v1729_v35 = vpop.f32.mrb[26].mxu0 }
 0x11c   : > { %879 = vst.msk [vmem:[%s1918_s18 + $0x54] sm:$0xf] %vm857_vm4, %v1614_v31  ;;  %vm659_vm14 = vcmp.ge.f32.partialorder %v611_v32, 0.0  ;;  %v691_v36 = vmul.f32 0.1, %v611_v32  ;;  %v614_v37 = vadd.f32 %v1729_v35, %v1908_v24  ;;  %v605_v38 = vpop.f32.mrb[27].mxu0  ;;  %1756 = vmatprep.mubr.msk.bf16.mxu1 %vm905_vm7, %v739_v30 }
 0x11d   : > { %vm657_vm15 = vcmp.ge.f32.partialorder %v603_v34, 0.0  ;;  %v689_v39 = vmul.f32 0.1, %v603_v34  ;;  %v606_v40 = vadd.f32 %v1908_v24, %v605_v38  ;;  %1757 = vmatmul.mubr.msk.bf16.gmra.mrb[20].mxu1 %vm905_vm7, %v740_v26 }
 0x11e   : > { %v723_v41 = vsel %vm659_vm14, %v611_v32, %v691_v36  ;;  %vm660_vm0 = vcmp.ge.f32.partialorder %v614_v37, 0.0  ;;  %v692_v42 = vmul.f32 0.1, %v614_v37 }
 0x11f   : > { %v1619_v43 = vpack.c.bf16 %v723_v41, %v723_v41  ;;  %v721_v44 = vsel %vm657_vm15, %v603_v34, %v689_v39  ;;  %vm658_vm1 = vcmp.ge.f32.partialorder %v606_v40, 0.0  ;;  %v690_v45 = vmul.f32 0.1, %v606_v40 }
 0x120   : > { %v1617_v46 = vpack.c.bf16 %v721_v44, %v721_v44  ;;  %v724_v47 = vsel %vm660_vm0, %v614_v37, %v692_v42 }
 0x121   : > { %884 = vst.msk [vmem:[%s1918_s18 + $0x68] sm:$0xf] %vm857_vm4, %v1619_v43  ;;  %v742_v48 = vpack.c.bf16 %v724_v47, %v723_v41  ;;  %v1620_v49 = vpack.c.bf16 %v724_v47, %v724_v47  ;;  %v722_v50 = vsel %vm658_vm1, %v606_v40, %v690_v45  ;;  %v1732_v51 = vpop.f32.mrb[28].mxu0 }
 0x122   : > { %882 = vst.msk [vmem:[%s1918_s18 + $0x60] sm:$0xf] %vm857_vm4, %v1617_v46  ;;  %v741_v52 = vpack.c.bf16 %v722_v50, %v721_v44  ;;  %v1618_v53 = vpack.c.bf16 %v722_v50, %v722_v50  ;;  %v627_v54 = vadd.f32 %v1732_v51, %v1908_v24  ;;  %v618_v55 = vpop.f32.mrb[29].mxu0 }
 0x123   : > { %885 = vst.msk [vmem:[%s1918_s18 + $0x6c] sm:$0xf] %vm857_vm4, %v1620_v49  ;;  %v619_v56 = vadd.f32 %v1908_v24, %v618_v55  ;;  %v1733_v57 = vpop.f32.mrb[30].mxu0 }
 0x124   : > { %883 = vst.msk [vmem:[%s1918_s18 + $0x64] sm:$0xf] %vm857_vm4, %v1618_v53  ;;  %vm663_vm2 = vcmp.ge.f32.partialorder %v627_v54, 0.0  ;;  %v695_v58 = vmul.f32 0.1, %v627_v54  ;;  %v630_v59 = vadd.f32 %v1733_v57, %v1908_v24  ;;  %v621_v60 = vpop.f32.mrb[31].mxu0  ;;  %1760 = vmatprep.mubr.msk.bf16.mxu1 %vm905_vm7, %v741_v52 }
 0x125   : > { %vm661_vm3 = vcmp.ge.f32.partialorder %v619_v56, 0.0  ;;  %v693_v61 = vmul.f32 0.1, %v619_v56  ;;  %v622_v62 = vadd.f32 %v1908_v24, %v621_v60  ;;  %1761 = vmatmul.mubr.msk.bf16.gmra.mrb[24].mxu1 %vm905_vm7, %v742_v48 }
 0x126   : > { %v727_v63 = vsel %vm663_vm2, %v627_v54, %v695_v58  ;;  %vm664_vm5 = vcmp.ge.f32.partialorder %v630_v59, 0.0  ;;  %v696_v0 = vmul.f32 0.1, %v630_v59 }
 0x127   : > { %v1623_v1 = vpack.c.bf16 %v727_v63, %v727_v63  ;;  %v725_v2 = vsel %vm661_vm3, %v619_v56, %v693_v61  ;;  %vm662_vm6 = vcmp.ge.f32.partialorder %v622_v62, 0.0  ;;  %v694_v3 = vmul.f32 0.1, %v622_v62 }
 0x128   : > { %v1621_v4 = vpack.c.bf16 %v725_v2, %v725_v2  ;;  %v728_v5 = vsel %vm664_vm5, %v630_v59, %v696_v0 }
 0x129   : > { %888 = vst.msk [vmem:[%s1918_s18 + $0x78] sm:$0xf] %vm857_vm4, %v1623_v1  ;;  %v744_v6 = vpack.c.bf16 %v728_v5, %v727_v63  ;;  %v1624_v7 = vpack.c.bf16 %v728_v5, %v728_v5  ;;  %v726_v8 = vsel %vm662_vm6, %v622_v62, %v694_v3 }
 0x12a   : > { %886 = vst.msk [vmem:[%s1918_s18 + $0x70] sm:$0xf] %vm857_vm4, %v1621_v4  ;;  %v743_v24 = vpack.c.bf16 %v726_v8, %v725_v2  ;;  %v1622_v9 = vpack.c.bf16 %v726_v8, %v726_v8 }
 0x12b   : > { %889 = vst.msk [vmem:[%s1918_s18 + $0x7c] sm:$0xf] %vm857_vm4, %v1624_v7 }
 0x12c   : > { %887 = vst.msk [vmem:[%s1918_s18 + $0x74] sm:$0xf] %vm857_vm4, %v1622_v9  ;;  %1764 = vmatprep.mubr.msk.bf16.mxu1 %vm905_vm7, %v743_v24 }
 0x12d   : > { %1765 = vmatmul.mubr.msk.bf16.gmra.mrb[28].mxu1 %vm905_vm7, %v744_v6 }
 0x1c8   : > { %v1738_v11 = vpop.f32.mrb[0].mxu1 }
 0x1c9   : > { %v997_v12 = vadd.f32 %v1738_v11, %v2031_v10  ;;  %v988_v13 = vpop.f32.mrb[1].mxu1 }
 0x1ca   : > { %v989_v14 = vadd.f32 %v2031_v10, %v988_v13  ;;  %v1739_v15 = vpop.f32.mrb[2].mxu1 }
 0x1cb   : > { %vm1117_vm8 = vcmp.ge.f32.partialorder %v997_v12, 0.0  ;;  %v1149_v16 = vmul.f32 0.01, %v997_v12  ;;  %v1000_v17 = vadd.f32 %v1739_v15, %v2031_v10  ;;  %v991_v18 = vpop.f32.mrb[3].mxu1 }
 0x1cc   : > { %vm1115_vm9 = vcmp.ge.f32.partialorder %v989_v14, 0.0  ;;  %v1147_v19 = vmul.f32 0.01, %v989_v14  ;;  %v992_v20 = vadd.f32 %v2031_v10, %v991_v18 }
 0x1cd   : > { %v1181_v21 = vsel %vm1117_vm8, %v997_v12, %v1149_v16  ;;  %vm1118_vm7 = vcmp.ge.f32.partialorder %v1000_v17, 0.0  ;;  %v1150_v22 = vmul.f32 0.01, %v1000_v17 }
 0x1ce   : > { %v1627_v23 = vpack.c.bf16 %v1181_v21, %v1181_v21  ;;  %v1179_v25 = vsel %vm1115_vm9, %v989_v14, %v1147_v19  ;;  %vm1116_vm10 = vcmp.ge.f32.partialorder %v992_v20, 0.0  ;;  %v1148_v26 = vmul.f32 0.01, %v992_v20 }
 0x1cf   : > { %v1625_v27 = vpack.c.bf16 %v1179_v25, %v1179_v25  ;;  %v1182_v28 = vsel %vm1118_vm7, %v1000_v17, %v1150_v22 }
 0x1d0   : > { %1341 = vst.msk [vmem:[%s2041_s24 + $0x8] sm:$0xf] %vm857_vm4, %v1627_v23  ;;  %v1628_v29 = vpack.c.bf16 %v1182_v28, %v1182_v28  ;;  %v1180_v30 = vsel %vm1116_vm10, %v992_v20, %v1148_v26  ;;  %v1742_v31 = vpop.f32.mrb[4].mxu1 }
 0x1d1   : > { %1339 = vst.msk [vmem:[%s2041_s24] sm:$0xf] %vm857_vm4, %v1625_v27  ;;  %v1626_v32 = vpack.c.bf16 %v1180_v30, %v1180_v30  ;;  %v1013_v33 = vadd.f32 %v1742_v31, %v2031_v10  ;;  %v1004_v34 = vpop.f32.mrb[5].mxu1 }
 0x1d2   : > { %1342 = vst.msk [vmem:[%s2041_s24 + $0xc] sm:$0xf] %vm857_vm4, %v1628_v29  ;;  %v1005_v35 = vadd.f32 %v2031_v10, %v1004_v34  ;;  %v1743_v36 = vpop.f32.mrb[6].mxu1 }
 0x1d3   : > { %1340 = vst.msk [vmem:[%s2041_s24 + $0x4] sm:$0xf] %vm857_vm4, %v1626_v32  ;;  %vm1121_vm11 = vcmp.ge.f32.partialorder %v1013_v33, 0.0  ;;  %v1153_v37 = vmul.f32 0.01, %v1013_v33  ;;  %v1016_v38 = vadd.f32 %v1743_v36, %v2031_v10  ;;  %v1007_v39 = vpop.f32.mrb[7].mxu1 }
 0x1d4   : > { %vm1119_vm12 = vcmp.ge.f32.partialorder %v1005_v35, 0.0  ;;  %v1151_v40 = vmul.f32 0.01, %v1005_v35  ;;  %v1008_v41 = vadd.f32 %v2031_v10, %v1007_v39 }
 0x1d5   : > { %v1185_v42 = vsel %vm1121_vm11, %v1013_v33, %v1153_v37  ;;  %vm1122_vm13 = vcmp.ge.f32.partialorder %v1016_v38, 0.0  ;;  %v1154_v43 = vmul.f32 0.01, %v1016_v38 }
 0x1d6   : > { %v1631_v44 = vpack.c.bf16 %v1185_v42, %v1185_v42  ;;  %v1183_v45 = vsel %vm1119_vm12, %v1005_v35, %v1151_v40  ;;  %vm1120_vm14 = vcmp.ge.f32.partialorder %v1008_v41, 0.0  ;;  %v1152_v46 = vmul.f32 0.01, %v1008_v41 }
 0x1d7   : > { %v1629_v47 = vpack.c.bf16 %v1183_v45, %v1183_v45  ;;  %v1186_v48 = vsel %vm1122_vm13, %v1016_v38, %v1154_v43 }
 0x1d8   : > { %1345 = vst.msk [vmem:[%s2041_s24 + $0x18] sm:$0xf] %vm857_vm4, %v1631_v44  ;;  %v1632_v49 = vpack.c.bf16 %v1186_v48, %v1186_v48  ;;  %v1184_v50 = vsel %vm1120_vm14, %v1008_v41, %v1152_v46  ;;  %v1746_v51 = vpop.f32.mrb[8].mxu1 }
 0x1d9   : > { %1343 = vst.msk [vmem:[%s2041_s24 + $0x10] sm:$0xf] %vm857_vm4, %v1629_v47  ;;  %v1630_v52 = vpack.c.bf16 %v1184_v50, %v1184_v50  ;;  %v1029_v53 = vadd.f32 %v1746_v51, %v2031_v10  ;;  %v1020_v54 = vpop.f32.mrb[9].mxu1 }
 0x1da   : > { %1346 = vst.msk [vmem:[%s2041_s24 + $0x1c] sm:$0xf] %vm857_vm4, %v1632_v49  ;;  %v1021_v55 = vadd.f32 %v2031_v10, %v1020_v54  ;;  %v1747_v56 = vpop.f32.mrb[10].mxu1 }
 0x1db   : > { %1344 = vst.msk [vmem:[%s2041_s24 + $0x14] sm:$0xf] %vm857_vm4, %v1630_v52  ;;  %vm1125_vm15 = vcmp.ge.f32.partialorder %v1029_v53, 0.0  ;;  %v1157_v57 = vmul.f32 0.01, %v1029_v53  ;;  %v1032_v58 = vadd.f32 %v1747_v56, %v2031_v10  ;;  %v1023_v59 = vpop.f32.mrb[11].mxu1 }
 0x1dc   : > { %vm1123_vm0 = vcmp.ge.f32.partialorder %v1021_v55, 0.0  ;;  %v1155_v60 = vmul.f32 0.01, %v1021_v55  ;;  %v1024_v61 = vadd.f32 %v2031_v10, %v1023_v59 }
 0x1dd   : > { %v1189_v62 = vsel %vm1125_vm15, %v1029_v53, %v1157_v57  ;;  %vm1126_vm1 = vcmp.ge.f32.partialorder %v1032_v58, 0.0  ;;  %v1158_v63 = vmul.f32 0.01, %v1032_v58 }
 0x1de   : > { %v1635_v0 = vpack.c.bf16 %v1189_v62, %v1189_v62  ;;  %v1187_v1 = vsel %vm1123_vm0, %v1021_v55, %v1155_v60  ;;  %vm1124_vm2 = vcmp.ge.f32.partialorder %v1024_v61, 0.0  ;;  %v1156_v2 = vmul.f32 0.01, %v1024_v61 }
 0x1df   : > { %v1633_v3 = vpack.c.bf16 %v1187_v1, %v1187_v1  ;;  %v1190_v4 = vsel %vm1126_vm1, %v1032_v58, %v1158_v63 }
 0x1e0   : > { %1349 = vst.msk [vmem:[%s2041_s24 + $0x28] sm:$0xf] %vm857_vm4, %v1635_v0  ;;  %v1636_v5 = vpack.c.bf16 %v1190_v4, %v1190_v4  ;;  %v1188_v6 = vsel %vm1124_vm2, %v1024_v61, %v1156_v2  ;;  %v1750_v7 = vpop.f32.mrb[12].mxu1 }
 0x1e1   : > { %1347 = vst.msk [vmem:[%s2041_s24 + $0x20] sm:$0xf] %vm857_vm4, %v1633_v3  ;;  %v1634_v8 = vpack.c.bf16 %v1188_v6, %v1188_v6  ;;  %v1045_v24 = vadd.f32 %v1750_v7, %v2031_v10  ;;  %v1036_v9 = vpop.f32.mrb[13].mxu1 }
 0x1e2   : > { %1350 = vst.msk [vmem:[%s2041_s24 + $0x2c] sm:$0xf] %vm857_vm4, %v1636_v5  ;;  %v1037_v11 = vadd.f32 %v2031_v10, %v1036_v9  ;;  %v1751_v12 = vpop.f32.mrb[14].mxu1 }
 0x1e3   : > { %1348 = vst.msk [vmem:[%s2041_s24 + $0x24] sm:$0xf] %vm857_vm4, %v1634_v8  ;;  %vm1129_vm3 = vcmp.ge.f32.partialorder %v1045_v24, 0.0  ;;  %v1161_v13 = vmul.f32 0.01, %v1045_v24  ;;  %v1048_v14 = vadd.f32 %v1751_v12, %v2031_v10  ;;  %v1039_v15 = vpop.f32.mrb[15].mxu1 }
 0x1e4   : > { %vm1127_vm5 = vcmp.ge.f32.partialorder %v1037_v11, 0.0  ;;  %v1159_v16 = vmul.f32 0.01, %v1037_v11  ;;  %v1040_v17 = vadd.f32 %v2031_v10, %v1039_v15 }
 0x1e5   : > { %v1193_v18 = vsel %vm1129_vm3, %v1045_v24, %v1161_v13  ;;  %vm1130_vm6 = vcmp.ge.f32.partialorder %v1048_v14, 0.0  ;;  %v1162_v19 = vmul.f32 0.01, %v1048_v14 }
 0x1e6   : > { %v1639_v20 = vpack.c.bf16 %v1193_v18, %v1193_v18  ;;  %v1191_v21 = vsel %vm1127_vm5, %v1037_v11, %v1159_v16  ;;  %vm1128_vm8 = vcmp.ge.f32.partialorder %v1040_v17, 0.0  ;;  %v1160_v22 = vmul.f32 0.01, %v1040_v17 }
 0x1e7   : > { %v1637_v23 = vpack.c.bf16 %v1191_v21, %v1191_v21  ;;  %v1194_v25 = vsel %vm1130_vm6, %v1048_v14, %v1162_v19 }
 0x1e8   : > { %1353 = vst.msk [vmem:[%s2041_s24 + $0x38] sm:$0xf] %vm857_vm4, %v1639_v20  ;;  %v1640_v26 = vpack.c.bf16 %v1194_v25, %v1194_v25  ;;  %v1192_v27 = vsel %vm1128_vm8, %v1040_v17, %v1160_v22  ;;  %v1754_v28 = vpop.f32.mrb[16].mxu1 }
 0x1e9   : > { %1351 = vst.msk [vmem:[%s2041_s24 + $0x30] sm:$0xf] %vm857_vm4, %v1637_v23  ;;  %v1638_v29 = vpack.c.bf16 %v1192_v27, %v1192_v27  ;;  %v1061_v30 = vadd.f32 %v1754_v28, %v2031_v10  ;;  %v1052_v31 = vpop.f32.mrb[17].mxu1 }
 0x1ea   : > { %1354 = vst.msk [vmem:[%s2041_s24 + $0x3c] sm:$0xf] %vm857_vm4, %v1640_v26  ;;  %v1053_v32 = vadd.f32 %v2031_v10, %v1052_v31  ;;  %v1755_v33 = vpop.f32.mrb[18].mxu1 }
 0x1eb   : > { %1352 = vst.msk [vmem:[%s2041_s24 + $0x34] sm:$0xf] %vm857_vm4, %v1638_v29  ;;  %vm1133_vm9 = vcmp.ge.f32.partialorder %v1061_v30, 0.0  ;;  %v1165_v34 = vmul.f32 0.01, %v1061_v30  ;;  %v1064_v35 = vadd.f32 %v1755_v33, %v2031_v10  ;;  %v1055_v36 = vpop.f32.mrb[19].mxu1 }
 0x1ec   : > { %vm1131_vm7 = vcmp.ge.f32.partialorder %v1053_v32, 0.0  ;;  %v1163_v37 = vmul.f32 0.01, %v1053_v32  ;;  %v1056_v38 = vadd.f32 %v2031_v10, %v1055_v36 }
 0x1ed   : > { %v1197_v39 = vsel %vm1133_vm9, %v1061_v30, %v1165_v34  ;;  %vm1134_vm10 = vcmp.ge.f32.partialorder %v1064_v35, 0.0  ;;  %v1166_v40 = vmul.f32 0.01, %v1064_v35 }
 0x1ee   : > { %v1643_v41 = vpack.c.bf16 %v1197_v39, %v1197_v39  ;;  %v1195_v42 = vsel %vm1131_vm7, %v1053_v32, %v1163_v37  ;;  %vm1132_vm11 = vcmp.ge.f32.partialorder %v1056_v38, 0.0  ;;  %v1164_v43 = vmul.f32 0.01, %v1056_v38 }
 0x1ef   : > { %v1641_v44 = vpack.c.bf16 %v1195_v42, %v1195_v42  ;;  %v1198_v45 = vsel %vm1134_vm10, %v1064_v35, %v1166_v40 }
 0x1f0   : > { %1357 = vst.msk [vmem:[%s2041_s24 + $0x48] sm:$0xf] %vm857_vm4, %v1643_v41  ;;  %v1644_v46 = vpack.c.bf16 %v1198_v45, %v1198_v45  ;;  %v1196_v47 = vsel %vm1132_vm11, %v1056_v38, %v1164_v43  ;;  %v1758_v48 = vpop.f32.mrb[20].mxu1 }
 0x1f1   : > { %1355 = vst.msk [vmem:[%s2041_s24 + $0x40] sm:$0xf] %vm857_vm4, %v1641_v44  ;;  %v1642_v49 = vpack.c.bf16 %v1196_v47, %v1196_v47  ;;  %v1077_v50 = vadd.f32 %v1758_v48, %v2031_v10  ;;  %v1068_v51 = vpop.f32.mrb[21].mxu1 }
 0x1f2   : > { %1358 = vst.msk [vmem:[%s2041_s24 + $0x4c] sm:$0xf] %vm857_vm4, %v1644_v46  ;;  %v1069_v52 = vadd.f32 %v2031_v10, %v1068_v51  ;;  %v1759_v53 = vpop.f32.mrb[22].mxu1 }
 0x1f3   : > { %1356 = vst.msk [vmem:[%s2041_s24 + $0x44] sm:$0xf] %vm857_vm4, %v1642_v49  ;;  %vm1137_vm12 = vcmp.ge.f32.partialorder %v1077_v50, 0.0  ;;  %v1169_v54 = vmul.f32 0.01, %v1077_v50  ;;  %v1080_v55 = vadd.f32 %v1759_v53, %v2031_v10  ;;  %v1071_v56 = vpop.f32.mrb[23].mxu1 }
 0x1f4   : > { %vm1135_vm13 = vcmp.ge.f32.partialorder %v1069_v52, 0.0  ;;  %v1167_v57 = vmul.f32 0.01, %v1069_v52  ;;  %v1072_v58 = vadd.f32 %v2031_v10, %v1071_v56 }
 0x1f5   : > { %v1201_v59 = vsel %vm1137_vm12, %v1077_v50, %v1169_v54  ;;  %vm1138_vm14 = vcmp.ge.f32.partialorder %v1080_v55, 0.0  ;;  %v1170_v60 = vmul.f32 0.01, %v1080_v55 }
 0x1f6   : > { %v1647_v61 = vpack.c.bf16 %v1201_v59, %v1201_v59  ;;  %v1199_v62 = vsel %vm1135_vm13, %v1069_v52, %v1167_v57  ;;  %vm1136_vm15 = vcmp.ge.f32.partialorder %v1072_v58, 0.0  ;;  %v1168_v63 = vmul.f32 0.01, %v1072_v58 }
 0x1f7   : > { %v1645_v0 = vpack.c.bf16 %v1199_v62, %v1199_v62  ;;  %v1202_v1 = vsel %vm1138_vm14, %v1080_v55, %v1170_v60 }
 0x1f8   : > { %1361 = vst.msk [vmem:[%s2041_s24 + $0x58] sm:$0xf] %vm857_vm4, %v1647_v61  ;;  %v1648_v2 = vpack.c.bf16 %v1202_v1, %v1202_v1  ;;  %v1200_v3 = vsel %vm1136_vm15, %v1072_v58, %v1168_v63  ;;  %v1762_v4 = vpop.f32.mrb[24].mxu1 }
 0x1f9   : > { %1359 = vst.msk [vmem:[%s2041_s24 + $0x50] sm:$0xf] %vm857_vm4, %v1645_v0  ;;  %v1646_v5 = vpack.c.bf16 %v1200_v3, %v1200_v3  ;;  %v1093_v6 = vadd.f32 %v1762_v4, %v2031_v10  ;;  %v1084_v7 = vpop.f32.mrb[25].mxu1 }
 0x1fa   : > { %1362 = vst.msk [vmem:[%s2041_s24 + $0x5c] sm:$0xf] %vm857_vm4, %v1648_v2  ;;  %v1085_v8 = vadd.f32 %v2031_v10, %v1084_v7  ;;  %v1763_v24 = vpop.f32.mrb[26].mxu1 }
 0x1fb   : > { %1360 = vst.msk [vmem:[%s2041_s24 + $0x54] sm:$0xf] %vm857_vm4, %v1646_v5  ;;  %vm1141_vm0 = vcmp.ge.f32.partialorder %v1093_v6, 0.0  ;;  %v1173_v9 = vmul.f32 0.01, %v1093_v6  ;;  %v1096_v11 = vadd.f32 %v1763_v24, %v2031_v10  ;;  %v1087_v12 = vpop.f32.mrb[27].mxu1 }
 0x1fc   : > { %vm1139_vm1 = vcmp.ge.f32.partialorder %v1085_v8, 0.0  ;;  %v1171_v13 = vmul.f32 0.01, %v1085_v8  ;;  %v1088_v14 = vadd.f32 %v2031_v10, %v1087_v12 }
 0x1fd   : > { %v1205_v15 = vsel %vm1141_vm0, %v1093_v6, %v1173_v9  ;;  %vm1142_vm2 = vcmp.ge.f32.partialorder %v1096_v11, 0.0  ;;  %v1174_v16 = vmul.f32 0.01, %v1096_v11 }
 0x1fe   : > { %v1651_v17 = vpack.c.bf16 %v1205_v15, %v1205_v15  ;;  %v1203_v18 = vsel %vm1139_vm1, %v1085_v8, %v1171_v13  ;;  %vm1140_vm3 = vcmp.ge.f32.partialorder %v1088_v14, 0.0  ;;  %v1172_v19 = vmul.f32 0.01, %v1088_v14 }
 0x1ff   : > { %v1649_v20 = vpack.c.bf16 %v1203_v18, %v1203_v18  ;;  %v1206_v21 = vsel %vm1142_vm2, %v1096_v11, %v1174_v16 }
 0x200   : > { %1365 = vst.msk [vmem:[%s2041_s24 + $0x68] sm:$0xf] %vm857_vm4, %v1651_v17  ;;  %v1652_v22 = vpack.c.bf16 %v1206_v21, %v1206_v21  ;;  %v1204_v23 = vsel %vm1140_vm3, %v1088_v14, %v1172_v19  ;;  %v1766_v25 = vpop.f32.mrb[28].mxu1 }
 0x201   : > { %1363 = vst.msk [vmem:[%s2041_s24 + $0x60] sm:$0xf] %vm857_vm4, %v1649_v20  ;;  %v1650_v26 = vpack.c.bf16 %v1204_v23, %v1204_v23  ;;  %v1109_v27 = vadd.f32 %v1766_v25, %v2031_v10  ;;  %v1100_v28 = vpop.f32.mrb[29].mxu1 }
 0x202   : > { %1366 = vst.msk [vmem:[%s2041_s24 + $0x6c] sm:$0xf] %vm857_vm4, %v1652_v22  ;;  %v1101_v29 = vadd.f32 %v2031_v10, %v1100_v28  ;;  %v1767_v30 = vpop.f32.mrb[30].mxu1 }
 0x203   : > { %1364 = vst.msk [vmem:[%s2041_s24 + $0x64] sm:$0xf] %vm857_vm4, %v1650_v26  ;;  %vm1145_vm5 = vcmp.ge.f32.partialorder %v1109_v27, 0.0  ;;  %v1177_v31 = vmul.f32 0.01, %v1109_v27  ;;  %v1112_v32 = vadd.f32 %v1767_v30, %v2031_v10  ;;  %v1103_v33 = vpop.f32.mrb[31].mxu1 }
 0x204   : > { %vm1143_vm6 = vcmp.ge.f32.partialorder %v1101_v29, 0.0  ;;  %v1175_v34 = vmul.f32 0.01, %v1101_v29  ;;  %v1104_v35 = vadd.f32 %v2031_v10, %v1103_v33 }
 0x205   : > { %v1209_v36 = vsel %vm1145_vm5, %v1109_v27, %v1177_v31  ;;  %vm1146_vm8 = vcmp.ge.f32.partialorder %v1112_v32, 0.0  ;;  %v1178_v37 = vmul.f32 0.01, %v1112_v32 }
 0x206   : > { %v1655_v38 = vpack.c.bf16 %v1209_v36, %v1209_v36  ;;  %v1207_v39 = vsel %vm1143_vm6, %v1101_v29, %v1175_v34  ;;  %vm1144_vm9 = vcmp.ge.f32.partialorder %v1104_v35, 0.0  ;;  %v1176_v40 = vmul.f32 0.01, %v1104_v35 }
 0x207   : > { %v1653_v41 = vpack.c.bf16 %v1207_v39, %v1207_v39  ;;  %v1210_v42 = vsel %vm1146_vm8, %v1112_v32, %v1178_v37 }
 0x208   : > { %1369 = vst.msk [vmem:[%s2041_s24 + $0x78] sm:$0xf] %vm857_vm4, %v1655_v38  ;;  %v1656_v43 = vpack.c.bf16 %v1210_v42, %v1210_v42  ;;  %v1208_v44 = vsel %vm1144_vm9, %v1104_v35, %v1176_v40 }
 0x209   : > { %1367 = vst.msk [vmem:[%s2041_s24 + $0x70] sm:$0xf] %vm857_vm4, %v1653_v41  ;;  %v1654_v45 = vpack.c.bf16 %v1208_v44, %v1208_v44 }
 0x20a   : > { %1370 = vst.msk [vmem:[%s2041_s24 + $0x7c] sm:$0xf] %vm857_vm4, %v1656_v43 }
 0x20b   : > { %1368 = vst.msk [vmem:[%s2041_s24 + $0x74] sm:$0xf] %vm857_vm4, %v1654_v45 }
 0x20c PF: > { %s17_s21 = sadd.s32 1, %s1804_s21  }
 0x20d   : > { %p14_p4 = scmp.ge.s32.totalorder %s17_s21, 4  }
 0x20f   :  { %16 = sbr.rel (!%p14_p4) target bundleno = 1 (0x1), region = 82 }

// kernel: resnet_forward.14
= control target key start
LH: loop header
LB: loop body
LE: loop exit
PB: predicated region body
PF: predicated region fallthrough
CT: control target
= control target key end

     0   :  { %s3085_s13 = smov 0   ;;  %s3525_s0 = inlined_call_operand.vmem [shape: bf16[512,144], index: 0, kind: input, shape index: {}]   ;;  %s3526_s1 = inlined_call_operand.vmem [shape: bf16[512,16], index: 1, kind: input, shape index: {}]   ;;  %s3527_s2 = inlined_call_operand.vmem [shape: bf16[144,16], index: 2, kind: input, shape index: {}]   ;;  %s3528_s3 = inlined_call_operand.vmem [shape: f32[1,16], index: 3, kind: input, shape index: {}]   ;;  %s3529_s4 = inlined_call_operand.vmem [shape: bf16[16,64], index: 4, kind: input, shape index: {}]   ;;  %s3530_s5 = inlined_call_operand.vmem [shape: f32[1,64], index: 5, kind: input, shape index: {}]   ;;  %s3531_s6 = inlined_call_operand.vmem [shape: bf16[16,64], index: 6, kind: input, shape index: {}]   ;;  %s3532_s7 = inlined_call_operand.vmem [shape: bf16[64,16], index: 7, kind: input, shape index: {}]   ;;  %s3533_s8 = inlined_call_operand.vmem [shape: f32[1,16], index: 8, kind: input, shape index: {}]   ;;  %s3534_s9 = inlined_call_operand.vmem [shape: bf16[512,64], index: 9, kind: output, shape index: {0}]   ;;  %s3535_s10 = inlined_call_operand.vmem [shape: bf16[512,16], index: 10, kind: output, shape index: {1}]  }
   0x1 LB: > { %s2430_s14 = sadd.s32 4294967295, %s3027_s13   ;;  %p2434_p0 = scmp.ge.s32.totalorder %s3027_s13, 1  ;;  %s3027_s13 = sphi %s3085_s13, %s21_s13  }
   0x2   : > { %p328_p1 = scmp.lt.s32.totalorder %s3027_s13, 3 }
   0x4   : > { %p329_p2 = pnand %p2434_p0, %p328_p1 }
   0x5   : > { %v2942_v0 = vld [vmem:[%s3527_s2] sm:$0xff] (!%p329_p2)   ;;  %v3029_v1 = vmov (!%p329_p2), 0   ;;  %s2435_s17 = sshll.u32 (!%p329_p2), %s2430_s14, 5  ;;  %v2943_v2 = vld [vmem:[%s3527_s2 + $0x8] sm:$0xff] (!%p329_p2)   ;;  %v2944_v3 = vld [vmem:[%s3527_s2 + $0x10] sm:$0xff] (!%p329_p2)   ;;  %vm658_vm0 = vcmask (!%p329_p2), 130048  }
   0x6   : > { %332 = sbr.rel (%p329_p2) target bundleno = 893 (0x37d), region = 56  ;;  %707 = vmatprep.subr.bf16.mxu0 (!%p329_p2), %v3029_v1  ;;  %p378_p3 = scmp.lt.s32.totalorder (!%p329_p2), %s2435_s17, 63  ;;  %v2945_v4 = vld [vmem:[%s3527_s2 + $0x18] sm:$0xff] (!%p329_p2)   ;;  %v2946_v6 = vld [vmem:[%s3527_s2 + $0x20] sm:$0xff] (!%p329_p2)   ;;  %v2947_v7 = vld [vmem:[%s3527_s2 + $0x28] sm:$0xff] (!%p329_p2)  }
   0x7   : > { %708 = vmatpush1.bf16.msra.mxu0 (!%p329_p2), %v2942_v0  ;;  %v2948_v8 = vld [vmem:[%s3527_s2 + $0x30] sm:$0xff] (!%p329_p2)   ;;  %v2949_v9 = vld [vmem:[%s3527_s2 + $0x38] sm:$0xff] (!%p329_p2)   ;;  %v2950_v10 = vld [vmem:[%s3527_s2 + $0x40] sm:$0xff] (!%p329_p2)  }
   0x8   : > { %709 = vmatprep.subr.bf16.mxu0 (!%p329_p2), %v3029_v1  ;;  %v2999_v35 = vld [vmem:[%s3529_s4] sm:$0xff] (!%p329_p2)  }
   0x9   : > { %2867 = vmatprep.subr.bf16.mxu1 (!%p329_p2), %v2999_v35  ;;  %v3182_v43 = vld [vmem:[%s3531_s6] sm:$0xff] (!%p329_p2)  }
   0xa   : > { %2868 = vmatpush3.bf16.msra.mxu1 (!%p329_p2), %v2999_v35  ;;  %v3188_v44 = vld [vmem:[%s3528_s3] ss:$0 sm:$0xff] (!%p329_p2) }
   0xb   : > { %710 = vmatpush1.bf16.msra.mxu0 (!%p329_p2), %v2943_v2  ;;  %2793 = vmatprep.subr.bf16.mxu1 (!%p329_p2), %v3182_v43 }
   0xc   : > { %711 = vmatprep.subr.bf16.mxu0 (!%p329_p2), %v3029_v1 }
   0xd   : > { %s3537_s17 = smov (!%p378_p3, %s2435_s17), 63 }
   0xe   : > { %s2640_s22 = sshll.u32 %s3537_s17, 3  ;;  %s3191_s27 = sshll.u32 %s3537_s17, 2 }
   0xf   : > { %s3108_s25 = scalar_lea.vmem %s3525_s0, %s2640_s22  ;;  %712 = vmatpush1.bf16.msra.mxu0 %v2944_v3  ;;  %s3198_s29 = scalar_lea.vmem %s3526_s1, %s3191_s27 }
  0x10   : > { %v2953_v5 = vld [vmem:[%s3108_s25 + $0x4] ss:$8 sps:$4 sm:$0xff]   ;;  %713 = vmatprep.subr.bf16.mxu0 %v3029_v1  ;;  %v2951_v11 = vld [vmem:[%s3108_s25] ss:$8 sps:$4 sm:$0xff]   ;;  %v2954_v12 = vld [vmem:[%s3108_s25 + $0x14] ss:$8 sps:$4 sm:$0xff]   ;;  %s3305_s23 = scalar_lea.vmem %s3534_s9, %s3191_s27 }
  0x11   : > { %2486 = vmatprep.mubr.msk.bf16.mxu0 %vm658_vm0, %v2953_v5  ;;  %v2956_v13 = vld [vmem:[%s3108_s25 + $0x10] ss:$8 sps:$4 sm:$0xff]   ;;  %v2957_v14 = vld [vmem:[%s3108_s25 + $0x24] ss:$8 sps:$4 sm:$0xff]   ;;  %v2959_v15 = vld [vmem:[%s3108_s25 + $0x20] ss:$8 sps:$4 sm:$0xff]  }
  0x12   : > { %v2960_v16 = vld [vmem:[%s3108_s25 + $0x34] ss:$8 sps:$4 sm:$0xff]   ;;  %v2962_v17 = vld [vmem:[%s3108_s25 + $0x30] ss:$8 sps:$4 sm:$0xff]   ;;  %v2963_v18 = vld [vmem:[%s3108_s25 + $0x44] ss:$8 sps:$4 sm:$0xff]  }
  0x13   : > { %714 = vmatpush1.bf16.msra.mxu0 %v2945_v4  ;;  %v2965_v19 = vld [vmem:[%s3108_s25 + $0x40] ss:$8 sps:$4 sm:$0xff]   ;;  %v2966_v20 = vld [vmem:[%s3108_s25 + $0x54] ss:$8 sps:$4 sm:$0xff]   ;;  %v2968_v21 = vld [vmem:[%s3108_s25 + $0x50] ss:$8 sps:$4 sm:$0xff]  }
  0x14   : > { %715 = vmatprep.subr.bf16.mxu0 %v3029_v1  ;;  %v2969_v22 = vld [vmem:[%s3108_s25 + $0x64] ss:$8 sps:$4 sm:$0xff]   ;;  %v2971_v23 = vld [vmem:[%s3108_s25 + $0x60] ss:$8 sps:$4 sm:$0xff]   ;;  %v2972_v24 = vld [vmem:[%s3108_s25 + $0x74] ss:$8 sps:$4 sm:$0xff]  }
  0x15   : > { %v2974_v25 = vld [vmem:[%s3108_s25 + $0x70] ss:$8 sps:$4 sm:$0xff]   ;;  %v2975_v26 = vld [vmem:[%s3108_s25 + $0x84] ss:$8 sps:$4 sm:$0xff]   ;;  %v2977_v27 = vld [vmem:[%s3108_s25 + $0x80] ss:$8 sps:$4 sm:$0xff]  }
  0x16   : > { %v2978_v28 = vld [vmem:[%s3108_s25 + $0x94] ss:$8 sps:$4 sm:$0xff]   ;;  %v2980_v29 = vld [vmem:[%s3108_s25 + $0x90] ss:$8 sps:$4 sm:$0xff]   ;;  %v2981_v30 = vld [vmem:[%s3108_s25 + $0xa4] ss:$8 sps:$4 sm:$0xff]  }
  0x17   : > { %716 = vmatpush1.bf16.msra.mxu0 %v2946_v6  ;;  %v2983_v31 = vld [vmem:[%s3108_s25 + $0xa0] ss:$8 sps:$4 sm:$0xff]   ;;  %v2984_v32 = vld [vmem:[%s3108_s25 + $0xb4] ss:$8 sps:$4 sm:$0xff]   ;;  %v2986_v33 = vld [vmem:[%s3108_s25 + $0xb0] ss:$8 sps:$4 sm:$0xff]  }
  0x18   : > { %717 = vmatprep.subr.bf16.mxu0 %v3029_v1  ;;  %v2987_v34 = vld [vmem:[%s3108_s25 + $0xc4] ss:$8 sps:$4 sm:$0xff]   ;;  %v2989_v36 = vld [vmem:[%s3108_s25 + $0xc0] ss:$8 sps:$4 sm:$0xff]   ;;  %v2990_v37 = vld [vmem:[%s3108_s25 + $0xd4] ss:$8 sps:$4 sm:$0xff]  }
  0x19   : > { %v2992_v38 = vld [vmem:[%s3108_s25 + $0xd0] ss:$8 sps:$4 sm:$0xff]   ;;  %v2993_v39 = vld [vmem:[%s3108_s25 + $0xe4] ss:$8 sps:$4 sm:$0xff]   ;;  %v2995_v40 = vld [vmem:[%s3108_s25 + $0xe0] ss:$8 sps:$4 sm:$0xff]  }
  0x1a   : > { %v2996_v41 = vld [vmem:[%s3108_s25 + $0xf4] ss:$8 sps:$4 sm:$0xff]   ;;  %v2998_v42 = vld [vmem:[%s3108_s25 + $0xf0] ss:$8 sps:$4 sm:$0xff]  }
  0x1b   : > { %718 = vmatpush1.bf16.msra.mxu0 %v2947_v7 }
  0x1c   : > { %719 = vmatprep.subr.bf16.mxu0 %v3029_v1 }
  0x1f   : > { %720 = vmatpush1.bf16.msra.mxu0 %v2948_v8 }
  0x20   : > { %721 = vmatprep.subr.bf16.mxu0 %v3029_v1 }
  0x23   : > { %722 = vmatpush1.bf16.msra.mxu0 %v2949_v9 }
  0x24   : > { %723 = vmatprep.subr.bf16.mxu0 %v3029_v1 }
  0x27   : > { %724 = vmatpush1.bf16.msra.mxu0 %v2950_v10 }
  0x28   : > { %2759 = vmatprep.subr.bf16.mxu0 %v2999_v35 }
  0x2a   : > { %740 = vmatmul.mubr.bf16.vlgmr.msra.gmra.mrb[0].mxu0 %v2951_v11 }
  0x2b   : > { %2487 = vmatprep.mubr.msk.bf16.mxu0 %vm658_vm0, %v2954_v12  ;;  %2760 = vmatpush3.bf16.msra.mxu0 %v2999_v35 }
  0x32   : > { %748 = vmatmul.mubr.bf16.gmra.mrb[4].mxu0 %v2956_v13 }
  0x33   : > { %2488 = vmatprep.mubr.msk.bf16.mxu0 %vm658_vm0, %v2957_v14 }
  0x3a   : > { %756 = vmatmul.mubr.bf16.gmra.mrb[8].mxu0 %v2959_v15 }
  0x3b   : > { %2489 = vmatprep.mubr.msk.bf16.mxu0 %vm658_vm0, %v2960_v16 }
  0x42   : > { %764 = vmatmul.mubr.bf16.gmra.mrb[12].mxu0 %v2962_v17 }
  0x43   : > { %2490 = vmatprep.mubr.msk.bf16.mxu0 %vm658_vm0, %v2963_v18 }
  0x4a   : > { %772 = vmatmul.mubr.bf16.gmra.mrb[16].mxu0 %v2965_v19 }
  0x4b   : > { %2491 = vmatprep.mubr.msk.bf16.mxu0 %vm658_vm0, %v2966_v20 }
  0x52   : > { %780 = vmatmul.mubr.bf16.gmra.mrb[20].mxu0 %v2968_v21 }
  0x53   : > { %2492 = vmatprep.mubr.msk.bf16.mxu0 %vm658_vm0, %v2969_v22 }
  0x5a   : > { %788 = vmatmul.mubr.bf16.gmra.mrb[24].mxu0 %v2971_v23 }
  0x5b   : > { %2493 = vmatprep.mubr.msk.bf16.mxu0 %vm658_vm0, %v2972_v24 }
  0x62   : > { %796 = vmatmul.mubr.bf16.gmra.mrb[28].mxu0 %v2974_v25 }
  0x63   : > { %2494 = vmatprep.mubr.msk.bf16.mxu0 %vm658_vm0, %v2975_v26 }
  0x6a   : > { %804 = vmatmul.mubr.bf16.gmra.mrb[32].mxu0 %v2977_v27 }
  0x6b   : > { %2495 = vmatprep.mubr.msk.bf16.mxu0 %vm658_vm0, %v2978_v28 }
  0x72   : > { %812 = vmatmul.mubr.bf16.gmra.mrb[36].mxu0 %v2980_v29 }
  0x73   : > { %2496 = vmatprep.mubr.msk.bf16.mxu0 %vm658_vm0, %v2981_v30 }
  0x7a   : > { %820 = vmatmul.mubr.bf16.gmra.mrb[40].mxu0 %v2983_v31 }
  0x7b   : > { %2497 = vmatprep.mubr.msk.bf16.mxu0 %vm658_vm0, %v2984_v32 }
  0x82   : > { %828 = vmatmul.mubr.bf16.gmra.mrb[44].mxu0 %v2986_v33 }
  0x83   : > { %2498 = vmatprep.mubr.msk.bf16.mxu0 %vm658_vm0, %v2987_v34 }
  0x8a   : > { %836 = vmatmul.mubr.bf16.gmra.mrb[48].mxu0 %v2989_v36 }
  0x8b   : > { %2499 = vmatprep.mubr.msk.bf16.mxu0 %vm658_vm0, %v2990_v37 }
  0x92   : > { %844 = vmatmul.mubr.bf16.gmra.mrb[52].mxu0 %v2992_v38 }
  0x93   : > { %2500 = vmatprep.mubr.msk.bf16.mxu0 %vm658_vm0, %v2993_v39 }
  0x9a   : > { %852 = vmatmul.mubr.bf16.gmra.mrb[56].mxu0 %v2995_v40 }
  0x9b   : > { %2501 = vmatprep.mubr.msk.bf16.mxu0 %vm658_vm0, %v2996_v41 }
  0xa2   : > { %860 = vmatmul.mubr.bf16.gmra.mrb[60].mxu0 %v2998_v42 }
  0xfd   : > { %v741_v45 = vpop.f32.mrb[0].mxu0 }
  0xfe   : > { %v742_v46 = vadd.f32 %v3188_v44, %v741_v45  ;;  %v743_v47 = vpop.f32.mrb[1].mxu0 }
  0xff   : > { %v744_v48 = vpop.f32.mrb[2].mxu0 }
 0x100   : > { %v900_v49 = vmul.f32 0.01, %v742_v46  ;;  %v745_v50 = vadd.f32 %v3188_v44, %v744_v48  ;;  %v746_v51 = vpop.f32.mrb[3].mxu0  ;;  %vm868_vm1 = vcmp.ge.f32.partialorder %v742_v46, 0.0 }
 0x102   : > { %vm869_vm2 = vcmp.ge.f32.partialorder %v745_v50, 0.0  ;;  %v901_v52 = vmul.f32 0.01, %v745_v50  ;;  %v932_v53 = vsel %vm868_vm1, %v742_v46, %v900_v49 }
 0x104   : > { %v933_v54 = vsel %vm869_vm2, %v745_v50, %v901_v52 }
 0x105   : > { %v964_v55 = vpack.c.bf16 %v933_v54, %v932_v53  ;;  %v749_v56 = vpop.f32.mrb[4].mxu0 }
 0x106   : > { %v750_v57 = vadd.f32 %v3188_v44, %v749_v56  ;;  %v751_v58 = vpop.f32.mrb[5].mxu0 }
 0x107   : > { %v752_v59 = vpop.f32.mrb[6].mxu0  ;;  %2761 = vmatprep.mubr.msk.bf16.mxu0 %vm658_vm0, %v964_v55 }
 0x108   : > { %vm870_vm3 = vcmp.ge.f32.partialorder %v750_v57, 0.0  ;;  %v902_v60 = vmul.f32 0.01, %v750_v57  ;;  %v753_v61 = vadd.f32 %v3188_v44, %v752_v59  ;;  %v754_v62 = vpop.f32.mrb[7].mxu0 }
 0x10a   : > { %vm871_vm4 = vcmp.ge.f32.partialorder %v753_v61, 0.0  ;;  %v903_v63 = vmul.f32 0.01, %v753_v61  ;;  %v934_v0 = vsel %vm870_vm3, %v750_v57, %v902_v60 }
 0x10c   : > { %v935_v1 = vsel %vm871_vm4, %v753_v61, %v903_v63 }
 0x10d   : > { %v965_v2 = vpack.c.bf16 %v935_v1, %v934_v0  ;;  %v757_v3 = vpop.f32.mrb[8].mxu0 }
 0x10e   : > { %v758_v4 = vadd.f32 %v3188_v44, %v757_v3  ;;  %v759_v5 = vpop.f32.mrb[9].mxu0 }
 0x10f   : > { %v760_v6 = vpop.f32.mrb[10].mxu0  ;;  %2762 = vmatmul.mubr.msk.bf16.vlgmr.msra.gmra.mrb[64].mxu0 %vm658_vm0, %v965_v2 }
 0x110   : > { %v904_v7 = vmul.f32 0.01, %v758_v4  ;;  %v761_v8 = vadd.f32 %v3188_v44, %v760_v6  ;;  %v762_v9 = vpop.f32.mrb[11].mxu0  ;;  %vm872_vm5 = vcmp.ge.f32.partialorder %v758_v4, 0.0 }
 0x112   : > { %vm873_vm6 = vcmp.ge.f32.partialorder %v761_v8, 0.0  ;;  %v905_v10 = vmul.f32 0.01, %v761_v8  ;;  %v936_v11 = vsel %vm872_vm5, %v758_v4, %v904_v7 }
 0x114   : > { %v937_v12 = vsel %vm873_vm6, %v761_v8, %v905_v10 }
 0x115   : > { %v966_v13 = vpack.c.bf16 %v937_v12, %v936_v11  ;;  %v765_v14 = vpop.f32.mrb[12].mxu0 }
 0x116   : > { %v766_v15 = vadd.f32 %v3188_v44, %v765_v14  ;;  %v767_v16 = vpop.f32.mrb[13].mxu0 }
 0x117   : > { %v768_v17 = vpop.f32.mrb[14].mxu0  ;;  %2765 = vmatprep.mubr.msk.bf16.mxu0 %vm658_vm0, %v966_v13 }
 0x118   : > { %v906_v18 = vmul.f32 0.01, %v766_v15  ;;  %v769_v19 = vadd.f32 %v3188_v44, %v768_v17  ;;  %v770_v20 = vpop.f32.mrb[15].mxu0  ;;  %vm874_vm7 = vcmp.ge.f32.partialorder %v766_v15, 0.0 }
 0x11a   : > { %vm875_vm8 = vcmp.ge.f32.partialorder %v769_v19, 0.0  ;;  %v907_v21 = vmul.f32 0.01, %v769_v19  ;;  %v938_v22 = vsel %vm874_vm7, %v766_v15, %v906_v18 }
 0x11c   : > { %v939_v23 = vsel %vm875_vm8, %v769_v19, %v907_v21 }
 0x11d   : > { %v967_v24 = vpack.c.bf16 %v939_v23, %v938_v22  ;;  %v773_v25 = vpop.f32.mrb[16].mxu0 }
 0x11e   : > { %v774_v26 = vadd.f32 %v3188_v44, %v773_v25  ;;  %v775_v27 = vpop.f32.mrb[17].mxu0 }
 0x11f   : > { %v776_v28 = vpop.f32.mrb[18].mxu0  ;;  %2766 = vmatmul.mubr.msk.bf16.gmra.mrb[68].mxu0 %vm658_vm0, %v967_v24 }
 0x120   : > { %v908_v29 = vmul.f32 0.01, %v774_v26  ;;  %v777_v30 = vadd.f32 %v3188_v44, %v776_v28  ;;  %v778_v31 = vpop.f32.mrb[19].mxu0  ;;  %vm876_vm9 = vcmp.ge.f32.partialorder %v774_v26, 0.0 }
 0x122   : > { %v909_v32 = vmul.f32 0.01, %v777_v30  ;;  %vm877_vm10 = vcmp.ge.f32.partialorder %v777_v30, 0.0  ;;  %v940_v33 = vsel %vm876_vm9, %v774_v26, %v908_v29 }
 0x124   : > { %v941_v34 = vsel %vm877_vm10, %v777_v30, %v909_v32 }
 0x125   : > { %v781_v35 = vpop.f32.mrb[20].mxu0  ;;  %v968_v36 = vpack.c.bf16 %v941_v34, %v940_v33 }
 0x126   : > { %v782_v37 = vadd.f32 %v3188_v44, %v781_v35  ;;  %v783_v38 = vpop.f32.mrb[21].mxu0 }
 0x127   : > { %v784_v39 = vpop.f32.mrb[22].mxu0  ;;  %2769 = vmatprep.mubr.msk.bf16.mxu1 %vm658_vm0, %v968_v36 }
 0x128   : > { %v910_v40 = vmul.f32 0.01, %v782_v37  ;;  %v785_v41 = vadd.f32 %v3188_v44, %v784_v39  ;;  %v786_v42 = vpop.f32.mrb[23].mxu0  ;;  %vm878_vm11 = vcmp.ge.f32.partialorder %v782_v37, 0.0 }
 0x12a   : > { %vm879_vm12 = vcmp.ge.f32.partialorder %v785_v41, 0.0  ;;  %v911_v45 = vmul.f32 0.01, %v785_v41  ;;  %v942_v46 = vsel %vm878_vm11, %v782_v37, %v910_v40 }
 0x12c   : > { %v943_v47 = vsel %vm879_vm12, %v785_v41, %v911_v45 }
 0x12d   : > { %v969_v48 = vpack.c.bf16 %v943_v47, %v942_v46  ;;  %v789_v49 = vpop.f32.mrb[24].mxu0 }
 0x12e   : > { %v790_v50 = vadd.f32 %v3188_v44, %v789_v49  ;;  %v791_v51 = vpop.f32.mrb[25].mxu0 }
 0x12f   : > { %v792_v52 = vpop.f32.mrb[26].mxu0  ;;  %2770 = vmatmul.mubr.msk.bf16.vlgmr.msra.gmra.mrb[0].mxu1 %vm658_vm0, %v969_v48 }
 0x130   : > { %v912_v53 = vmul.f32 0.01, %v790_v50  ;;  %v793_v54 = vadd.f32 %v3188_v44, %v792_v52  ;;  %v794_v55 = vpop.f32.mrb[27].mxu0  ;;  %2794 = vmatpush3.bf16.msra.mxu1 %v3182_v43  ;;  %vm880_vm13 = vcmp.ge.f32.partialorder %v790_v50, 0.0 }
 0x132   : > { %vm881_vm14 = vcmp.ge.f32.partialorder %v793_v54, 0.0  ;;  %v913_v56 = vmul.f32 0.01, %v793_v54  ;;  %v944_v57 = vsel %vm880_vm13, %v790_v50, %v912_v53 }
 0x134   : > { %v945_v58 = vsel %vm881_vm14, %v793_v54, %v913_v56 }
 0x135   : > { %v970_v59 = vpack.c.bf16 %v945_v58, %v944_v57  ;;  %v797_v60 = vpop.f32.mrb[28].mxu0 }
 0x136   : > { %v798_v61 = vadd.f32 %v3188_v44, %v797_v60  ;;  %v799_v62 = vpop.f32.mrb[29].mxu0 }
 0x137   : > { %v800_v63 = vpop.f32.mrb[30].mxu0  ;;  %2773 = vmatprep.mubr.msk.bf16.mxu1 %vm658_vm0, %v970_v59 }
 0x138   : > { %v914_v0 = vmul.f32 0.01, %v798_v61  ;;  %v801_v1 = vadd.f32 %v3188_v44, %v800_v63  ;;  %v802_v2 = vpop.f32.mrb[31].mxu0  ;;  %vm882_vm15 = vcmp.ge.f32.partialorder %v798_v61, 0.0 }
 0x13a   : > { %vm883_vm1 = vcmp.ge.f32.partialorder %v801_v1, 0.0  ;;  %v915_v43 = vmul.f32 0.01, %v801_v1  ;;  %v946_v3 = vsel %vm882_vm15, %v798_v61, %v914_v0 }
 0x13c   : > { %v947_v4 = vsel %vm883_vm1, %v801_v1, %v915_v43 }
 0x13d   : > { %v971_v5 = vpack.c.bf16 %v947_v4, %v946_v3  ;;  %v805_v6 = vpop.f32.mrb[32].mxu0 }
 0x13e   : > { %v806_v7 = vadd.f32 %v3188_v44, %v805_v6  ;;  %v807_v8 = vpop.f32.mrb[33].mxu0 }
 0x13f   : > { %v808_v9 = vpop.f32.mrb[34].mxu0  ;;  %2774 = vmatmul.mubr.msk.bf16.gmra.mrb[4].mxu1 %vm658_vm0, %v971_v5 }
 0x140   : > { %v916_v10 = vmul.f32 0.01, %v806_v7  ;;  %v809_v11 = vadd.f32 %v3188_v44, %v808_v9  ;;  %v810_v12 = vpop.f32.mrb[35].mxu0  ;;  %vm884_vm2 = vcmp.ge.f32.partialorder %v806_v7, 0.0 }
 0x142   : > { %vm885_vm3 = vcmp.ge.f32.partialorder %v809_v11, 0.0  ;;  %v917_v13 = vmul.f32 0.01, %v809_v11  ;;  %v948_v14 = vsel %vm884_vm2, %v806_v7, %v916_v10 }
 0x144   : > { %v949_v15 = vsel %vm885_vm3, %v809_v11, %v917_v13 }
 0x145   : > { %v972_v16 = vpack.c.bf16 %v949_v15, %v948_v14  ;;  %v813_v17 = vpop.f32.mrb[36].mxu0 }
 0x146   : > { %v814_v18 = vadd.f32 %v3188_v44, %v813_v17  ;;  %v815_v19 = vpop.f32.mrb[37].mxu0 }
 0x147   : > { %v816_v20 = vpop.f32.mrb[38].mxu0  ;;  %2777 = vmatprep.mubr.msk.bf16.mxu1 %vm658_vm0, %v972_v16 }
 0x148   : > { %v918_v21 = vmul.f32 0.01, %v814_v18  ;;  %v817_v22 = vadd.f32 %v3188_v44, %v816_v20  ;;  %v818_v23 = vpop.f32.mrb[39].mxu0  ;;  %vm886_vm4 = vcmp.ge.f32.partialorder %v814_v18, 0.0 }
 0x149   : > { %v3017_v23 = vld [vmem:[%s3532_s7] sm:$0xff]  }
 0x14a   : > { %vm887_vm5 = vcmp.ge.f32.partialorder %v817_v22, 0.0  ;;  %v919_v24 = vmul.f32 0.01, %v817_v22  ;;  %v950_v25 = vsel %vm886_vm4, %v814_v18, %v918_v21  ;;  %2827 = vmatprep.subr.bf16.mxu1 %v3017_v23  ;;  %vm1789_vm4 = vcmask 519168  }
 0x14c   : > { %v951_v26 = vsel %vm887_vm5, %v817_v22, %v919_v24 }
 0x14d   : > { %v973_v27 = vpack.c.bf16 %v951_v26, %v950_v25  ;;  %v821_v28 = vpop.f32.mrb[40].mxu0 }
 0x14e   : > { %v822_v29 = vadd.f32 %v3188_v44, %v821_v28  ;;  %v823_v30 = vpop.f32.mrb[41].mxu0 }
 0x14f   : > { %v824_v31 = vpop.f32.mrb[42].mxu0  ;;  %2778 = vmatmul.mubr.msk.bf16.gmra.mrb[8].mxu1 %vm658_vm0, %v973_v27 }
 0x150   : > { %v920_v32 = vmul.f32 0.01, %v822_v29  ;;  %v825_v33 = vadd.f32 %v3188_v44, %v824_v31  ;;  %v826_v34 = vpop.f32.mrb[43].mxu0  ;;  %vm888_vm6 = vcmp.ge.f32.partialorder %v822_v29, 0.0  ;;  %v3001_v31 = vld [vmem:[%s3198_s29] sm:$0xff]  }
 0x151   : > { %v3003_v34 = vld [vmem:[%s3198_s29 + $0x10] sm:$0xff]  }
 0x152   : > { %vm889_vm7 = vcmp.ge.f32.partialorder %v825_v33, 0.0  ;;  %v921_v35 = vmul.f32 0.01, %v825_v33  ;;  %v952_v36 = vsel %vm888_vm6, %v822_v29, %v920_v32 }
 0x154   : > { %v953_v37 = vsel %vm889_vm7, %v825_v33, %v921_v35  ;;  %v3002_v33 = vld [vmem:[%s3198_s29 + $0x8] sm:$0xff]   ;;  %v3019_v35 = vld [vmem:[%s3532_s7 + $0x10] sm:$0xff]   ;;  %vm1861_vm7 = vcmask 523264  }
 0x155   : > { %v974_v38 = vpack.c.bf16 %v953_v37, %v952_v36  ;;  %v829_v39 = vpop.f32.mrb[44].mxu0  ;;  %v3004_v36 = vld [vmem:[%s3198_s29 + $0x18] sm:$0xff]   ;;  %v3005_v37 = vld [vmem:[%s3198_s29 + $0x20] sm:$0xff]  }
 0x156   : > { %v830_v40 = vadd.f32 %v3188_v44, %v829_v39  ;;  %v831_v41 = vpop.f32.mrb[45].mxu0  ;;  %v3006_v39 = vld [vmem:[%s3198_s29 + $0x28] sm:$0xff]  }
 0x157   : > { %v832_v42 = vpop.f32.mrb[46].mxu0  ;;  %2781 = vmatprep.mubr.msk.bf16.mxu1 %vm658_vm0, %v974_v38  ;;  %v3020_v38 = vld [vmem:[%s3532_s7 + $0x18] sm:$0xff]  }
 0x158   : > { %v922_v45 = vmul.f32 0.01, %v830_v40  ;;  %v833_v46 = vadd.f32 %v3188_v44, %v832_v42  ;;  %v834_v47 = vpop.f32.mrb[47].mxu0  ;;  %vm890_vm8 = vcmp.ge.f32.partialorder %v830_v40, 0.0  ;;  %v3008_v41 = vld [vmem:[%s3198_s29 + $0x38] sm:$0xff]   ;;  %v3009_v42 = vld [vmem:[%s3198_s29 + $0x40] sm:$0xff]  }
 0x159   : > { %v3012_v47 = vld [vmem:[%s3198_s29 + $0x58] sm:$0xff]  }
 0x15a   : > { %vm891_vm9 = vcmp.ge.f32.partialorder %v833_v46, 0.0  ;;  %v923_v48 = vmul.f32 0.01, %v833_v46  ;;  %v954_v49 = vsel %vm890_vm8, %v830_v40, %v922_v45  ;;  %v3007_v40 = vld [vmem:[%s3198_s29 + $0x30] sm:$0xff]   ;;  %v3010_v45 = vld [vmem:[%s3198_s29 + $0x48] sm:$0xff]  }
 0x15c   : > { %v955_v50 = vsel %vm891_vm9, %v833_v46, %v923_v48  ;;  %v3011_v46 = vld [vmem:[%s3198_s29 + $0x50] sm:$0xff]   ;;  %v3013_v48 = vld [vmem:[%s3198_s29 + $0x60] sm:$0xff]  }
 0x15d   : > { %v975_v51 = vpack.c.bf16 %v955_v50, %v954_v49  ;;  %v837_v52 = vpop.f32.mrb[48].mxu0  ;;  %v3014_v49 = vld [vmem:[%s3198_s29 + $0x68] sm:$0xff]   ;;  %v3015_v50 = vld [vmem:[%s3198_s29 + $0x70] sm:$0xff]  }
 0x15e   : > { %v838_v53 = vadd.f32 %v3188_v44, %v837_v52  ;;  %v839_v54 = vpop.f32.mrb[49].mxu0 }
 0x15f   : > { %v840_v55 = vpop.f32.mrb[50].mxu0  ;;  %2782 = vmatmul.mubr.msk.bf16.gmra.mrb[12].mxu1 %vm658_vm0, %v975_v51  ;;  %v3016_v51 = vld [vmem:[%s3198_s29 + $0x78] sm:$0xff]   ;;  %s3428_s29 = scalar_lea.vmem %s3535_s10, %s3191_s27 }
 0x160   : > { %v924_v56 = vmul.f32 0.01, %v838_v53  ;;  %v841_v57 = vadd.f32 %v3188_v44, %v840_v55  ;;  %v842_v58 = vpop.f32.mrb[51].mxu0  ;;  %vm892_vm10 = vcmp.ge.f32.partialorder %v838_v53, 0.0 }
 0x162   : > { %vm893_vm11 = vcmp.ge.f32.partialorder %v841_v57, 0.0  ;;  %v925_v59 = vmul.f32 0.01, %v841_v57  ;;  %v956_v60 = vsel %vm892_vm10, %v838_v53, %v924_v56 }
 0x164   : > { %v957_v61 = vsel %vm893_vm11, %v841_v57, %v925_v59 }
 0x165   : > { %v976_v62 = vpack.c.bf16 %v957_v61, %v956_v60  ;;  %v845_v63 = vpop.f32.mrb[52].mxu0  ;;  %v3295_v60 = vld [vmem:[%s3530_s5] ss:$0 sm:$0xff] }
 0x166   : > { %v846_v0 = vadd.f32 %v3188_v44, %v845_v63  ;;  %v847_v1 = vpop.f32.mrb[53].mxu0 }
 0x167   : > { %v848_v2 = vpop.f32.mrb[54].mxu0  ;;  %2785 = vmatprep.mubr.msk.bf16.mxu1 %vm658_vm0, %v976_v62 }
 0x168   : > { %v926_v43 = vmul.f32 0.01, %v846_v0  ;;  %v849_v3 = vadd.f32 %v3188_v44, %v848_v2  ;;  %v850_v4 = vpop.f32.mrb[55].mxu0  ;;  %vm894_vm12 = vcmp.ge.f32.partialorder %v846_v0, 0.0 }
 0x16a   : > { %vm895_vm13 = vcmp.ge.f32.partialorder %v849_v3, 0.0  ;;  %v927_v5 = vmul.f32 0.01, %v849_v3  ;;  %v958_v6 = vsel %vm894_vm12, %v846_v0, %v926_v43 }
 0x16c   : > { %v959_v7 = vsel %vm895_vm13, %v849_v3, %v927_v5 }
 0x16d   : > { %v977_v8 = vpack.c.bf16 %v959_v7, %v958_v6  ;;  %v853_v9 = vpop.f32.mrb[56].mxu0 }
 0x16e   : > { %v854_v10 = vadd.f32 %v3188_v44, %v853_v9  ;;  %v855_v11 = vpop.f32.mrb[57].mxu0 }
 0x16f   : > { %v856_v12 = vpop.f32.mrb[58].mxu0  ;;  %2786 = vmatmul.mubr.msk.bf16.gmra.mrb[16].mxu1 %vm658_vm0, %v977_v8 }
 0x170   : > { %v928_v13 = vmul.f32 0.01, %v854_v10  ;;  %v857_v14 = vadd.f32 %v3188_v44, %v856_v12  ;;  %v858_v15 = vpop.f32.mrb[59].mxu0  ;;  %vm896_vm14 = vcmp.ge.f32.partialorder %v854_v10, 0.0 }
 0x172   : > { %vm897_vm15 = vcmp.ge.f32.partialorder %v857_v14, 0.0  ;;  %v929_v16 = vmul.f32 0.01, %v857_v14  ;;  %v960_v17 = vsel %vm896_vm14, %v854_v10, %v928_v13 }
 0x174   : > { %v961_v18 = vsel %vm897_vm15, %v857_v14, %v929_v16 }
 0x175   : > { %v978_v19 = vpack.c.bf16 %v961_v18, %v960_v17  ;;  %v861_v20 = vpop.f32.mrb[60].mxu0 }
 0x176   : > { %v862_v21 = vadd.f32 %v3188_v44, %v861_v20  ;;  %v863_v22 = vpop.f32.mrb[61].mxu0 }
 0x177   : > { %v864_v24 = vpop.f32.mrb[62].mxu0  ;;  %2789 = vmatprep.mubr.msk.bf16.mxu1 %vm658_vm0, %v978_v19 }
 0x178   : > { %v930_v25 = vmul.f32 0.01, %v862_v21  ;;  %v865_v26 = vadd.f32 %v3188_v44, %v864_v24  ;;  %v866_v27 = vpop.f32.mrb[63].mxu0  ;;  %vm898_vm1 = vcmp.ge.f32.partialorder %v862_v21, 0.0  ;;  %v3018_v44 = vld [vmem:[%s3532_s7 + $0x8] sm:$0xff]  }
 0x17a   : > { %vm899_vm2 = vcmp.ge.f32.partialorder %v865_v26, 0.0  ;;  %v931_v28 = vmul.f32 0.01, %v865_v26  ;;  %v962_v29 = vsel %vm898_vm1, %v862_v21, %v930_v25 }
 0x17c   : > { %v963_v30 = vsel %vm899_vm2, %v865_v26, %v931_v28 }
 0x17d   : > { %v979_v32 = vpack.c.bf16 %v963_v30, %v962_v29 }
 0x17f   : > { %2790 = vmatmul.mubr.msk.bf16.gmra.mrb[20].mxu1 %vm658_vm0, %v979_v32 }
 0x180   : > { %2795 = vmatprep.mubr.msk.bf16.mxu1 %vm658_vm0, %v3001_v31 }
 0x187   : > { %2796 = vmatmul.mubr.msk.bf16.vlgmr.msra.gmra.mrb[24].mxu1 %vm658_vm0, %v3002_v33 }
 0x188   : > { %2799 = vmatprep.mubr.msk.bf16.mxu1 %vm658_vm0, %v3003_v34  ;;  %2828 = vmatpush3.bf16.msra.mxu1 %v3017_v23 }
 0x189   : > { %2829 = vmatprep.subr.bf16.mxu1 %v3018_v44 }
 0x18c   : > { %2830 = vmatpush3.bf16.msra.mxu1 %v3018_v44 }
 0x18d   : > { %2831 = vmatprep.subr.bf16.mxu1 %v3019_v35 }
 0x18f   : > { %2800 = vmatmul.mubr.msk.bf16.gmra.mrb[28].mxu1 %vm658_vm0, %v3004_v36 }
 0x190   : > { %2803 = vmatprep.mubr.msk.bf16.mxu1 %vm658_vm0, %v3005_v37  ;;  %2832 = vmatpush3.bf16.msra.mxu1 %v3019_v35 }
 0x191   : > { %2833 = vmatprep.subr.bf16.mxu1 %v3020_v38 }
 0x194   : > { %2834 = vmatpush3.bf16.msra.mxu1 %v3020_v38 }
 0x197   : > { %2804 = vmatmul.mubr.msk.bf16.gmra.mrb[0].mxu1 %vm658_vm0, %v3006_v39 }
 0x198   : > { %2807 = vmatprep.mubr.msk.bf16.mxu1 %vm658_vm0, %v3007_v40 }
 0x19f   : > { %2808 = vmatmul.mubr.msk.bf16.gmra.mrb[4].mxu1 %vm658_vm0, %v3008_v41 }
 0x1a0   : > { %2811 = vmatprep.mubr.msk.bf16.mxu1 %vm658_vm0, %v3009_v42 }
 0x1a7   : > { %2812 = vmatmul.mubr.msk.bf16.gmra.mrb[8].mxu1 %vm658_vm0, %v3010_v45 }
 0x1a8   : > { %2815 = vmatprep.mubr.msk.bf16.mxu1 %vm658_vm0, %v3011_v46 }
 0x1af   : > { %2816 = vmatmul.mubr.msk.bf16.gmra.mrb[12].mxu1 %vm658_vm0, %v3012_v47 }
 0x1b0   : > { %2819 = vmatprep.mubr.msk.bf16.mxu1 %vm658_vm0, %v3013_v48 }
 0x1b7   : > { %2820 = vmatmul.mubr.msk.bf16.gmra.mrb[16].mxu1 %vm658_vm0, %v3014_v49 }
 0x1b8   : > { %2823 = vmatprep.mubr.msk.bf16.mxu1 %vm658_vm0, %v3015_v50 }
 0x1bf   : > { %2824 = vmatmul.mubr.msk.bf16.gmra.mrb[20].mxu1 %vm658_vm0, %v3016_v51 }
 0x1e2   : > { %v2763_v52 = vpop.f32.mrb[64].mxu0 }
 0x1e3   : > { %v1077_v53 = vpop.f32.mrb[65].mxu0  ;;  %v1086_v61 = vadd.f32 %v2763_v52, %v3295_v60 }
 0x1e4   : > { %v2764_v54 = vpop.f32.mrb[66].mxu0  ;;  %v1078_v62 = vadd.f32 %v3295_v60, %v1077_v53 }
 0x1e5   : > { %v1080_v55 = vpop.f32.mrb[67].mxu0  ;;  %v1089_v0 = vadd.f32 %v2764_v54, %v3295_v60 }
 0x1e6   : > { %v1081_v43 = vadd.f32 %v3295_v60, %v1080_v55 }
 0x1f2   : > { %v2767_v56 = vpop.f32.mrb[68].mxu0 }
 0x1f3   : > { %v1093_v57 = vpop.f32.mrb[69].mxu0  ;;  %v1102_v15 = vadd.f32 %v2767_v56, %v3295_v60 }
 0x1f4   : > { %v2768_v58 = vpop.f32.mrb[70].mxu0  ;;  %v1094_v18 = vadd.f32 %v3295_v60, %v1093_v57 }
 0x1f5   : > { %v1096_v59 = vpop.f32.mrb[71].mxu0  ;;  %v1105_v23 = vadd.f32 %v2768_v58, %v3295_v60 }
 0x1f6   : > { %v1097_v28 = vadd.f32 %v3295_v60, %v1096_v59 }
 0x25a   : > { %v2797_v63 = vpop.f32.mrb[24].mxu1 }
 0x25b   : > { %v1535_v1 = vadd.f32 %v2797_v63, %v1086_v61  ;;  %v1406_v2 = vpop.f32.mrb[25].mxu1 }
 0x25c   : > { %v1533_v3 = vadd.f32 %v1406_v2, %v1078_v62  ;;  %v2798_v4 = vpop.f32.mrb[26].mxu1 }
 0x25d   : > { %vm1567_vm0 = vcmp.ge.f32.partialorder %v1535_v1, 0.0  ;;  %v1599_v5 = vmul.f32 0.01, %v1535_v1  ;;  %v1536_v6 = vadd.f32 %v2798_v4, %v1089_v0  ;;  %v1409_v7 = vpop.f32.mrb[27].mxu1 }
 0x25e   : > { %vm1565_vm3 = vcmp.ge.f32.partialorder %v1533_v3, 0.0  ;;  %v1597_v8 = vmul.f32 0.01, %v1533_v3  ;;  %v1534_v9 = vadd.f32 %v1409_v7, %v1081_v43 }
 0x25f   : > { %v1631_v10 = vsel %vm1567_vm0, %v1535_v1, %v1599_v5  ;;  %vm1568_vm5 = vcmp.ge.f32.partialorder %v1536_v6, 0.0  ;;  %v1600_v11 = vmul.f32 0.01, %v1536_v6 }
 0x260   : > { %v2643_v12 = vpack.c.bf16 %v1631_v10, %v1631_v10  ;;  %v1629_v13 = vsel %vm1565_vm3, %v1533_v3, %v1597_v8  ;;  %vm1566_vm6 = vcmp.ge.f32.partialorder %v1534_v9, 0.0  ;;  %v1598_v14 = vmul.f32 0.01, %v1534_v9 }
 0x261   : > { %v2641_v16 = vpack.c.bf16 %v1629_v13, %v1629_v13  ;;  %v1632_v17 = vsel %vm1568_vm5, %v1536_v6, %v1600_v11 }
 0x262   : > { %1792 = vst.msk [vmem:[%s3305_s23 + $0x8] sm:$0xf] %vm1789_vm4, %v2643_v12  ;;  %v1662_v19 = vpack.c.bf16 %v1632_v17, %v1631_v10  ;;  %v2644_v20 = vpack.c.bf16 %v1632_v17, %v1632_v17  ;;  %v1630_v21 = vsel %vm1566_vm6, %v1534_v9, %v1598_v14  ;;  %v2801_v22 = vpop.f32.mrb[28].mxu1 }
 0x263   : > { %1790 = vst.msk [vmem:[%s3305_s23] sm:$0xf] %vm1789_vm4, %v2641_v16  ;;  %v1661_v24 = vpack.c.bf16 %v1630_v21, %v1629_v13  ;;  %v2642_v25 = vpack.c.bf16 %v1630_v21, %v1630_v21  ;;  %v1539_v26 = vadd.f32 %v2801_v22, %v1102_v15  ;;  %v1422_v27 = vpop.f32.mrb[29].mxu1 }
 0x264   : > { %1793 = vst.msk [vmem:[%s3305_s23 + $0xc] sm:$0xf] %vm1789_vm4, %v2644_v20  ;;  %v1537_v29 = vadd.f32 %v1422_v27, %v1094_v18  ;;  %v2802_v30 = vpop.f32.mrb[30].mxu1 }
 0x265   : > { %1791 = vst.msk [vmem:[%s3305_s23 + $0x4] sm:$0xf] %vm1789_vm4, %v2642_v25  ;;  %vm1571_vm8 = vcmp.ge.f32.partialorder %v1539_v26, 0.0  ;;  %v1603_v31 = vmul.f32 0.01, %v1539_v26  ;;  %v1540_v32 = vadd.f32 %v2802_v30, %v1105_v23  ;;  %v1425_v33 = vpop.f32.mrb[31].mxu1  ;;  %2835 = vmatprep.mubr.msk.bf16.mxu1 %vm1861_vm7, %v1661_v24 }
 0x266   : > { %vm1569_vm9 = vcmp.ge.f32.partialorder %v1537_v29, 0.0  ;;  %v1601_v34 = vmul.f32 0.01, %v1537_v29  ;;  %v1538_v44 = vadd.f32 %v1425_v33, %v1097_v28  ;;  %2836 = vmatmul.mubr.msk.bf16.vlgmr.msra.gmra.mrb[32].mxu1 %vm1861_vm7, %v1662_v19 }
 0x267   : > { %v1635_v35 = vsel %vm1571_vm8, %v1539_v26, %v1603_v31  ;;  %vm1572_vm10 = vcmp.ge.f32.partialorder %v1540_v32, 0.0  ;;  %v1604_v36 = vmul.f32 0.01, %v1540_v32 }
 0x268   : > { %v2647_v37 = vpack.c.bf16 %v1635_v35, %v1635_v35  ;;  %v1633_v38 = vsel %vm1569_vm9, %v1537_v29, %v1601_v34  ;;  %vm1570_vm11 = vcmp.ge.f32.partialorder %v1538_v44, 0.0  ;;  %v1602_v39 = vmul.f32 0.01, %v1538_v44 }
 0x269   : > { %v2645_v40 = vpack.c.bf16 %v1633_v38, %v1633_v38  ;;  %v1636_v41 = vsel %vm1572_vm10, %v1540_v32, %v1604_v36 }
 0x26a   : > { %1796 = vst.msk [vmem:[%s3305_s23 + $0x18] sm:$0xf] %vm1789_vm4, %v2647_v37  ;;  %v1664_v42 = vpack.c.bf16 %v1636_v41, %v1635_v35  ;;  %v2648_v45 = vpack.c.bf16 %v1636_v41, %v1636_v41  ;;  %v1634_v46 = vsel %vm1570_vm11, %v1538_v44, %v1602_v39  ;;  %v2805_v47 = vpop.f32.mrb[0].mxu1 }
 0x26b   : > { %1794 = vst.msk [vmem:[%s3305_s23 + $0x10] sm:$0xf] %vm1789_vm4, %v2645_v40  ;;  %v1663_v48 = vpack.c.bf16 %v1634_v46, %v1633_v38  ;;  %v2646_v49 = vpack.c.bf16 %v1634_v46, %v1634_v46  ;;  %v2885_v50 = vadd.f32 %v2805_v47, %v3295_v60  ;;  %v1438_v51 = vpop.f32.mrb[1].mxu1 }
 0x26c   : > { %1797 = vst.msk [vmem:[%s3305_s23 + $0x1c] sm:$0xf] %vm1789_vm4, %v2648_v45  ;;  %v2886_v52 = vadd.f32 %v3295_v60, %v1438_v51  ;;  %v2806_v53 = vpop.f32.mrb[2].mxu1 }
 0x26d   : > { %1795 = vst.msk [vmem:[%s3305_s23 + $0x14] sm:$0xf] %vm1789_vm4, %v2646_v49  ;;  %vm1575_vm12 = vcmp.ge.f32.partialorder %v2885_v50, 0.0  ;;  %v1607_v54 = vmul.f32 0.01, %v2885_v50  ;;  %v2887_v55 = vadd.f32 %v2806_v53, %v3295_v60  ;;  %v1441_v56 = vpop.f32.mrb[3].mxu1  ;;  %2839 = vmatprep.mubr.msk.bf16.mxu1 %vm1861_vm7, %v1663_v48 }
 0x26e   : > { %vm1573_vm13 = vcmp.ge.f32.partialorder %v2886_v52, 0.0  ;;  %v1605_v57 = vmul.f32 0.01, %v2886_v52  ;;  %v2888_v58 = vadd.f32 %v3295_v60, %v1441_v56  ;;  %2840 = vmatmul.mubr.msk.bf16.gmra.mrb[36].mxu1 %vm1861_vm7, %v1664_v42 }
 0x26f   : > { %v1639_v59 = vsel %vm1575_vm12, %v2885_v50, %v1607_v54  ;;  %vm1576_vm14 = vcmp.ge.f32.partialorder %v2887_v55, 0.0  ;;  %v1608_v61 = vmul.f32 0.01, %v2887_v55 }
 0x270   : > { %v2651_v62 = vpack.c.bf16 %v1639_v59, %v1639_v59  ;;  %v1637_v63 = vsel %vm1573_vm13, %v2886_v52, %v1605_v57  ;;  %vm1574_vm15 = vcmp.ge.f32.partialorder %v2888_v58, 0.0  ;;  %v1606_v0 = vmul.f32 0.01, %v2888_v58 }
 0x271   : > { %v2649_v1 = vpack.c.bf16 %v1637_v63, %v1637_v63  ;;  %v1640_v2 = vsel %vm1576_vm14, %v2887_v55, %v1608_v61 }
 0x272   : > { %1800 = vst.msk [vmem:[%s3305_s23 + $0x28] sm:$0xf] %vm1789_vm4, %v2651_v62  ;;  %v1666_v43 = vpack.c.bf16 %v1640_v2, %v1639_v59  ;;  %v2652_v3 = vpack.c.bf16 %v1640_v2, %v1640_v2  ;;  %v1638_v4 = vsel %vm1574_vm15, %v2888_v58, %v1606_v0  ;;  %v2809_v5 = vpop.f32.mrb[4].mxu1 }
 0x273   : > { %1798 = vst.msk [vmem:[%s3305_s23 + $0x20] sm:$0xf] %vm1789_vm4, %v2649_v1  ;;  %v1665_v6 = vpack.c.bf16 %v1638_v4, %v1637_v63  ;;  %v2650_v7 = vpack.c.bf16 %v1638_v4, %v1638_v4  ;;  %v2889_v8 = vadd.f32 %v2809_v5, %v3295_v60  ;;  %v1454_v9 = vpop.f32.mrb[5].mxu1 }
 0x274   : > { %1801 = vst.msk [vmem:[%s3305_s23 + $0x2c] sm:$0xf] %vm1789_vm4, %v2652_v3  ;;  %v2890_v10 = vadd.f32 %v3295_v60, %v1454_v9  ;;  %v2810_v11 = vpop.f32.mrb[6].mxu1 }
 0x275   : > { %1799 = vst.msk [vmem:[%s3305_s23 + $0x24] sm:$0xf] %vm1789_vm4, %v2650_v7  ;;  %vm1579_vm1 = vcmp.ge.f32.partialorder %v2889_v8, 0.0  ;;  %v1611_v12 = vmul.f32 0.01, %v2889_v8  ;;  %v2891_v13 = vadd.f32 %v2810_v11, %v3295_v60  ;;  %v1457_v14 = vpop.f32.mrb[7].mxu1  ;;  %2843 = vmatprep.mubr.msk.bf16.mxu1 %vm1861_vm7, %v1665_v6 }
 0x276   : > { %vm1577_vm2 = vcmp.ge.f32.partialorder %v2890_v10, 0.0  ;;  %v1609_v15 = vmul.f32 0.01, %v2890_v10  ;;  %v2892_v16 = vadd.f32 %v3295_v60, %v1457_v14  ;;  %2844 = vmatmul.mubr.msk.bf16.gmra.mrb[40].mxu1 %vm1861_vm7, %v1666_v43 }
 0x277   : > { %v1643_v17 = vsel %vm1579_vm1, %v2889_v8, %v1611_v12  ;;  %vm1580_vm0 = vcmp.ge.f32.partialorder %v2891_v13, 0.0  ;;  %v1612_v18 = vmul.f32 0.01, %v2891_v13 }
 0x278   : > { %v2655_v19 = vpack.c.bf16 %v1643_v17, %v1643_v17  ;;  %v1641_v20 = vsel %vm1577_vm2, %v2890_v10, %v1609_v15  ;;  %vm1578_vm3 = vcmp.ge.f32.partialorder %v2892_v16, 0.0  ;;  %v1610_v21 = vmul.f32 0.01, %v2892_v16 }
 0x279   : > { %v2653_v22 = vpack.c.bf16 %v1641_v20, %v1641_v20  ;;  %v1644_v23 = vsel %vm1580_vm0, %v2891_v13, %v1612_v18 }
 0x27a   : > { %1804 = vst.msk [vmem:[%s3305_s23 + $0x38] sm:$0xf] %vm1789_vm4, %v2655_v19  ;;  %v1668_v24 = vpack.c.bf16 %v1644_v23, %v1643_v17  ;;  %v2656_v25 = vpack.c.bf16 %v1644_v23, %v1644_v23  ;;  %v1642_v26 = vsel %vm1578_vm3, %v2892_v16, %v1610_v21  ;;  %v2813_v27 = vpop.f32.mrb[8].mxu1 }
 0x27b   : > { %1802 = vst.msk [vmem:[%s3305_s23 + $0x30] sm:$0xf] %vm1789_vm4, %v2653_v22  ;;  %v1667_v28 = vpack.c.bf16 %v1642_v26, %v1641_v20  ;;  %v2654_v29 = vpack.c.bf16 %v1642_v26, %v1642_v26  ;;  %v2893_v30 = vadd.f32 %v2813_v27, %v3295_v60  ;;  %v1470_v31 = vpop.f32.mrb[9].mxu1 }
 0x27c   : > { %1805 = vst.msk [vmem:[%s3305_s23 + $0x3c] sm:$0xf] %vm1789_vm4, %v2656_v25  ;;  %v2894_v32 = vadd.f32 %v3295_v60, %v1470_v31  ;;  %v2814_v33 = vpop.f32.mrb[10].mxu1 }
 0x27d   : > { %1803 = vst.msk [vmem:[%s3305_s23 + $0x34] sm:$0xf] %vm1789_vm4, %v2654_v29  ;;  %vm1583_vm5 = vcmp.ge.f32.partialorder %v2893_v30, 0.0  ;;  %v1615_v34 = vmul.f32 0.01, %v2893_v30  ;;  %v2895_v44 = vadd.f32 %v2814_v33, %v3295_v60  ;;  %v1473_v35 = vpop.f32.mrb[11].mxu1  ;;  %2847 = vmatprep.mubr.msk.bf16.mxu1 %vm1861_vm7, %v1667_v28 }
 0x27e   : > { %vm1581_vm6 = vcmp.ge.f32.partialorder %v2894_v32, 0.0  ;;  %v1613_v36 = vmul.f32 0.01, %v2894_v32  ;;  %v2896_v37 = vadd.f32 %v3295_v60, %v1473_v35  ;;  %2848 = vmatmul.mubr.msk.bf16.gmra.mrb[44].mxu1 %vm1861_vm7, %v1668_v24 }
 0x27f   : > { %v1647_v38 = vsel %vm1583_vm5, %v2893_v30, %v1615_v34  ;;  %vm1584_vm8 = vcmp.ge.f32.partialorder %v2895_v44, 0.0  ;;  %v1616_v39 = vmul.f32 0.01, %v2895_v44 }
 0x280   : > { %v2659_v40 = vpack.c.bf16 %v1647_v38, %v1647_v38  ;;  %v1645_v41 = vsel %vm1581_vm6, %v2894_v32, %v1613_v36  ;;  %vm1582_vm9 = vcmp.ge.f32.partialorder %v2896_v37, 0.0  ;;  %v1614_v42 = vmul.f32 0.01, %v2896_v37 }
 0x281   : > { %v2657_v45 = vpack.c.bf16 %v1645_v41, %v1645_v41  ;;  %v1648_v46 = vsel %vm1584_vm8, %v2895_v44, %v1616_v39 }
 0x282   : > { %1808 = vst.msk [vmem:[%s3305_s23 + $0x48] sm:$0xf] %vm1789_vm4, %v2659_v40  ;;  %v1670_v47 = vpack.c.bf16 %v1648_v46, %v1647_v38  ;;  %v2660_v48 = vpack.c.bf16 %v1648_v46, %v1648_v46  ;;  %v1646_v49 = vsel %vm1582_vm9, %v2896_v37, %v1614_v42  ;;  %v2817_v50 = vpop.f32.mrb[12].mxu1 }
 0x283   : > { %1806 = vst.msk [vmem:[%s3305_s23 + $0x40] sm:$0xf] %vm1789_vm4, %v2657_v45  ;;  %v1669_v51 = vpack.c.bf16 %v1646_v49, %v1645_v41  ;;  %v2658_v52 = vpack.c.bf16 %v1646_v49, %v1646_v49  ;;  %v2897_v53 = vadd.f32 %v2817_v50, %v3295_v60  ;;  %v1486_v54 = vpop.f32.mrb[13].mxu1 }
 0x284   : > { %1809 = vst.msk [vmem:[%s3305_s23 + $0x4c] sm:$0xf] %vm1789_vm4, %v2660_v48  ;;  %v2898_v55 = vadd.f32 %v3295_v60, %v1486_v54  ;;  %v2818_v56 = vpop.f32.mrb[14].mxu1  ;;  %v3418_v54 = vld [vmem:[%s3533_s8] ss:$0 sm:$0xff] }
 0x285   : > { %1807 = vst.msk [vmem:[%s3305_s23 + $0x44] sm:$0xf] %vm1789_vm4, %v2658_v52  ;;  %vm1587_vm10 = vcmp.ge.f32.partialorder %v2897_v53, 0.0  ;;  %v1619_v57 = vmul.f32 0.01, %v2897_v53  ;;  %v2899_v58 = vadd.f32 %v2818_v56, %v3295_v60  ;;  %v1489_v59 = vpop.f32.mrb[15].mxu1  ;;  %2851 = vmatprep.mubr.msk.bf16.mxu1 %vm1861_vm7, %v1669_v51 }
 0x286   : > { %vm1585_vm11 = vcmp.ge.f32.partialorder %v2898_v55, 0.0  ;;  %v1617_v61 = vmul.f32 0.01, %v2898_v55  ;;  %v2900_v62 = vadd.f32 %v3295_v60, %v1489_v59  ;;  %2852 = vmatmul.mubr.msk.bf16.gmra.mrb[48].mxu1 %vm1861_vm7, %v1670_v47 }
 0x287   : > { %v1651_v63 = vsel %vm1587_vm10, %v2897_v53, %v1619_v57  ;;  %vm1588_vm12 = vcmp.ge.f32.partialorder %v2899_v58, 0.0  ;;  %v1620_v0 = vmul.f32 0.01, %v2899_v58 }
 0x288   : > { %v2663_v1 = vpack.c.bf16 %v1651_v63, %v1651_v63  ;;  %v1649_v2 = vsel %vm1585_vm11, %v2898_v55, %v1617_v61  ;;  %vm1586_vm13 = vcmp.ge.f32.partialorder %v2900_v62, 0.0  ;;  %v1618_v43 = vmul.f32 0.01, %v2900_v62 }
 0x289   : > { %v2661_v3 = vpack.c.bf16 %v1649_v2, %v1649_v2  ;;  %v1652_v4 = vsel %vm1588_vm12, %v2899_v58, %v1620_v0 }
 0x28a   : > { %1812 = vst.msk [vmem:[%s3305_s23 + $0x58] sm:$0xf] %vm1789_vm4, %v2663_v1  ;;  %v1672_v5 = vpack.c.bf16 %v1652_v4, %v1651_v63  ;;  %v2664_v6 = vpack.c.bf16 %v1652_v4, %v1652_v4  ;;  %v1650_v7 = vsel %vm1586_vm13, %v2900_v62, %v1618_v43  ;;  %v2821_v8 = vpop.f32.mrb[16].mxu1 }
 0x28b   : > { %1810 = vst.msk [vmem:[%s3305_s23 + $0x50] sm:$0xf] %vm1789_vm4, %v2661_v3  ;;  %v1671_v9 = vpack.c.bf16 %v1650_v7, %v1649_v2  ;;  %v2662_v10 = vpack.c.bf16 %v1650_v7, %v1650_v7  ;;  %v2901_v11 = vadd.f32 %v2821_v8, %v3295_v60  ;;  %v1502_v12 = vpop.f32.mrb[17].mxu1 }
 0x28c   : > { %1813 = vst.msk [vmem:[%s3305_s23 + $0x5c] sm:$0xf] %vm1789_vm4, %v2664_v6  ;;  %v2902_v13 = vadd.f32 %v3295_v60, %v1502_v12  ;;  %v2822_v14 = vpop.f32.mrb[18].mxu1 }
 0x28d   : > { %1811 = vst.msk [vmem:[%s3305_s23 + $0x54] sm:$0xf] %vm1789_vm4, %v2662_v10  ;;  %vm1591_vm14 = vcmp.ge.f32.partialorder %v2901_v11, 0.0  ;;  %v1623_v15 = vmul.f32 0.01, %v2901_v11  ;;  %v2903_v16 = vadd.f32 %v2822_v14, %v3295_v60  ;;  %v1505_v17 = vpop.f32.mrb[19].mxu1  ;;  %2855 = vmatprep.mubr.msk.bf16.mxu1 %vm1861_vm7, %v1671_v9 }
 0x28e   : > { %vm1589_vm15 = vcmp.ge.f32.partialorder %v2902_v13, 0.0  ;;  %v1621_v18 = vmul.f32 0.01, %v2902_v13  ;;  %v2904_v19 = vadd.f32 %v3295_v60, %v1505_v17  ;;  %2856 = vmatmul.mubr.msk.bf16.gmra.mrb[52].mxu1 %vm1861_vm7, %v1672_v5 }
 0x28f   : > { %v1655_v20 = vsel %vm1591_vm14, %v2901_v11, %v1623_v15  ;;  %vm1592_vm1 = vcmp.ge.f32.partialorder %v2903_v16, 0.0  ;;  %v1624_v21 = vmul.f32 0.01, %v2903_v16 }
 0x290   : > { %v2667_v22 = vpack.c.bf16 %v1655_v20, %v1655_v20  ;;  %v1653_v23 = vsel %vm1589_vm15, %v2902_v13, %v1621_v18  ;;  %vm1590_vm2 = vcmp.ge.f32.partialorder %v2904_v19, 0.0  ;;  %v1622_v24 = vmul.f32 0.01, %v2904_v19 }
 0x291   : > { %v2665_v25 = vpack.c.bf16 %v1653_v23, %v1653_v23  ;;  %v1656_v26 = vsel %vm1592_vm1, %v2903_v16, %v1624_v21 }
 0x292   : > { %1816 = vst.msk [vmem:[%s3305_s23 + $0x68] sm:$0xf] %vm1789_vm4, %v2667_v22  ;;  %v1674_v27 = vpack.c.bf16 %v1656_v26, %v1655_v20  ;;  %v2668_v28 = vpack.c.bf16 %v1656_v26, %v1656_v26  ;;  %v1654_v29 = vsel %vm1590_vm2, %v2904_v19, %v1622_v24  ;;  %v2825_v30 = vpop.f32.mrb[20].mxu1 }
 0x293   : > { %1814 = vst.msk [vmem:[%s3305_s23 + $0x60] sm:$0xf] %vm1789_vm4, %v2665_v25  ;;  %v1673_v31 = vpack.c.bf16 %v1654_v29, %v1653_v23  ;;  %v2666_v32 = vpack.c.bf16 %v1654_v29, %v1654_v29  ;;  %v2905_v33 = vadd.f32 %v2825_v30, %v3295_v60  ;;  %v1518_v34 = vpop.f32.mrb[21].mxu1 }
 0x294   : > { %1817 = vst.msk [vmem:[%s3305_s23 + $0x6c] sm:$0xf] %vm1789_vm4, %v2668_v28  ;;  %v2906_v44 = vadd.f32 %v3295_v60, %v1518_v34  ;;  %v2826_v35 = vpop.f32.mrb[22].mxu1 }
 0x295   : > { %1815 = vst.msk [vmem:[%s3305_s23 + $0x64] sm:$0xf] %vm1789_vm4, %v2666_v32  ;;  %vm1595_vm0 = vcmp.ge.f32.partialorder %v2905_v33, 0.0  ;;  %v1627_v36 = vmul.f32 0.01, %v2905_v33  ;;  %v2907_v37 = vadd.f32 %v2826_v35, %v3295_v60  ;;  %v1521_v38 = vpop.f32.mrb[23].mxu1  ;;  %2859 = vmatprep.mubr.msk.bf16.mxu1 %vm1861_vm7, %v1673_v31 }
 0x296   : > { %vm1593_vm3 = vcmp.ge.f32.partialorder %v2906_v44, 0.0  ;;  %v1625_v39 = vmul.f32 0.01, %v2906_v44  ;;  %v2908_v40 = vadd.f32 %v3295_v60, %v1521_v38  ;;  %2860 = vmatmul.mubr.msk.bf16.gmra.mrb[56].mxu1 %vm1861_vm7, %v1674_v27 }
 0x297   : > { %v1659_v41 = vsel %vm1595_vm0, %v2905_v33, %v1627_v36  ;;  %vm1596_vm5 = vcmp.ge.f32.partialorder %v2907_v37, 0.0  ;;  %v1628_v42 = vmul.f32 0.01, %v2907_v37 }
 0x298   : > { %v2671_v45 = vpack.c.bf16 %v1659_v41, %v1659_v41  ;;  %v1657_v46 = vsel %vm1593_vm3, %v2906_v44, %v1625_v39  ;;  %vm1594_vm6 = vcmp.ge.f32.partialorder %v2908_v40, 0.0  ;;  %v1626_v47 = vmul.f32 0.01, %v2908_v40 }
 0x299   : > { %v2669_v48 = vpack.c.bf16 %v1657_v46, %v1657_v46  ;;  %v1660_v49 = vsel %vm1596_vm5, %v2907_v37, %v1628_v42 }
 0x29a   : > { %1820 = vst.msk [vmem:[%s3305_s23 + $0x78] sm:$0xf] %vm1789_vm4, %v2671_v45  ;;  %v1676_v50 = vpack.c.bf16 %v1660_v49, %v1659_v41  ;;  %v2672_v51 = vpack.c.bf16 %v1660_v49, %v1660_v49  ;;  %v1658_v52 = vsel %vm1594_vm6, %v2908_v40, %v1626_v47 }
 0x29b   : > { %1818 = vst.msk [vmem:[%s3305_s23 + $0x70] sm:$0xf] %vm1789_vm4, %v2669_v48  ;;  %v1675_v60 = vpack.c.bf16 %v1658_v52, %v1657_v46  ;;  %v2670_v53 = vpack.c.bf16 %v1658_v52, %v1658_v52 }
 0x29c   : > { %1821 = vst.msk [vmem:[%s3305_s23 + $0x7c] sm:$0xf] %vm1789_vm4, %v2672_v51 }
 0x29d   : > { %1819 = vst.msk [vmem:[%s3305_s23 + $0x74] sm:$0xf] %vm1789_vm4, %v2670_v53  ;;  %2863 = vmatprep.mubr.msk.bf16.mxu1 %vm1861_vm7, %v1675_v60 }
 0x29e   : > { %2864 = vmatmul.mubr.msk.bf16.gmra.mrb[60].mxu1 %vm1861_vm7, %v1676_v50  ;;  %vm2295_vm7 = vcmask 125952  }
 0x339   : > { %v2837_v55 = vpop.f32.mrb[32].mxu1 }
 0x33a   : > { %v1953_v56 = vadd.f32 %v2837_v55, %v3418_v54  ;;  %v1944_v57 = vpop.f32.mrb[33].mxu1 }
 0x33b   : > { %v1945_v58 = vadd.f32 %v3418_v54, %v1944_v57  ;;  %v2838_v59 = vpop.f32.mrb[34].mxu1 }
 0x33c   : > { %vm2073_vm8 = vcmp.ge.f32.partialorder %v1953_v56, 0.0  ;;  %v2105_v61 = vmul.f32 0.01, %v1953_v56  ;;  %v1956_v62 = vadd.f32 %v2838_v59, %v3418_v54  ;;  %v1947_v63 = vpop.f32.mrb[35].mxu1 }
 0x33d   : > { %vm2071_vm4 = vcmp.ge.f32.partialorder %v1945_v58, 0.0  ;;  %v2103_v0 = vmul.f32 0.01, %v1945_v58  ;;  %v1948_v1 = vadd.f32 %v3418_v54, %v1947_v63 }
 0x33e   : > { %v2137_v2 = vsel %vm2073_vm8, %v1953_v56, %v2105_v61  ;;  %vm2074_vm9 = vcmp.ge.f32.partialorder %v1956_v62, 0.0  ;;  %v2106_v43 = vmul.f32 0.01, %v1956_v62 }
 0x33f   : > { %v2675_v3 = vpack.c.bf16 %v2137_v2, %v2137_v2  ;;  %v2135_v4 = vsel %vm2071_vm4, %v1945_v58, %v2103_v0  ;;  %vm2072_vm10 = vcmp.ge.f32.partialorder %v1948_v1, 0.0  ;;  %v2104_v5 = vmul.f32 0.01, %v1948_v1 }
 0x340   : > { %v2673_v6 = vpack.c.bf16 %v2135_v4, %v2135_v4  ;;  %v2138_v7 = vsel %vm2074_vm9, %v1956_v62, %v2106_v43 }
 0x341   : > { %2298 = vst.msk [vmem:[%s3428_s29 + $0x8] sm:$0xf] %vm2295_vm7, %v2675_v3  ;;  %v2676_v8 = vpack.c.bf16 %v2138_v7, %v2138_v7  ;;  %v2136_v9 = vsel %vm2072_vm10, %v1948_v1, %v2104_v5  ;;  %v2841_v10 = vpop.f32.mrb[36].mxu1 }
 0x342   : > { %2296 = vst.msk [vmem:[%s3428_s29] sm:$0xf] %vm2295_vm7, %v2673_v6  ;;  %v2674_v11 = vpack.c.bf16 %v2136_v9, %v2136_v9  ;;  %v1969_v12 = vadd.f32 %v2841_v10, %v3418_v54  ;;  %v1960_v13 = vpop.f32.mrb[37].mxu1 }
 0x343   : > { %2299 = vst.msk [vmem:[%s3428_s29 + $0xc] sm:$0xf] %vm2295_vm7, %v2676_v8  ;;  %v1961_v14 = vadd.f32 %v3418_v54, %v1960_v13  ;;  %v2842_v15 = vpop.f32.mrb[38].mxu1 }
 0x344   : > { %2297 = vst.msk [vmem:[%s3428_s29 + $0x4] sm:$0xf] %vm2295_vm7, %v2674_v11  ;;  %vm2077_vm11 = vcmp.ge.f32.partialorder %v1969_v12, 0.0  ;;  %v2109_v16 = vmul.f32 0.01, %v1969_v12  ;;  %v1972_v17 = vadd.f32 %v2842_v15, %v3418_v54  ;;  %v1963_v18 = vpop.f32.mrb[39].mxu1 }
 0x345   : > { %vm2075_vm12 = vcmp.ge.f32.partialorder %v1961_v14, 0.0  ;;  %v2107_v19 = vmul.f32 0.01, %v1961_v14  ;;  %v1964_v20 = vadd.f32 %v3418_v54, %v1963_v18 }
 0x346   : > { %v2141_v21 = vsel %vm2077_vm11, %v1969_v12, %v2109_v16  ;;  %vm2078_vm13 = vcmp.ge.f32.partialorder %v1972_v17, 0.0  ;;  %v2110_v22 = vmul.f32 0.01, %v1972_v17 }
 0x347   : > { %v2679_v23 = vpack.c.bf16 %v2141_v21, %v2141_v21  ;;  %v2139_v24 = vsel %vm2075_vm12, %v1961_v14, %v2107_v19  ;;  %vm2076_vm14 = vcmp.ge.f32.partialorder %v1964_v20, 0.0  ;;  %v2108_v25 = vmul.f32 0.01, %v1964_v20 }
 0x348   : > { %v2677_v26 = vpack.c.bf16 %v2139_v24, %v2139_v24  ;;  %v2142_v27 = vsel %vm2078_vm13, %v1972_v17, %v2110_v22 }
 0x349   : > { %2302 = vst.msk [vmem:[%s3428_s29 + $0x18] sm:$0xf] %vm2295_vm7, %v2679_v23  ;;  %v2680_v28 = vpack.c.bf16 %v2142_v27, %v2142_v27  ;;  %v2140_v29 = vsel %vm2076_vm14, %v1964_v20, %v2108_v25  ;;  %v2845_v30 = vpop.f32.mrb[40].mxu1 }
 0x34a   : > { %2300 = vst.msk [vmem:[%s3428_s29 + $0x10] sm:$0xf] %vm2295_vm7, %v2677_v26  ;;  %v2678_v31 = vpack.c.bf16 %v2140_v29, %v2140_v29  ;;  %v1985_v32 = vadd.f32 %v2845_v30, %v3418_v54  ;;  %v1976_v33 = vpop.f32.mrb[41].mxu1 }
 0x34b   : > { %2303 = vst.msk [vmem:[%s3428_s29 + $0x1c] sm:$0xf] %vm2295_vm7, %v2680_v28  ;;  %v1977_v34 = vadd.f32 %v3418_v54, %v1976_v33  ;;  %v2846_v44 = vpop.f32.mrb[42].mxu1 }
 0x34c   : > { %2301 = vst.msk [vmem:[%s3428_s29 + $0x14] sm:$0xf] %vm2295_vm7, %v2678_v31  ;;  %vm2081_vm15 = vcmp.ge.f32.partialorder %v1985_v32, 0.0  ;;  %v2113_v35 = vmul.f32 0.01, %v1985_v32  ;;  %v1988_v36 = vadd.f32 %v2846_v44, %v3418_v54  ;;  %v1979_v37 = vpop.f32.mrb[43].mxu1 }
 0x34d   : > { %vm2079_vm1 = vcmp.ge.f32.partialorder %v1977_v34, 0.0  ;;  %v2111_v38 = vmul.f32 0.01, %v1977_v34  ;;  %v1980_v39 = vadd.f32 %v3418_v54, %v1979_v37 }
 0x34e   : > { %v2145_v40 = vsel %vm2081_vm15, %v1985_v32, %v2113_v35  ;;  %vm2082_vm2 = vcmp.ge.f32.partialorder %v1988_v36, 0.0  ;;  %v2114_v41 = vmul.f32 0.01, %v1988_v36 }
 0x34f   : > { %v2683_v42 = vpack.c.bf16 %v2145_v40, %v2145_v40  ;;  %v2143_v45 = vsel %vm2079_vm1, %v1977_v34, %v2111_v38  ;;  %vm2080_vm0 = vcmp.ge.f32.partialorder %v1980_v39, 0.0  ;;  %v2112_v46 = vmul.f32 0.01, %v1980_v39 }
 0x350   : > { %v2681_v47 = vpack.c.bf16 %v2143_v45, %v2143_v45  ;;  %v2146_v48 = vsel %vm2082_vm2, %v1988_v36, %v2114_v41 }
 0x351   : > { %2306 = vst.msk [vmem:[%s3428_s29 + $0x28] sm:$0xf] %vm2295_vm7, %v2683_v42  ;;  %v2684_v49 = vpack.c.bf16 %v2146_v48, %v2146_v48  ;;  %v2144_v50 = vsel %vm2080_vm0, %v1980_v39, %v2112_v46  ;;  %v2849_v51 = vpop.f32.mrb[44].mxu1 }
 0x352   : > { %2304 = vst.msk [vmem:[%s3428_s29 + $0x20] sm:$0xf] %vm2295_vm7, %v2681_v47  ;;  %v2682_v52 = vpack.c.bf16 %v2144_v50, %v2144_v50  ;;  %v2001_v60 = vadd.f32 %v2849_v51, %v3418_v54  ;;  %v1992_v53 = vpop.f32.mrb[45].mxu1 }
 0x353   : > { %2307 = vst.msk [vmem:[%s3428_s29 + $0x2c] sm:$0xf] %vm2295_vm7, %v2684_v49  ;;  %v1993_v55 = vadd.f32 %v3418_v54, %v1992_v53  ;;  %v2850_v56 = vpop.f32.mrb[46].mxu1 }
 0x354   : > { %2305 = vst.msk [vmem:[%s3428_s29 + $0x24] sm:$0xf] %vm2295_vm7, %v2682_v52  ;;  %vm2085_vm3 = vcmp.ge.f32.partialorder %v2001_v60, 0.0  ;;  %v2117_v57 = vmul.f32 0.01, %v2001_v60  ;;  %v2004_v58 = vadd.f32 %v2850_v56, %v3418_v54  ;;  %v1995_v59 = vpop.f32.mrb[47].mxu1 }
 0x355   : > { %vm2083_vm5 = vcmp.ge.f32.partialorder %v1993_v55, 0.0  ;;  %v2115_v61 = vmul.f32 0.01, %v1993_v55  ;;  %v1996_v62 = vadd.f32 %v3418_v54, %v1995_v59 }
 0x356   : > { %v2149_v63 = vsel %vm2085_vm3, %v2001_v60, %v2117_v57  ;;  %vm2086_vm6 = vcmp.ge.f32.partialorder %v2004_v58, 0.0  ;;  %v2118_v0 = vmul.f32 0.01, %v2004_v58 }
 0x357   : > { %v2687_v1 = vpack.c.bf16 %v2149_v63, %v2149_v63  ;;  %v2147_v2 = vsel %vm2083_vm5, %v1993_v55, %v2115_v61  ;;  %vm2084_vm8 = vcmp.ge.f32.partialorder %v1996_v62, 0.0  ;;  %v2116_v43 = vmul.f32 0.01, %v1996_v62 }
 0x358   : > { %v2685_v3 = vpack.c.bf16 %v2147_v2, %v2147_v2  ;;  %v2150_v4 = vsel %vm2086_vm6, %v2004_v58, %v2118_v0 }
 0x359   : > { %2310 = vst.msk [vmem:[%s3428_s29 + $0x38] sm:$0xf] %vm2295_vm7, %v2687_v1  ;;  %v2688_v5 = vpack.c.bf16 %v2150_v4, %v2150_v4  ;;  %v2148_v6 = vsel %vm2084_vm8, %v1996_v62, %v2116_v43  ;;  %v2853_v7 = vpop.f32.mrb[48].mxu1 }
 0x35a   : > { %2308 = vst.msk [vmem:[%s3428_s29 + $0x30] sm:$0xf] %vm2295_vm7, %v2685_v3  ;;  %v2686_v8 = vpack.c.bf16 %v2148_v6, %v2148_v6  ;;  %v2017_v9 = vadd.f32 %v2853_v7, %v3418_v54  ;;  %v2008_v10 = vpop.f32.mrb[49].mxu1 }
 0x35b   : > { %2311 = vst.msk [vmem:[%s3428_s29 + $0x3c] sm:$0xf] %vm2295_vm7, %v2688_v5  ;;  %v2009_v11 = vadd.f32 %v3418_v54, %v2008_v10  ;;  %v2854_v12 = vpop.f32.mrb[50].mxu1 }
 0x35c   : > { %2309 = vst.msk [vmem:[%s3428_s29 + $0x34] sm:$0xf] %vm2295_vm7, %v2686_v8  ;;  %vm2089_vm4 = vcmp.ge.f32.partialorder %v2017_v9, 0.0  ;;  %v2121_v13 = vmul.f32 0.01, %v2017_v9  ;;  %v2020_v14 = vadd.f32 %v2854_v12, %v3418_v54  ;;  %v2011_v15 = vpop.f32.mrb[51].mxu1 }
 0x35d   : > { %vm2087_vm9 = vcmp.ge.f32.partialorder %v2009_v11, 0.0  ;;  %v2119_v16 = vmul.f32 0.01, %v2009_v11  ;;  %v2012_v17 = vadd.f32 %v3418_v54, %v2011_v15 }
 0x35e   : > { %v2153_v18 = vsel %vm2089_vm4, %v2017_v9, %v2121_v13  ;;  %vm2090_vm10 = vcmp.ge.f32.partialorder %v2020_v14, 0.0  ;;  %v2122_v19 = vmul.f32 0.01, %v2020_v14 }
 0x35f   : > { %v2691_v20 = vpack.c.bf16 %v2153_v18, %v2153_v18  ;;  %v2151_v21 = vsel %vm2087_vm9, %v2009_v11, %v2119_v16  ;;  %vm2088_vm11 = vcmp.ge.f32.partialorder %v2012_v17, 0.0  ;;  %v2120_v22 = vmul.f32 0.01, %v2012_v17 }
 0x360   : > { %v2689_v23 = vpack.c.bf16 %v2151_v21, %v2151_v21  ;;  %v2154_v24 = vsel %vm2090_vm10, %v2020_v14, %v2122_v19 }
 0x361   : > { %2314 = vst.msk [vmem:[%s3428_s29 + $0x48] sm:$0xf] %vm2295_vm7, %v2691_v20  ;;  %v2692_v25 = vpack.c.bf16 %v2154_v24, %v2154_v24  ;;  %v2152_v26 = vsel %vm2088_vm11, %v2012_v17, %v2120_v22  ;;  %v2857_v27 = vpop.f32.mrb[52].mxu1 }
 0x362   : > { %2312 = vst.msk [vmem:[%s3428_s29 + $0x40] sm:$0xf] %vm2295_vm7, %v2689_v23  ;;  %v2690_v28 = vpack.c.bf16 %v2152_v26, %v2152_v26  ;;  %v2033_v29 = vadd.f32 %v2857_v27, %v3418_v54  ;;  %v2024_v30 = vpop.f32.mrb[53].mxu1 }
 0x363   : > { %2315 = vst.msk [vmem:[%s3428_s29 + $0x4c] sm:$0xf] %vm2295_vm7, %v2692_v25  ;;  %v2025_v31 = vadd.f32 %v3418_v54, %v2024_v30  ;;  %v2858_v32 = vpop.f32.mrb[54].mxu1 }
 0x364   : > { %2313 = vst.msk [vmem:[%s3428_s29 + $0x44] sm:$0xf] %vm2295_vm7, %v2690_v28  ;;  %vm2093_vm12 = vcmp.ge.f32.partialorder %v2033_v29, 0.0  ;;  %v2125_v33 = vmul.f32 0.01, %v2033_v29  ;;  %v2036_v34 = vadd.f32 %v2858_v32, %v3418_v54  ;;  %v2027_v44 = vpop.f32.mrb[55].mxu1 }
 0x365   : > { %vm2091_vm13 = vcmp.ge.f32.partialorder %v2025_v31, 0.0  ;;  %v2123_v35 = vmul.f32 0.01, %v2025_v31  ;;  %v2028_v36 = vadd.f32 %v3418_v54, %v2027_v44 }
 0x366   : > { %v2157_v37 = vsel %vm2093_vm12, %v2033_v29, %v2125_v33  ;;  %vm2094_vm14 = vcmp.ge.f32.partialorder %v2036_v34, 0.0  ;;  %v2126_v38 = vmul.f32 0.01, %v2036_v34 }
 0x367   : > { %v2695_v39 = vpack.c.bf16 %v2157_v37, %v2157_v37  ;;  %v2155_v40 = vsel %vm2091_vm13, %v2025_v31, %v2123_v35  ;;  %vm2092_vm15 = vcmp.ge.f32.partialorder %v2028_v36, 0.0  ;;  %v2124_v41 = vmul.f32 0.01, %v2028_v36 }
 0x368   : > { %v2693_v42 = vpack.c.bf16 %v2155_v40, %v2155_v40  ;;  %v2158_v45 = vsel %vm2094_vm14, %v2036_v34, %v2126_v38 }
 0x369   : > { %2318 = vst.msk [vmem:[%s3428_s29 + $0x58] sm:$0xf] %vm2295_vm7, %v2695_v39  ;;  %v2696_v46 = vpack.c.bf16 %v2158_v45, %v2158_v45  ;;  %v2156_v47 = vsel %vm2092_vm15, %v2028_v36, %v2124_v41  ;;  %v2861_v48 = vpop.f32.mrb[56].mxu1 }
 0x36a   : > { %2316 = vst.msk [vmem:[%s3428_s29 + $0x50] sm:$0xf] %vm2295_vm7, %v2693_v42  ;;  %v2694_v49 = vpack.c.bf16 %v2156_v47, %v2156_v47  ;;  %v2049_v50 = vadd.f32 %v2861_v48, %v3418_v54  ;;  %v2040_v51 = vpop.f32.mrb[57].mxu1 }
 0x36b   : > { %2319 = vst.msk [vmem:[%s3428_s29 + $0x5c] sm:$0xf] %vm2295_vm7, %v2696_v46  ;;  %v2041_v52 = vadd.f32 %v3418_v54, %v2040_v51  ;;  %v2862_v60 = vpop.f32.mrb[58].mxu1 }
 0x36c   : > { %2317 = vst.msk [vmem:[%s3428_s29 + $0x54] sm:$0xf] %vm2295_vm7, %v2694_v49  ;;  %vm2097_vm1 = vcmp.ge.f32.partialorder %v2049_v50, 0.0  ;;  %v2129_v53 = vmul.f32 0.01, %v2049_v50  ;;  %v2052_v55 = vadd.f32 %v2862_v60, %v3418_v54  ;;  %v2043_v56 = vpop.f32.mrb[59].mxu1 }
 0x36d   : > { %vm2095_vm2 = vcmp.ge.f32.partialorder %v2041_v52, 0.0  ;;  %v2127_v57 = vmul.f32 0.01, %v2041_v52  ;;  %v2044_v58 = vadd.f32 %v3418_v54, %v2043_v56 }
 0x36e   : > { %v2161_v59 = vsel %vm2097_vm1, %v2049_v50, %v2129_v53  ;;  %vm2098_vm0 = vcmp.ge.f32.partialorder %v2052_v55, 0.0  ;;  %v2130_v61 = vmul.f32 0.01, %v2052_v55 }
 0x36f   : > { %v2699_v62 = vpack.c.bf16 %v2161_v59, %v2161_v59  ;;  %v2159_v63 = vsel %vm2095_vm2, %v2041_v52, %v2127_v57  ;;  %vm2096_vm3 = vcmp.ge.f32.partialorder %v2044_v58, 0.0  ;;  %v2128_v0 = vmul.f32 0.01, %v2044_v58 }
 0x370   : > { %v2697_v1 = vpack.c.bf16 %v2159_v63, %v2159_v63  ;;  %v2162_v2 = vsel %vm2098_vm0, %v2052_v55, %v2130_v61 }
 0x371   : > { %2322 = vst.msk [vmem:[%s3428_s29 + $0x68] sm:$0xf] %vm2295_vm7, %v2699_v62  ;;  %v2700_v43 = vpack.c.bf16 %v2162_v2, %v2162_v2  ;;  %v2160_v3 = vsel %vm2096_vm3, %v2044_v58, %v2128_v0  ;;  %v2865_v4 = vpop.f32.mrb[60].mxu1 }
 0x372   : > { %2320 = vst.msk [vmem:[%s3428_s29 + $0x60] sm:$0xf] %vm2295_vm7, %v2697_v1  ;;  %v2698_v5 = vpack.c.bf16 %v2160_v3, %v2160_v3  ;;  %v2065_v6 = vadd.f32 %v2865_v4, %v3418_v54  ;;  %v2056_v7 = vpop.f32.mrb[61].mxu1 }
 0x373   : > { %2323 = vst.msk [vmem:[%s3428_s29 + $0x6c] sm:$0xf] %vm2295_vm7, %v2700_v43  ;;  %v2057_v8 = vadd.f32 %v3418_v54, %v2056_v7  ;;  %v2866_v9 = vpop.f32.mrb[62].mxu1 }
 0x374   : > { %2321 = vst.msk [vmem:[%s3428_s29 + $0x64] sm:$0xf] %vm2295_vm7, %v2698_v5  ;;  %vm2101_vm5 = vcmp.ge.f32.partialorder %v2065_v6, 0.0  ;;  %v2133_v10 = vmul.f32 0.01, %v2065_v6  ;;  %v2068_v11 = vadd.f32 %v2866_v9, %v3418_v54  ;;  %v2059_v12 = vpop.f32.mrb[63].mxu1 }
 0x375   : > { %vm2099_vm6 = vcmp.ge.f32.partialorder %v2057_v8, 0.0  ;;  %v2131_v13 = vmul.f32 0.01, %v2057_v8  ;;  %v2060_v14 = vadd.f32 %v3418_v54, %v2059_v12 }
 0x376   : > { %v2165_v15 = vsel %vm2101_vm5, %v2065_v6, %v2133_v10  ;;  %vm2102_vm8 = vcmp.ge.f32.partialorder %v2068_v11, 0.0  ;;  %v2134_v16 = vmul.f32 0.01, %v2068_v11 }
 0x377   : > { %v2703_v17 = vpack.c.bf16 %v2165_v15, %v2165_v15  ;;  %v2163_v18 = vsel %vm2099_vm6, %v2057_v8, %v2131_v13  ;;  %vm2100_vm4 = vcmp.ge.f32.partialorder %v2060_v14, 0.0  ;;  %v2132_v19 = vmul.f32 0.01, %v2060_v14 }
 0x378   : > { %v2701_v20 = vpack.c.bf16 %v2163_v18, %v2163_v18  ;;  %v2166_v21 = vsel %vm2102_vm8, %v2068_v11, %v2134_v16 }
 0x379   : > { %2326 = vst.msk [vmem:[%s3428_s29 + $0x78] sm:$0xf] %vm2295_vm7, %v2703_v17  ;;  %v2704_v22 = vpack.c.bf16 %v2166_v21, %v2166_v21  ;;  %v2164_v23 = vsel %vm2100_vm4, %v2060_v14, %v2132_v19 }
 0x37a   : > { %2324 = vst.msk [vmem:[%s3428_s29 + $0x70] sm:$0xf] %vm2295_vm7, %v2701_v20  ;;  %v2702_v24 = vpack.c.bf16 %v2164_v23, %v2164_v23 }
 0x37b   : > { %2327 = vst.msk [vmem:[%s3428_s29 + $0x7c] sm:$0xf] %vm2295_vm7, %v2704_v22 }
 0x37c   : > { %2325 = vst.msk [vmem:[%s3428_s29 + $0x74] sm:$0xf] %vm2295_vm7, %v2702_v24 }
 0x37d PF: > { %s21_s13 = sadd.s32 1, %s3027_s13  }
 0x37e   : > { %p18_p4 = scmp.ge.s32.totalorder %s21_s13, 4  }
 0x380   :  { %20 = sbr.rel (!%p18_p4) target bundleno = 1 (0x1), region = 101 }

// kernel: resnet_forward.15
= control target key start
LH: loop header
LB: loop body
LE: loop exit
PB: predicated region body
PF: predicated region fallthrough
CT: control target
= control target key end

     0   :  { %s2700_s30 = smov 0   ;;  %s3117_s0 = inlined_call_operand.vmem [shape: bf16[512,144], index: 0, kind: input, shape index: {}]   ;;  %s3118_s1 = inlined_call_operand.vmem [shape: bf16[512,64], index: 1, kind: input, shape index: {}]   ;;  %s3119_s2 = inlined_call_operand.vmem [shape: bf16[144,16], index: 2, kind: input, shape index: {}]   ;;  %s3120_s3 = inlined_call_operand.vmem [shape: f32[1,16], index: 3, kind: input, shape index: {}]   ;;  %s3121_s4 = inlined_call_operand.vmem [shape: bf16[16,64], index: 4, kind: input, shape index: {}]   ;;  %s3122_s5 = inlined_call_operand.vmem [shape: f32[1,64], index: 5, kind: input, shape index: {}]   ;;  %s3123_s6 = inlined_call_operand.vmem [shape: bf16[64,16], index: 6, kind: input, shape index: {}]   ;;  %s3124_s7 = inlined_call_operand.vmem [shape: f32[1,16], index: 7, kind: input, shape index: {}]   ;;  %s3125_s8 = inlined_call_operand.vmem [shape: bf16[512,64], index: 8, kind: output, shape index: {0}]   ;;  %s3126_s9 = inlined_call_operand.vmem [shape: bf16[512,16], index: 9, kind: output, shape index: {1}]  }
   0x1 LB: > { %s2138_s10 = sadd.s32 4294967295, %s2647_s30   ;;  %p2142_p0 = scmp.ge.s32.totalorder %s2647_s30, 1  ;;  %s2647_s30 = sphi %s2700_s30, %s20_s30  }
   0x2   : > { %p303_p1 = scmp.lt.s32.totalorder %s2647_s30, 3 }
   0x4   : > { %p304_p2 = pnand %p2142_p0, %p303_p1 }
   0x5   : > { %v2579_v0 = vld [vmem:[%s3119_s2] sm:$0xff] (!%p304_p2)   ;;  %v2649_v1 = vmov (!%p304_p2), 0   ;;  %s2143_s13 = sshll.u32 (!%p304_p2), %s2138_s10, 5  ;;  %v2580_v2 = vld [vmem:[%s3119_s2 + $0x8] sm:$0xff] (!%p304_p2)   ;;  %v2581_v3 = vld [vmem:[%s3119_s2 + $0x10] sm:$0xff] (!%p304_p2)   ;;  %vm631_vm0 = vcmask (!%p304_p2), 130048  }
   0x6   : > { %307 = sbr.rel (%p304_p2) target bundleno = 831 (0x33f), region = 52  ;;  %680 = vmatprep.subr.bf16.mxu0 (!%p304_p2), %v2649_v1  ;;  %p351_p3 = scmp.lt.s32.totalorder (!%p304_p2), %s2143_s13, 63  ;;  %v2582_v4 = vld [vmem:[%s3119_s2 + $0x18] sm:$0xff] (!%p304_p2)   ;;  %v2583_v6 = vld [vmem:[%s3119_s2 + $0x20] sm:$0xff] (!%p304_p2)   ;;  %v2584_v7 = vld [vmem:[%s3119_s2 + $0x28] sm:$0xff] (!%p304_p2)  }
   0x7   : > { %681 = vmatpush1.bf16.msra.mxu0 (!%p304_p2), %v2579_v0  ;;  %v2585_v8 = vld [vmem:[%s3119_s2 + $0x30] sm:$0xff] (!%p304_p2)   ;;  %v2586_v9 = vld [vmem:[%s3119_s2 + $0x38] sm:$0xff] (!%p304_p2)   ;;  %v2587_v10 = vld [vmem:[%s3119_s2 + $0x40] sm:$0xff] (!%p304_p2)  }
   0x8   : > { %682 = vmatprep.subr.bf16.mxu0 (!%p304_p2), %v2649_v1  ;;  %v2636_v37 = vld [vmem:[%s3121_s4] sm:$0xff] (!%p304_p2)  }
   0x9   : > { %2496 = vmatprep.subr.bf16.mxu1 (!%p304_p2), %v2636_v37  ;;  %v2797_v43 = vld [vmem:[%s3120_s3] ss:$0 sm:$0xff] (!%p304_p2) }
   0xa   : > { %2497 = vmatpush3.bf16.msra.mxu1 (!%p304_p2), %v2636_v37  ;;  %v2637_v48 = vld [vmem:[%s3123_s6] sm:$0xff] (!%p304_p2)  }
   0xb   : > { %683 = vmatpush1.bf16.msra.mxu0 (!%p304_p2), %v2580_v2  ;;  %2530 = vmatprep.subr.bf16.mxu1 (!%p304_p2), %v2637_v48 }
   0xc   : > { %684 = vmatprep.subr.bf16.mxu0 (!%p304_p2), %v2649_v1 }
   0xd   : > { %s3128_s13 = smov (!%p351_p3, %s2143_s13), 63 }
   0xe   : > { %s2315_s18 = sshll.u32 %s3128_s13, 3  ;;  %s2860_s27 = sshll.u32 %s3128_s13, 2 }
   0xf   : > { %s2723_s21 = scalar_lea.vmem %s3117_s0, %s2315_s18  ;;  %685 = vmatpush1.bf16.msra.mxu0 %v2581_v3  ;;  %s2866_s10 = scalar_lea.vmem %s3118_s1, %s2860_s27 }
  0x10   : > { %v2590_v5 = vld [vmem:[%s2723_s21 + $0x4] ss:$8 sps:$4 sm:$0xff]   ;;  %686 = vmatprep.subr.bf16.mxu0 %v2649_v1  ;;  %v2588_v11 = vld [vmem:[%s2723_s21] ss:$8 sps:$4 sm:$0xff]   ;;  %v2591_v12 = vld [vmem:[%s2723_s21 + $0x14] ss:$8 sps:$4 sm:$0xff]   ;;  %s2883_s15 = scalar_lea.vmem %s3125_s8, %s2860_s27  ;;  %s3020_s20 = scalar_lea.vmem %s3126_s9, %s2860_s27 }
  0x11   : > { %2194 = vmatprep.mubr.msk.bf16.mxu0 %vm631_vm0, %v2590_v5  ;;  %v2593_v13 = vld [vmem:[%s2723_s21 + $0x10] ss:$8 sps:$4 sm:$0xff]   ;;  %v2594_v14 = vld [vmem:[%s2723_s21 + $0x24] ss:$8 sps:$4 sm:$0xff]   ;;  %v2596_v15 = vld [vmem:[%s2723_s21 + $0x20] ss:$8 sps:$4 sm:$0xff]  }
  0x12   : > { %v2597_v16 = vld [vmem:[%s2723_s21 + $0x34] ss:$8 sps:$4 sm:$0xff]   ;;  %v2599_v17 = vld [vmem:[%s2723_s21 + $0x30] ss:$8 sps:$4 sm:$0xff]   ;;  %v2600_v18 = vld [vmem:[%s2723_s21 + $0x44] ss:$8 sps:$4 sm:$0xff]  }
  0x13   : > { %687 = vmatpush1.bf16.msra.mxu0 %v2582_v4  ;;  %v2602_v19 = vld [vmem:[%s2723_s21 + $0x40] ss:$8 sps:$4 sm:$0xff]   ;;  %v2603_v20 = vld [vmem:[%s2723_s21 + $0x54] ss:$8 sps:$4 sm:$0xff]   ;;  %v2605_v21 = vld [vmem:[%s2723_s21 + $0x50] ss:$8 sps:$4 sm:$0xff]  }
  0x14   : > { %688 = vmatprep.subr.bf16.mxu0 %v2649_v1  ;;  %v2606_v22 = vld [vmem:[%s2723_s21 + $0x64] ss:$8 sps:$4 sm:$0xff]   ;;  %v2608_v23 = vld [vmem:[%s2723_s21 + $0x60] ss:$8 sps:$4 sm:$0xff]   ;;  %v2609_v24 = vld [vmem:[%s2723_s21 + $0x74] ss:$8 sps:$4 sm:$0xff]  }
  0x15   : > { %v2611_v25 = vld [vmem:[%s2723_s21 + $0x70] ss:$8 sps:$4 sm:$0xff]   ;;  %v2612_v26 = vld [vmem:[%s2723_s21 + $0x84] ss:$8 sps:$4 sm:$0xff]   ;;  %v2614_v27 = vld [vmem:[%s2723_s21 + $0x80] ss:$8 sps:$4 sm:$0xff]  }
  0x16   : > { %v2615_v28 = vld [vmem:[%s2723_s21 + $0x94] ss:$8 sps:$4 sm:$0xff]   ;;  %v2617_v29 = vld [vmem:[%s2723_s21 + $0x90] ss:$8 sps:$4 sm:$0xff]   ;;  %v2618_v30 = vld [vmem:[%s2723_s21 + $0xa4] ss:$8 sps:$4 sm:$0xff]  }
  0x17   : > { %689 = vmatpush1.bf16.msra.mxu0 %v2583_v6  ;;  %v2620_v31 = vld [vmem:[%s2723_s21 + $0xa0] ss:$8 sps:$4 sm:$0xff]   ;;  %v2621_v32 = vld [vmem:[%s2723_s21 + $0xb4] ss:$8 sps:$4 sm:$0xff]   ;;  %v2623_v33 = vld [vmem:[%s2723_s21 + $0xb0] ss:$8 sps:$4 sm:$0xff]  }
  0x18   : > { %690 = vmatprep.subr.bf16.mxu0 %v2649_v1  ;;  %v2624_v34 = vld [vmem:[%s2723_s21 + $0xc4] ss:$8 sps:$4 sm:$0xff]   ;;  %v2626_v35 = vld [vmem:[%s2723_s21 + $0xc0] ss:$8 sps:$4 sm:$0xff]   ;;  %v2627_v36 = vld [vmem:[%s2723_s21 + $0xd4] ss:$8 sps:$4 sm:$0xff]  }
  0x19   : > { %v2629_v38 = vld [vmem:[%s2723_s21 + $0xd0] ss:$8 sps:$4 sm:$0xff]   ;;  %v2630_v39 = vld [vmem:[%s2723_s21 + $0xe4] ss:$8 sps:$4 sm:$0xff]   ;;  %v2632_v40 = vld [vmem:[%s2723_s21 + $0xe0] ss:$8 sps:$4 sm:$0xff]  }
  0x1a   : > { %v2633_v41 = vld [vmem:[%s2723_s21 + $0xf4] ss:$8 sps:$4 sm:$0xff]   ;;  %v2635_v42 = vld [vmem:[%s2723_s21 + $0xf0] ss:$8 sps:$4 sm:$0xff]  }
  0x1b   : > { %691 = vmatpush1.bf16.msra.mxu0 %v2584_v7 }
  0x1c   : > { %692 = vmatprep.subr.bf16.mxu0 %v2649_v1 }
  0x1f   : > { %693 = vmatpush1.bf16.msra.mxu0 %v2585_v8 }
  0x20   : > { %694 = vmatprep.subr.bf16.mxu0 %v2649_v1 }
  0x23   : > { %695 = vmatpush1.bf16.msra.mxu0 %v2586_v9 }
  0x24   : > { %696 = vmatprep.subr.bf16.mxu0 %v2649_v1 }
  0x27   : > { %697 = vmatpush1.bf16.msra.mxu0 %v2587_v10 }
  0x2a   : > { %713 = vmatmul.mubr.bf16.vlgmr.msra.gmra.mrb[0].mxu0 %v2588_v11 }
  0x2b   : > { %2195 = vmatprep.mubr.msk.bf16.mxu0 %vm631_vm0, %v2591_v12 }
  0x32   : > { %721 = vmatmul.mubr.bf16.gmra.mrb[4].mxu0 %v2593_v13 }
  0x33   : > { %2196 = vmatprep.mubr.msk.bf16.mxu0 %vm631_vm0, %v2594_v14 }
  0x3a   : > { %729 = vmatmul.mubr.bf16.gmra.mrb[8].mxu0 %v2596_v15 }
  0x3b   : > { %2197 = vmatprep.mubr.msk.bf16.mxu0 %vm631_vm0, %v2597_v16 }
  0x42   : > { %737 = vmatmul.mubr.bf16.gmra.mrb[12].mxu0 %v2599_v17 }
  0x43   : > { %2198 = vmatprep.mubr.msk.bf16.mxu0 %vm631_vm0, %v2600_v18 }
  0x4a   : > { %745 = vmatmul.mubr.bf16.gmra.mrb[16].mxu0 %v2602_v19 }
  0x4b   : > { %2199 = vmatprep.mubr.msk.bf16.mxu0 %vm631_vm0, %v2603_v20 }
  0x52   : > { %753 = vmatmul.mubr.bf16.gmra.mrb[20].mxu0 %v2605_v21 }
  0x53   : > { %2200 = vmatprep.mubr.msk.bf16.mxu0 %vm631_vm0, %v2606_v22 }
  0x5a   : > { %761 = vmatmul.mubr.bf16.gmra.mrb[24].mxu0 %v2608_v23 }
  0x5b   : > { %2201 = vmatprep.mubr.msk.bf16.mxu0 %vm631_vm0, %v2609_v24 }
  0x62   : > { %769 = vmatmul.mubr.bf16.gmra.mrb[28].mxu0 %v2611_v25 }
  0x63   : > { %2202 = vmatprep.mubr.msk.bf16.mxu0 %vm631_vm0, %v2612_v26 }
  0x6a   : > { %777 = vmatmul.mubr.bf16.gmra.mrb[32].mxu0 %v2614_v27 }
  0x6b   : > { %2203 = vmatprep.mubr.msk.bf16.mxu0 %vm631_vm0, %v2615_v28 }
  0x72   : > { %785 = vmatmul.mubr.bf16.gmra.mrb[36].mxu0 %v2617_v29 }
  0x73   : > { %2204 = vmatprep.mubr.msk.bf16.mxu0 %vm631_vm0, %v2618_v30 }
  0x7a   : > { %793 = vmatmul.mubr.bf16.gmra.mrb[40].mxu0 %v2620_v31 }
  0x7b   : > { %2205 = vmatprep.mubr.msk.bf16.mxu0 %vm631_vm0, %v2621_v32 }
  0x82   : > { %801 = vmatmul.mubr.bf16.gmra.mrb[44].mxu0 %v2623_v33 }
  0x83   : > { %2206 = vmatprep.mubr.msk.bf16.mxu0 %vm631_vm0, %v2624_v34 }
  0x8a   : > { %809 = vmatmul.mubr.bf16.gmra.mrb[48].mxu0 %v2626_v35 }
  0x8b   : > { %2207 = vmatprep.mubr.msk.bf16.mxu0 %vm631_vm0, %v2627_v36 }
  0x92   : > { %817 = vmatmul.mubr.bf16.gmra.mrb[52].mxu0 %v2629_v38 }
  0x93   : > { %2208 = vmatprep.mubr.msk.bf16.mxu0 %vm631_vm0, %v2630_v39 }
  0x9a   : > { %825 = vmatmul.mubr.bf16.gmra.mrb[56].mxu0 %v2632_v40 }
  0x9b   : > { %2209 = vmatprep.mubr.msk.bf16.mxu0 %vm631_vm0, %v2633_v41 }
  0xa2   : > { %833 = vmatmul.mubr.bf16.gmra.mrb[60].mxu0 %v2635_v42 }
  0xfd   : > { %v714_v44 = vpop.f32.mrb[0].mxu0 }
  0xfe   : > { %v715_v45 = vadd.f32 %v2797_v43, %v714_v44  ;;  %v716_v46 = vpop.f32.mrb[1].mxu0 }
  0xff   : > { %v717_v47 = vpop.f32.mrb[2].mxu0 }
 0x100   : > { %v873_v49 = vmul.f32 0.01, %v715_v45  ;;  %v718_v50 = vadd.f32 %v2797_v43, %v717_v47  ;;  %v719_v51 = vpop.f32.mrb[3].mxu0  ;;  %vm841_vm1 = vcmp.ge.f32.partialorder %v715_v45, 0.0 }
 0x102   : > { %v874_v52 = vmul.f32 0.01, %v718_v50  ;;  %vm842_vm2 = vcmp.ge.f32.partialorder %v718_v50, 0.0  ;;  %v905_v53 = vsel %vm841_vm1, %v715_v45, %v873_v49 }
 0x104   : > { %v906_v54 = vsel %vm842_vm2, %v718_v50, %v874_v52 }
 0x105   : > { %v722_v55 = vpop.f32.mrb[4].mxu0  ;;  %v937_v56 = vpack.c.bf16 %v906_v54, %v905_v53 }
 0x106   : > { %v723_v57 = vadd.f32 %v2797_v43, %v722_v55  ;;  %v724_v58 = vpop.f32.mrb[5].mxu0 }
 0x107   : > { %v725_v59 = vpop.f32.mrb[6].mxu0  ;;  %2498 = vmatprep.mubr.msk.bf16.mxu1 %vm631_vm0, %v937_v56 }
 0x108   : > { %v875_v60 = vmul.f32 0.01, %v723_v57  ;;  %v726_v61 = vadd.f32 %v2797_v43, %v725_v59  ;;  %v727_v62 = vpop.f32.mrb[7].mxu0  ;;  %vm843_vm3 = vcmp.ge.f32.partialorder %v723_v57, 0.0 }
 0x10a   : > { %vm844_vm4 = vcmp.ge.f32.partialorder %v726_v61, 0.0  ;;  %v876_v63 = vmul.f32 0.01, %v726_v61  ;;  %v907_v0 = vsel %vm843_vm3, %v723_v57, %v875_v60 }
 0x10c   : > { %v908_v1 = vsel %vm844_vm4, %v726_v61, %v876_v63 }
 0x10d   : > { %v938_v2 = vpack.c.bf16 %v908_v1, %v907_v0  ;;  %v730_v3 = vpop.f32.mrb[8].mxu0 }
 0x10e   : > { %v731_v4 = vadd.f32 %v2797_v43, %v730_v3  ;;  %v732_v5 = vpop.f32.mrb[9].mxu0 }
 0x10f   : > { %v733_v6 = vpop.f32.mrb[10].mxu0  ;;  %2499 = vmatmul.mubr.msk.bf16.vlgmr.msra.gmra.mrb[0].mxu1 %vm631_vm0, %v938_v2 }
 0x110   : > { %v877_v7 = vmul.f32 0.01, %v731_v4  ;;  %v734_v8 = vadd.f32 %v2797_v43, %v733_v6  ;;  %v735_v9 = vpop.f32.mrb[11].mxu0  ;;  %2531 = vmatpush3.bf16.msra.mxu1 %v2637_v48  ;;  %vm845_vm5 = vcmp.ge.f32.partialorder %v731_v4, 0.0 }
 0x112   : > { %vm846_vm6 = vcmp.ge.f32.partialorder %v734_v8, 0.0  ;;  %v878_v10 = vmul.f32 0.01, %v734_v8  ;;  %v909_v11 = vsel %vm845_vm5, %v731_v4, %v877_v7 }
 0x114   : > { %v910_v12 = vsel %vm846_vm6, %v734_v8, %v878_v10 }
 0x115   : > { %v939_v13 = vpack.c.bf16 %v910_v12, %v909_v11  ;;  %v738_v14 = vpop.f32.mrb[12].mxu0 }
 0x116   : > { %v739_v15 = vadd.f32 %v2797_v43, %v738_v14  ;;  %v740_v16 = vpop.f32.mrb[13].mxu0 }
 0x117   : > { %v741_v17 = vpop.f32.mrb[14].mxu0  ;;  %2502 = vmatprep.mubr.msk.bf16.mxu1 %vm631_vm0, %v939_v13 }
 0x118   : > { %v879_v18 = vmul.f32 0.01, %v739_v15  ;;  %v742_v19 = vadd.f32 %v2797_v43, %v741_v17  ;;  %v743_v20 = vpop.f32.mrb[15].mxu0  ;;  %vm847_vm7 = vcmp.ge.f32.partialorder %v739_v15, 0.0 }
 0x11a   : > { %vm848_vm8 = vcmp.ge.f32.partialorder %v742_v19, 0.0  ;;  %v880_v21 = vmul.f32 0.01, %v742_v19  ;;  %v911_v22 = vsel %vm847_vm7, %v739_v15, %v879_v18 }
 0x11c   : > { %v912_v23 = vsel %vm848_vm8, %v742_v19, %v880_v21 }
 0x11d   : > { %v940_v24 = vpack.c.bf16 %v912_v23, %v911_v22  ;;  %v746_v25 = vpop.f32.mrb[16].mxu0 }
 0x11e   : > { %v747_v26 = vadd.f32 %v2797_v43, %v746_v25  ;;  %v748_v27 = vpop.f32.mrb[17].mxu0 }
 0x11f   : > { %v749_v28 = vpop.f32.mrb[18].mxu0  ;;  %2503 = vmatmul.mubr.msk.bf16.gmra.mrb[4].mxu1 %vm631_vm0, %v940_v24 }
 0x120   : > { %v881_v29 = vmul.f32 0.01, %v747_v26  ;;  %v750_v30 = vadd.f32 %v2797_v43, %v749_v28  ;;  %v751_v31 = vpop.f32.mrb[19].mxu0  ;;  %vm849_vm9 = vcmp.ge.f32.partialorder %v747_v26, 0.0 }
 0x122   : > { %vm850_vm10 = vcmp.ge.f32.partialorder %v750_v30, 0.0  ;;  %v882_v32 = vmul.f32 0.01, %v750_v30  ;;  %v913_v33 = vsel %vm849_vm9, %v747_v26, %v881_v29 }
 0x124   : > { %v914_v34 = vsel %vm850_vm10, %v750_v30, %v882_v32 }
 0x125   : > { %v941_v35 = vpack.c.bf16 %v914_v34, %v913_v33  ;;  %v754_v36 = vpop.f32.mrb[20].mxu0 }
 0x126   : > { %v755_v37 = vadd.f32 %v2797_v43, %v754_v36  ;;  %v756_v38 = vpop.f32.mrb[21].mxu0 }
 0x127   : > { %v757_v39 = vpop.f32.mrb[22].mxu0  ;;  %2506 = vmatprep.mubr.msk.bf16.mxu1 %vm631_vm0, %v941_v35 }
 0x128   : > { %v883_v40 = vmul.f32 0.01, %v755_v37  ;;  %v758_v41 = vadd.f32 %v2797_v43, %v757_v39  ;;  %v759_v42 = vpop.f32.mrb[23].mxu0  ;;  %vm851_vm11 = vcmp.ge.f32.partialorder %v755_v37, 0.0 }
 0x12a   : > { %vm852_vm12 = vcmp.ge.f32.partialorder %v758_v41, 0.0  ;;  %v884_v44 = vmul.f32 0.01, %v758_v41  ;;  %v915_v45 = vsel %vm851_vm11, %v755_v37, %v883_v40 }
 0x12c   : > { %v916_v46 = vsel %vm852_vm12, %v758_v41, %v884_v44 }
 0x12d   : > { %v942_v47 = vpack.c.bf16 %v916_v46, %v915_v45  ;;  %v762_v48 = vpop.f32.mrb[24].mxu0 }
 0x12e   : > { %v763_v49 = vadd.f32 %v2797_v43, %v762_v48  ;;  %v764_v50 = vpop.f32.mrb[25].mxu0 }
 0x12f   : > { %v765_v51 = vpop.f32.mrb[26].mxu0  ;;  %2507 = vmatmul.mubr.msk.bf16.gmra.mrb[8].mxu1 %vm631_vm0, %v942_v47 }
 0x130   : > { %v885_v52 = vmul.f32 0.01, %v763_v49  ;;  %v766_v53 = vadd.f32 %v2797_v43, %v765_v51  ;;  %v767_v54 = vpop.f32.mrb[27].mxu0  ;;  %vm853_vm13 = vcmp.ge.f32.partialorder %v763_v49, 0.0 }
 0x132   : > { %vm854_vm14 = vcmp.ge.f32.partialorder %v766_v53, 0.0  ;;  %v886_v55 = vmul.f32 0.01, %v766_v53  ;;  %v917_v56 = vsel %vm853_vm13, %v763_v49, %v885_v52 }
 0x134   : > { %v918_v57 = vsel %vm854_vm14, %v766_v53, %v886_v55 }
 0x135   : > { %v943_v58 = vpack.c.bf16 %v918_v57, %v917_v56  ;;  %v770_v59 = vpop.f32.mrb[28].mxu0 }
 0x136   : > { %v771_v60 = vadd.f32 %v2797_v43, %v770_v59  ;;  %v772_v61 = vpop.f32.mrb[29].mxu0  ;;  %v2638_v59 = vld [vmem:[%s3123_s6 + $0x8] sm:$0xff]  }
 0x137   : > { %v773_v62 = vpop.f32.mrb[30].mxu0  ;;  %2510 = vmatprep.mubr.msk.bf16.mxu1 %vm631_vm0, %v943_v58  ;;  %2532 = vmatprep.subr.bf16.mxu1 %v2638_v59 }
 0x138   : > { %v887_v63 = vmul.f32 0.01, %v771_v60  ;;  %v774_v0 = vadd.f32 %v2797_v43, %v773_v62  ;;  %v775_v1 = vpop.f32.mrb[31].mxu0  ;;  %vm855_vm15 = vcmp.ge.f32.partialorder %v771_v60, 0.0  ;;  %2533 = vmatpush3.bf16.msra.mxu1 %v2638_v59 }
 0x13a   : > { %vm856_vm1 = vcmp.ge.f32.partialorder %v774_v0, 0.0  ;;  %v888_v2 = vmul.f32 0.01, %v774_v0  ;;  %v919_v3 = vsel %vm855_vm15, %v771_v60, %v887_v63 }
 0x13c   : > { %v920_v4 = vsel %vm856_vm1, %v774_v0, %v888_v2  ;;  %v2639_v2 = vld [vmem:[%s3123_s6 + $0x10] sm:$0xff]  }
 0x13d   : > { %v944_v5 = vpack.c.bf16 %v920_v4, %v919_v3  ;;  %v778_v6 = vpop.f32.mrb[32].mxu0  ;;  %2534 = vmatprep.subr.bf16.mxu1 %v2639_v2 }
 0x13e   : > { %v779_v7 = vadd.f32 %v2797_v43, %v778_v6  ;;  %v780_v8 = vpop.f32.mrb[33].mxu0  ;;  %2535 = vmatpush3.bf16.msra.mxu1 %v2639_v2 }
 0x13f   : > { %v781_v9 = vpop.f32.mrb[34].mxu0  ;;  %2511 = vmatmul.mubr.msk.bf16.gmra.mrb[12].mxu1 %vm631_vm0, %v944_v5  ;;  %v2640_v8 = vld [vmem:[%s3123_s6 + $0x18] sm:$0xff]  }
 0x140   : > { %v889_v10 = vmul.f32 0.01, %v779_v7  ;;  %v782_v11 = vadd.f32 %v2797_v43, %v781_v9  ;;  %v783_v12 = vpop.f32.mrb[35].mxu0  ;;  %vm857_vm2 = vcmp.ge.f32.partialorder %v779_v7, 0.0  ;;  %2536 = vmatprep.subr.bf16.mxu1 %v2640_v8 }
 0x142   : > { %vm858_vm3 = vcmp.ge.f32.partialorder %v782_v11, 0.0  ;;  %v890_v13 = vmul.f32 0.01, %v782_v11  ;;  %v921_v14 = vsel %vm857_vm2, %v779_v7, %v889_v10  ;;  %2537 = vmatpush3.bf16.msra.mxu1 %v2640_v8 }
 0x144   : > { %v922_v15 = vsel %vm858_vm3, %v782_v11, %v890_v13 }
 0x145   : > { %v945_v16 = vpack.c.bf16 %v922_v15, %v921_v14  ;;  %v786_v17 = vpop.f32.mrb[36].mxu0 }
 0x146   : > { %v787_v18 = vadd.f32 %v2797_v43, %v786_v17  ;;  %v788_v19 = vpop.f32.mrb[37].mxu0 }
 0x147   : > { %v789_v20 = vpop.f32.mrb[38].mxu0  ;;  %2514 = vmatprep.mubr.msk.bf16.mxu1 %vm631_vm0, %v945_v16 }
 0x148   : > { %v891_v21 = vmul.f32 0.01, %v787_v18  ;;  %v790_v22 = vadd.f32 %v2797_v43, %v789_v20  ;;  %v791_v23 = vpop.f32.mrb[39].mxu0  ;;  %vm859_vm4 = vcmp.ge.f32.partialorder %v787_v18, 0.0 }
 0x14a   : > { %vm860_vm5 = vcmp.ge.f32.partialorder %v790_v22, 0.0  ;;  %v892_v24 = vmul.f32 0.01, %v790_v22  ;;  %v923_v25 = vsel %vm859_vm4, %v787_v18, %v891_v21  ;;  %vm1497_vm4 = vcmask 519168  }
 0x14c   : > { %v924_v26 = vsel %vm860_vm5, %v790_v22, %v892_v24 }
 0x14d   : > { %v946_v27 = vpack.c.bf16 %v924_v26, %v923_v25  ;;  %v794_v28 = vpop.f32.mrb[40].mxu0 }
 0x14e   : > { %v795_v29 = vadd.f32 %v2797_v43, %v794_v28  ;;  %v796_v30 = vpop.f32.mrb[41].mxu0 }
 0x14f   : > { %v797_v31 = vpop.f32.mrb[42].mxu0  ;;  %2515 = vmatmul.mubr.msk.bf16.gmra.mrb[16].mxu1 %vm631_vm0, %v946_v27 }
 0x150   : > { %v893_v32 = vmul.f32 0.01, %v795_v29  ;;  %v798_v33 = vadd.f32 %v2797_v43, %v797_v31  ;;  %v799_v34 = vpop.f32.mrb[43].mxu0  ;;  %vm861_vm6 = vcmp.ge.f32.partialorder %v795_v29, 0.0 }
 0x151   : > { %v2381_v34 = vld [vmem:[%s2866_s10] sm:$0xff]  }
 0x152   : > { %vm862_vm7 = vcmp.ge.f32.partialorder %v798_v33, 0.0  ;;  %v894_v35 = vmul.f32 0.01, %v798_v33  ;;  %v925_v36 = vsel %vm861_vm6, %v795_v29, %v893_v32 }
 0x154   : > { %v926_v37 = vsel %vm862_vm7, %v798_v33, %v894_v35  ;;  %v2873_v35 = vld [vmem:[%s3122_s5] ss:$0 sm:$0xff]  ;;  %vm1569_vm7 = vcmask 523264  }
 0x155   : > { %v947_v38 = vpack.c.bf16 %v926_v37, %v925_v36  ;;  %v802_v39 = vpop.f32.mrb[44].mxu0 }
 0x156   : > { %v803_v40 = vadd.f32 %v2797_v43, %v802_v39  ;;  %v804_v41 = vpop.f32.mrb[45].mxu0 }
 0x157   : > { %v805_v42 = vpop.f32.mrb[46].mxu0  ;;  %2518 = vmatprep.mubr.msk.bf16.mxu1 %vm631_vm0, %v947_v38  ;;  %v2382_v38 = vunpack.c.l.bf16 %v2381_v34 }
 0x158   : > { %v895_v44 = vmul.f32 0.01, %v803_v40  ;;  %v806_v45 = vadd.f32 %v2797_v43, %v805_v42  ;;  %v807_v46 = vpop.f32.mrb[47].mxu0  ;;  %vm863_vm8 = vcmp.ge.f32.partialorder %v803_v40, 0.0 }
 0x15a   : > { %vm864_vm9 = vcmp.ge.f32.partialorder %v806_v45, 0.0  ;;  %v896_v47 = vmul.f32 0.01, %v806_v45  ;;  %v927_v48 = vsel %vm863_vm8, %v803_v40, %v895_v44 }
 0x15c   : > { %v928_v49 = vsel %vm864_vm9, %v806_v45, %v896_v47  ;;  %v2383_v45 = vunpack.c.h.bf16 %v2381_v34  ;;  %v2448_v34 = vld [vmem:[%s2866_s10 + $0x28] sm:$0xff]  }
 0x15d   : > { %v948_v50 = vpack.c.bf16 %v928_v49, %v927_v48  ;;  %v810_v51 = vpop.f32.mrb[48].mxu0 }
 0x15e   : > { %v811_v52 = vadd.f32 %v2797_v43, %v810_v51  ;;  %v812_v53 = vpop.f32.mrb[49].mxu0 }
 0x15f   : > { %v813_v54 = vpop.f32.mrb[50].mxu0  ;;  %2519 = vmatmul.mubr.msk.bf16.gmra.mrb[20].mxu1 %vm631_vm0, %v948_v50 }
 0x160   : > { %v897_v55 = vmul.f32 0.01, %v811_v52  ;;  %v814_v56 = vadd.f32 %v2797_v43, %v813_v54  ;;  %v815_v57 = vpop.f32.mrb[51].mxu0  ;;  %vm865_vm10 = vcmp.ge.f32.partialorder %v811_v52, 0.0 }
 0x162   : > { %vm866_vm11 = vcmp.ge.f32.partialorder %v814_v56, 0.0  ;;  %v898_v58 = vmul.f32 0.01, %v814_v56  ;;  %v929_v60 = vsel %vm865_vm10, %v811_v52, %v897_v55 }
 0x164   : > { %v930_v61 = vsel %vm866_vm11, %v814_v56, %v898_v58 }
 0x165   : > { %v949_v62 = vpack.c.bf16 %v930_v61, %v929_v60  ;;  %v818_v63 = vpop.f32.mrb[52].mxu0 }
 0x166   : > { %v819_v0 = vadd.f32 %v2797_v43, %v818_v63  ;;  %v820_v1 = vpop.f32.mrb[53].mxu0 }
 0x167   : > { %v821_v3 = vpop.f32.mrb[54].mxu0  ;;  %2522 = vmatprep.mubr.msk.bf16.mxu1 %vm631_vm0, %v949_v62 }
 0x168   : > { %v899_v4 = vmul.f32 0.01, %v819_v0  ;;  %v822_v5 = vadd.f32 %v2797_v43, %v821_v3  ;;  %v823_v6 = vpop.f32.mrb[55].mxu0  ;;  %vm867_vm12 = vcmp.ge.f32.partialorder %v819_v0, 0.0  ;;  %v2446_v3 = vld [vmem:[%s2866_s10 + $0x18] sm:$0xff]  }
 0x16a   : > { %vm868_vm13 = vcmp.ge.f32.partialorder %v822_v5, 0.0  ;;  %v900_v7 = vmul.f32 0.01, %v822_v5  ;;  %v931_v9 = vsel %vm867_vm12, %v819_v0, %v899_v4  ;;  %v2445_v4 = vld [vmem:[%s2866_s10 + $0x10] sm:$0xff]  }
 0x16c   : > { %v932_v10 = vsel %vm868_vm13, %v822_v5, %v900_v7  ;;  %v2394_v5 = vunpack.c.l.bf16 %v2446_v3  ;;  %v2390_v7 = vunpack.c.l.bf16 %v2445_v4 }
 0x16d   : > { %v950_v11 = vpack.c.bf16 %v932_v10, %v931_v9  ;;  %v826_v12 = vpop.f32.mrb[56].mxu0  ;;  %v2395_v10 = vunpack.c.h.bf16 %v2446_v3 }
 0x16e   : > { %v827_v13 = vadd.f32 %v2797_v43, %v826_v12  ;;  %v828_v14 = vpop.f32.mrb[57].mxu0 }
 0x16f   : > { %v829_v15 = vpop.f32.mrb[58].mxu0  ;;  %2523 = vmatmul.mubr.msk.bf16.gmra.mrb[24].mxu1 %vm631_vm0, %v950_v11 }
 0x170   : > { %v901_v16 = vmul.f32 0.01, %v827_v13  ;;  %v830_v17 = vadd.f32 %v2797_v43, %v829_v15  ;;  %v831_v18 = vpop.f32.mrb[59].mxu0  ;;  %vm869_vm14 = vcmp.ge.f32.partialorder %v827_v13, 0.0 }
 0x172   : > { %vm870_vm15 = vcmp.ge.f32.partialorder %v830_v17, 0.0  ;;  %v902_v19 = vmul.f32 0.01, %v830_v17  ;;  %v933_v20 = vsel %vm869_vm14, %v827_v13, %v901_v16  ;;  %v2391_v13 = vunpack.c.h.bf16 %v2445_v4  ;;  %v2450_v4 = vld [vmem:[%s2866_s10 + $0x38] sm:$0xff]  }
 0x174   : > { %v934_v21 = vsel %vm870_vm15, %v830_v17, %v902_v19 }
 0x175   : > { %v951_v22 = vpack.c.bf16 %v934_v21, %v933_v20  ;;  %v834_v23 = vpop.f32.mrb[60].mxu0 }
 0x176   : > { %v835_v24 = vadd.f32 %v2797_v43, %v834_v23  ;;  %v836_v25 = vpop.f32.mrb[61].mxu0 }
 0x177   : > { %v837_v26 = vpop.f32.mrb[62].mxu0  ;;  %2526 = vmatprep.mubr.msk.bf16.mxu1 %vm631_vm0, %v951_v22 }
 0x178   : > { %v903_v27 = vmul.f32 0.01, %v835_v24  ;;  %v838_v28 = vadd.f32 %v2797_v43, %v837_v26  ;;  %v839_v29 = vpop.f32.mrb[63].mxu0  ;;  %vm871_vm1 = vcmp.ge.f32.partialorder %v835_v24, 0.0  ;;  %v2444_v43 = vld [vmem:[%s2866_s10 + $0x8] sm:$0xff]  }
 0x179   : > { %v2386_v36 = vunpack.c.l.bf16 %v2444_v43  ;;  %v2387_v41 = vunpack.c.h.bf16 %v2444_v43 }
 0x17a   : > { %vm872_vm2 = vcmp.ge.f32.partialorder %v838_v28, 0.0  ;;  %v904_v30 = vmul.f32 0.01, %v838_v28  ;;  %v935_v31 = vsel %vm871_vm1, %v835_v24, %v903_v27 }
 0x17c   : > { %v936_v32 = vsel %vm872_vm2, %v838_v28, %v904_v30 }
 0x17d   : > { %v952_v33 = vpack.c.bf16 %v936_v32, %v935_v31 }
 0x17f   : > { %2527 = vmatmul.mubr.msk.bf16.gmra.mrb[28].mxu1 %vm631_vm0, %v952_v33 }
 0x1e2   : > { %v2500_v37 = vpop.f32.mrb[0].mxu1 }
 0x1e3   : > { %v1059_v39 = vadd.f32 %v2500_v37, %v2873_v35  ;;  %v1050_v40 = vpop.f32.mrb[1].mxu1  ;;  %v2402_v37 = vunpack.c.l.bf16 %v2448_v34 }
 0x1e4   : > { %v1051_v42 = vadd.f32 %v2873_v35, %v1050_v40  ;;  %v2501_v44 = vpop.f32.mrb[2].mxu1 }
 0x1e5   : > { %v1243_v46 = vadd.f32 %v2386_v36, %v1059_v39  ;;  %v1062_v47 = vadd.f32 %v2501_v44, %v2873_v35  ;;  %v1053_v48 = vpop.f32.mrb[3].mxu1  ;;  %v2447_v36 = vld [vmem:[%s2866_s10 + $0x20] sm:$0xff]  }
 0x1e6   : > { %v1241_v49 = vadd.f32 %v2382_v38, %v1051_v42  ;;  %v1054_v50 = vadd.f32 %v2873_v35, %v1053_v48  ;;  %v2398_v39 = vunpack.c.l.bf16 %v2447_v36  ;;  %v2403_v42 = vunpack.c.h.bf16 %v2448_v34 }
 0x1e7   : > { %vm1275_vm0 = vcmp.ge.f32.partialorder %v1243_v46, 0.0  ;;  %v1307_v51 = vmul.f32 0.01, %v1243_v46  ;;  %v1244_v52 = vadd.f32 %v2387_v41, %v1062_v47 }
 0x1e8   : > { %vm1273_vm3 = vcmp.ge.f32.partialorder %v1241_v49, 0.0  ;;  %v1305_v53 = vmul.f32 0.01, %v1241_v49  ;;  %v1242_v54 = vadd.f32 %v2383_v45, %v1054_v50 }
 0x1e9   : > { %v1339_v55 = vsel %vm1275_vm0, %v1243_v46, %v1307_v51  ;;  %vm1276_vm5 = vcmp.ge.f32.partialorder %v1244_v52, 0.0  ;;  %v1308_v56 = vmul.f32 0.01, %v1244_v52  ;;  %v2399_v46 = vunpack.c.h.bf16 %v2447_v36  ;;  %v2452_v36 = vld [vmem:[%s2866_s10 + $0x48] sm:$0xff]  }
 0x1ea   : > { %v2318_v57 = vpack.c.bf16 %v1339_v55, %v1339_v55  ;;  %v1337_v58 = vsel %vm1273_vm3, %v1241_v49, %v1305_v53  ;;  %vm1274_vm6 = vcmp.ge.f32.partialorder %v1242_v54, 0.0  ;;  %v1306_v59 = vmul.f32 0.01, %v1242_v54 }
 0x1eb   : > { %v2316_v60 = vpack.c.bf16 %v1337_v58, %v1337_v58  ;;  %v1340_v61 = vsel %vm1276_vm5, %v1244_v52, %v1308_v56 }
 0x1ec   : > { %1500 = vst.msk [vmem:[%s2883_s15 + $0x8] sm:$0xf] %vm1497_vm4, %v2318_v57  ;;  %v1370_v62 = vpack.c.bf16 %v1340_v61, %v1339_v55  ;;  %v2319_v63 = vpack.c.bf16 %v1340_v61, %v1340_v61  ;;  %v1338_v0 = vsel %vm1274_vm6, %v1242_v54, %v1306_v59 }
 0x1ed   : > { %1498 = vst.msk [vmem:[%s2883_s15] sm:$0xf] %vm1497_vm4, %v2316_v60  ;;  %v2317_v1 = vpack.c.bf16 %v1338_v0, %v1338_v0  ;;  %v1369_v2 = vpack.c.bf16 %v1338_v0, %v1337_v58 }
 0x1ee   : > { %1501 = vst.msk [vmem:[%s2883_s15 + $0xc] sm:$0xf] %vm1497_vm4, %v2319_v63 }
 0x1ef   : > { %1499 = vst.msk [vmem:[%s2883_s15 + $0x4] sm:$0xf] %vm1497_vm4, %v2317_v1  ;;  %2538 = vmatprep.mubr.msk.bf16.mxu1 %vm1569_vm7, %v1369_v2 }
 0x1f0   : > { %2539 = vmatmul.mubr.msk.bf16.vlgmr.msra.gmra.mrb[32].mxu1 %vm1569_vm7, %v1370_v62 }
 0x1f2   : > { %v2504_v6 = vpop.f32.mrb[4].mxu1 }
 0x1f3   : > { %v1075_v8 = vadd.f32 %v2504_v6, %v2873_v35  ;;  %v1066_v9 = vpop.f32.mrb[5].mxu1  ;;  %v2410_v6 = vunpack.c.l.bf16 %v2450_v4 }
 0x1f4   : > { %v1067_v11 = vadd.f32 %v2873_v35, %v1066_v9  ;;  %v2505_v12 = vpop.f32.mrb[6].mxu1 }
 0x1f5   : > { %v1247_v14 = vadd.f32 %v2394_v5, %v1075_v8  ;;  %v1078_v15 = vadd.f32 %v2505_v12, %v2873_v35  ;;  %v1069_v16 = vpop.f32.mrb[7].mxu1  ;;  %v2449_v5 = vld [vmem:[%s2866_s10 + $0x30] sm:$0xff]  }
 0x1f6   : > { %v1245_v17 = vadd.f32 %v2390_v7, %v1067_v11  ;;  %v1070_v18 = vadd.f32 %v2873_v35, %v1069_v16  ;;  %v2406_v8 = vunpack.c.l.bf16 %v2449_v5  ;;  %v2411_v11 = vunpack.c.h.bf16 %v2450_v4 }
 0x1f7   : > { %vm1279_vm8 = vcmp.ge.f32.partialorder %v1247_v14, 0.0  ;;  %v1311_v19 = vmul.f32 0.01, %v1247_v14  ;;  %v1248_v20 = vadd.f32 %v2395_v10, %v1078_v15 }
 0x1f8   : > { %vm1277_vm9 = vcmp.ge.f32.partialorder %v1245_v17, 0.0  ;;  %v1309_v21 = vmul.f32 0.01, %v1245_v17  ;;  %v1246_v22 = vadd.f32 %v2391_v13, %v1070_v18 }
 0x1f9   : > { %v1343_v23 = vsel %vm1279_vm8, %v1247_v14, %v1311_v19  ;;  %vm1280_vm10 = vcmp.ge.f32.partialorder %v1248_v20, 0.0  ;;  %v1312_v24 = vmul.f32 0.01, %v1248_v20  ;;  %v2407_v14 = vunpack.c.h.bf16 %v2449_v5  ;;  %v2454_v5 = vld [vmem:[%s2866_s10 + $0x58] sm:$0xff]  }
 0x1fa   : > { %v2322_v25 = vpack.c.bf16 %v1343_v23, %v1343_v23  ;;  %v1341_v26 = vsel %vm1277_vm9, %v1245_v17, %v1309_v21  ;;  %vm1278_vm11 = vcmp.ge.f32.partialorder %v1246_v22, 0.0  ;;  %v1310_v27 = vmul.f32 0.01, %v1246_v22 }
 0x1fb   : > { %v2320_v28 = vpack.c.bf16 %v1341_v26, %v1341_v26  ;;  %v1344_v29 = vsel %vm1280_vm10, %v1248_v20, %v1312_v24 }
 0x1fc   : > { %1504 = vst.msk [vmem:[%s2883_s15 + $0x18] sm:$0xf] %vm1497_vm4, %v2322_v25  ;;  %v2323_v30 = vpack.c.bf16 %v1344_v29, %v1344_v29  ;;  %v1342_v31 = vsel %vm1278_vm11, %v1246_v22, %v1310_v27  ;;  %v1372_v32 = vpack.c.bf16 %v1344_v29, %v1343_v23 }
 0x1fd   : > { %1502 = vst.msk [vmem:[%s2883_s15 + $0x10] sm:$0xf] %vm1497_vm4, %v2320_v28  ;;  %v2321_v33 = vpack.c.bf16 %v1342_v31, %v1342_v31  ;;  %v1371_v43 = vpack.c.bf16 %v1342_v31, %v1341_v26 }
 0x1fe   : > { %1505 = vst.msk [vmem:[%s2883_s15 + $0x1c] sm:$0xf] %vm1497_vm4, %v2323_v30 }
 0x1ff   : > { %1503 = vst.msk [vmem:[%s2883_s15 + $0x14] sm:$0xf] %vm1497_vm4, %v2321_v33  ;;  %2542 = vmatprep.mubr.msk.bf16.mxu1 %vm1569_vm7, %v1371_v43 }
 0x200   : > { %2543 = vmatmul.mubr.msk.bf16.gmra.mrb[36].mxu1 %vm1569_vm7, %v1372_v32 }
 0x202   : > { %v2508_v38 = vpop.f32.mrb[8].mxu1 }
 0x203   : > { %v1091_v40 = vadd.f32 %v2508_v38, %v2873_v35  ;;  %v1082_v41 = vpop.f32.mrb[9].mxu1  ;;  %v2418_v38 = vunpack.c.l.bf16 %v2452_v36 }
 0x204   : > { %v1083_v44 = vadd.f32 %v2873_v35, %v1082_v41  ;;  %v2509_v45 = vpop.f32.mrb[10].mxu1 }
 0x205   : > { %v1251_v47 = vadd.f32 %v2402_v37, %v1091_v40  ;;  %v1094_v48 = vadd.f32 %v2509_v45, %v2873_v35  ;;  %v1085_v49 = vpop.f32.mrb[11].mxu1  ;;  %v2451_v37 = vld [vmem:[%s2866_s10 + $0x40] sm:$0xff]  }
 0x206   : > { %v1249_v50 = vadd.f32 %v2398_v39, %v1083_v44  ;;  %v1086_v51 = vadd.f32 %v2873_v35, %v1085_v49  ;;  %v2414_v40 = vunpack.c.l.bf16 %v2451_v37  ;;  %v2419_v44 = vunpack.c.h.bf16 %v2452_v36 }
 0x207   : > { %vm1283_vm12 = vcmp.ge.f32.partialorder %v1251_v47, 0.0  ;;  %v1315_v52 = vmul.f32 0.01, %v1251_v47  ;;  %v1252_v53 = vadd.f32 %v2403_v42, %v1094_v48 }
 0x208   : > { %vm1281_vm13 = vcmp.ge.f32.partialorder %v1249_v50, 0.0  ;;  %v1313_v54 = vmul.f32 0.01, %v1249_v50  ;;  %v1250_v55 = vadd.f32 %v2399_v46, %v1086_v51 }
 0x209   : > { %v1347_v56 = vsel %vm1283_vm12, %v1251_v47, %v1315_v52  ;;  %vm1284_vm14 = vcmp.ge.f32.partialorder %v1252_v53, 0.0  ;;  %v1316_v57 = vmul.f32 0.01, %v1252_v53  ;;  %v2415_v47 = vunpack.c.h.bf16 %v2451_v37  ;;  %v2456_v37 = vld [vmem:[%s2866_s10 + $0x68] sm:$0xff]  }
 0x20a   : > { %v2326_v58 = vpack.c.bf16 %v1347_v56, %v1347_v56  ;;  %v1345_v59 = vsel %vm1281_vm13, %v1249_v50, %v1313_v54  ;;  %vm1282_vm15 = vcmp.ge.f32.partialorder %v1250_v55, 0.0  ;;  %v1314_v60 = vmul.f32 0.01, %v1250_v55 }
 0x20b   : > { %v2324_v61 = vpack.c.bf16 %v1345_v59, %v1345_v59  ;;  %v1348_v62 = vsel %vm1284_vm14, %v1252_v53, %v1316_v57 }
 0x20c   : > { %1508 = vst.msk [vmem:[%s2883_s15 + $0x28] sm:$0xf] %vm1497_vm4, %v2326_v58  ;;  %v2327_v63 = vpack.c.bf16 %v1348_v62, %v1348_v62  ;;  %v1346_v0 = vsel %vm1282_vm15, %v1250_v55, %v1314_v60  ;;  %v1374_v1 = vpack.c.bf16 %v1348_v62, %v1347_v56 }
 0x20d   : > { %1506 = vst.msk [vmem:[%s2883_s15 + $0x20] sm:$0xf] %vm1497_vm4, %v2324_v61  ;;  %v2325_v2 = vpack.c.bf16 %v1346_v0, %v1346_v0  ;;  %v1373_v3 = vpack.c.bf16 %v1346_v0, %v1345_v59 }
 0x20e   : > { %1509 = vst.msk [vmem:[%s2883_s15 + $0x2c] sm:$0xf] %vm1497_vm4, %v2327_v63 }
 0x20f   : > { %1507 = vst.msk [vmem:[%s2883_s15 + $0x24] sm:$0xf] %vm1497_vm4, %v2325_v2  ;;  %2546 = vmatprep.mubr.msk.bf16.mxu1 %vm1569_vm7, %v1373_v3 }
 0x210   : > { %2547 = vmatmul.mubr.msk.bf16.gmra.mrb[40].mxu1 %vm1569_vm7, %v1374_v1 }
 0x212   : > { %v2512_v7 = vpop.f32.mrb[12].mxu1 }
 0x213   : > { %v1107_v9 = vadd.f32 %v2512_v7, %v2873_v35  ;;  %v1098_v10 = vpop.f32.mrb[13].mxu1  ;;  %v2426_v7 = vunpack.c.l.bf16 %v2454_v5 }
 0x214   : > { %v1099_v12 = vadd.f32 %v2873_v35, %v1098_v10  ;;  %v2513_v13 = vpop.f32.mrb[14].mxu1 }
 0x215   : > { %v1255_v15 = vadd.f32 %v2410_v6, %v1107_v9  ;;  %v1110_v16 = vadd.f32 %v2513_v13, %v2873_v35  ;;  %v1101_v17 = vpop.f32.mrb[15].mxu1  ;;  %v2453_v6 = vld [vmem:[%s2866_s10 + $0x50] sm:$0xff]  }
 0x216   : > { %v1253_v18 = vadd.f32 %v2406_v8, %v1099_v12  ;;  %v1102_v19 = vadd.f32 %v2873_v35, %v1101_v17  ;;  %v2422_v9 = vunpack.c.l.bf16 %v2453_v6  ;;  %v2427_v12 = vunpack.c.h.bf16 %v2454_v5 }
 0x217   : > { %vm1287_vm1 = vcmp.ge.f32.partialorder %v1255_v15, 0.0  ;;  %v1319_v20 = vmul.f32 0.01, %v1255_v15  ;;  %v1256_v21 = vadd.f32 %v2411_v11, %v1110_v16 }
 0x218   : > { %vm1285_vm2 = vcmp.ge.f32.partialorder %v1253_v18, 0.0  ;;  %v1317_v22 = vmul.f32 0.01, %v1253_v18  ;;  %v1254_v23 = vadd.f32 %v2407_v14, %v1102_v19 }
 0x219   : > { %v1351_v24 = vsel %vm1287_vm1, %v1255_v15, %v1319_v20  ;;  %vm1288_vm0 = vcmp.ge.f32.partialorder %v1256_v21, 0.0  ;;  %v1320_v25 = vmul.f32 0.01, %v1256_v21  ;;  %v2423_v15 = vunpack.c.h.bf16 %v2453_v6  ;;  %v2458_v6 = vld [vmem:[%s2866_s10 + $0x78] sm:$0xff]  }
 0x21a   : > { %v2330_v26 = vpack.c.bf16 %v1351_v24, %v1351_v24  ;;  %v1349_v27 = vsel %vm1285_vm2, %v1253_v18, %v1317_v22  ;;  %vm1286_vm3 = vcmp.ge.f32.partialorder %v1254_v23, 0.0  ;;  %v1318_v28 = vmul.f32 0.01, %v1254_v23 }
 0x21b   : > { %v2328_v29 = vpack.c.bf16 %v1349_v27, %v1349_v27  ;;  %v1352_v30 = vsel %vm1288_vm0, %v1256_v21, %v1320_v25 }
 0x21c   : > { %1512 = vst.msk [vmem:[%s2883_s15 + $0x38] sm:$0xf] %vm1497_vm4, %v2330_v26  ;;  %v2331_v31 = vpack.c.bf16 %v1352_v30, %v1352_v30  ;;  %v1350_v32 = vsel %vm1286_vm3, %v1254_v23, %v1318_v28  ;;  %v1376_v33 = vpack.c.bf16 %v1352_v30, %v1351_v24 }
 0x21d   : > { %1510 = vst.msk [vmem:[%s2883_s15 + $0x30] sm:$0xf] %vm1497_vm4, %v2328_v29  ;;  %v2329_v43 = vpack.c.bf16 %v1350_v32, %v1350_v32  ;;  %v1375_v34 = vpack.c.bf16 %v1350_v32, %v1349_v27 }
 0x21e   : > { %1513 = vst.msk [vmem:[%s2883_s15 + $0x3c] sm:$0xf] %vm1497_vm4, %v2331_v31 }
 0x21f   : > { %1511 = vst.msk [vmem:[%s2883_s15 + $0x34] sm:$0xf] %vm1497_vm4, %v2329_v43  ;;  %2550 = vmatprep.mubr.msk.bf16.mxu1 %vm1569_vm7, %v1375_v34 }
 0x220   : > { %2551 = vmatmul.mubr.msk.bf16.gmra.mrb[44].mxu1 %vm1569_vm7, %v1376_v33 }
 0x222   : > { %v2516_v39 = vpop.f32.mrb[16].mxu1 }
 0x223   : > { %v1123_v41 = vadd.f32 %v2516_v39, %v2873_v35  ;;  %v1114_v42 = vpop.f32.mrb[17].mxu1  ;;  %v2434_v39 = vunpack.c.l.bf16 %v2456_v37 }
 0x224   : > { %v1115_v45 = vadd.f32 %v2873_v35, %v1114_v42  ;;  %v2517_v46 = vpop.f32.mrb[18].mxu1 }
 0x225   : > { %v1259_v48 = vadd.f32 %v2418_v38, %v1123_v41  ;;  %v1126_v49 = vadd.f32 %v2517_v46, %v2873_v35  ;;  %v1117_v50 = vpop.f32.mrb[19].mxu1  ;;  %v2455_v38 = vld [vmem:[%s2866_s10 + $0x60] sm:$0xff]  }
 0x226   : > { %v1257_v51 = vadd.f32 %v2414_v40, %v1115_v45  ;;  %v1118_v52 = vadd.f32 %v2873_v35, %v1117_v50  ;;  %v2430_v41 = vunpack.c.l.bf16 %v2455_v38  ;;  %v2435_v45 = vunpack.c.h.bf16 %v2456_v37  ;;  %v3010_v37 = vld [vmem:[%s3124_s7] ss:$0 sm:$0xff] }
 0x227   : > { %vm1291_vm5 = vcmp.ge.f32.partialorder %v1259_v48, 0.0  ;;  %v1323_v53 = vmul.f32 0.01, %v1259_v48  ;;  %v1260_v54 = vadd.f32 %v2419_v44, %v1126_v49 }
 0x228   : > { %vm1289_vm6 = vcmp.ge.f32.partialorder %v1257_v51, 0.0  ;;  %v1321_v55 = vmul.f32 0.01, %v1257_v51  ;;  %v1258_v56 = vadd.f32 %v2415_v47, %v1118_v52 }
 0x229   : > { %v1355_v57 = vsel %vm1291_vm5, %v1259_v48, %v1323_v53  ;;  %vm1292_vm8 = vcmp.ge.f32.partialorder %v1260_v54, 0.0  ;;  %v1324_v58 = vmul.f32 0.01, %v1260_v54  ;;  %v2431_v48 = vunpack.c.h.bf16 %v2455_v38 }
 0x22a   : > { %v2334_v59 = vpack.c.bf16 %v1355_v57, %v1355_v57  ;;  %v1353_v60 = vsel %vm1289_vm6, %v1257_v51, %v1321_v55  ;;  %vm1290_vm9 = vcmp.ge.f32.partialorder %v1258_v56, 0.0  ;;  %v1322_v61 = vmul.f32 0.01, %v1258_v56 }
 0x22b   : > { %v2332_v62 = vpack.c.bf16 %v1353_v60, %v1353_v60  ;;  %v1356_v63 = vsel %vm1292_vm8, %v1260_v54, %v1324_v58 }
 0x22c   : > { %1516 = vst.msk [vmem:[%s2883_s15 + $0x48] sm:$0xf] %vm1497_vm4, %v2334_v59  ;;  %v2335_v0 = vpack.c.bf16 %v1356_v63, %v1356_v63  ;;  %v1354_v1 = vsel %vm1290_vm9, %v1258_v56, %v1322_v61  ;;  %v1378_v2 = vpack.c.bf16 %v1356_v63, %v1355_v57 }
 0x22d   : > { %1514 = vst.msk [vmem:[%s2883_s15 + $0x40] sm:$0xf] %vm1497_vm4, %v2332_v62  ;;  %v2333_v3 = vpack.c.bf16 %v1354_v1, %v1354_v1  ;;  %v1377_v4 = vpack.c.bf16 %v1354_v1, %v1353_v60 }
 0x22e   : > { %1517 = vst.msk [vmem:[%s2883_s15 + $0x4c] sm:$0xf] %vm1497_vm4, %v2335_v0 }
 0x22f   : > { %1515 = vst.msk [vmem:[%s2883_s15 + $0x44] sm:$0xf] %vm1497_vm4, %v2333_v3  ;;  %2554 = vmatprep.mubr.msk.bf16.mxu1 %vm1569_vm7, %v1377_v4 }
 0x230   : > { %2555 = vmatmul.mubr.msk.bf16.gmra.mrb[48].mxu1 %vm1569_vm7, %v1378_v2 }
 0x232   : > { %v2520_v8 = vpop.f32.mrb[20].mxu1 }
 0x233   : > { %v1139_v10 = vadd.f32 %v2520_v8, %v2873_v35  ;;  %v1130_v11 = vpop.f32.mrb[21].mxu1  ;;  %v2442_v8 = vunpack.c.l.bf16 %v2458_v6 }
 0x234   : > { %v1131_v13 = vadd.f32 %v2873_v35, %v1130_v11  ;;  %v2521_v14 = vpop.f32.mrb[22].mxu1 }
 0x235   : > { %v1263_v16 = vadd.f32 %v2426_v7, %v1139_v10  ;;  %v1142_v17 = vadd.f32 %v2521_v14, %v2873_v35  ;;  %v1133_v18 = vpop.f32.mrb[23].mxu1  ;;  %v2457_v7 = vld [vmem:[%s2866_s10 + $0x70] sm:$0xff]  }
 0x236   : > { %v1261_v19 = vadd.f32 %v2422_v9, %v1131_v13  ;;  %v1134_v20 = vadd.f32 %v2873_v35, %v1133_v18  ;;  %v2438_v10 = vunpack.c.l.bf16 %v2457_v7  ;;  %v2443_v13 = vunpack.c.h.bf16 %v2458_v6 }
 0x237   : > { %vm1295_vm10 = vcmp.ge.f32.partialorder %v1263_v16, 0.0  ;;  %v1327_v21 = vmul.f32 0.01, %v1263_v16  ;;  %v1264_v22 = vadd.f32 %v2427_v12, %v1142_v17 }
 0x238   : > { %vm1293_vm11 = vcmp.ge.f32.partialorder %v1261_v19, 0.0  ;;  %v1325_v23 = vmul.f32 0.01, %v1261_v19  ;;  %v1262_v24 = vadd.f32 %v2423_v15, %v1134_v20 }
 0x239   : > { %v1359_v25 = vsel %vm1295_vm10, %v1263_v16, %v1327_v21  ;;  %vm1296_vm12 = vcmp.ge.f32.partialorder %v1264_v22, 0.0  ;;  %v1328_v26 = vmul.f32 0.01, %v1264_v22  ;;  %v2439_v16 = vunpack.c.h.bf16 %v2457_v7 }
 0x23a   : > { %v2338_v27 = vpack.c.bf16 %v1359_v25, %v1359_v25  ;;  %v1357_v28 = vsel %vm1293_vm11, %v1261_v19, %v1325_v23  ;;  %vm1294_vm13 = vcmp.ge.f32.partialorder %v1262_v24, 0.0  ;;  %v1326_v29 = vmul.f32 0.01, %v1262_v24 }
 0x23b   : > { %v2336_v30 = vpack.c.bf16 %v1357_v28, %v1357_v28  ;;  %v1360_v31 = vsel %vm1296_vm12, %v1264_v22, %v1328_v26 }
 0x23c   : > { %1520 = vst.msk [vmem:[%s2883_s15 + $0x58] sm:$0xf] %vm1497_vm4, %v2338_v27  ;;  %v2339_v32 = vpack.c.bf16 %v1360_v31, %v1360_v31  ;;  %v1358_v33 = vsel %vm1294_vm13, %v1262_v24, %v1326_v29  ;;  %v1380_v43 = vpack.c.bf16 %v1360_v31, %v1359_v25 }
 0x23d   : > { %1518 = vst.msk [vmem:[%s2883_s15 + $0x50] sm:$0xf] %vm1497_vm4, %v2336_v30  ;;  %v2337_v34 = vpack.c.bf16 %v1358_v33, %v1358_v33  ;;  %v1379_v36 = vpack.c.bf16 %v1358_v33, %v1357_v28 }
 0x23e   : > { %1521 = vst.msk [vmem:[%s2883_s15 + $0x5c] sm:$0xf] %vm1497_vm4, %v2339_v32 }
 0x23f   : > { %1519 = vst.msk [vmem:[%s2883_s15 + $0x54] sm:$0xf] %vm1497_vm4, %v2337_v34  ;;  %2558 = vmatprep.mubr.msk.bf16.mxu1 %vm1569_vm7, %v1379_v36 }
 0x240   : > { %2559 = vmatmul.mubr.msk.bf16.gmra.mrb[52].mxu1 %vm1569_vm7, %v1380_v43 }
 0x242   : > { %v2524_v40 = vpop.f32.mrb[24].mxu1 }
 0x243   : > { %v1155_v42 = vadd.f32 %v2524_v40, %v2873_v35  ;;  %v1146_v44 = vpop.f32.mrb[25].mxu1 }
 0x244   : > { %v1147_v46 = vadd.f32 %v2873_v35, %v1146_v44  ;;  %v2525_v47 = vpop.f32.mrb[26].mxu1 }
 0x245   : > { %v1267_v49 = vadd.f32 %v2434_v39, %v1155_v42  ;;  %v1158_v50 = vadd.f32 %v2525_v47, %v2873_v35  ;;  %v1149_v51 = vpop.f32.mrb[27].mxu1 }
 0x246   : > { %v1265_v52 = vadd.f32 %v2430_v41, %v1147_v46  ;;  %v1150_v53 = vadd.f32 %v2873_v35, %v1149_v51 }
 0x247   : > { %vm1299_vm14 = vcmp.ge.f32.partialorder %v1267_v49, 0.0  ;;  %v1331_v54 = vmul.f32 0.01, %v1267_v49  ;;  %v1268_v55 = vadd.f32 %v2435_v45, %v1158_v50 }
 0x248   : > { %vm1297_vm15 = vcmp.ge.f32.partialorder %v1265_v52, 0.0  ;;  %v1329_v56 = vmul.f32 0.01, %v1265_v52  ;;  %v1266_v57 = vadd.f32 %v2431_v48, %v1150_v53 }
 0x249   : > { %v1363_v58 = vsel %vm1299_vm14, %v1267_v49, %v1331_v54  ;;  %vm1300_vm1 = vcmp.ge.f32.partialorder %v1268_v55, 0.0  ;;  %v1332_v59 = vmul.f32 0.01, %v1268_v55 }
 0x24a   : > { %v2342_v60 = vpack.c.bf16 %v1363_v58, %v1363_v58  ;;  %v1361_v61 = vsel %vm1297_vm15, %v1265_v52, %v1329_v56  ;;  %vm1298_vm2 = vcmp.ge.f32.partialorder %v1266_v57, 0.0  ;;  %v1330_v62 = vmul.f32 0.01, %v1266_v57 }
 0x24b   : > { %v2340_v63 = vpack.c.bf16 %v1361_v61, %v1361_v61  ;;  %v1364_v0 = vsel %vm1300_vm1, %v1268_v55, %v1332_v59 }
 0x24c   : > { %1524 = vst.msk [vmem:[%s2883_s15 + $0x68] sm:$0xf] %vm1497_vm4, %v2342_v60  ;;  %v2343_v1 = vpack.c.bf16 %v1364_v0, %v1364_v0  ;;  %v1362_v2 = vsel %vm1298_vm2, %v1266_v57, %v1330_v62  ;;  %v1382_v3 = vpack.c.bf16 %v1364_v0, %v1363_v58 }
 0x24d   : > { %1522 = vst.msk [vmem:[%s2883_s15 + $0x60] sm:$0xf] %vm1497_vm4, %v2340_v63  ;;  %v2341_v4 = vpack.c.bf16 %v1362_v2, %v1362_v2  ;;  %v1381_v5 = vpack.c.bf16 %v1362_v2, %v1361_v61 }
 0x24e   : > { %1525 = vst.msk [vmem:[%s2883_s15 + $0x6c] sm:$0xf] %vm1497_vm4, %v2343_v1 }
 0x24f   : > { %1523 = vst.msk [vmem:[%s2883_s15 + $0x64] sm:$0xf] %vm1497_vm4, %v2341_v4  ;;  %2562 = vmatprep.mubr.msk.bf16.mxu1 %vm1569_vm7, %v1381_v5 }
 0x250   : > { %2563 = vmatmul.mubr.msk.bf16.gmra.mrb[56].mxu1 %vm1569_vm7, %v1382_v3 }
 0x252   : > { %v2528_v9 = vpop.f32.mrb[28].mxu1 }
 0x253   : > { %v1171_v11 = vadd.f32 %v2528_v9, %v2873_v35  ;;  %v1162_v12 = vpop.f32.mrb[29].mxu1 }
 0x254   : > { %v1163_v14 = vadd.f32 %v2873_v35, %v1162_v12  ;;  %v2529_v15 = vpop.f32.mrb[30].mxu1 }
 0x255   : > { %v1271_v17 = vadd.f32 %v2442_v8, %v1171_v11  ;;  %v1174_v18 = vadd.f32 %v2529_v15, %v2873_v35  ;;  %v1165_v19 = vpop.f32.mrb[31].mxu1 }
 0x256   : > { %v1269_v20 = vadd.f32 %v2438_v10, %v1163_v14  ;;  %v1166_v21 = vadd.f32 %v2873_v35, %v1165_v19 }
 0x257   : > { %vm1303_vm0 = vcmp.ge.f32.partialorder %v1271_v17, 0.0  ;;  %v1335_v22 = vmul.f32 0.01, %v1271_v17  ;;  %v1272_v23 = vadd.f32 %v2443_v13, %v1174_v18 }
 0x258   : > { %vm1301_vm3 = vcmp.ge.f32.partialorder %v1269_v20, 0.0  ;;  %v1333_v24 = vmul.f32 0.01, %v1269_v20  ;;  %v1270_v25 = vadd.f32 %v2439_v16, %v1166_v21 }
 0x259   : > { %v1367_v26 = vsel %vm1303_vm0, %v1271_v17, %v1335_v22  ;;  %vm1304_vm5 = vcmp.ge.f32.partialorder %v1272_v23, 0.0  ;;  %v1336_v27 = vmul.f32 0.01, %v1272_v23 }
 0x25a   : > { %v2346_v28 = vpack.c.bf16 %v1367_v26, %v1367_v26  ;;  %v1365_v29 = vsel %vm1301_vm3, %v1269_v20, %v1333_v24  ;;  %vm1302_vm6 = vcmp.ge.f32.partialorder %v1270_v25, 0.0  ;;  %v1334_v30 = vmul.f32 0.01, %v1270_v25 }
 0x25b   : > { %v2344_v31 = vpack.c.bf16 %v1365_v29, %v1365_v29  ;;  %v1368_v32 = vsel %vm1304_vm5, %v1272_v23, %v1336_v27 }
 0x25c   : > { %1528 = vst.msk [vmem:[%s2883_s15 + $0x78] sm:$0xf] %vm1497_vm4, %v2346_v28  ;;  %v2347_v35 = vpack.c.bf16 %v1368_v32, %v1368_v32  ;;  %v1366_v33 = vsel %vm1302_vm6, %v1270_v25, %v1334_v30  ;;  %v1384_v43 = vpack.c.bf16 %v1368_v32, %v1367_v26 }
 0x25d   : > { %1526 = vst.msk [vmem:[%s2883_s15 + $0x70] sm:$0xf] %vm1497_vm4, %v2344_v31  ;;  %v2345_v34 = vpack.c.bf16 %v1366_v33, %v1366_v33  ;;  %v1383_v36 = vpack.c.bf16 %v1366_v33, %v1365_v29 }
 0x25e   : > { %1529 = vst.msk [vmem:[%s2883_s15 + $0x7c] sm:$0xf] %vm1497_vm4, %v2347_v35 }
 0x25f   : > { %1527 = vst.msk [vmem:[%s2883_s15 + $0x74] sm:$0xf] %vm1497_vm4, %v2345_v34  ;;  %2566 = vmatprep.mubr.msk.bf16.mxu1 %vm1569_vm7, %v1383_v36 }
 0x260   : > { %2567 = vmatmul.mubr.msk.bf16.gmra.mrb[60].mxu1 %vm1569_vm7, %v1384_v43  ;;  %vm2003_vm7 = vcmask 125952  }
 0x2c3   : > { %v2540_v38 = vpop.f32.mrb[32].mxu1 }
 0x2c4   : > { %v1661_v39 = vadd.f32 %v2540_v38, %v3010_v37  ;;  %v1652_v40 = vpop.f32.mrb[33].mxu1 }
 0x2c5   : > { %v1653_v41 = vadd.f32 %v3010_v37, %v1652_v40  ;;  %v2541_v42 = vpop.f32.mrb[34].mxu1 }
 0x2c6   : > { %vm1781_vm8 = vcmp.ge.f32.partialorder %v1661_v39, 0.0  ;;  %v1813_v44 = vmul.f32 0.01, %v1661_v39  ;;  %v1664_v45 = vadd.f32 %v2541_v42, %v3010_v37  ;;  %v1655_v46 = vpop.f32.mrb[35].mxu1 }
 0x2c7   : > { %vm1779_vm4 = vcmp.ge.f32.partialorder %v1653_v41, 0.0  ;;  %v1811_v47 = vmul.f32 0.01, %v1653_v41  ;;  %v1656_v48 = vadd.f32 %v3010_v37, %v1655_v46 }
 0x2c8   : > { %v1845_v49 = vsel %vm1781_vm8, %v1661_v39, %v1813_v44  ;;  %vm1782_vm9 = vcmp.ge.f32.partialorder %v1664_v45, 0.0  ;;  %v1814_v50 = vmul.f32 0.01, %v1664_v45 }
 0x2c9   : > { %v2350_v51 = vpack.c.bf16 %v1845_v49, %v1845_v49  ;;  %v1843_v52 = vsel %vm1779_vm4, %v1653_v41, %v1811_v47  ;;  %vm1780_vm10 = vcmp.ge.f32.partialorder %v1656_v48, 0.0  ;;  %v1812_v53 = vmul.f32 0.01, %v1656_v48 }
 0x2ca   : > { %v2348_v54 = vpack.c.bf16 %v1843_v52, %v1843_v52  ;;  %v1846_v55 = vsel %vm1782_vm9, %v1664_v45, %v1814_v50 }
 0x2cb   : > { %2006 = vst.msk [vmem:[%s3020_s20 + $0x8] sm:$0xf] %vm2003_vm7, %v2350_v51  ;;  %v2351_v56 = vpack.c.bf16 %v1846_v55, %v1846_v55  ;;  %v1844_v57 = vsel %vm1780_vm10, %v1656_v48, %v1812_v53 }
 0x2cc   : > { %2004 = vst.msk [vmem:[%s3020_s20] sm:$0xf] %vm2003_vm7, %v2348_v54  ;;  %v2349_v58 = vpack.c.bf16 %v1844_v57, %v1844_v57 }
 0x2cd   : > { %2007 = vst.msk [vmem:[%s3020_s20 + $0xc] sm:$0xf] %vm2003_vm7, %v2351_v56 }
 0x2ce   : > { %2005 = vst.msk [vmem:[%s3020_s20 + $0x4] sm:$0xf] %vm2003_vm7, %v2349_v58 }
 0x2d3   : > { %v2544_v59 = vpop.f32.mrb[36].mxu1 }
 0x2d4   : > { %v1677_v60 = vadd.f32 %v2544_v59, %v3010_v37  ;;  %v1668_v61 = vpop.f32.mrb[37].mxu1 }
 0x2d5   : > { %v1669_v62 = vadd.f32 %v3010_v37, %v1668_v61  ;;  %v2545_v63 = vpop.f32.mrb[38].mxu1 }
 0x2d6   : > { %vm1785_vm11 = vcmp.ge.f32.partialorder %v1677_v60, 0.0  ;;  %v1817_v0 = vmul.f32 0.01, %v1677_v60  ;;  %v1680_v1 = vadd.f32 %v2545_v63, %v3010_v37  ;;  %v1671_v2 = vpop.f32.mrb[39].mxu1 }
 0x2d7   : > { %vm1783_vm12 = vcmp.ge.f32.partialorder %v1669_v62, 0.0  ;;  %v1815_v3 = vmul.f32 0.01, %v1669_v62  ;;  %v1672_v4 = vadd.f32 %v3010_v37, %v1671_v2 }
 0x2d8   : > { %v1849_v5 = vsel %vm1785_vm11, %v1677_v60, %v1817_v0  ;;  %vm1786_vm13 = vcmp.ge.f32.partialorder %v1680_v1, 0.0  ;;  %v1818_v6 = vmul.f32 0.01, %v1680_v1 }
 0x2d9   : > { %v2354_v7 = vpack.c.bf16 %v1849_v5, %v1849_v5  ;;  %v1847_v8 = vsel %vm1783_vm12, %v1669_v62, %v1815_v3  ;;  %vm1784_vm14 = vcmp.ge.f32.partialorder %v1672_v4, 0.0  ;;  %v1816_v9 = vmul.f32 0.01, %v1672_v4 }
 0x2da   : > { %v2352_v10 = vpack.c.bf16 %v1847_v8, %v1847_v8  ;;  %v1850_v11 = vsel %vm1786_vm13, %v1680_v1, %v1818_v6 }
 0x2db   : > { %2010 = vst.msk [vmem:[%s3020_s20 + $0x18] sm:$0xf] %vm2003_vm7, %v2354_v7  ;;  %v2355_v12 = vpack.c.bf16 %v1850_v11, %v1850_v11  ;;  %v1848_v13 = vsel %vm1784_vm14, %v1672_v4, %v1816_v9 }
 0x2dc   : > { %2008 = vst.msk [vmem:[%s3020_s20 + $0x10] sm:$0xf] %vm2003_vm7, %v2352_v10  ;;  %v2353_v14 = vpack.c.bf16 %v1848_v13, %v1848_v13 }
 0x2dd   : > { %2011 = vst.msk [vmem:[%s3020_s20 + $0x1c] sm:$0xf] %vm2003_vm7, %v2355_v12 }
 0x2de   : > { %2009 = vst.msk [vmem:[%s3020_s20 + $0x14] sm:$0xf] %vm2003_vm7, %v2353_v14 }
 0x2e3   : > { %v2548_v15 = vpop.f32.mrb[40].mxu1 }
 0x2e4   : > { %v1693_v16 = vadd.f32 %v2548_v15, %v3010_v37  ;;  %v1684_v17 = vpop.f32.mrb[41].mxu1 }
 0x2e5   : > { %v1685_v18 = vadd.f32 %v3010_v37, %v1684_v17  ;;  %v2549_v19 = vpop.f32.mrb[42].mxu1 }
 0x2e6   : > { %vm1789_vm15 = vcmp.ge.f32.partialorder %v1693_v16, 0.0  ;;  %v1821_v20 = vmul.f32 0.01, %v1693_v16  ;;  %v1696_v21 = vadd.f32 %v2549_v19, %v3010_v37  ;;  %v1687_v22 = vpop.f32.mrb[43].mxu1 }
 0x2e7   : > { %vm1787_vm1 = vcmp.ge.f32.partialorder %v1685_v18, 0.0  ;;  %v1819_v23 = vmul.f32 0.01, %v1685_v18  ;;  %v1688_v24 = vadd.f32 %v3010_v37, %v1687_v22 }
 0x2e8   : > { %v1853_v25 = vsel %vm1789_vm15, %v1693_v16, %v1821_v20  ;;  %vm1790_vm2 = vcmp.ge.f32.partialorder %v1696_v21, 0.0  ;;  %v1822_v26 = vmul.f32 0.01, %v1696_v21 }
 0x2e9   : > { %v2358_v27 = vpack.c.bf16 %v1853_v25, %v1853_v25  ;;  %v1851_v28 = vsel %vm1787_vm1, %v1685_v18, %v1819_v23  ;;  %vm1788_vm0 = vcmp.ge.f32.partialorder %v1688_v24, 0.0  ;;  %v1820_v29 = vmul.f32 0.01, %v1688_v24 }
 0x2ea   : > { %v2356_v30 = vpack.c.bf16 %v1851_v28, %v1851_v28  ;;  %v1854_v31 = vsel %vm1790_vm2, %v1696_v21, %v1822_v26 }
 0x2eb   : > { %2014 = vst.msk [vmem:[%s3020_s20 + $0x28] sm:$0xf] %vm2003_vm7, %v2358_v27  ;;  %v2359_v32 = vpack.c.bf16 %v1854_v31, %v1854_v31  ;;  %v1852_v35 = vsel %vm1788_vm0, %v1688_v24, %v1820_v29 }
 0x2ec   : > { %2012 = vst.msk [vmem:[%s3020_s20 + $0x20] sm:$0xf] %vm2003_vm7, %v2356_v30  ;;  %v2357_v33 = vpack.c.bf16 %v1852_v35, %v1852_v35 }
 0x2ed   : > { %2015 = vst.msk [vmem:[%s3020_s20 + $0x2c] sm:$0xf] %vm2003_vm7, %v2359_v32 }
 0x2ee   : > { %2013 = vst.msk [vmem:[%s3020_s20 + $0x24] sm:$0xf] %vm2003_vm7, %v2357_v33 }
 0x2f3   : > { %v2552_v43 = vpop.f32.mrb[44].mxu1 }
 0x2f4   : > { %v1709_v34 = vadd.f32 %v2552_v43, %v3010_v37  ;;  %v1700_v36 = vpop.f32.mrb[45].mxu1 }
 0x2f5   : > { %v1701_v38 = vadd.f32 %v3010_v37, %v1700_v36  ;;  %v2553_v39 = vpop.f32.mrb[46].mxu1 }
 0x2f6   : > { %vm1793_vm3 = vcmp.ge.f32.partialorder %v1709_v34, 0.0  ;;  %v1825_v40 = vmul.f32 0.01, %v1709_v34  ;;  %v1712_v41 = vadd.f32 %v2553_v39, %v3010_v37  ;;  %v1703_v42 = vpop.f32.mrb[47].mxu1 }
 0x2f7   : > { %vm1791_vm5 = vcmp.ge.f32.partialorder %v1701_v38, 0.0  ;;  %v1823_v44 = vmul.f32 0.01, %v1701_v38  ;;  %v1704_v45 = vadd.f32 %v3010_v37, %v1703_v42 }
 0x2f8   : > { %v1857_v46 = vsel %vm1793_vm3, %v1709_v34, %v1825_v40  ;;  %vm1794_vm6 = vcmp.ge.f32.partialorder %v1712_v41, 0.0  ;;  %v1826_v47 = vmul.f32 0.01, %v1712_v41 }
 0x2f9   : > { %v2362_v48 = vpack.c.bf16 %v1857_v46, %v1857_v46  ;;  %v1855_v49 = vsel %vm1791_vm5, %v1701_v38, %v1823_v44  ;;  %vm1792_vm8 = vcmp.ge.f32.partialorder %v1704_v45, 0.0  ;;  %v1824_v50 = vmul.f32 0.01, %v1704_v45 }
 0x2fa   : > { %v2360_v51 = vpack.c.bf16 %v1855_v49, %v1855_v49  ;;  %v1858_v52 = vsel %vm1794_vm6, %v1712_v41, %v1826_v47 }
 0x2fb   : > { %2018 = vst.msk [vmem:[%s3020_s20 + $0x38] sm:$0xf] %vm2003_vm7, %v2362_v48  ;;  %v2363_v53 = vpack.c.bf16 %v1858_v52, %v1858_v52  ;;  %v1856_v54 = vsel %vm1792_vm8, %v1704_v45, %v1824_v50 }
 0x2fc   : > { %2016 = vst.msk [vmem:[%s3020_s20 + $0x30] sm:$0xf] %vm2003_vm7, %v2360_v51  ;;  %v2361_v55 = vpack.c.bf16 %v1856_v54, %v1856_v54 }
 0x2fd   : > { %2019 = vst.msk [vmem:[%s3020_s20 + $0x3c] sm:$0xf] %vm2003_vm7, %v2363_v53 }
 0x2fe   : > { %2017 = vst.msk [vmem:[%s3020_s20 + $0x34] sm:$0xf] %vm2003_vm7, %v2361_v55 }
 0x303   : > { %v2556_v56 = vpop.f32.mrb[48].mxu1 }
 0x304   : > { %v1725_v57 = vadd.f32 %v2556_v56, %v3010_v37  ;;  %v1716_v58 = vpop.f32.mrb[49].mxu1 }
 0x305   : > { %v1717_v59 = vadd.f32 %v3010_v37, %v1716_v58  ;;  %v2557_v60 = vpop.f32.mrb[50].mxu1 }
 0x306   : > { %vm1797_vm4 = vcmp.ge.f32.partialorder %v1725_v57, 0.0  ;;  %v1829_v61 = vmul.f32 0.01, %v1725_v57  ;;  %v1728_v62 = vadd.f32 %v2557_v60, %v3010_v37  ;;  %v1719_v63 = vpop.f32.mrb[51].mxu1 }
 0x307   : > { %vm1795_vm9 = vcmp.ge.f32.partialorder %v1717_v59, 0.0  ;;  %v1827_v0 = vmul.f32 0.01, %v1717_v59  ;;  %v1720_v1 = vadd.f32 %v3010_v37, %v1719_v63 }
 0x308   : > { %v1861_v2 = vsel %vm1797_vm4, %v1725_v57, %v1829_v61  ;;  %vm1798_vm10 = vcmp.ge.f32.partialorder %v1728_v62, 0.0  ;;  %v1830_v3 = vmul.f32 0.01, %v1728_v62 }
 0x309   : > { %v2366_v4 = vpack.c.bf16 %v1861_v2, %v1861_v2  ;;  %v1859_v5 = vsel %vm1795_vm9, %v1717_v59, %v1827_v0  ;;  %vm1796_vm11 = vcmp.ge.f32.partialorder %v1720_v1, 0.0  ;;  %v1828_v6 = vmul.f32 0.01, %v1720_v1 }
 0x30a   : > { %v2364_v7 = vpack.c.bf16 %v1859_v5, %v1859_v5  ;;  %v1862_v8 = vsel %vm1798_vm10, %v1728_v62, %v1830_v3 }
 0x30b   : > { %2022 = vst.msk [vmem:[%s3020_s20 + $0x48] sm:$0xf] %vm2003_vm7, %v2366_v4  ;;  %v2367_v9 = vpack.c.bf16 %v1862_v8, %v1862_v8  ;;  %v1860_v10 = vsel %vm1796_vm11, %v1720_v1, %v1828_v6 }
 0x30c   : > { %2020 = vst.msk [vmem:[%s3020_s20 + $0x40] sm:$0xf] %vm2003_vm7, %v2364_v7  ;;  %v2365_v11 = vpack.c.bf16 %v1860_v10, %v1860_v10 }
 0x30d   : > { %2023 = vst.msk [vmem:[%s3020_s20 + $0x4c] sm:$0xf] %vm2003_vm7, %v2367_v9 }
 0x30e   : > { %2021 = vst.msk [vmem:[%s3020_s20 + $0x44] sm:$0xf] %vm2003_vm7, %v2365_v11 }
 0x313   : > { %v2560_v12 = vpop.f32.mrb[52].mxu1 }
 0x314   : > { %v1741_v13 = vadd.f32 %v2560_v12, %v3010_v37  ;;  %v1732_v14 = vpop.f32.mrb[53].mxu1 }
 0x315   : > { %v1733_v15 = vadd.f32 %v3010_v37, %v1732_v14  ;;  %v2561_v16 = vpop.f32.mrb[54].mxu1 }
 0x316   : > { %vm1801_vm12 = vcmp.ge.f32.partialorder %v1741_v13, 0.0  ;;  %v1833_v17 = vmul.f32 0.01, %v1741_v13  ;;  %v1744_v18 = vadd.f32 %v2561_v16, %v3010_v37  ;;  %v1735_v19 = vpop.f32.mrb[55].mxu1 }
 0x317   : > { %vm1799_vm13 = vcmp.ge.f32.partialorder %v1733_v15, 0.0  ;;  %v1831_v20 = vmul.f32 0.01, %v1733_v15  ;;  %v1736_v21 = vadd.f32 %v3010_v37, %v1735_v19 }
 0x318   : > { %v1865_v22 = vsel %vm1801_vm12, %v1741_v13, %v1833_v17  ;;  %vm1802_vm14 = vcmp.ge.f32.partialorder %v1744_v18, 0.0  ;;  %v1834_v23 = vmul.f32 0.01, %v1744_v18 }
 0x319   : > { %v2370_v24 = vpack.c.bf16 %v1865_v22, %v1865_v22  ;;  %v1863_v25 = vsel %vm1799_vm13, %v1733_v15, %v1831_v20  ;;  %vm1800_vm15 = vcmp.ge.f32.partialorder %v1736_v21, 0.0  ;;  %v1832_v26 = vmul.f32 0.01, %v1736_v21 }
 0x31a   : > { %v2368_v27 = vpack.c.bf16 %v1863_v25, %v1863_v25  ;;  %v1866_v28 = vsel %vm1802_vm14, %v1744_v18, %v1834_v23 }
 0x31b   : > { %2026 = vst.msk [vmem:[%s3020_s20 + $0x58] sm:$0xf] %vm2003_vm7, %v2370_v24  ;;  %v2371_v29 = vpack.c.bf16 %v1866_v28, %v1866_v28  ;;  %v1864_v30 = vsel %vm1800_vm15, %v1736_v21, %v1832_v26 }
 0x31c   : > { %2024 = vst.msk [vmem:[%s3020_s20 + $0x50] sm:$0xf] %vm2003_vm7, %v2368_v27  ;;  %v2369_v31 = vpack.c.bf16 %v1864_v30, %v1864_v30 }
 0x31d   : > { %2027 = vst.msk [vmem:[%s3020_s20 + $0x5c] sm:$0xf] %vm2003_vm7, %v2371_v29 }
 0x31e   : > { %2025 = vst.msk [vmem:[%s3020_s20 + $0x54] sm:$0xf] %vm2003_vm7, %v2369_v31 }
 0x323   : > { %v2564_v32 = vpop.f32.mrb[56].mxu1 }
 0x324   : > { %v1757_v35 = vadd.f32 %v2564_v32, %v3010_v37  ;;  %v1748_v33 = vpop.f32.mrb[57].mxu1 }
 0x325   : > { %v1749_v43 = vadd.f32 %v3010_v37, %v1748_v33  ;;  %v2565_v34 = vpop.f32.mrb[58].mxu1 }
 0x326   : > { %vm1805_vm1 = vcmp.ge.f32.partialorder %v1757_v35, 0.0  ;;  %v1837_v36 = vmul.f32 0.01, %v1757_v35  ;;  %v1760_v38 = vadd.f32 %v2565_v34, %v3010_v37  ;;  %v1751_v39 = vpop.f32.mrb[59].mxu1 }
 0x327   : > { %vm1803_vm2 = vcmp.ge.f32.partialorder %v1749_v43, 0.0  ;;  %v1835_v40 = vmul.f32 0.01, %v1749_v43  ;;  %v1752_v41 = vadd.f32 %v3010_v37, %v1751_v39 }
 0x328   : > { %v1869_v42 = vsel %vm1805_vm1, %v1757_v35, %v1837_v36  ;;  %vm1806_vm0 = vcmp.ge.f32.partialorder %v1760_v38, 0.0  ;;  %v1838_v44 = vmul.f32 0.01, %v1760_v38 }
 0x329   : > { %v2374_v45 = vpack.c.bf16 %v1869_v42, %v1869_v42  ;;  %v1867_v46 = vsel %vm1803_vm2, %v1749_v43, %v1835_v40  ;;  %vm1804_vm3 = vcmp.ge.f32.partialorder %v1752_v41, 0.0  ;;  %v1836_v47 = vmul.f32 0.01, %v1752_v41 }
 0x32a   : > { %v2372_v48 = vpack.c.bf16 %v1867_v46, %v1867_v46  ;;  %v1870_v49 = vsel %vm1806_vm0, %v1760_v38, %v1838_v44 }
 0x32b   : > { %2030 = vst.msk [vmem:[%s3020_s20 + $0x68] sm:$0xf] %vm2003_vm7, %v2374_v45  ;;  %v2375_v50 = vpack.c.bf16 %v1870_v49, %v1870_v49  ;;  %v1868_v51 = vsel %vm1804_vm3, %v1752_v41, %v1836_v47 }
 0x32c   : > { %2028 = vst.msk [vmem:[%s3020_s20 + $0x60] sm:$0xf] %vm2003_vm7, %v2372_v48  ;;  %v2373_v52 = vpack.c.bf16 %v1868_v51, %v1868_v51 }
 0x32d   : > { %2031 = vst.msk [vmem:[%s3020_s20 + $0x6c] sm:$0xf] %vm2003_vm7, %v2375_v50 }
 0x32e   : > { %2029 = vst.msk [vmem:[%s3020_s20 + $0x64] sm:$0xf] %vm2003_vm7, %v2373_v52 }
 0x333   : > { %v2568_v53 = vpop.f32.mrb[60].mxu1 }
 0x334   : > { %v1773_v54 = vadd.f32 %v2568_v53, %v3010_v37  ;;  %v1764_v55 = vpop.f32.mrb[61].mxu1 }
 0x335   : > { %v1765_v56 = vadd.f32 %v3010_v37, %v1764_v55  ;;  %v2569_v57 = vpop.f32.mrb[62].mxu1 }
 0x336   : > { %vm1809_vm5 = vcmp.ge.f32.partialorder %v1773_v54, 0.0  ;;  %v1841_v58 = vmul.f32 0.01, %v1773_v54  ;;  %v1776_v59 = vadd.f32 %v2569_v57, %v3010_v37  ;;  %v1767_v60 = vpop.f32.mrb[63].mxu1 }
 0x337   : > { %vm1807_vm6 = vcmp.ge.f32.partialorder %v1765_v56, 0.0  ;;  %v1839_v61 = vmul.f32 0.01, %v1765_v56  ;;  %v1768_v62 = vadd.f32 %v3010_v37, %v1767_v60 }
 0x338   : > { %v1873_v63 = vsel %vm1809_vm5, %v1773_v54, %v1841_v58  ;;  %vm1810_vm8 = vcmp.ge.f32.partialorder %v1776_v59, 0.0  ;;  %v1842_v0 = vmul.f32 0.01, %v1776_v59 }
 0x339   : > { %v2378_v1 = vpack.c.bf16 %v1873_v63, %v1873_v63  ;;  %v1871_v2 = vsel %vm1807_vm6, %v1765_v56, %v1839_v61  ;;  %vm1808_vm4 = vcmp.ge.f32.partialorder %v1768_v62, 0.0  ;;  %v1840_v3 = vmul.f32 0.01, %v1768_v62 }
 0x33a   : > { %v2376_v4 = vpack.c.bf16 %v1871_v2, %v1871_v2  ;;  %v1874_v5 = vsel %vm1810_vm8, %v1776_v59, %v1842_v0 }
 0x33b   : > { %2034 = vst.msk [vmem:[%s3020_s20 + $0x78] sm:$0xf] %vm2003_vm7, %v2378_v1  ;;  %v2379_v6 = vpack.c.bf16 %v1874_v5, %v1874_v5  ;;  %v1872_v7 = vsel %vm1808_vm4, %v1768_v62, %v1840_v3 }
 0x33c   : > { %2032 = vst.msk [vmem:[%s3020_s20 + $0x70] sm:$0xf] %vm2003_vm7, %v2376_v4  ;;  %v2377_v8 = vpack.c.bf16 %v1872_v7, %v1872_v7 }
 0x33d   : > { %2035 = vst.msk [vmem:[%s3020_s20 + $0x7c] sm:$0xf] %vm2003_vm7, %v2379_v6 }
 0x33e   : > { %2033 = vst.msk [vmem:[%s3020_s20 + $0x74] sm:$0xf] %vm2003_vm7, %v2377_v8 }
 0x33f PF: > { %s20_s30 = sadd.s32 1, %s2647_s30  }
 0x340   : > { %p17_p4 = scmp.ge.s32.totalorder %s20_s30, 4  }
 0x342   :  { %19 = sbr.rel (!%p17_p4) target bundleno = 1 (0x1), region = 97 }

// kernel: resnet_forward.17
= control target key start
LH: loop header
LB: loop body
LE: loop exit
PB: predicated region body
PF: predicated region fallthrough
CT: control target
= control target key end

     0   :  { %s2700_s30 = smov 0   ;;  %s3117_s0 = inlined_call_operand.vmem [shape: bf16[512,144], index: 0, kind: input, shape index: {}]   ;;  %s3118_s1 = inlined_call_operand.vmem [shape: bf16[512,64], index: 1, kind: input, shape index: {}]   ;;  %s3119_s2 = inlined_call_operand.vmem [shape: bf16[144,16], index: 2, kind: input, shape index: {}]   ;;  %s3120_s3 = inlined_call_operand.vmem [shape: f32[1,16], index: 3, kind: input, shape index: {}]   ;;  %s3121_s4 = inlined_call_operand.vmem [shape: bf16[16,64], index: 4, kind: input, shape index: {}]   ;;  %s3122_s5 = inlined_call_operand.vmem [shape: f32[1,64], index: 5, kind: input, shape index: {}]   ;;  %s3123_s6 = inlined_call_operand.vmem [shape: bf16[64,32], index: 6, kind: input, shape index: {}]   ;;  %s3124_s7 = inlined_call_operand.vmem [shape: f32[1,32], index: 7, kind: input, shape index: {}]   ;;  %s3125_s8 = inlined_call_operand.vmem [shape: bf16[512,64], index: 8, kind: output, shape index: {0}]   ;;  %s3126_s9 = inlined_call_operand.vmem [shape: bf16[512,32], index: 9, kind: output, shape index: {1}]  }
   0x1 LB: > { %s2138_s10 = sadd.s32 4294967295, %s2647_s30   ;;  %p2142_p0 = scmp.ge.s32.totalorder %s2647_s30, 1  ;;  %s2647_s30 = sphi %s2700_s30, %s20_s30  }
   0x2   : > { %p303_p1 = scmp.lt.s32.totalorder %s2647_s30, 3 }
   0x4   : > { %p304_p2 = pnand %p2142_p0, %p303_p1 }
   0x5   : > { %v2579_v0 = vld [vmem:[%s3119_s2] sm:$0xff] (!%p304_p2)   ;;  %v2649_v1 = vmov (!%p304_p2), 0   ;;  %s2143_s13 = sshll.u32 (!%p304_p2), %s2138_s10, 5  ;;  %v2580_v2 = vld [vmem:[%s3119_s2 + $0x8] sm:$0xff] (!%p304_p2)   ;;  %v2581_v3 = vld [vmem:[%s3119_s2 + $0x10] sm:$0xff] (!%p304_p2)   ;;  %vm631_vm0 = vcmask (!%p304_p2), 130048  }
   0x6   : > { %307 = sbr.rel (%p304_p2) target bundleno = 831 (0x33f), region = 52  ;;  %680 = vmatprep.subr.bf16.mxu0 (!%p304_p2), %v2649_v1  ;;  %p351_p3 = scmp.lt.s32.totalorder (!%p304_p2), %s2143_s13, 63  ;;  %v2582_v4 = vld [vmem:[%s3119_s2 + $0x18] sm:$0xff] (!%p304_p2)   ;;  %v2583_v6 = vld [vmem:[%s3119_s2 + $0x20] sm:$0xff] (!%p304_p2)   ;;  %v2584_v7 = vld [vmem:[%s3119_s2 + $0x28] sm:$0xff] (!%p304_p2)  }
   0x7   : > { %681 = vmatpush1.bf16.msra.mxu0 (!%p304_p2), %v2579_v0  ;;  %v2585_v8 = vld [vmem:[%s3119_s2 + $0x30] sm:$0xff] (!%p304_p2)   ;;  %v2586_v9 = vld [vmem:[%s3119_s2 + $0x38] sm:$0xff] (!%p304_p2)   ;;  %v2587_v10 = vld [vmem:[%s3119_s2 + $0x40] sm:$0xff] (!%p304_p2)  }
   0x8   : > { %682 = vmatprep.subr.bf16.mxu0 (!%p304_p2), %v2649_v1  ;;  %v2636_v37 = vld [vmem:[%s3121_s4] sm:$0xff] (!%p304_p2)  }
   0x9   : > { %2496 = vmatprep.subr.bf16.mxu1 (!%p304_p2), %v2636_v37  ;;  %v2797_v43 = vld [vmem:[%s3120_s3] ss:$0 sm:$0xff] (!%p304_p2) }
   0xa   : > { %2497 = vmatpush3.bf16.msra.mxu1 (!%p304_p2), %v2636_v37  ;;  %v2637_v48 = vld [vmem:[%s3123_s6] sm:$0xff] (!%p304_p2)  }
   0xb   : > { %683 = vmatpush1.bf16.msra.mxu0 (!%p304_p2), %v2580_v2  ;;  %2530 = vmatprep.subr.bf16.mxu1 (!%p304_p2), %v2637_v48 }
   0xc   : > { %684 = vmatprep.subr.bf16.mxu0 (!%p304_p2), %v2649_v1 }
   0xd   : > { %s3128_s13 = smov (!%p351_p3, %s2143_s13), 63 }
   0xe   : > { %s2315_s18 = sshll.u32 %s3128_s13, 3  ;;  %s2860_s27 = sshll.u32 %s3128_s13, 2 }
   0xf   : > { %s2723_s21 = scalar_lea.vmem %s3117_s0, %s2315_s18  ;;  %685 = vmatpush1.bf16.msra.mxu0 %v2581_v3  ;;  %s2866_s10 = scalar_lea.vmem %s3118_s1, %s2860_s27 }
  0x10   : > { %v2590_v5 = vld [vmem:[%s2723_s21 + $0x4] ss:$8 sps:$4 sm:$0xff]   ;;  %686 = vmatprep.subr.bf16.mxu0 %v2649_v1  ;;  %v2588_v11 = vld [vmem:[%s2723_s21] ss:$8 sps:$4 sm:$0xff]   ;;  %v2591_v12 = vld [vmem:[%s2723_s21 + $0x14] ss:$8 sps:$4 sm:$0xff]   ;;  %s2883_s15 = scalar_lea.vmem %s3125_s8, %s2860_s27  ;;  %s3020_s20 = scalar_lea.vmem %s3126_s9, %s2860_s27 }
  0x11   : > { %2194 = vmatprep.mubr.msk.bf16.mxu0 %vm631_vm0, %v2590_v5  ;;  %v2593_v13 = vld [vmem:[%s2723_s21 + $0x10] ss:$8 sps:$4 sm:$0xff]   ;;  %v2594_v14 = vld [vmem:[%s2723_s21 + $0x24] ss:$8 sps:$4 sm:$0xff]   ;;  %v2596_v15 = vld [vmem:[%s2723_s21 + $0x20] ss:$8 sps:$4 sm:$0xff]  }
  0x12   : > { %v2597_v16 = vld [vmem:[%s2723_s21 + $0x34] ss:$8 sps:$4 sm:$0xff]   ;;  %v2599_v17 = vld [vmem:[%s2723_s21 + $0x30] ss:$8 sps:$4 sm:$0xff]   ;;  %v2600_v18 = vld [vmem:[%s2723_s21 + $0x44] ss:$8 sps:$4 sm:$0xff]  }
  0x13   : > { %687 = vmatpush1.bf16.msra.mxu0 %v2582_v4  ;;  %v2602_v19 = vld [vmem:[%s2723_s21 + $0x40] ss:$8 sps:$4 sm:$0xff]   ;;  %v2603_v20 = vld [vmem:[%s2723_s21 + $0x54] ss:$8 sps:$4 sm:$0xff]   ;;  %v2605_v21 = vld [vmem:[%s2723_s21 + $0x50] ss:$8 sps:$4 sm:$0xff]  }
  0x14   : > { %688 = vmatprep.subr.bf16.mxu0 %v2649_v1  ;;  %v2606_v22 = vld [vmem:[%s2723_s21 + $0x64] ss:$8 sps:$4 sm:$0xff]   ;;  %v2608_v23 = vld [vmem:[%s2723_s21 + $0x60] ss:$8 sps:$4 sm:$0xff]   ;;  %v2609_v24 = vld [vmem:[%s2723_s21 + $0x74] ss:$8 sps:$4 sm:$0xff]  }
  0x15   : > { %v2611_v25 = vld [vmem:[%s2723_s21 + $0x70] ss:$8 sps:$4 sm:$0xff]   ;;  %v2612_v26 = vld [vmem:[%s2723_s21 + $0x84] ss:$8 sps:$4 sm:$0xff]   ;;  %v2614_v27 = vld [vmem:[%s2723_s21 + $0x80] ss:$8 sps:$4 sm:$0xff]  }
  0x16   : > { %v2615_v28 = vld [vmem:[%s2723_s21 + $0x94] ss:$8 sps:$4 sm:$0xff]   ;;  %v2617_v29 = vld [vmem:[%s2723_s21 + $0x90] ss:$8 sps:$4 sm:$0xff]   ;;  %v2618_v30 = vld [vmem:[%s2723_s21 + $0xa4] ss:$8 sps:$4 sm:$0xff]  }
  0x17   : > { %689 = vmatpush1.bf16.msra.mxu0 %v2583_v6  ;;  %v2620_v31 = vld [vmem:[%s2723_s21 + $0xa0] ss:$8 sps:$4 sm:$0xff]   ;;  %v2621_v32 = vld [vmem:[%s2723_s21 + $0xb4] ss:$8 sps:$4 sm:$0xff]   ;;  %v2623_v33 = vld [vmem:[%s2723_s21 + $0xb0] ss:$8 sps:$4 sm:$0xff]  }
  0x18   : > { %690 = vmatprep.subr.bf16.mxu0 %v2649_v1  ;;  %v2624_v34 = vld [vmem:[%s2723_s21 + $0xc4] ss:$8 sps:$4 sm:$0xff]   ;;  %v2626_v35 = vld [vmem:[%s2723_s21 + $0xc0] ss:$8 sps:$4 sm:$0xff]   ;;  %v2627_v36 = vld [vmem:[%s2723_s21 + $0xd4] ss:$8 sps:$4 sm:$0xff]  }
  0x19   : > { %v2629_v38 = vld [vmem:[%s2723_s21 + $0xd0] ss:$8 sps:$4 sm:$0xff]   ;;  %v2630_v39 = vld [vmem:[%s2723_s21 + $0xe4] ss:$8 sps:$4 sm:$0xff]   ;;  %v2632_v40 = vld [vmem:[%s2723_s21 + $0xe0] ss:$8 sps:$4 sm:$0xff]  }
  0x1a   : > { %v2633_v41 = vld [vmem:[%s2723_s21 + $0xf4] ss:$8 sps:$4 sm:$0xff]   ;;  %v2635_v42 = vld [vmem:[%s2723_s21 + $0xf0] ss:$8 sps:$4 sm:$0xff]  }
  0x1b   : > { %691 = vmatpush1.bf16.msra.mxu0 %v2584_v7 }
  0x1c   : > { %692 = vmatprep.subr.bf16.mxu0 %v2649_v1 }
  0x1f   : > { %693 = vmatpush1.bf16.msra.mxu0 %v2585_v8 }
  0x20   : > { %694 = vmatprep.subr.bf16.mxu0 %v2649_v1 }
  0x23   : > { %695 = vmatpush1.bf16.msra.mxu0 %v2586_v9 }
  0x24   : > { %696 = vmatprep.subr.bf16.mxu0 %v2649_v1 }
  0x27   : > { %697 = vmatpush1.bf16.msra.mxu0 %v2587_v10 }
  0x2a   : > { %713 = vmatmul.mubr.bf16.vlgmr.msra.gmra.mrb[0].mxu0 %v2588_v11 }
  0x2b   : > { %2195 = vmatprep.mubr.msk.bf16.mxu0 %vm631_vm0, %v2591_v12 }
  0x32   : > { %721 = vmatmul.mubr.bf16.gmra.mrb[4].mxu0 %v2593_v13 }
  0x33   : > { %2196 = vmatprep.mubr.msk.bf16.mxu0 %vm631_vm0, %v2594_v14 }
  0x3a   : > { %729 = vmatmul.mubr.bf16.gmra.mrb[8].mxu0 %v2596_v15 }
  0x3b   : > { %2197 = vmatprep.mubr.msk.bf16.mxu0 %vm631_vm0, %v2597_v16 }
  0x42   : > { %737 = vmatmul.mubr.bf16.gmra.mrb[12].mxu0 %v2599_v17 }
  0x43   : > { %2198 = vmatprep.mubr.msk.bf16.mxu0 %vm631_vm0, %v2600_v18 }
  0x4a   : > { %745 = vmatmul.mubr.bf16.gmra.mrb[16].mxu0 %v2602_v19 }
  0x4b   : > { %2199 = vmatprep.mubr.msk.bf16.mxu0 %vm631_vm0, %v2603_v20 }
  0x52   : > { %753 = vmatmul.mubr.bf16.gmra.mrb[20].mxu0 %v2605_v21 }
  0x53   : > { %2200 = vmatprep.mubr.msk.bf16.mxu0 %vm631_vm0, %v2606_v22 }
  0x5a   : > { %761 = vmatmul.mubr.bf16.gmra.mrb[24].mxu0 %v2608_v23 }
  0x5b   : > { %2201 = vmatprep.mubr.msk.bf16.mxu0 %vm631_vm0, %v2609_v24 }
  0x62   : > { %769 = vmatmul.mubr.bf16.gmra.mrb[28].mxu0 %v2611_v25 }
  0x63   : > { %2202 = vmatprep.mubr.msk.bf16.mxu0 %vm631_vm0, %v2612_v26 }
  0x6a   : > { %777 = vmatmul.mubr.bf16.gmra.mrb[32].mxu0 %v2614_v27 }
  0x6b   : > { %2203 = vmatprep.mubr.msk.bf16.mxu0 %vm631_vm0, %v2615_v28 }
  0x72   : > { %785 = vmatmul.mubr.bf16.gmra.mrb[36].mxu0 %v2617_v29 }
  0x73   : > { %2204 = vmatprep.mubr.msk.bf16.mxu0 %vm631_vm0, %v2618_v30 }
  0x7a   : > { %793 = vmatmul.mubr.bf16.gmra.mrb[40].mxu0 %v2620_v31 }
  0x7b   : > { %2205 = vmatprep.mubr.msk.bf16.mxu0 %vm631_vm0, %v2621_v32 }
  0x82   : > { %801 = vmatmul.mubr.bf16.gmra.mrb[44].mxu0 %v2623_v33 }
  0x83   : > { %2206 = vmatprep.mubr.msk.bf16.mxu0 %vm631_vm0, %v2624_v34 }
  0x8a   : > { %809 = vmatmul.mubr.bf16.gmra.mrb[48].mxu0 %v2626_v35 }
  0x8b   : > { %2207 = vmatprep.mubr.msk.bf16.mxu0 %vm631_vm0, %v2627_v36 }
  0x92   : > { %817 = vmatmul.mubr.bf16.gmra.mrb[52].mxu0 %v2629_v38 }
  0x93   : > { %2208 = vmatprep.mubr.msk.bf16.mxu0 %vm631_vm0, %v2630_v39 }
  0x9a   : > { %825 = vmatmul.mubr.bf16.gmra.mrb[56].mxu0 %v2632_v40 }
  0x9b   : > { %2209 = vmatprep.mubr.msk.bf16.mxu0 %vm631_vm0, %v2633_v41 }
  0xa2   : > { %833 = vmatmul.mubr.bf16.gmra.mrb[60].mxu0 %v2635_v42 }
  0xfd   : > { %v714_v44 = vpop.f32.mrb[0].mxu0 }
  0xfe   : > { %v715_v45 = vadd.f32 %v2797_v43, %v714_v44  ;;  %v716_v46 = vpop.f32.mrb[1].mxu0 }
  0xff   : > { %v717_v47 = vpop.f32.mrb[2].mxu0 }
 0x100   : > { %v873_v49 = vmul.f32 0.01, %v715_v45  ;;  %v718_v50 = vadd.f32 %v2797_v43, %v717_v47  ;;  %v719_v51 = vpop.f32.mrb[3].mxu0  ;;  %vm841_vm1 = vcmp.ge.f32.partialorder %v715_v45, 0.0 }
 0x102   : > { %v874_v52 = vmul.f32 0.01, %v718_v50  ;;  %vm842_vm2 = vcmp.ge.f32.partialorder %v718_v50, 0.0  ;;  %v905_v53 = vsel %vm841_vm1, %v715_v45, %v873_v49 }
 0x104   : > { %v906_v54 = vsel %vm842_vm2, %v718_v50, %v874_v52 }
 0x105   : > { %v722_v55 = vpop.f32.mrb[4].mxu0  ;;  %v937_v56 = vpack.c.bf16 %v906_v54, %v905_v53 }
 0x106   : > { %v723_v57 = vadd.f32 %v2797_v43, %v722_v55  ;;  %v724_v58 = vpop.f32.mrb[5].mxu0 }
 0x107   : > { %v725_v59 = vpop.f32.mrb[6].mxu0  ;;  %2498 = vmatprep.mubr.msk.bf16.mxu1 %vm631_vm0, %v937_v56 }
 0x108   : > { %v875_v60 = vmul.f32 0.01, %v723_v57  ;;  %v726_v61 = vadd.f32 %v2797_v43, %v725_v59  ;;  %v727_v62 = vpop.f32.mrb[7].mxu0  ;;  %vm843_vm3 = vcmp.ge.f32.partialorder %v723_v57, 0.0 }
 0x10a   : > { %vm844_vm4 = vcmp.ge.f32.partialorder %v726_v61, 0.0  ;;  %v876_v63 = vmul.f32 0.01, %v726_v61  ;;  %v907_v0 = vsel %vm843_vm3, %v723_v57, %v875_v60 }
 0x10c   : > { %v908_v1 = vsel %vm844_vm4, %v726_v61, %v876_v63 }
 0x10d   : > { %v938_v2 = vpack.c.bf16 %v908_v1, %v907_v0  ;;  %v730_v3 = vpop.f32.mrb[8].mxu0 }
 0x10e   : > { %v731_v4 = vadd.f32 %v2797_v43, %v730_v3  ;;  %v732_v5 = vpop.f32.mrb[9].mxu0 }
 0x10f   : > { %v733_v6 = vpop.f32.mrb[10].mxu0  ;;  %2499 = vmatmul.mubr.msk.bf16.vlgmr.msra.gmra.mrb[0].mxu1 %vm631_vm0, %v938_v2 }
 0x110   : > { %v877_v7 = vmul.f32 0.01, %v731_v4  ;;  %v734_v8 = vadd.f32 %v2797_v43, %v733_v6  ;;  %v735_v9 = vpop.f32.mrb[11].mxu0  ;;  %2531 = vmatpush3.bf16.msra.mxu1 %v2637_v48  ;;  %vm845_vm5 = vcmp.ge.f32.partialorder %v731_v4, 0.0 }
 0x112   : > { %vm846_vm6 = vcmp.ge.f32.partialorder %v734_v8, 0.0  ;;  %v878_v10 = vmul.f32 0.01, %v734_v8  ;;  %v909_v11 = vsel %vm845_vm5, %v731_v4, %v877_v7 }
 0x114   : > { %v910_v12 = vsel %vm846_vm6, %v734_v8, %v878_v10 }
 0x115   : > { %v939_v13 = vpack.c.bf16 %v910_v12, %v909_v11  ;;  %v738_v14 = vpop.f32.mrb[12].mxu0 }
 0x116   : > { %v739_v15 = vadd.f32 %v2797_v43, %v738_v14  ;;  %v740_v16 = vpop.f32.mrb[13].mxu0 }
 0x117   : > { %v741_v17 = vpop.f32.mrb[14].mxu0  ;;  %2502 = vmatprep.mubr.msk.bf16.mxu1 %vm631_vm0, %v939_v13 }
 0x118   : > { %v879_v18 = vmul.f32 0.01, %v739_v15  ;;  %v742_v19 = vadd.f32 %v2797_v43, %v741_v17  ;;  %v743_v20 = vpop.f32.mrb[15].mxu0  ;;  %vm847_vm7 = vcmp.ge.f32.partialorder %v739_v15, 0.0 }
 0x11a   : > { %vm848_vm8 = vcmp.ge.f32.partialorder %v742_v19, 0.0  ;;  %v880_v21 = vmul.f32 0.01, %v742_v19  ;;  %v911_v22 = vsel %vm847_vm7, %v739_v15, %v879_v18 }
 0x11c   : > { %v912_v23 = vsel %vm848_vm8, %v742_v19, %v880_v21 }
 0x11d   : > { %v940_v24 = vpack.c.bf16 %v912_v23, %v911_v22  ;;  %v746_v25 = vpop.f32.mrb[16].mxu0 }
 0x11e   : > { %v747_v26 = vadd.f32 %v2797_v43, %v746_v25  ;;  %v748_v27 = vpop.f32.mrb[17].mxu0 }
 0x11f   : > { %v749_v28 = vpop.f32.mrb[18].mxu0  ;;  %2503 = vmatmul.mubr.msk.bf16.gmra.mrb[4].mxu1 %vm631_vm0, %v940_v24 }
 0x120   : > { %v881_v29 = vmul.f32 0.01, %v747_v26  ;;  %v750_v30 = vadd.f32 %v2797_v43, %v749_v28  ;;  %v751_v31 = vpop.f32.mrb[19].mxu0  ;;  %vm849_vm9 = vcmp.ge.f32.partialorder %v747_v26, 0.0 }
 0x122   : > { %vm850_vm10 = vcmp.ge.f32.partialorder %v750_v30, 0.0  ;;  %v882_v32 = vmul.f32 0.01, %v750_v30  ;;  %v913_v33 = vsel %vm849_vm9, %v747_v26, %v881_v29 }
 0x124   : > { %v914_v34 = vsel %vm850_vm10, %v750_v30, %v882_v32 }
 0x125   : > { %v941_v35 = vpack.c.bf16 %v914_v34, %v913_v33  ;;  %v754_v36 = vpop.f32.mrb[20].mxu0 }
 0x126   : > { %v755_v37 = vadd.f32 %v2797_v43, %v754_v36  ;;  %v756_v38 = vpop.f32.mrb[21].mxu0 }
 0x127   : > { %v757_v39 = vpop.f32.mrb[22].mxu0  ;;  %2506 = vmatprep.mubr.msk.bf16.mxu1 %vm631_vm0, %v941_v35 }
 0x128   : > { %v883_v40 = vmul.f32 0.01, %v755_v37  ;;  %v758_v41 = vadd.f32 %v2797_v43, %v757_v39  ;;  %v759_v42 = vpop.f32.mrb[23].mxu0  ;;  %vm851_vm11 = vcmp.ge.f32.partialorder %v755_v37, 0.0 }
 0x12a   : > { %vm852_vm12 = vcmp.ge.f32.partialorder %v758_v41, 0.0  ;;  %v884_v44 = vmul.f32 0.01, %v758_v41  ;;  %v915_v45 = vsel %vm851_vm11, %v755_v37, %v883_v40 }
 0x12c   : > { %v916_v46 = vsel %vm852_vm12, %v758_v41, %v884_v44 }
 0x12d   : > { %v942_v47 = vpack.c.bf16 %v916_v46, %v915_v45  ;;  %v762_v48 = vpop.f32.mrb[24].mxu0 }
 0x12e   : > { %v763_v49 = vadd.f32 %v2797_v43, %v762_v48  ;;  %v764_v50 = vpop.f32.mrb[25].mxu0 }
 0x12f   : > { %v765_v51 = vpop.f32.mrb[26].mxu0  ;;  %2507 = vmatmul.mubr.msk.bf16.gmra.mrb[8].mxu1 %vm631_vm0, %v942_v47 }
 0x130   : > { %v885_v52 = vmul.f32 0.01, %v763_v49  ;;  %v766_v53 = vadd.f32 %v2797_v43, %v765_v51  ;;  %v767_v54 = vpop.f32.mrb[27].mxu0  ;;  %vm853_vm13 = vcmp.ge.f32.partialorder %v763_v49, 0.0 }
 0x132   : > { %vm854_vm14 = vcmp.ge.f32.partialorder %v766_v53, 0.0  ;;  %v886_v55 = vmul.f32 0.01, %v766_v53  ;;  %v917_v56 = vsel %vm853_vm13, %v763_v49, %v885_v52 }
 0x134   : > { %v918_v57 = vsel %vm854_vm14, %v766_v53, %v886_v55 }
 0x135   : > { %v943_v58 = vpack.c.bf16 %v918_v57, %v917_v56  ;;  %v770_v59 = vpop.f32.mrb[28].mxu0 }
 0x136   : > { %v771_v60 = vadd.f32 %v2797_v43, %v770_v59  ;;  %v772_v61 = vpop.f32.mrb[29].mxu0  ;;  %v2638_v59 = vld [vmem:[%s3123_s6 + $0x8] sm:$0xff]  }
 0x137   : > { %v773_v62 = vpop.f32.mrb[30].mxu0  ;;  %2510 = vmatprep.mubr.msk.bf16.mxu1 %vm631_vm0, %v943_v58  ;;  %2532 = vmatprep.subr.bf16.mxu1 %v2638_v59 }
 0x138   : > { %v887_v63 = vmul.f32 0.01, %v771_v60  ;;  %v774_v0 = vadd.f32 %v2797_v43, %v773_v62  ;;  %v775_v1 = vpop.f32.mrb[31].mxu0  ;;  %vm855_vm15 = vcmp.ge.f32.partialorder %v771_v60, 0.0  ;;  %2533 = vmatpush3.bf16.msra.mxu1 %v2638_v59 }
 0x13a   : > { %vm856_vm1 = vcmp.ge.f32.partialorder %v774_v0, 0.0  ;;  %v888_v2 = vmul.f32 0.01, %v774_v0  ;;  %v919_v3 = vsel %vm855_vm15, %v771_v60, %v887_v63 }
 0x13c   : > { %v920_v4 = vsel %vm856_vm1, %v774_v0, %v888_v2  ;;  %v2639_v2 = vld [vmem:[%s3123_s6 + $0x10] sm:$0xff]  }
 0x13d   : > { %v944_v5 = vpack.c.bf16 %v920_v4, %v919_v3  ;;  %v778_v6 = vpop.f32.mrb[32].mxu0  ;;  %2534 = vmatprep.subr.bf16.mxu1 %v2639_v2 }
 0x13e   : > { %v779_v7 = vadd.f32 %v2797_v43, %v778_v6  ;;  %v780_v8 = vpop.f32.mrb[33].mxu0  ;;  %2535 = vmatpush3.bf16.msra.mxu1 %v2639_v2 }
 0x13f   : > { %v781_v9 = vpop.f32.mrb[34].mxu0  ;;  %2511 = vmatmul.mubr.msk.bf16.gmra.mrb[12].mxu1 %vm631_vm0, %v944_v5  ;;  %v2640_v8 = vld [vmem:[%s3123_s6 + $0x18] sm:$0xff]  }
 0x140   : > { %v889_v10 = vmul.f32 0.01, %v779_v7  ;;  %v782_v11 = vadd.f32 %v2797_v43, %v781_v9  ;;  %v783_v12 = vpop.f32.mrb[35].mxu0  ;;  %vm857_vm2 = vcmp.ge.f32.partialorder %v779_v7, 0.0  ;;  %2536 = vmatprep.subr.bf16.mxu1 %v2640_v8 }
 0x142   : > { %vm858_vm3 = vcmp.ge.f32.partialorder %v782_v11, 0.0  ;;  %v890_v13 = vmul.f32 0.01, %v782_v11  ;;  %v921_v14 = vsel %vm857_vm2, %v779_v7, %v889_v10  ;;  %2537 = vmatpush3.bf16.msra.mxu1 %v2640_v8 }
 0x144   : > { %v922_v15 = vsel %vm858_vm3, %v782_v11, %v890_v13 }
 0x145   : > { %v945_v16 = vpack.c.bf16 %v922_v15, %v921_v14  ;;  %v786_v17 = vpop.f32.mrb[36].mxu0 }
 0x146   : > { %v787_v18 = vadd.f32 %v2797_v43, %v786_v17  ;;  %v788_v19 = vpop.f32.mrb[37].mxu0 }
 0x147   : > { %v789_v20 = vpop.f32.mrb[38].mxu0  ;;  %2514 = vmatprep.mubr.msk.bf16.mxu1 %vm631_vm0, %v945_v16 }
 0x148   : > { %v891_v21 = vmul.f32 0.01, %v787_v18  ;;  %v790_v22 = vadd.f32 %v2797_v43, %v789_v20  ;;  %v791_v23 = vpop.f32.mrb[39].mxu0  ;;  %vm859_vm4 = vcmp.ge.f32.partialorder %v787_v18, 0.0 }
 0x14a   : > { %vm860_vm5 = vcmp.ge.f32.partialorder %v790_v22, 0.0  ;;  %v892_v24 = vmul.f32 0.01, %v790_v22  ;;  %v923_v25 = vsel %vm859_vm4, %v787_v18, %v891_v21  ;;  %vm1497_vm4 = vcmask 519168  }
 0x14c   : > { %v924_v26 = vsel %vm860_vm5, %v790_v22, %v892_v24 }
 0x14d   : > { %v946_v27 = vpack.c.bf16 %v924_v26, %v923_v25  ;;  %v794_v28 = vpop.f32.mrb[40].mxu0 }
 0x14e   : > { %v795_v29 = vadd.f32 %v2797_v43, %v794_v28  ;;  %v796_v30 = vpop.f32.mrb[41].mxu0 }
 0x14f   : > { %v797_v31 = vpop.f32.mrb[42].mxu0  ;;  %2515 = vmatmul.mubr.msk.bf16.gmra.mrb[16].mxu1 %vm631_vm0, %v946_v27 }
 0x150   : > { %v893_v32 = vmul.f32 0.01, %v795_v29  ;;  %v798_v33 = vadd.f32 %v2797_v43, %v797_v31  ;;  %v799_v34 = vpop.f32.mrb[43].mxu0  ;;  %vm861_vm6 = vcmp.ge.f32.partialorder %v795_v29, 0.0 }
 0x151   : > { %v2381_v34 = vld [vmem:[%s2866_s10] sm:$0xff]  }
 0x152   : > { %vm862_vm7 = vcmp.ge.f32.partialorder %v798_v33, 0.0  ;;  %v894_v35 = vmul.f32 0.01, %v798_v33  ;;  %v925_v36 = vsel %vm861_vm6, %v795_v29, %v893_v32 }
 0x154   : > { %v926_v37 = vsel %vm862_vm7, %v798_v33, %v894_v35  ;;  %v2873_v35 = vld [vmem:[%s3122_s5] ss:$0 sm:$0xff]  ;;  %vm1569_vm7 = vcmask 523264  }
 0x155   : > { %v947_v38 = vpack.c.bf16 %v926_v37, %v925_v36  ;;  %v802_v39 = vpop.f32.mrb[44].mxu0 }
 0x156   : > { %v803_v40 = vadd.f32 %v2797_v43, %v802_v39  ;;  %v804_v41 = vpop.f32.mrb[45].mxu0 }
 0x157   : > { %v805_v42 = vpop.f32.mrb[46].mxu0  ;;  %2518 = vmatprep.mubr.msk.bf16.mxu1 %vm631_vm0, %v947_v38  ;;  %v2382_v38 = vunpack.c.l.bf16 %v2381_v34 }
 0x158   : > { %v895_v44 = vmul.f32 0.01, %v803_v40  ;;  %v806_v45 = vadd.f32 %v2797_v43, %v805_v42  ;;  %v807_v46 = vpop.f32.mrb[47].mxu0  ;;  %vm863_vm8 = vcmp.ge.f32.partialorder %v803_v40, 0.0 }
 0x15a   : > { %vm864_vm9 = vcmp.ge.f32.partialorder %v806_v45, 0.0  ;;  %v896_v47 = vmul.f32 0.01, %v806_v45  ;;  %v927_v48 = vsel %vm863_vm8, %v803_v40, %v895_v44 }
 0x15c   : > { %v928_v49 = vsel %vm864_vm9, %v806_v45, %v896_v47  ;;  %v2383_v45 = vunpack.c.h.bf16 %v2381_v34  ;;  %v2448_v34 = vld [vmem:[%s2866_s10 + $0x28] sm:$0xff]  }
 0x15d   : > { %v948_v50 = vpack.c.bf16 %v928_v49, %v927_v48  ;;  %v810_v51 = vpop.f32.mrb[48].mxu0 }
 0x15e   : > { %v811_v52 = vadd.f32 %v2797_v43, %v810_v51  ;;  %v812_v53 = vpop.f32.mrb[49].mxu0 }
 0x15f   : > { %v813_v54 = vpop.f32.mrb[50].mxu0  ;;  %2519 = vmatmul.mubr.msk.bf16.gmra.mrb[20].mxu1 %vm631_vm0, %v948_v50 }
 0x160   : > { %v897_v55 = vmul.f32 0.01, %v811_v52  ;;  %v814_v56 = vadd.f32 %v2797_v43, %v813_v54  ;;  %v815_v57 = vpop.f32.mrb[51].mxu0  ;;  %vm865_vm10 = vcmp.ge.f32.partialorder %v811_v52, 0.0 }
 0x162   : > { %vm866_vm11 = vcmp.ge.f32.partialorder %v814_v56, 0.0  ;;  %v898_v58 = vmul.f32 0.01, %v814_v56  ;;  %v929_v60 = vsel %vm865_vm10, %v811_v52, %v897_v55 }
 0x164   : > { %v930_v61 = vsel %vm866_vm11, %v814_v56, %v898_v58 }
 0x165   : > { %v949_v62 = vpack.c.bf16 %v930_v61, %v929_v60  ;;  %v818_v63 = vpop.f32.mrb[52].mxu0 }
 0x166   : > { %v819_v0 = vadd.f32 %v2797_v43, %v818_v63  ;;  %v820_v1 = vpop.f32.mrb[53].mxu0 }
 0x167   : > { %v821_v3 = vpop.f32.mrb[54].mxu0  ;;  %2522 = vmatprep.mubr.msk.bf16.mxu1 %vm631_vm0, %v949_v62 }
 0x168   : > { %v899_v4 = vmul.f32 0.01, %v819_v0  ;;  %v822_v5 = vadd.f32 %v2797_v43, %v821_v3  ;;  %v823_v6 = vpop.f32.mrb[55].mxu0  ;;  %vm867_vm12 = vcmp.ge.f32.partialorder %v819_v0, 0.0  ;;  %v2446_v3 = vld [vmem:[%s2866_s10 + $0x18] sm:$0xff]  }
 0x16a   : > { %vm868_vm13 = vcmp.ge.f32.partialorder %v822_v5, 0.0  ;;  %v900_v7 = vmul.f32 0.01, %v822_v5  ;;  %v931_v9 = vsel %vm867_vm12, %v819_v0, %v899_v4  ;;  %v2445_v4 = vld [vmem:[%s2866_s10 + $0x10] sm:$0xff]  }
 0x16c   : > { %v932_v10 = vsel %vm868_vm13, %v822_v5, %v900_v7  ;;  %v2394_v5 = vunpack.c.l.bf16 %v2446_v3  ;;  %v2390_v7 = vunpack.c.l.bf16 %v2445_v4 }
 0x16d   : > { %v950_v11 = vpack.c.bf16 %v932_v10, %v931_v9  ;;  %v826_v12 = vpop.f32.mrb[56].mxu0  ;;  %v2395_v10 = vunpack.c.h.bf16 %v2446_v3 }
 0x16e   : > { %v827_v13 = vadd.f32 %v2797_v43, %v826_v12  ;;  %v828_v14 = vpop.f32.mrb[57].mxu0 }
 0x16f   : > { %v829_v15 = vpop.f32.mrb[58].mxu0  ;;  %2523 = vmatmul.mubr.msk.bf16.gmra.mrb[24].mxu1 %vm631_vm0, %v950_v11 }
 0x170   : > { %v901_v16 = vmul.f32 0.01, %v827_v13  ;;  %v830_v17 = vadd.f32 %v2797_v43, %v829_v15  ;;  %v831_v18 = vpop.f32.mrb[59].mxu0  ;;  %vm869_vm14 = vcmp.ge.f32.partialorder %v827_v13, 0.0 }
 0x172   : > { %vm870_vm15 = vcmp.ge.f32.partialorder %v830_v17, 0.0  ;;  %v902_v19 = vmul.f32 0.01, %v830_v17  ;;  %v933_v20 = vsel %vm869_vm14, %v827_v13, %v901_v16  ;;  %v2391_v13 = vunpack.c.h.bf16 %v2445_v4  ;;  %v2450_v4 = vld [vmem:[%s2866_s10 + $0x38] sm:$0xff]  }
 0x174   : > { %v934_v21 = vsel %vm870_vm15, %v830_v17, %v902_v19 }
 0x175   : > { %v951_v22 = vpack.c.bf16 %v934_v21, %v933_v20  ;;  %v834_v23 = vpop.f32.mrb[60].mxu0 }
 0x176   : > { %v835_v24 = vadd.f32 %v2797_v43, %v834_v23  ;;  %v836_v25 = vpop.f32.mrb[61].mxu0 }
 0x177   : > { %v837_v26 = vpop.f32.mrb[62].mxu0  ;;  %2526 = vmatprep.mubr.msk.bf16.mxu1 %vm631_vm0, %v951_v22 }
 0x178   : > { %v903_v27 = vmul.f32 0.01, %v835_v24  ;;  %v838_v28 = vadd.f32 %v2797_v43, %v837_v26  ;;  %v839_v29 = vpop.f32.mrb[63].mxu0  ;;  %vm871_vm1 = vcmp.ge.f32.partialorder %v835_v24, 0.0  ;;  %v2444_v43 = vld [vmem:[%s2866_s10 + $0x8] sm:$0xff]  }
 0x179   : > { %v2386_v36 = vunpack.c.l.bf16 %v2444_v43  ;;  %v2387_v41 = vunpack.c.h.bf16 %v2444_v43 }
 0x17a   : > { %vm872_vm2 = vcmp.ge.f32.partialorder %v838_v28, 0.0  ;;  %v904_v30 = vmul.f32 0.01, %v838_v28  ;;  %v935_v31 = vsel %vm871_vm1, %v835_v24, %v903_v27 }
 0x17c   : > { %v936_v32 = vsel %vm872_vm2, %v838_v28, %v904_v30 }
 0x17d   : > { %v952_v33 = vpack.c.bf16 %v936_v32, %v935_v31 }
 0x17f   : > { %2527 = vmatmul.mubr.msk.bf16.gmra.mrb[28].mxu1 %vm631_vm0, %v952_v33 }
 0x1e2   : > { %v2500_v37 = vpop.f32.mrb[0].mxu1 }
 0x1e3   : > { %v1059_v39 = vadd.f32 %v2500_v37, %v2873_v35  ;;  %v1050_v40 = vpop.f32.mrb[1].mxu1  ;;  %v2402_v37 = vunpack.c.l.bf16 %v2448_v34 }
 0x1e4   : > { %v1051_v42 = vadd.f32 %v2873_v35, %v1050_v40  ;;  %v2501_v44 = vpop.f32.mrb[2].mxu1 }
 0x1e5   : > { %v1243_v46 = vadd.f32 %v2386_v36, %v1059_v39  ;;  %v1062_v47 = vadd.f32 %v2501_v44, %v2873_v35  ;;  %v1053_v48 = vpop.f32.mrb[3].mxu1  ;;  %v2447_v36 = vld [vmem:[%s2866_s10 + $0x20] sm:$0xff]  }
 0x1e6   : > { %v1241_v49 = vadd.f32 %v2382_v38, %v1051_v42  ;;  %v1054_v50 = vadd.f32 %v2873_v35, %v1053_v48  ;;  %v2398_v39 = vunpack.c.l.bf16 %v2447_v36  ;;  %v2403_v42 = vunpack.c.h.bf16 %v2448_v34 }
 0x1e7   : > { %vm1275_vm0 = vcmp.ge.f32.partialorder %v1243_v46, 0.0  ;;  %v1307_v51 = vmul.f32 0.01, %v1243_v46  ;;  %v1244_v52 = vadd.f32 %v2387_v41, %v1062_v47 }
 0x1e8   : > { %vm1273_vm3 = vcmp.ge.f32.partialorder %v1241_v49, 0.0  ;;  %v1305_v53 = vmul.f32 0.01, %v1241_v49  ;;  %v1242_v54 = vadd.f32 %v2383_v45, %v1054_v50 }
 0x1e9   : > { %v1339_v55 = vsel %vm1275_vm0, %v1243_v46, %v1307_v51  ;;  %vm1276_vm5 = vcmp.ge.f32.partialorder %v1244_v52, 0.0  ;;  %v1308_v56 = vmul.f32 0.01, %v1244_v52  ;;  %v2399_v46 = vunpack.c.h.bf16 %v2447_v36  ;;  %v2452_v36 = vld [vmem:[%s2866_s10 + $0x48] sm:$0xff]  }
 0x1ea   : > { %v2318_v57 = vpack.c.bf16 %v1339_v55, %v1339_v55  ;;  %v1337_v58 = vsel %vm1273_vm3, %v1241_v49, %v1305_v53  ;;  %vm1274_vm6 = vcmp.ge.f32.partialorder %v1242_v54, 0.0  ;;  %v1306_v59 = vmul.f32 0.01, %v1242_v54 }
 0x1eb   : > { %v2316_v60 = vpack.c.bf16 %v1337_v58, %v1337_v58  ;;  %v1340_v61 = vsel %vm1276_vm5, %v1244_v52, %v1308_v56 }
 0x1ec   : > { %1500 = vst.msk [vmem:[%s2883_s15 + $0x8] sm:$0xf] %vm1497_vm4, %v2318_v57  ;;  %v1370_v62 = vpack.c.bf16 %v1340_v61, %v1339_v55  ;;  %v2319_v63 = vpack.c.bf16 %v1340_v61, %v1340_v61  ;;  %v1338_v0 = vsel %vm1274_vm6, %v1242_v54, %v1306_v59 }
 0x1ed   : > { %1498 = vst.msk [vmem:[%s2883_s15] sm:$0xf] %vm1497_vm4, %v2316_v60  ;;  %v2317_v1 = vpack.c.bf16 %v1338_v0, %v1338_v0  ;;  %v1369_v2 = vpack.c.bf16 %v1338_v0, %v1337_v58 }
 0x1ee   : > { %1501 = vst.msk [vmem:[%s2883_s15 + $0xc] sm:$0xf] %vm1497_vm4, %v2319_v63 }
 0x1ef   : > { %1499 = vst.msk [vmem:[%s2883_s15 + $0x4] sm:$0xf] %vm1497_vm4, %v2317_v1  ;;  %2538 = vmatprep.mubr.msk.bf16.mxu1 %vm1569_vm7, %v1369_v2 }
 0x1f0   : > { %2539 = vmatmul.mubr.msk.bf16.vlgmr.msra.gmra.mrb[32].mxu1 %vm1569_vm7, %v1370_v62 }
 0x1f2   : > { %v2504_v6 = vpop.f32.mrb[4].mxu1 }
 0x1f3   : > { %v1075_v8 = vadd.f32 %v2504_v6, %v2873_v35  ;;  %v1066_v9 = vpop.f32.mrb[5].mxu1  ;;  %v2410_v6 = vunpack.c.l.bf16 %v2450_v4 }
 0x1f4   : > { %v1067_v11 = vadd.f32 %v2873_v35, %v1066_v9  ;;  %v2505_v12 = vpop.f32.mrb[6].mxu1 }
 0x1f5   : > { %v1247_v14 = vadd.f32 %v2394_v5, %v1075_v8  ;;  %v1078_v15 = vadd.f32 %v2505_v12, %v2873_v35  ;;  %v1069_v16 = vpop.f32.mrb[7].mxu1  ;;  %v2449_v5 = vld [vmem:[%s2866_s10 + $0x30] sm:$0xff]  }
 0x1f6   : > { %v1245_v17 = vadd.f32 %v2390_v7, %v1067_v11  ;;  %v1070_v18 = vadd.f32 %v2873_v35, %v1069_v16  ;;  %v2406_v8 = vunpack.c.l.bf16 %v2449_v5  ;;  %v2411_v11 = vunpack.c.h.bf16 %v2450_v4 }
 0x1f7   : > { %vm1279_vm8 = vcmp.ge.f32.partialorder %v1247_v14, 0.0  ;;  %v1311_v19 = vmul.f32 0.01, %v1247_v14  ;;  %v1248_v20 = vadd.f32 %v2395_v10, %v1078_v15 }
 0x1f8   : > { %vm1277_vm9 = vcmp.ge.f32.partialorder %v1245_v17, 0.0  ;;  %v1309_v21 = vmul.f32 0.01, %v1245_v17  ;;  %v1246_v22 = vadd.f32 %v2391_v13, %v1070_v18 }
 0x1f9   : > { %v1343_v23 = vsel %vm1279_vm8, %v1247_v14, %v1311_v19  ;;  %vm1280_vm10 = vcmp.ge.f32.partialorder %v1248_v20, 0.0  ;;  %v1312_v24 = vmul.f32 0.01, %v1248_v20  ;;  %v2407_v14 = vunpack.c.h.bf16 %v2449_v5  ;;  %v2454_v5 = vld [vmem:[%s2866_s10 + $0x58] sm:$0xff]  }
 0x1fa   : > { %v2322_v25 = vpack.c.bf16 %v1343_v23, %v1343_v23  ;;  %v1341_v26 = vsel %vm1277_vm9, %v1245_v17, %v1309_v21  ;;  %vm1278_vm11 = vcmp.ge.f32.partialorder %v1246_v22, 0.0  ;;  %v1310_v27 = vmul.f32 0.01, %v1246_v22 }
 0x1fb   : > { %v2320_v28 = vpack.c.bf16 %v1341_v26, %v1341_v26  ;;  %v1344_v29 = vsel %vm1280_vm10, %v1248_v20, %v1312_v24 }
 0x1fc   : > { %1504 = vst.msk [vmem:[%s2883_s15 + $0x18] sm:$0xf] %vm1497_vm4, %v2322_v25  ;;  %v2323_v30 = vpack.c.bf16 %v1344_v29, %v1344_v29  ;;  %v1342_v31 = vsel %vm1278_vm11, %v1246_v22, %v1310_v27  ;;  %v1372_v32 = vpack.c.bf16 %v1344_v29, %v1343_v23 }
 0x1fd   : > { %1502 = vst.msk [vmem:[%s2883_s15 + $0x10] sm:$0xf] %vm1497_vm4, %v2320_v28  ;;  %v2321_v33 = vpack.c.bf16 %v1342_v31, %v1342_v31  ;;  %v1371_v43 = vpack.c.bf16 %v1342_v31, %v1341_v26 }
 0x1fe   : > { %1505 = vst.msk [vmem:[%s2883_s15 + $0x1c] sm:$0xf] %vm1497_vm4, %v2323_v30 }
 0x1ff   : > { %1503 = vst.msk [vmem:[%s2883_s15 + $0x14] sm:$0xf] %vm1497_vm4, %v2321_v33  ;;  %2542 = vmatprep.mubr.msk.bf16.mxu1 %vm1569_vm7, %v1371_v43 }
 0x200   : > { %2543 = vmatmul.mubr.msk.bf16.gmra.mrb[36].mxu1 %vm1569_vm7, %v1372_v32 }
 0x202   : > { %v2508_v38 = vpop.f32.mrb[8].mxu1 }
 0x203   : > { %v1091_v40 = vadd.f32 %v2508_v38, %v2873_v35  ;;  %v1082_v41 = vpop.f32.mrb[9].mxu1  ;;  %v2418_v38 = vunpack.c.l.bf16 %v2452_v36 }
 0x204   : > { %v1083_v44 = vadd.f32 %v2873_v35, %v1082_v41  ;;  %v2509_v45 = vpop.f32.mrb[10].mxu1 }
 0x205   : > { %v1251_v47 = vadd.f32 %v2402_v37, %v1091_v40  ;;  %v1094_v48 = vadd.f32 %v2509_v45, %v2873_v35  ;;  %v1085_v49 = vpop.f32.mrb[11].mxu1  ;;  %v2451_v37 = vld [vmem:[%s2866_s10 + $0x40] sm:$0xff]  }
 0x206   : > { %v1249_v50 = vadd.f32 %v2398_v39, %v1083_v44  ;;  %v1086_v51 = vadd.f32 %v2873_v35, %v1085_v49  ;;  %v2414_v40 = vunpack.c.l.bf16 %v2451_v37  ;;  %v2419_v44 = vunpack.c.h.bf16 %v2452_v36 }
 0x207   : > { %vm1283_vm12 = vcmp.ge.f32.partialorder %v1251_v47, 0.0  ;;  %v1315_v52 = vmul.f32 0.01, %v1251_v47  ;;  %v1252_v53 = vadd.f32 %v2403_v42, %v1094_v48 }
 0x208   : > { %vm1281_vm13 = vcmp.ge.f32.partialorder %v1249_v50, 0.0  ;;  %v1313_v54 = vmul.f32 0.01, %v1249_v50  ;;  %v1250_v55 = vadd.f32 %v2399_v46, %v1086_v51 }
 0x209   : > { %v1347_v56 = vsel %vm1283_vm12, %v1251_v47, %v1315_v52  ;;  %vm1284_vm14 = vcmp.ge.f32.partialorder %v1252_v53, 0.0  ;;  %v1316_v57 = vmul.f32 0.01, %v1252_v53  ;;  %v2415_v47 = vunpack.c.h.bf16 %v2451_v37  ;;  %v2456_v37 = vld [vmem:[%s2866_s10 + $0x68] sm:$0xff]  }
 0x20a   : > { %v2326_v58 = vpack.c.bf16 %v1347_v56, %v1347_v56  ;;  %v1345_v59 = vsel %vm1281_vm13, %v1249_v50, %v1313_v54  ;;  %vm1282_vm15 = vcmp.ge.f32.partialorder %v1250_v55, 0.0  ;;  %v1314_v60 = vmul.f32 0.01, %v1250_v55 }
 0x20b   : > { %v2324_v61 = vpack.c.bf16 %v1345_v59, %v1345_v59  ;;  %v1348_v62 = vsel %vm1284_vm14, %v1252_v53, %v1316_v57 }
 0x20c   : > { %1508 = vst.msk [vmem:[%s2883_s15 + $0x28] sm:$0xf] %vm1497_vm4, %v2326_v58  ;;  %v2327_v63 = vpack.c.bf16 %v1348_v62, %v1348_v62  ;;  %v1346_v0 = vsel %vm1282_vm15, %v1250_v55, %v1314_v60  ;;  %v1374_v1 = vpack.c.bf16 %v1348_v62, %v1347_v56 }
 0x20d   : > { %1506 = vst.msk [vmem:[%s2883_s15 + $0x20] sm:$0xf] %vm1497_vm4, %v2324_v61  ;;  %v2325_v2 = vpack.c.bf16 %v1346_v0, %v1346_v0  ;;  %v1373_v3 = vpack.c.bf16 %v1346_v0, %v1345_v59 }
 0x20e   : > { %1509 = vst.msk [vmem:[%s2883_s15 + $0x2c] sm:$0xf] %vm1497_vm4, %v2327_v63 }
 0x20f   : > { %1507 = vst.msk [vmem:[%s2883_s15 + $0x24] sm:$0xf] %vm1497_vm4, %v2325_v2  ;;  %2546 = vmatprep.mubr.msk.bf16.mxu1 %vm1569_vm7, %v1373_v3 }
 0x210   : > { %2547 = vmatmul.mubr.msk.bf16.gmra.mrb[40].mxu1 %vm1569_vm7, %v1374_v1 }
 0x212   : > { %v2512_v7 = vpop.f32.mrb[12].mxu1 }
 0x213   : > { %v1107_v9 = vadd.f32 %v2512_v7, %v2873_v35  ;;  %v1098_v10 = vpop.f32.mrb[13].mxu1  ;;  %v2426_v7 = vunpack.c.l.bf16 %v2454_v5 }
 0x214   : > { %v1099_v12 = vadd.f32 %v2873_v35, %v1098_v10  ;;  %v2513_v13 = vpop.f32.mrb[14].mxu1 }
 0x215   : > { %v1255_v15 = vadd.f32 %v2410_v6, %v1107_v9  ;;  %v1110_v16 = vadd.f32 %v2513_v13, %v2873_v35  ;;  %v1101_v17 = vpop.f32.mrb[15].mxu1  ;;  %v2453_v6 = vld [vmem:[%s2866_s10 + $0x50] sm:$0xff]  }
 0x216   : > { %v1253_v18 = vadd.f32 %v2406_v8, %v1099_v12  ;;  %v1102_v19 = vadd.f32 %v2873_v35, %v1101_v17  ;;  %v2422_v9 = vunpack.c.l.bf16 %v2453_v6  ;;  %v2427_v12 = vunpack.c.h.bf16 %v2454_v5 }
 0x217   : > { %vm1287_vm1 = vcmp.ge.f32.partialorder %v1255_v15, 0.0  ;;  %v1319_v20 = vmul.f32 0.01, %v1255_v15  ;;  %v1256_v21 = vadd.f32 %v2411_v11, %v1110_v16 }
 0x218   : > { %vm1285_vm2 = vcmp.ge.f32.partialorder %v1253_v18, 0.0  ;;  %v1317_v22 = vmul.f32 0.01, %v1253_v18  ;;  %v1254_v23 = vadd.f32 %v2407_v14, %v1102_v19 }
 0x219   : > { %v1351_v24 = vsel %vm1287_vm1, %v1255_v15, %v1319_v20  ;;  %vm1288_vm0 = vcmp.ge.f32.partialorder %v1256_v21, 0.0  ;;  %v1320_v25 = vmul.f32 0.01, %v1256_v21  ;;  %v2423_v15 = vunpack.c.h.bf16 %v2453_v6  ;;  %v2458_v6 = vld [vmem:[%s2866_s10 + $0x78] sm:$0xff]  }
 0x21a   : > { %v2330_v26 = vpack.c.bf16 %v1351_v24, %v1351_v24  ;;  %v1349_v27 = vsel %vm1285_vm2, %v1253_v18, %v1317_v22  ;;  %vm1286_vm3 = vcmp.ge.f32.partialorder %v1254_v23, 0.0  ;;  %v1318_v28 = vmul.f32 0.01, %v1254_v23 }
 0x21b   : > { %v2328_v29 = vpack.c.bf16 %v1349_v27, %v1349_v27  ;;  %v1352_v30 = vsel %vm1288_vm0, %v1256_v21, %v1320_v25 }
 0x21c   : > { %1512 = vst.msk [vmem:[%s2883_s15 + $0x38] sm:$0xf] %vm1497_vm4, %v2330_v26  ;;  %v2331_v31 = vpack.c.bf16 %v1352_v30, %v1352_v30  ;;  %v1350_v32 = vsel %vm1286_vm3, %v1254_v23, %v1318_v28  ;;  %v1376_v33 = vpack.c.bf16 %v1352_v30, %v1351_v24 }
 0x21d   : > { %1510 = vst.msk [vmem:[%s2883_s15 + $0x30] sm:$0xf] %vm1497_vm4, %v2328_v29  ;;  %v2329_v43 = vpack.c.bf16 %v1350_v32, %v1350_v32  ;;  %v1375_v34 = vpack.c.bf16 %v1350_v32, %v1349_v27 }
 0x21e   : > { %1513 = vst.msk [vmem:[%s2883_s15 + $0x3c] sm:$0xf] %vm1497_vm4, %v2331_v31 }
 0x21f   : > { %1511 = vst.msk [vmem:[%s2883_s15 + $0x34] sm:$0xf] %vm1497_vm4, %v2329_v43  ;;  %2550 = vmatprep.mubr.msk.bf16.mxu1 %vm1569_vm7, %v1375_v34 }
 0x220   : > { %2551 = vmatmul.mubr.msk.bf16.gmra.mrb[44].mxu1 %vm1569_vm7, %v1376_v33 }
 0x222   : > { %v2516_v39 = vpop.f32.mrb[16].mxu1 }
 0x223   : > { %v1123_v41 = vadd.f32 %v2516_v39, %v2873_v35  ;;  %v1114_v42 = vpop.f32.mrb[17].mxu1  ;;  %v2434_v39 = vunpack.c.l.bf16 %v2456_v37 }
 0x224   : > { %v1115_v45 = vadd.f32 %v2873_v35, %v1114_v42  ;;  %v2517_v46 = vpop.f32.mrb[18].mxu1 }
 0x225   : > { %v1259_v48 = vadd.f32 %v2418_v38, %v1123_v41  ;;  %v1126_v49 = vadd.f32 %v2517_v46, %v2873_v35  ;;  %v1117_v50 = vpop.f32.mrb[19].mxu1  ;;  %v2455_v38 = vld [vmem:[%s2866_s10 + $0x60] sm:$0xff]  }
 0x226   : > { %v1257_v51 = vadd.f32 %v2414_v40, %v1115_v45  ;;  %v1118_v52 = vadd.f32 %v2873_v35, %v1117_v50  ;;  %v2430_v41 = vunpack.c.l.bf16 %v2455_v38  ;;  %v2435_v45 = vunpack.c.h.bf16 %v2456_v37  ;;  %v3010_v37 = vld [vmem:[%s3124_s7] ss:$0 sm:$0xff] }
 0x227   : > { %vm1291_vm5 = vcmp.ge.f32.partialorder %v1259_v48, 0.0  ;;  %v1323_v53 = vmul.f32 0.01, %v1259_v48  ;;  %v1260_v54 = vadd.f32 %v2419_v44, %v1126_v49 }
 0x228   : > { %vm1289_vm6 = vcmp.ge.f32.partialorder %v1257_v51, 0.0  ;;  %v1321_v55 = vmul.f32 0.01, %v1257_v51  ;;  %v1258_v56 = vadd.f32 %v2415_v47, %v1118_v52 }
 0x229   : > { %v1355_v57 = vsel %vm1291_vm5, %v1259_v48, %v1323_v53  ;;  %vm1292_vm8 = vcmp.ge.f32.partialorder %v1260_v54, 0.0  ;;  %v1324_v58 = vmul.f32 0.01, %v1260_v54  ;;  %v2431_v48 = vunpack.c.h.bf16 %v2455_v38 }
 0x22a   : > { %v2334_v59 = vpack.c.bf16 %v1355_v57, %v1355_v57  ;;  %v1353_v60 = vsel %vm1289_vm6, %v1257_v51, %v1321_v55  ;;  %vm1290_vm9 = vcmp.ge.f32.partialorder %v1258_v56, 0.0  ;;  %v1322_v61 = vmul.f32 0.01, %v1258_v56 }
 0x22b   : > { %v2332_v62 = vpack.c.bf16 %v1353_v60, %v1353_v60  ;;  %v1356_v63 = vsel %vm1292_vm8, %v1260_v54, %v1324_v58 }
 0x22c   : > { %1516 = vst.msk [vmem:[%s2883_s15 + $0x48] sm:$0xf] %vm1497_vm4, %v2334_v59  ;;  %v2335_v0 = vpack.c.bf16 %v1356_v63, %v1356_v63  ;;  %v1354_v1 = vsel %vm1290_vm9, %v1258_v56, %v1322_v61  ;;  %v1378_v2 = vpack.c.bf16 %v1356_v63, %v1355_v57 }
 0x22d   : > { %1514 = vst.msk [vmem:[%s2883_s15 + $0x40] sm:$0xf] %vm1497_vm4, %v2332_v62  ;;  %v2333_v3 = vpack.c.bf16 %v1354_v1, %v1354_v1  ;;  %v1377_v4 = vpack.c.bf16 %v1354_v1, %v1353_v60 }
 0x22e   : > { %1517 = vst.msk [vmem:[%s2883_s15 + $0x4c] sm:$0xf] %vm1497_vm4, %v2335_v0 }
 0x22f   : > { %1515 = vst.msk [vmem:[%s2883_s15 + $0x44] sm:$0xf] %vm1497_vm4, %v2333_v3  ;;  %2554 = vmatprep.mubr.msk.bf16.mxu1 %vm1569_vm7, %v1377_v4 }
 0x230   : > { %2555 = vmatmul.mubr.msk.bf16.gmra.mrb[48].mxu1 %vm1569_vm7, %v1378_v2 }
 0x232   : > { %v2520_v8 = vpop.f32.mrb[20].mxu1 }
 0x233   : > { %v1139_v10 = vadd.f32 %v2520_v8, %v2873_v35  ;;  %v1130_v11 = vpop.f32.mrb[21].mxu1  ;;  %v2442_v8 = vunpack.c.l.bf16 %v2458_v6 }
 0x234   : > { %v1131_v13 = vadd.f32 %v2873_v35, %v1130_v11  ;;  %v2521_v14 = vpop.f32.mrb[22].mxu1 }
 0x235   : > { %v1263_v16 = vadd.f32 %v2426_v7, %v1139_v10  ;;  %v1142_v17 = vadd.f32 %v2521_v14, %v2873_v35  ;;  %v1133_v18 = vpop.f32.mrb[23].mxu1  ;;  %v2457_v7 = vld [vmem:[%s2866_s10 + $0x70] sm:$0xff]  }
 0x236   : > { %v1261_v19 = vadd.f32 %v2422_v9, %v1131_v13  ;;  %v1134_v20 = vadd.f32 %v2873_v35, %v1133_v18  ;;  %v2438_v10 = vunpack.c.l.bf16 %v2457_v7  ;;  %v2443_v13 = vunpack.c.h.bf16 %v2458_v6 }
 0x237   : > { %vm1295_vm10 = vcmp.ge.f32.partialorder %v1263_v16, 0.0  ;;  %v1327_v21 = vmul.f32 0.01, %v1263_v16  ;;  %v1264_v22 = vadd.f32 %v2427_v12, %v1142_v17 }
 0x238   : > { %vm1293_vm11 = vcmp.ge.f32.partialorder %v1261_v19, 0.0  ;;  %v1325_v23 = vmul.f32 0.01, %v1261_v19  ;;  %v1262_v24 = vadd.f32 %v2423_v15, %v1134_v20 }
 0x239   : > { %v1359_v25 = vsel %vm1295_vm10, %v1263_v16, %v1327_v21  ;;  %vm1296_vm12 = vcmp.ge.f32.partialorder %v1264_v22, 0.0  ;;  %v1328_v26 = vmul.f32 0.01, %v1264_v22  ;;  %v2439_v16 = vunpack.c.h.bf16 %v2457_v7 }
 0x23a   : > { %v2338_v27 = vpack.c.bf16 %v1359_v25, %v1359_v25  ;;  %v1357_v28 = vsel %vm1293_vm11, %v1261_v19, %v1325_v23  ;;  %vm1294_vm13 = vcmp.ge.f32.partialorder %v1262_v24, 0.0  ;;  %v1326_v29 = vmul.f32 0.01, %v1262_v24 }
 0x23b   : > { %v2336_v30 = vpack.c.bf16 %v1357_v28, %v1357_v28  ;;  %v1360_v31 = vsel %vm1296_vm12, %v1264_v22, %v1328_v26 }
 0x23c   : > { %1520 = vst.msk [vmem:[%s2883_s15 + $0x58] sm:$0xf] %vm1497_vm4, %v2338_v27  ;;  %v2339_v32 = vpack.c.bf16 %v1360_v31, %v1360_v31  ;;  %v1358_v33 = vsel %vm1294_vm13, %v1262_v24, %v1326_v29  ;;  %v1380_v43 = vpack.c.bf16 %v1360_v31, %v1359_v25 }
 0x23d   : > { %1518 = vst.msk [vmem:[%s2883_s15 + $0x50] sm:$0xf] %vm1497_vm4, %v2336_v30  ;;  %v2337_v34 = vpack.c.bf16 %v1358_v33, %v1358_v33  ;;  %v1379_v36 = vpack.c.bf16 %v1358_v33, %v1357_v28 }
 0x23e   : > { %1521 = vst.msk [vmem:[%s2883_s15 + $0x5c] sm:$0xf] %vm1497_vm4, %v2339_v32 }
 0x23f   : > { %1519 = vst.msk [vmem:[%s2883_s15 + $0x54] sm:$0xf] %vm1497_vm4, %v2337_v34  ;;  %2558 = vmatprep.mubr.msk.bf16.mxu1 %vm1569_vm7, %v1379_v36 }
 0x240   : > { %2559 = vmatmul.mubr.msk.bf16.gmra.mrb[52].mxu1 %vm1569_vm7, %v1380_v43 }
 0x242   : > { %v2524_v40 = vpop.f32.mrb[24].mxu1 }
 0x243   : > { %v1155_v42 = vadd.f32 %v2524_v40, %v2873_v35  ;;  %v1146_v44 = vpop.f32.mrb[25].mxu1 }
 0x244   : > { %v1147_v46 = vadd.f32 %v2873_v35, %v1146_v44  ;;  %v2525_v47 = vpop.f32.mrb[26].mxu1 }
 0x245   : > { %v1267_v49 = vadd.f32 %v2434_v39, %v1155_v42  ;;  %v1158_v50 = vadd.f32 %v2525_v47, %v2873_v35  ;;  %v1149_v51 = vpop.f32.mrb[27].mxu1 }
 0x246   : > { %v1265_v52 = vadd.f32 %v2430_v41, %v1147_v46  ;;  %v1150_v53 = vadd.f32 %v2873_v35, %v1149_v51 }
 0x247   : > { %vm1299_vm14 = vcmp.ge.f32.partialorder %v1267_v49, 0.0  ;;  %v1331_v54 = vmul.f32 0.01, %v1267_v49  ;;  %v1268_v55 = vadd.f32 %v2435_v45, %v1158_v50 }
 0x248   : > { %vm1297_vm15 = vcmp.ge.f32.partialorder %v1265_v52, 0.0  ;;  %v1329_v56 = vmul.f32 0.01, %v1265_v52  ;;  %v1266_v57 = vadd.f32 %v2431_v48, %v1150_v53 }
 0x249   : > { %v1363_v58 = vsel %vm1299_vm14, %v1267_v49, %v1331_v54  ;;  %vm1300_vm1 = vcmp.ge.f32.partialorder %v1268_v55, 0.0  ;;  %v1332_v59 = vmul.f32 0.01, %v1268_v55 }
 0x24a   : > { %v2342_v60 = vpack.c.bf16 %v1363_v58, %v1363_v58  ;;  %v1361_v61 = vsel %vm1297_vm15, %v1265_v52, %v1329_v56  ;;  %vm1298_vm2 = vcmp.ge.f32.partialorder %v1266_v57, 0.0  ;;  %v1330_v62 = vmul.f32 0.01, %v1266_v57 }
 0x24b   : > { %v2340_v63 = vpack.c.bf16 %v1361_v61, %v1361_v61  ;;  %v1364_v0 = vsel %vm1300_vm1, %v1268_v55, %v1332_v59 }
 0x24c   : > { %1524 = vst.msk [vmem:[%s2883_s15 + $0x68] sm:$0xf] %vm1497_vm4, %v2342_v60  ;;  %v2343_v1 = vpack.c.bf16 %v1364_v0, %v1364_v0  ;;  %v1362_v2 = vsel %vm1298_vm2, %v1266_v57, %v1330_v62  ;;  %v1382_v3 = vpack.c.bf16 %v1364_v0, %v1363_v58 }
 0x24d   : > { %1522 = vst.msk [vmem:[%s2883_s15 + $0x60] sm:$0xf] %vm1497_vm4, %v2340_v63  ;;  %v2341_v4 = vpack.c.bf16 %v1362_v2, %v1362_v2  ;;  %v1381_v5 = vpack.c.bf16 %v1362_v2, %v1361_v61 }
 0x24e   : > { %1525 = vst.msk [vmem:[%s2883_s15 + $0x6c] sm:$0xf] %vm1497_vm4, %v2343_v1 }
 0x24f   : > { %1523 = vst.msk [vmem:[%s2883_s15 + $0x64] sm:$0xf] %vm1497_vm4, %v2341_v4  ;;  %2562 = vmatprep.mubr.msk.bf16.mxu1 %vm1569_vm7, %v1381_v5 }
 0x250   : > { %2563 = vmatmul.mubr.msk.bf16.gmra.mrb[56].mxu1 %vm1569_vm7, %v1382_v3 }
 0x252   : > { %v2528_v9 = vpop.f32.mrb[28].mxu1 }
 0x253   : > { %v1171_v11 = vadd.f32 %v2528_v9, %v2873_v35  ;;  %v1162_v12 = vpop.f32.mrb[29].mxu1 }
 0x254   : > { %v1163_v14 = vadd.f32 %v2873_v35, %v1162_v12  ;;  %v2529_v15 = vpop.f32.mrb[30].mxu1 }
 0x255   : > { %v1271_v17 = vadd.f32 %v2442_v8, %v1171_v11  ;;  %v1174_v18 = vadd.f32 %v2529_v15, %v2873_v35  ;;  %v1165_v19 = vpop.f32.mrb[31].mxu1 }
 0x256   : > { %v1269_v20 = vadd.f32 %v2438_v10, %v1163_v14  ;;  %v1166_v21 = vadd.f32 %v2873_v35, %v1165_v19 }
 0x257   : > { %vm1303_vm0 = vcmp.ge.f32.partialorder %v1271_v17, 0.0  ;;  %v1335_v22 = vmul.f32 0.01, %v1271_v17  ;;  %v1272_v23 = vadd.f32 %v2443_v13, %v1174_v18 }
 0x258   : > { %vm1301_vm3 = vcmp.ge.f32.partialorder %v1269_v20, 0.0  ;;  %v1333_v24 = vmul.f32 0.01, %v1269_v20  ;;  %v1270_v25 = vadd.f32 %v2439_v16, %v1166_v21 }
 0x259   : > { %v1367_v26 = vsel %vm1303_vm0, %v1271_v17, %v1335_v22  ;;  %vm1304_vm5 = vcmp.ge.f32.partialorder %v1272_v23, 0.0  ;;  %v1336_v27 = vmul.f32 0.01, %v1272_v23 }
 0x25a   : > { %v2346_v28 = vpack.c.bf16 %v1367_v26, %v1367_v26  ;;  %v1365_v29 = vsel %vm1301_vm3, %v1269_v20, %v1333_v24  ;;  %vm1302_vm6 = vcmp.ge.f32.partialorder %v1270_v25, 0.0  ;;  %v1334_v30 = vmul.f32 0.01, %v1270_v25 }
 0x25b   : > { %v2344_v31 = vpack.c.bf16 %v1365_v29, %v1365_v29  ;;  %v1368_v32 = vsel %vm1304_vm5, %v1272_v23, %v1336_v27 }
 0x25c   : > { %1528 = vst.msk [vmem:[%s2883_s15 + $0x78] sm:$0xf] %vm1497_vm4, %v2346_v28  ;;  %v2347_v35 = vpack.c.bf16 %v1368_v32, %v1368_v32  ;;  %v1366_v33 = vsel %vm1302_vm6, %v1270_v25, %v1334_v30  ;;  %v1384_v43 = vpack.c.bf16 %v1368_v32, %v1367_v26 }
 0x25d   : > { %1526 = vst.msk [vmem:[%s2883_s15 + $0x70] sm:$0xf] %vm1497_vm4, %v2344_v31  ;;  %v2345_v34 = vpack.c.bf16 %v1366_v33, %v1366_v33  ;;  %v1383_v36 = vpack.c.bf16 %v1366_v33, %v1365_v29 }
 0x25e   : > { %1529 = vst.msk [vmem:[%s2883_s15 + $0x7c] sm:$0xf] %vm1497_vm4, %v2347_v35 }
 0x25f   : > { %1527 = vst.msk [vmem:[%s2883_s15 + $0x74] sm:$0xf] %vm1497_vm4, %v2345_v34  ;;  %2566 = vmatprep.mubr.msk.bf16.mxu1 %vm1569_vm7, %v1383_v36 }
 0x260   : > { %2567 = vmatmul.mubr.msk.bf16.gmra.mrb[60].mxu1 %vm1569_vm7, %v1384_v43  ;;  %vm2003_vm7 = vcmask 257024  }
 0x2c3   : > { %v2540_v38 = vpop.f32.mrb[32].mxu1 }
 0x2c4   : > { %v1661_v39 = vadd.f32 %v2540_v38, %v3010_v37  ;;  %v1652_v40 = vpop.f32.mrb[33].mxu1 }
 0x2c5   : > { %v1653_v41 = vadd.f32 %v3010_v37, %v1652_v40  ;;  %v2541_v42 = vpop.f32.mrb[34].mxu1 }
 0x2c6   : > { %vm1781_vm8 = vcmp.ge.f32.partialorder %v1661_v39, 0.0  ;;  %v1813_v44 = vmul.f32 0.01, %v1661_v39  ;;  %v1664_v45 = vadd.f32 %v2541_v42, %v3010_v37  ;;  %v1655_v46 = vpop.f32.mrb[35].mxu1 }
 0x2c7   : > { %vm1779_vm4 = vcmp.ge.f32.partialorder %v1653_v41, 0.0  ;;  %v1811_v47 = vmul.f32 0.01, %v1653_v41  ;;  %v1656_v48 = vadd.f32 %v3010_v37, %v1655_v46 }
 0x2c8   : > { %v1845_v49 = vsel %vm1781_vm8, %v1661_v39, %v1813_v44  ;;  %vm1782_vm9 = vcmp.ge.f32.partialorder %v1664_v45, 0.0  ;;  %v1814_v50 = vmul.f32 0.01, %v1664_v45 }
 0x2c9   : > { %v2350_v51 = vpack.c.bf16 %v1845_v49, %v1845_v49  ;;  %v1843_v52 = vsel %vm1779_vm4, %v1653_v41, %v1811_v47  ;;  %vm1780_vm10 = vcmp.ge.f32.partialorder %v1656_v48, 0.0  ;;  %v1812_v53 = vmul.f32 0.01, %v1656_v48 }
 0x2ca   : > { %v2348_v54 = vpack.c.bf16 %v1843_v52, %v1843_v52  ;;  %v1846_v55 = vsel %vm1782_vm9, %v1664_v45, %v1814_v50 }
 0x2cb   : > { %2006 = vst.msk [vmem:[%s3020_s20 + $0x8] sm:$0xf] %vm2003_vm7, %v2350_v51  ;;  %v2351_v56 = vpack.c.bf16 %v1846_v55, %v1846_v55  ;;  %v1844_v57 = vsel %vm1780_vm10, %v1656_v48, %v1812_v53 }
 0x2cc   : > { %2004 = vst.msk [vmem:[%s3020_s20] sm:$0xf] %vm2003_vm7, %v2348_v54  ;;  %v2349_v58 = vpack.c.bf16 %v1844_v57, %v1844_v57 }
 0x2cd   : > { %2007 = vst.msk [vmem:[%s3020_s20 + $0xc] sm:$0xf] %vm2003_vm7, %v2351_v56 }
 0x2ce   : > { %2005 = vst.msk [vmem:[%s3020_s20 + $0x4] sm:$0xf] %vm2003_vm7, %v2349_v58 }
 0x2d3   : > { %v2544_v59 = vpop.f32.mrb[36].mxu1 }
 0x2d4   : > { %v1677_v60 = vadd.f32 %v2544_v59, %v3010_v37  ;;  %v1668_v61 = vpop.f32.mrb[37].mxu1 }
 0x2d5   : > { %v1669_v62 = vadd.f32 %v3010_v37, %v1668_v61  ;;  %v2545_v63 = vpop.f32.mrb[38].mxu1 }
 0x2d6   : > { %vm1785_vm11 = vcmp.ge.f32.partialorder %v1677_v60, 0.0  ;;  %v1817_v0 = vmul.f32 0.01, %v1677_v60  ;;  %v1680_v1 = vadd.f32 %v2545_v63, %v3010_v37  ;;  %v1671_v2 = vpop.f32.mrb[39].mxu1 }
 0x2d7   : > { %vm1783_vm12 = vcmp.ge.f32.partialorder %v1669_v62, 0.0  ;;  %v1815_v3 = vmul.f32 0.01, %v1669_v62  ;;  %v1672_v4 = vadd.f32 %v3010_v37, %v1671_v2 }
 0x2d8   : > { %v1849_v5 = vsel %vm1785_vm11, %v1677_v60, %v1817_v0  ;;  %vm1786_vm13 = vcmp.ge.f32.partialorder %v1680_v1, 0.0  ;;  %v1818_v6 = vmul.f32 0.01, %v1680_v1 }
 0x2d9   : > { %v2354_v7 = vpack.c.bf16 %v1849_v5, %v1849_v5  ;;  %v1847_v8 = vsel %vm1783_vm12, %v1669_v62, %v1815_v3  ;;  %vm1784_vm14 = vcmp.ge.f32.partialorder %v1672_v4, 0.0  ;;  %v1816_v9 = vmul.f32 0.01, %v1672_v4 }
 0x2da   : > { %v2352_v10 = vpack.c.bf16 %v1847_v8, %v1847_v8  ;;  %v1850_v11 = vsel %vm1786_vm13, %v1680_v1, %v1818_v6 }
 0x2db   : > { %2010 = vst.msk [vmem:[%s3020_s20 + $0x18] sm:$0xf] %vm2003_vm7, %v2354_v7  ;;  %v2355_v12 = vpack.c.bf16 %v1850_v11, %v1850_v11  ;;  %v1848_v13 = vsel %vm1784_vm14, %v1672_v4, %v1816_v9 }
 0x2dc   : > { %2008 = vst.msk [vmem:[%s3020_s20 + $0x10] sm:$0xf] %vm2003_vm7, %v2352_v10  ;;  %v2353_v14 = vpack.c.bf16 %v1848_v13, %v1848_v13 }
 0x2dd   : > { %2011 = vst.msk [vmem:[%s3020_s20 + $0x1c] sm:$0xf] %vm2003_vm7, %v2355_v12 }
 0x2de   : > { %2009 = vst.msk [vmem:[%s3020_s20 + $0x14] sm:$0xf] %vm2003_vm7, %v2353_v14 }
 0x2e3   : > { %v2548_v15 = vpop.f32.mrb[40].mxu1 }
 0x2e4   : > { %v1693_v16 = vadd.f32 %v2548_v15, %v3010_v37  ;;  %v1684_v17 = vpop.f32.mrb[41].mxu1 }
 0x2e5   : > { %v1685_v18 = vadd.f32 %v3010_v37, %v1684_v17  ;;  %v2549_v19 = vpop.f32.mrb[42].mxu1 }
 0x2e6   : > { %vm1789_vm15 = vcmp.ge.f32.partialorder %v1693_v16, 0.0  ;;  %v1821_v20 = vmul.f32 0.01, %v1693_v16  ;;  %v1696_v21 = vadd.f32 %v2549_v19, %v3010_v37  ;;  %v1687_v22 = vpop.f32.mrb[43].mxu1 }
 0x2e7   : > { %vm1787_vm1 = vcmp.ge.f32.partialorder %v1685_v18, 0.0  ;;  %v1819_v23 = vmul.f32 0.01, %v1685_v18  ;;  %v1688_v24 = vadd.f32 %v3010_v37, %v1687_v22 }
 0x2e8   : > { %v1853_v25 = vsel %vm1789_vm15, %v1693_v16, %v1821_v20  ;;  %vm1790_vm2 = vcmp.ge.f32.partialorder %v1696_v21, 0.0  ;;  %v1822_v26 = vmul.f32 0.01, %v1696_v21 }
 0x2e9   : > { %v2358_v27 = vpack.c.bf16 %v1853_v25, %v1853_v25  ;;  %v1851_v28 = vsel %vm1787_vm1, %v1685_v18, %v1819_v23  ;;  %vm1788_vm0 = vcmp.ge.f32.partialorder %v1688_v24, 0.0  ;;  %v1820_v29 = vmul.f32 0.01, %v1688_v24 }
 0x2ea   : > { %v2356_v30 = vpack.c.bf16 %v1851_v28, %v1851_v28  ;;  %v1854_v31 = vsel %vm1790_vm2, %v1696_v21, %v1822_v26 }
 0x2eb   : > { %2014 = vst.msk [vmem:[%s3020_s20 + $0x28] sm:$0xf] %vm2003_vm7, %v2358_v27  ;;  %v2359_v32 = vpack.c.bf16 %v1854_v31, %v1854_v31  ;;  %v1852_v35 = vsel %vm1788_vm0, %v1688_v24, %v1820_v29 }
 0x2ec   : > { %2012 = vst.msk [vmem:[%s3020_s20 + $0x20] sm:$0xf] %vm2003_vm7, %v2356_v30  ;;  %v2357_v33 = vpack.c.bf16 %v1852_v35, %v1852_v35 }
 0x2ed   : > { %2015 = vst.msk [vmem:[%s3020_s20 + $0x2c] sm:$0xf] %vm2003_vm7, %v2359_v32 }
 0x2ee   : > { %2013 = vst.msk [vmem:[%s3020_s20 + $0x24] sm:$0xf] %vm2003_vm7, %v2357_v33 }
 0x2f3   : > { %v2552_v43 = vpop.f32.mrb[44].mxu1 }
 0x2f4   : > { %v1709_v34 = vadd.f32 %v2552_v43, %v3010_v37  ;;  %v1700_v36 = vpop.f32.mrb[45].mxu1 }
 0x2f5   : > { %v1701_v38 = vadd.f32 %v3010_v37, %v1700_v36  ;;  %v2553_v39 = vpop.f32.mrb[46].mxu1 }
 0x2f6   : > { %vm1793_vm3 = vcmp.ge.f32.partialorder %v1709_v34, 0.0  ;;  %v1825_v40 = vmul.f32 0.01, %v1709_v34  ;;  %v1712_v41 = vadd.f32 %v2553_v39, %v3010_v37  ;;  %v1703_v42 = vpop.f32.mrb[47].mxu1 }
 0x2f7   : > { %vm1791_vm5 = vcmp.ge.f32.partialorder %v1701_v38, 0.0  ;;  %v1823_v44 = vmul.f32 0.01, %v1701_v38  ;;  %v1704_v45 = vadd.f32 %v3010_v37, %v1703_v42 }
 0x2f8   : > { %v1857_v46 = vsel %vm1793_vm3, %v1709_v34, %v1825_v40  ;;  %vm1794_vm6 = vcmp.ge.f32.partialorder %v1712_v41, 0.0  ;;  %v1826_v47 = vmul.f32 0.01, %v1712_v41 }
 0x2f9   : > { %v2362_v48 = vpack.c.bf16 %v1857_v46, %v1857_v46  ;;  %v1855_v49 = vsel %vm1791_vm5, %v1701_v38, %v1823_v44  ;;  %vm1792_vm8 = vcmp.ge.f32.partialorder %v1704_v45, 0.0  ;;  %v1824_v50 = vmul.f32 0.01, %v1704_v45 }
 0x2fa   : > { %v2360_v51 = vpack.c.bf16 %v1855_v49, %v1855_v49  ;;  %v1858_v52 = vsel %vm1794_vm6, %v1712_v41, %v1826_v47 }
 0x2fb   : > { %2018 = vst.msk [vmem:[%s3020_s20 + $0x38] sm:$0xf] %vm2003_vm7, %v2362_v48  ;;  %v2363_v53 = vpack.c.bf16 %v1858_v52, %v1858_v52  ;;  %v1856_v54 = vsel %vm1792_vm8, %v1704_v45, %v1824_v50 }
 0x2fc   : > { %2016 = vst.msk [vmem:[%s3020_s20 + $0x30] sm:$0xf] %vm2003_vm7, %v2360_v51  ;;  %v2361_v55 = vpack.c.bf16 %v1856_v54, %v1856_v54 }
 0x2fd   : > { %2019 = vst.msk [vmem:[%s3020_s20 + $0x3c] sm:$0xf] %vm2003_vm7, %v2363_v53 }
 0x2fe   : > { %2017 = vst.msk [vmem:[%s3020_s20 + $0x34] sm:$0xf] %vm2003_vm7, %v2361_v55 }
 0x303   : > { %v2556_v56 = vpop.f32.mrb[48].mxu1 }
 0x304   : > { %v1725_v57 = vadd.f32 %v2556_v56, %v3010_v37  ;;  %v1716_v58 = vpop.f32.mrb[49].mxu1 }
 0x305   : > { %v1717_v59 = vadd.f32 %v3010_v37, %v1716_v58  ;;  %v2557_v60 = vpop.f32.mrb[50].mxu1 }
 0x306   : > { %vm1797_vm4 = vcmp.ge.f32.partialorder %v1725_v57, 0.0  ;;  %v1829_v61 = vmul.f32 0.01, %v1725_v57  ;;  %v1728_v62 = vadd.f32 %v2557_v60, %v3010_v37  ;;  %v1719_v63 = vpop.f32.mrb[51].mxu1 }
 0x307   : > { %vm1795_vm9 = vcmp.ge.f32.partialorder %v1717_v59, 0.0  ;;  %v1827_v0 = vmul.f32 0.01, %v1717_v59  ;;  %v1720_v1 = vadd.f32 %v3010_v37, %v1719_v63 }
 0x308   : > { %v1861_v2 = vsel %vm1797_vm4, %v1725_v57, %v1829_v61  ;;  %vm1798_vm10 = vcmp.ge.f32.partialorder %v1728_v62, 0.0  ;;  %v1830_v3 = vmul.f32 0.01, %v1728_v62 }
 0x309   : > { %v2366_v4 = vpack.c.bf16 %v1861_v2, %v1861_v2  ;;  %v1859_v5 = vsel %vm1795_vm9, %v1717_v59, %v1827_v0  ;;  %vm1796_vm11 = vcmp.ge.f32.partialorder %v1720_v1, 0.0  ;;  %v1828_v6 = vmul.f32 0.01, %v1720_v1 }
 0x30a   : > { %v2364_v7 = vpack.c.bf16 %v1859_v5, %v1859_v5  ;;  %v1862_v8 = vsel %vm1798_vm10, %v1728_v62, %v1830_v3 }
 0x30b   : > { %2022 = vst.msk [vmem:[%s3020_s20 + $0x48] sm:$0xf] %vm2003_vm7, %v2366_v4  ;;  %v2367_v9 = vpack.c.bf16 %v1862_v8, %v1862_v8  ;;  %v1860_v10 = vsel %vm1796_vm11, %v1720_v1, %v1828_v6 }
 0x30c   : > { %2020 = vst.msk [vmem:[%s3020_s20 + $0x40] sm:$0xf] %vm2003_vm7, %v2364_v7  ;;  %v2365_v11 = vpack.c.bf16 %v1860_v10, %v1860_v10 }
 0x30d   : > { %2023 = vst.msk [vmem:[%s3020_s20 + $0x4c] sm:$0xf] %vm2003_vm7, %v2367_v9 }
 0x30e   : > { %2021 = vst.msk [vmem:[%s3020_s20 + $0x44] sm:$0xf] %vm2003_vm7, %v2365_v11 }
 0x313   : > { %v2560_v12 = vpop.f32.mrb[52].mxu1 }
 0x314   : > { %v1741_v13 = vadd.f32 %v2560_v12, %v3010_v37  ;;  %v1732_v14 = vpop.f32.mrb[53].mxu1 }
 0x315   : > { %v1733_v15 = vadd.f32 %v3010_v37, %v1732_v14  ;;  %v2561_v16 = vpop.f32.mrb[54].mxu1 }
 0x316   : > { %vm1801_vm12 = vcmp.ge.f32.partialorder %v1741_v13, 0.0  ;;  %v1833_v17 = vmul.f32 0.01, %v1741_v13  ;;  %v1744_v18 = vadd.f32 %v2561_v16, %v3010_v37  ;;  %v1735_v19 = vpop.f32.mrb[55].mxu1 }
 0x317   : > { %vm1799_vm13 = vcmp.ge.f32.partialorder %v1733_v15, 0.0  ;;  %v1831_v20 = vmul.f32 0.01, %v1733_v15  ;;  %v1736_v21 = vadd.f32 %v3010_v37, %v1735_v19 }
 0x318   : > { %v1865_v22 = vsel %vm1801_vm12, %v1741_v13, %v1833_v17  ;;  %vm1802_vm14 = vcmp.ge.f32.partialorder %v1744_v18, 0.0  ;;  %v1834_v23 = vmul.f32 0.01, %v1744_v18 }
 0x319   : > { %v2370_v24 = vpack.c.bf16 %v1865_v22, %v1865_v22  ;;  %v1863_v25 = vsel %vm1799_vm13, %v1733_v15, %v1831_v20  ;;  %vm1800_vm15 = vcmp.ge.f32.partialorder %v1736_v21, 0.0  ;;  %v1832_v26 = vmul.f32 0.01, %v1736_v21 }
 0x31a   : > { %v2368_v27 = vpack.c.bf16 %v1863_v25, %v1863_v25  ;;  %v1866_v28 = vsel %vm1802_vm14, %v1744_v18, %v1834_v23 }
 0x31b   : > { %2026 = vst.msk [vmem:[%s3020_s20 + $0x58] sm:$0xf] %vm2003_vm7, %v2370_v24  ;;  %v2371_v29 = vpack.c.bf16 %v1866_v28, %v1866_v28  ;;  %v1864_v30 = vsel %vm1800_vm15, %v1736_v21, %v1832_v26 }
 0x31c   : > { %2024 = vst.msk [vmem:[%s3020_s20 + $0x50] sm:$0xf] %vm2003_vm7, %v2368_v27  ;;  %v2369_v31 = vpack.c.bf16 %v1864_v30, %v1864_v30 }
 0x31d   : > { %2027 = vst.msk [vmem:[%s3020_s20 + $0x5c] sm:$0xf] %vm2003_vm7, %v2371_v29 }
 0x31e   : > { %2025 = vst.msk [vmem:[%s3020_s20 + $0x54] sm:$0xf] %vm2003_vm7, %v2369_v31 }
 0x323   : > { %v2564_v32 = vpop.f32.mrb[56].mxu1 }
 0x324   : > { %v1757_v35 = vadd.f32 %v2564_v32, %v3010_v37  ;;  %v1748_v33 = vpop.f32.mrb[57].mxu1 }
 0x325   : > { %v1749_v43 = vadd.f32 %v3010_v37, %v1748_v33  ;;  %v2565_v34 = vpop.f32.mrb[58].mxu1 }
 0x326   : > { %vm1805_vm1 = vcmp.ge.f32.partialorder %v1757_v35, 0.0  ;;  %v1837_v36 = vmul.f32 0.01, %v1757_v35  ;;  %v1760_v38 = vadd.f32 %v2565_v34, %v3010_v37  ;;  %v1751_v39 = vpop.f32.mrb[59].mxu1 }
 0x327   : > { %vm1803_vm2 = vcmp.ge.f32.partialorder %v1749_v43, 0.0  ;;  %v1835_v40 = vmul.f32 0.01, %v1749_v43  ;;  %v1752_v41 = vadd.f32 %v3010_v37, %v1751_v39 }
 0x328   : > { %v1869_v42 = vsel %vm1805_vm1, %v1757_v35, %v1837_v36  ;;  %vm1806_vm0 = vcmp.ge.f32.partialorder %v1760_v38, 0.0  ;;  %v1838_v44 = vmul.f32 0.01, %v1760_v38 }
 0x329   : > { %v2374_v45 = vpack.c.bf16 %v1869_v42, %v1869_v42  ;;  %v1867_v46 = vsel %vm1803_vm2, %v1749_v43, %v1835_v40  ;;  %vm1804_vm3 = vcmp.ge.f32.partialorder %v1752_v41, 0.0  ;;  %v1836_v47 = vmul.f32 0.01, %v1752_v41 }
 0x32a   : > { %v2372_v48 = vpack.c.bf16 %v1867_v46, %v1867_v46  ;;  %v1870_v49 = vsel %vm1806_vm0, %v1760_v38, %v1838_v44 }
 0x32b   : > { %2030 = vst.msk [vmem:[%s3020_s20 + $0x68] sm:$0xf] %vm2003_vm7, %v2374_v45  ;;  %v2375_v50 = vpack.c.bf16 %v1870_v49, %v1870_v49  ;;  %v1868_v51 = vsel %vm1804_vm3, %v1752_v41, %v1836_v47 }
 0x32c   : > { %2028 = vst.msk [vmem:[%s3020_s20 + $0x60] sm:$0xf] %vm2003_vm7, %v2372_v48  ;;  %v2373_v52 = vpack.c.bf16 %v1868_v51, %v1868_v51 }
 0x32d   : > { %2031 = vst.msk [vmem:[%s3020_s20 + $0x6c] sm:$0xf] %vm2003_vm7, %v2375_v50 }
 0x32e   : > { %2029 = vst.msk [vmem:[%s3020_s20 + $0x64] sm:$0xf] %vm2003_vm7, %v2373_v52 }
 0x333   : > { %v2568_v53 = vpop.f32.mrb[60].mxu1 }
 0x334   : > { %v1773_v54 = vadd.f32 %v2568_v53, %v3010_v37  ;;  %v1764_v55 = vpop.f32.mrb[61].mxu1 }
 0x335   : > { %v1765_v56 = vadd.f32 %v3010_v37, %v1764_v55  ;;  %v2569_v57 = vpop.f32.mrb[62].mxu1 }
 0x336   : > { %vm1809_vm5 = vcmp.ge.f32.partialorder %v1773_v54, 0.0  ;;  %v1841_v58 = vmul.f32 0.01, %v1773_v54  ;;  %v1776_v59 = vadd.f32 %v2569_v57, %v3010_v37  ;;  %v1767_v60 = vpop.f32.mrb[63].mxu1 }
 0x337   : > { %vm1807_vm6 = vcmp.ge.f32.partialorder %v1765_v56, 0.0  ;;  %v1839_v61 = vmul.f32 0.01, %v1765_v56  ;;  %v1768_v62 = vadd.f32 %v3010_v37, %v1767_v60 }
 0x338   : > { %v1873_v63 = vsel %vm1809_vm5, %v1773_v54, %v1841_v58  ;;  %vm1810_vm8 = vcmp.ge.f32.partialorder %v1776_v59, 0.0  ;;  %v1842_v0 = vmul.f32 0.01, %v1776_v59 }
 0x339   : > { %v2378_v1 = vpack.c.bf16 %v1873_v63, %v1873_v63  ;;  %v1871_v2 = vsel %vm1807_vm6, %v1765_v56, %v1839_v61  ;;  %vm1808_vm4 = vcmp.ge.f32.partialorder %v1768_v62, 0.0  ;;  %v1840_v3 = vmul.f32 0.01, %v1768_v62 }
 0x33a   : > { %v2376_v4 = vpack.c.bf16 %v1871_v2, %v1871_v2  ;;  %v1874_v5 = vsel %vm1810_vm8, %v1776_v59, %v1842_v0 }
 0x33b   : > { %2034 = vst.msk [vmem:[%s3020_s20 + $0x78] sm:$0xf] %vm2003_vm7, %v2378_v1  ;;  %v2379_v6 = vpack.c.bf16 %v1874_v5, %v1874_v5  ;;  %v1872_v7 = vsel %vm1808_vm4, %v1768_v62, %v1840_v3 }
 0x33c   : > { %2032 = vst.msk [vmem:[%s3020_s20 + $0x70] sm:$0xf] %vm2003_vm7, %v2376_v4  ;;  %v2377_v8 = vpack.c.bf16 %v1872_v7, %v1872_v7 }
 0x33d   : > { %2035 = vst.msk [vmem:[%s3020_s20 + $0x7c] sm:$0xf] %vm2003_vm7, %v2379_v6 }
 0x33e   : > { %2033 = vst.msk [vmem:[%s3020_s20 + $0x74] sm:$0xf] %vm2003_vm7, %v2377_v8 }
 0x33f PF: > { %s20_s30 = sadd.s32 1, %s2647_s30  }
 0x340   : > { %p17_p4 = scmp.ge.s32.totalorder %s20_s30, 4  }
 0x342   :  { %19 = sbr.rel (!%p17_p4) target bundleno = 1 (0x1), region = 97 }

// kernel: resnet_forward.18
= control target key start
LH: loop header
LB: loop body
LE: loop exit
PB: predicated region body
PF: predicated region fallthrough
CT: control target
= control target key end

     0   :  { %vm338_vm0 = vcmask 261120   ;;  %s2438_s2 = inlined_call_operand.vmem [shape: bf16[288,32], index: 2, kind: input, shape index: {}]   ;;  %s2439_s0 = inlined_call_operand.vmem [shape: bf16[128,288], index: 0, kind: input, shape index: {}]   ;;  %s2440_s4 = inlined_call_operand.vmem [shape: bf16[32,128], index: 4, kind: input, shape index: {}]   ;;  %s2441_s6 = inlined_call_operand.vmem [shape: bf16[64,128], index: 6, kind: input, shape index: {}]   ;;  %s2442_s1 = inlined_call_operand.vmem [shape: bf16[128,64], index: 1, kind: input, shape index: {}]   ;;  %s2443_s7 = inlined_call_operand.vmem [shape: bf16[128,32], index: 7, kind: input, shape index: {}]   ;;  %s2444_s3 = inlined_call_operand.vmem [shape: f32[1,32], index: 3, kind: input, shape index: {}]   ;;  %s2445_s5 = inlined_call_operand.vmem [shape: f32[1,128], index: 5, kind: input, shape index: {}]   ;;  %s2446_s9 = inlined_call_operand.vmem [shape: bf16[128,128], index: 9, kind: output, shape index: {0}]   ;;  %s2447_s8 = inlined_call_operand.vmem [shape: f32[1,32], index: 8, kind: input, shape index: {}]   ;;  %s2448_s10 = inlined_call_operand.vmem [shape: bf16[128,32], index: 10, kind: output, shape index: {1}]  }
   0x1   :  { %v1874_v0 = vld [vmem:[%s2438_s2 + $0x40] sm:$0xff]   ;;  %v1876_v2 = vld [vmem:[%s2438_s2 + $0x48] sm:$0xff]   ;;  %v1878_v4 = vld [vmem:[%s2438_s2 + $0x50] sm:$0xff]  }
   0x2   :  { %v1875_v1 = vld [vmem:[%s2438_s2] sm:$0xff]   ;;  %1618 = vmatprep.subr.bf16.mxu0 %v1874_v0  ;;  %v1877_v3 = vld [vmem:[%s2438_s2 + $0x8] sm:$0xff]   ;;  %v1879_v5 = vld [vmem:[%s2438_s2 + $0x10] sm:$0xff]  }
   0x3   :  { %1619 = vmatpush3.bf16.msra.mxu0 %v1875_v1  ;;  %v1880_v6 = vld [vmem:[%s2438_s2 + $0x58] sm:$0xff]   ;;  %v1882_v8 = vld [vmem:[%s2438_s2 + $0x60] sm:$0xff]   ;;  %v1884_v11 = vld [vmem:[%s2438_s2 + $0x68] sm:$0xff]  }
   0x4   :  { %1620 = vmatprep.subr.bf16.mxu0 %v1876_v2  ;;  %v1881_v7 = vld [vmem:[%s2438_s2 + $0x18] sm:$0xff]   ;;  %v1883_v9 = vld [vmem:[%s2438_s2 + $0x20] sm:$0xff]   ;;  %v1885_v12 = vld [vmem:[%s2438_s2 + $0x28] sm:$0xff]  }
   0x5   :  { %v1889_v10 = vld [vmem:[%s2438_s2 + $0x80] sm:$0xff]   ;;  %v1886_v13 = vld [vmem:[%s2438_s2 + $0x70] sm:$0xff]   ;;  %v1894_v15 = vld [vmem:[%s2438_s2 + $0x88] sm:$0xff]  }
   0x6   :  { %1730 = vmatprep.subr.bf16.mxu1 %v1889_v10  ;;  %v1893_v14 = vld [vmem:[%s2439_s0 + $0x4] ss:$12 sps:$4 sm:$0xff]   ;;  %v1895_v16 = vld [vmem:[%s2439_s0 + $0x8] ss:$12 sps:$4 sm:$0xff]   ;;  %v1896_v17 = vld [vmem:[%s2439_s0 + $0x20] ss:$12 sps:$4 sm:$0xff]  }
   0x7   :  { %1621 = vmatpush3.bf16.msra.mxu0 %v1877_v3  ;;  %1731 = vmatpush3.bf16.msra.mxu1 %v1889_v10  ;;  %v1887_v18 = vld [vmem:[%s2438_s2 + $0x30] sm:$0xff]   ;;  %v1888_v19 = vld [vmem:[%s2438_s2 + $0x78] sm:$0xff]   ;;  %v1891_v22 = vld [vmem:[%s2439_s0] ss:$12 sps:$4 sm:$0xff]  }
   0x8   :  { %1622 = vmatprep.subr.bf16.mxu0 %v1878_v4  ;;  %395 = vmatprep.mubr.bf16.mxu0 %v1893_v14  ;;  %v1903_v20 = vld [vmem:[%s2439_s0 + $0x38] ss:$12 sps:$4 sm:$0xff]   ;;  %v1904_v23 = vld [vmem:[%s2439_s0 + $0x50] ss:$12 sps:$4 sm:$0xff]   ;;  %v1911_v24 = vld [vmem:[%s2439_s0 + $0x68] ss:$12 sps:$4 sm:$0xff]  }
   0x9   :  { %1732 = vmatprep.subr.bf16.mxu1 %v1894_v15  ;;  %1734 = vmatprep.mubr.msk.bf16.mxu1 %vm338_vm0, %v1895_v16  ;;  %v1890_v21 = vld [vmem:[%s2438_s2 + $0x38] sm:$0xff]   ;;  %v1912_v26 = vld [vmem:[%s2439_s0 + $0x80] ss:$12 sps:$4 sm:$0xff]   ;;  %v1907_v33 = vld [vmem:[%s2439_s0 + $0x48] ss:$12 sps:$4 sm:$0xff]  }
   0xa   :  { %v1897_v25 = vld [vmem:[%s2439_s0 + $0x1c] ss:$12 sps:$4 sm:$0xff]   ;;  %v1899_v27 = vld [vmem:[%s2439_s0 + $0x18] ss:$12 sps:$4 sm:$0xff]   ;;  %v1900_v29 = vld [vmem:[%s2439_s0 + $0x34] ss:$12 sps:$4 sm:$0xff]  }
   0xb   :  { %1623 = vmatpush3.bf16.msra.mxu0 %v1879_v5  ;;  %1733 = vmatpush3.bf16.msra.mxu1 %v1894_v15  ;;  %v1919_v28 = vld [vmem:[%s2439_s0 + $0x98] ss:$12 sps:$4 sm:$0xff]   ;;  %v1920_v30 = vld [vmem:[%s2439_s0 + $0xb0] ss:$12 sps:$4 sm:$0xff]   ;;  %v1910_v35 = vld [vmem:[%s2439_s0 + $0x60] ss:$12 sps:$4 sm:$0xff]  }
   0xc   :  { %1624 = vmatprep.subr.bf16.mxu0 %v1880_v6  ;;  %v1902_v31 = vld [vmem:[%s2439_s0 + $0x30] ss:$12 sps:$4 sm:$0xff]   ;;  %v1905_v32 = vld [vmem:[%s2439_s0 + $0x4c] ss:$12 sps:$4 sm:$0xff]   ;;  %v1916_v38 = vld [vmem:[%s2439_s0 + $0x94] ss:$12 sps:$4 sm:$0xff]  }
   0xd   :  { %v1908_v34 = vld [vmem:[%s2439_s0 + $0x64] ss:$12 sps:$4 sm:$0xff]   ;;  %v1913_v36 = vld [vmem:[%s2439_s0 + $0x7c] ss:$12 sps:$4 sm:$0xff]   ;;  %v1921_v40 = vld [vmem:[%s2439_s0 + $0xac] ss:$12 sps:$4 sm:$0xff]  }
   0xe   :  { %1735 = vmatmul.mubr.msk.bf16.vlgmr.msra.gmra.mrb[0].mxu1 %vm338_vm0, %v1896_v17  ;;  %v1915_v37 = vld [vmem:[%s2439_s0 + $0x78] ss:$12 sps:$4 sm:$0xff]   ;;  %v1918_v39 = vld [vmem:[%s2439_s0 + $0x90] ss:$12 sps:$4 sm:$0xff]   ;;  %v1923_v41 = vld [vmem:[%s2439_s0 + $0xa8] ss:$12 sps:$4 sm:$0xff]  }
   0xf   :  { %1625 = vmatpush3.bf16.msra.mxu0 %v1881_v7  ;;  %1738 = vmatprep.mubr.msk.bf16.mxu1 %vm338_vm0, %v1903_v20  ;;  %v1924_v42 = vld [vmem:[%s2440_s4] sm:$0xff]   ;;  %v1925_v43 = vld [vmem:[%s2440_s4 + $0x8] sm:$0xff]   ;;  %v2163_v47 = vld [vmem:[%s2443_s7 + $0x10] sm:$0xff]  }
  0x10   :  { %1626 = vmatprep.subr.bf16.mxu0 %v1882_v8  ;;  %1750 = vmatprep.subr.bf16.mxu1 %v1924_v42  ;;  %v2144_v44 = vld [vmem:[%s2441_s6] sm:$0xff]   ;;  %v2155_v46 = vld [vmem:[%s2443_s7 + $0x8] sm:$0xff]   ;;  %v2170_v48 = vld [vmem:[%s2443_s7 + $0x18] sm:$0xff]  }
  0x11   :  { %1751 = vmatpush3.bf16.msra.mxu1 %v1924_v42  ;;  %v2150_v45 = vld [vmem:[%s2443_s7] sm:$0xff]   ;;  %v2184_v52 = vld [vmem:[%s2443_s7 + $0x28] sm:$0xff]  }
  0x12   :  { %1752 = vmatprep.subr.bf16.mxu1 %v1925_v43  ;;  %v2177_v49 = vld [vmem:[%s2443_s7 + $0x20] sm:$0xff]  }
  0x13   :  { %1627 = vmatpush3.bf16.msra.mxu0 %v1883_v9  ;;  %v2194_v59 = vld [vmem:[%s2444_s3] ss:$0 sm:$0xff] }
  0x14   :  { %1628 = vmatprep.subr.bf16.mxu0 %v1884_v11 }
  0x15   :  { %1753 = vmatpush3.bf16.msra.mxu1 %v1925_v43 }
  0x16   :  { %1739 = vmatmul.mubr.msk.bf16.gmra.mrb[4].mxu1 %vm338_vm0, %v1904_v23  ;;  %1770 = vmatprep.subr.bf16.mxu1 %v2144_v44 }
  0x17   :  { %1629 = vmatpush3.bf16.msra.mxu0 %v1885_v12  ;;  %1742 = vmatprep.mubr.msk.bf16.mxu1 %vm338_vm0, %v1911_v24 }
  0x18   :  { %1630 = vmatprep.subr.bf16.mxu0 %v1886_v13 }
  0x1b   :  { %1631 = vmatpush3.bf16.msra.mxu0 %v1887_v18 }
  0x1c   :  { %1632 = vmatprep.subr.bf16.mxu0 %v1888_v19 }
  0x1e   :  { %1743 = vmatmul.mubr.msk.bf16.gmra.mrb[8].mxu1 %vm338_vm0, %v1912_v26 }
  0x1f   :  { %1633 = vmatpush3.bf16.msra.mxu0 %v1890_v21  ;;  %1746 = vmatprep.mubr.msk.bf16.mxu1 %vm338_vm0, %v1919_v28 }
  0x20   :  { %1794 = vmatprep.subr.bf16.mxu0 %v2150_v45 }
  0x22   :  { %396 = vmatmul.mubr.bf16.vlgmr.msra.gmra.mrb[0].mxu0 %v1891_v22 }
  0x23   :  { %403 = vmatprep.mubr.bf16.mxu0 %v1897_v25  ;;  %1795 = vmatpush3.bf16.msra.mxu0 %v2150_v45 }
  0x24   :  { %1796 = vmatprep.subr.bf16.mxu0 %v2155_v46 }
  0x26   :  { %1747 = vmatmul.mubr.msk.bf16.gmra.mrb[12].mxu1 %vm338_vm0, %v1920_v30 }
  0x27   :  { %1797 = vmatpush3.bf16.msra.mxu0 %v2155_v46 }
  0x28   :  { %1798 = vmatprep.subr.bf16.mxu0 %v2163_v47 }
  0x2a   :  { %404 = vmatmul.mubr.bf16.gmra.mrb[4].mxu0 %v1899_v27 }
  0x2b   :  { %411 = vmatprep.mubr.bf16.mxu0 %v1900_v29  ;;  %1799 = vmatpush3.bf16.msra.mxu0 %v2163_v47 }
  0x2c   :  { %1800 = vmatprep.subr.bf16.mxu0 %v2170_v48 }
  0x2f   :  { %1801 = vmatpush3.bf16.msra.mxu0 %v2170_v48 }
  0x30   :  { %1802 = vmatprep.subr.bf16.mxu0 %v2177_v49 }
  0x32   :  { %412 = vmatmul.mubr.bf16.gmra.mrb[8].mxu0 %v1902_v31 }
  0x33   :  { %419 = vmatprep.mubr.bf16.mxu0 %v1905_v32  ;;  %1803 = vmatpush3.bf16.msra.mxu0 %v2177_v49 }
  0x34   :  { %1804 = vmatprep.subr.bf16.mxu0 %v2184_v52 }
  0x37   :  { %1805 = vmatpush3.bf16.msra.mxu0 %v2184_v52 }
  0x3a   :  { %420 = vmatmul.mubr.bf16.gmra.mrb[12].mxu0 %v1907_v33 }
  0x3b   :  { %427 = vmatprep.mubr.bf16.mxu0 %v1908_v34 }
  0x42   :  { %428 = vmatmul.mubr.bf16.gmra.mrb[16].mxu0 %v1910_v35 }
  0x43   :  { %435 = vmatprep.mubr.bf16.mxu0 %v1913_v36 }
  0x4a   :  { %436 = vmatmul.mubr.bf16.gmra.mrb[20].mxu0 %v1915_v37 }
  0x4b   :  { %443 = vmatprep.mubr.bf16.mxu0 %v1916_v38 }
  0x52   :  { %444 = vmatmul.mubr.bf16.gmra.mrb[24].mxu0 %v1918_v39 }
  0x53   :  { %451 = vmatprep.mubr.bf16.mxu0 %v1921_v40 }
  0x5a   :  { %452 = vmatmul.mubr.bf16.gmra.mrb[28].mxu0 %v1923_v41  ;;  %v1927_v41 = vld [vmem:[%s2441_s6 + $0x8] sm:$0xff]  }
  0xe1   :  { %v1736_v50 = vpop.f32.mrb[0].mxu1 }
  0xe2   :  { %v494_v51 = vpop.f32.mrb[1].mxu1 }
  0xe3   :  { %v1737_v53 = vpop.f32.mrb[2].mxu1 }
  0xe4   :  { %v497_v54 = vpop.f32.mrb[3].mxu1 }
  0xe9   :  { %v2188_v55 = vpop.f32.mrb[4].mxu1 }
  0xea   :  { %v510_v57 = vpop.f32.mrb[5].mxu1 }
  0xeb   :  { %v2196_v60 = vpop.f32.mrb[6].mxu1 }
  0xec   :  { %v513_v63 = vpop.f32.mrb[7].mxu1 }
  0xf1   :  { %v2200_v5 = vpop.f32.mrb[8].mxu1 }
  0xf2   :  { %v2202_v9 = vpop.f32.mrb[9].mxu1 }
  0xf3   :  { %v2204_v11 = vpop.f32.mrb[10].mxu1 }
  0xf4   :  { %v2206_v15 = vpop.f32.mrb[11].mxu1 }
  0xf5   :  { %v1634_v56 = vpop.f32.mrb[0].mxu0 }
  0xf6   :  { %v1635_v58 = vpop.f32.mrb[1].mxu0 }
  0xf7   :  { %v1636_v61 = vadd.f32 %v1635_v58, %v1634_v56  ;;  %v1637_v62 = vpop.f32.mrb[2].mxu0  ;;  %v1928_v56 = vld [vmem:[%s2441_s6 + $0x10] sm:$0xff]  }
  0xf8   :  { %v1638_v0 = vpop.f32.mrb[3].mxu0 }
  0xf9   :  { %v1639_v1 = vadd.f32 %v1638_v0, %v1637_v62  ;;  %v398_v2 = vadd.f32 %v1636_v61, %v2194_v59  ;;  %v2211_v24 = vpop.f32.mrb[12].mxu1 }
  0xfa   :  { %v2213_v28 = vpop.f32.mrb[13].mxu1 }
  0xfb   :  { %v495_v3 = vadd.f32 %v494_v51, %v398_v2  ;;  %v401_v4 = vadd.f32 %v1639_v1, %v2194_v59  ;;  %v2215_v30 = vpop.f32.mrb[14].mxu1 }
  0xfc   :  { %v2217_v34 = vpop.f32.mrb[15].mxu1 }
  0xfd   :  { %v573_v6 = vmul.f32 0.01, %v495_v3  ;;  %v498_v7 = vadd.f32 %v497_v54, %v401_v4  ;;  %v1640_v8 = vpop.f32.mrb[4].mxu0  ;;  %vm557_vm1 = vcmp.ge.f32.partialorder %v495_v3, 0.0 }
  0xfe   :  { %v1641_v10 = vpop.f32.mrb[5].mxu0 }
  0xff   :  { %vm558_vm2 = vcmp.ge.f32.partialorder %v498_v7, 0.0  ;;  %v574_v12 = vmul.f32 0.01, %v498_v7  ;;  %v1642_v13 = vadd.f32 %v1641_v10, %v1640_v8  ;;  %v1643_v14 = vpop.f32.mrb[6].mxu0  ;;  %v589_v17 = vsel %vm557_vm1, %v495_v3, %v573_v6 }
 0x100   :  { %v1644_v16 = vpop.f32.mrb[7].mxu0 }
 0x101   :  { %v590_v18 = vsel %vm558_vm2, %v498_v7, %v574_v12  ;;  %v406_v19 = vadd.f32 %v1642_v13, %v2194_v59  ;;  %v1645_v20 = vadd.f32 %v1644_v16, %v1643_v14  ;;  %vm845_vm2 = vcmask 523264  }
 0x102   :  { %v605_v21 = vpack.c.bf16 %v590_v18, %v589_v17 }
 0x103   :  { %v503_v22 = vadd.f32 %v1736_v50, %v406_v19  ;;  %v409_v23 = vadd.f32 %v1645_v20, %v2194_v59 }
 0x104   :  { %1754 = vmatprep.mubr.msk.bf16.mxu1 %vm338_vm0, %v605_v21 }
 0x105   :  { %v575_v25 = vmul.f32 0.01, %v503_v22  ;;  %v506_v26 = vadd.f32 %v1737_v53, %v409_v23  ;;  %v1646_v27 = vpop.f32.mrb[8].mxu0  ;;  %vm559_vm3 = vcmp.ge.f32.partialorder %v503_v22, 0.0 }
 0x106   :  { %v1647_v29 = vpop.f32.mrb[9].mxu0 }
 0x107   :  { %vm560_vm4 = vcmp.ge.f32.partialorder %v506_v26, 0.0  ;;  %v576_v31 = vmul.f32 0.01, %v506_v26  ;;  %v1648_v32 = vadd.f32 %v1647_v29, %v1646_v27  ;;  %v1649_v33 = vpop.f32.mrb[10].mxu0  ;;  %v591_v36 = vsel %vm559_vm3, %v503_v22, %v575_v25 }
 0x108   :  { %v1650_v35 = vpop.f32.mrb[11].mxu0 }
 0x109   :  { %v592_v37 = vsel %vm560_vm4, %v506_v26, %v576_v31  ;;  %v1651_v38 = vadd.f32 %v1650_v35, %v1649_v33  ;;  %v414_v39 = vadd.f32 %v1648_v32, %v2194_v59 }
 0x10a   :  { %v606_v40 = vpack.c.bf16 %v592_v37, %v591_v36 }
 0x10b   :  { %v511_v42 = vadd.f32 %v510_v57, %v414_v39  ;;  %v417_v43 = vadd.f32 %v1651_v38, %v2194_v59 }
 0x10c   :  { %1755 = vmatmul.mubr.msk.bf16.vlgmr.msra.gmra.mrb[16].mxu1 %vm338_vm0, %v606_v40 }
 0x10d   :  { %v577_v50 = vmul.f32 0.01, %v511_v42  ;;  %v514_v51 = vadd.f32 %v513_v63, %v417_v43  ;;  %v1652_v53 = vpop.f32.mrb[12].mxu0  ;;  %1771 = vmatpush3.bf16.msra.mxu1 %v2144_v44  ;;  %vm561_vm5 = vcmp.ge.f32.partialorder %v511_v42, 0.0  ;;  %v1929_v44 = vld [vmem:[%s2441_s6 + $0x18] sm:$0xff]  }
 0x10e   :  { %v1653_v54 = vpop.f32.mrb[13].mxu0  ;;  %1772 = vmatprep.subr.bf16.mxu1 %v1927_v41 }
 0x10f   :  { %vm562_vm6 = vcmp.ge.f32.partialorder %v514_v51, 0.0  ;;  %v578_v58 = vmul.f32 0.01, %v514_v51  ;;  %v1654_v61 = vadd.f32 %v1653_v54, %v1652_v53  ;;  %v1655_v57 = vpop.f32.mrb[14].mxu0  ;;  %v593_v0 = vsel %vm561_vm5, %v511_v42, %v577_v50 }
 0x110   :  { %v1656_v62 = vpop.f32.mrb[15].mxu0 }
 0x111   :  { %v594_v1 = vsel %vm562_vm6, %v514_v51, %v578_v58  ;;  %v422_v2 = vadd.f32 %v1654_v61, %v2194_v59  ;;  %v1657_v63 = vadd.f32 %v1656_v62, %v1655_v57  ;;  %1773 = vmatpush3.bf16.msra.mxu1 %v1927_v41 }
 0x112   :  { %v607_v3 = vpack.c.bf16 %v594_v1, %v593_v0  ;;  %1774 = vmatprep.subr.bf16.mxu1 %v1928_v56 }
 0x113   :  { %v519_v4 = vadd.f32 %v2188_v55, %v422_v2  ;;  %v425_v6 = vadd.f32 %v1657_v63, %v2194_v59 }
 0x114   :  { %1758 = vmatprep.mubr.msk.bf16.mxu1 %vm338_vm0, %v607_v3 }
 0x115   :  { %v579_v7 = vmul.f32 0.01, %v519_v4  ;;  %v522_v8 = vadd.f32 %v2196_v60, %v425_v6  ;;  %v1658_v10 = vpop.f32.mrb[16].mxu0  ;;  %1775 = vmatpush3.bf16.msra.mxu1 %v1928_v56  ;;  %vm563_vm7 = vcmp.ge.f32.partialorder %v519_v4, 0.0 }
 0x116   :  { %v1659_v12 = vpop.f32.mrb[17].mxu0  ;;  %1776 = vmatprep.subr.bf16.mxu1 %v1929_v44 }
 0x117   :  { %vm564_vm8 = vcmp.ge.f32.partialorder %v522_v8, 0.0  ;;  %v580_v13 = vmul.f32 0.01, %v522_v8  ;;  %v1660_v14 = vadd.f32 %v1659_v12, %v1658_v10  ;;  %v1661_v16 = vpop.f32.mrb[18].mxu0  ;;  %v595_v19 = vsel %vm563_vm7, %v519_v4, %v579_v7 }
 0x118   :  { %v1662_v17 = vpop.f32.mrb[19].mxu0 }
 0x119   :  { %v1663_v18 = vadd.f32 %v1662_v17, %v1661_v16  ;;  %v430_v55 = vadd.f32 %v1660_v14, %v2194_v59  ;;  %v596_v20 = vsel %vm564_vm8, %v522_v8, %v580_v13  ;;  %1777 = vmatpush3.bf16.msra.mxu1 %v1929_v44 }
 0x11a   :  { %v608_v21 = vpack.c.bf16 %v596_v20, %v595_v19  ;;  %1826 = vmatprep.subr.bf16.mxu1 %v2150_v45  ;;  %v1930_v19 = vld [vmem:[%s2442_s1] sm:$0xff]  }
 0x11b   :  { %v527_v60 = vadd.f32 %v2202_v9, %v430_v55  ;;  %v433_v22 = vadd.f32 %v1663_v18, %v2194_v59 }
 0x11c   :  { %1759 = vmatmul.mubr.msk.bf16.gmra.mrb[20].mxu1 %vm338_vm0, %v608_v21  ;;  %v1934_v21 = vld [vmem:[%s2442_s1 + $0x20] sm:$0xff]  }
 0x11d   :  { %v581_v23 = vmul.f32 0.01, %v527_v60  ;;  %v530_v25 = vadd.f32 %v2206_v15, %v433_v22  ;;  %v1664_v26 = vpop.f32.mrb[20].mxu0  ;;  %vm565_vm9 = vcmp.ge.f32.partialorder %v527_v60, 0.0 }
 0x11e   :  { %v1665_v27 = vpop.f32.mrb[21].mxu0 }
 0x11f   :  { %vm566_vm10 = vcmp.ge.f32.partialorder %v530_v25, 0.0  ;;  %v582_v29 = vmul.f32 0.01, %v530_v25  ;;  %v1666_v31 = vadd.f32 %v1665_v27, %v1664_v26  ;;  %v1667_v32 = vpop.f32.mrb[22].mxu0  ;;  %v597_v35 = vsel %vm565_vm9, %v527_v60, %v581_v23  ;;  %v1936_v60 = vld [vmem:[%s2442_s1 + $0x30] sm:$0xff]  }
 0x120   :  { %v1668_v33 = vpop.f32.mrb[23].mxu0 }
 0x121   :  { %v598_v36 = vsel %vm566_vm10, %v530_v25, %v582_v29  ;;  %v438_v37 = vadd.f32 %v1666_v31, %v2194_v59  ;;  %v1669_v9 = vadd.f32 %v1668_v33, %v1667_v32 }
 0x122   :  { %v609_v38 = vpack.c.bf16 %v598_v36, %v597_v35 }
 0x123   :  { %v535_v39 = vadd.f32 %v2200_v5, %v438_v37  ;;  %v441_v40 = vadd.f32 %v1669_v9, %v2194_v59 }
 0x124   :  { %1762 = vmatprep.mubr.msk.bf16.mxu1 %vm338_vm0, %v609_v38 }
 0x125   :  { %v583_v15 = vmul.f32 0.01, %v535_v39  ;;  %v538_v41 = vadd.f32 %v2204_v11, %v441_v40  ;;  %v1670_v42 = vpop.f32.mrb[24].mxu0  ;;  %vm567_vm11 = vcmp.ge.f32.partialorder %v535_v39, 0.0 }
 0x126   :  { %v1671_v43 = vpop.f32.mrb[25].mxu0 }
 0x127   :  { %vm568_vm12 = vcmp.ge.f32.partialorder %v538_v41, 0.0  ;;  %v584_v50 = vmul.f32 0.01, %v538_v41  ;;  %v1672_v51 = vadd.f32 %v1671_v43, %v1670_v42  ;;  %v1673_v53 = vpop.f32.mrb[26].mxu0  ;;  %v599_v61 = vsel %vm567_vm11, %v535_v39, %v583_v15 }
 0x128   :  { %v1674_v54 = vpop.f32.mrb[27].mxu0 }
 0x129   :  { %v1675_v56 = vadd.f32 %v1674_v54, %v1673_v53  ;;  %v446_v58 = vadd.f32 %v1672_v51, %v2194_v59  ;;  %v600_v5 = vsel %vm568_vm12, %v538_v41, %v584_v50 }
 0x12a   :  { %v610_v57 = vpack.c.bf16 %v600_v5, %v599_v61 }
 0x12b   :  { %v543_v62 = vadd.f32 %v2213_v28, %v446_v58  ;;  %v449_v0 = vadd.f32 %v1675_v56, %v2194_v59 }
 0x12c   :  { %1763 = vmatmul.mubr.msk.bf16.gmra.mrb[24].mxu1 %vm338_vm0, %v610_v57 }
 0x12d   :  { %v585_v11 = vmul.f32 0.01, %v543_v62  ;;  %v546_v1 = vadd.f32 %v2217_v34, %v449_v0  ;;  %v1676_v2 = vpop.f32.mrb[28].mxu0  ;;  %vm569_vm13 = vcmp.ge.f32.partialorder %v543_v62, 0.0 }
 0x12e   :  { %v1677_v63 = vpop.f32.mrb[29].mxu0 }
 0x12f   :  { %vm570_vm14 = vcmp.ge.f32.partialorder %v546_v1, 0.0  ;;  %v586_v3 = vmul.f32 0.01, %v546_v1  ;;  %v1678_v44 = vadd.f32 %v1677_v63, %v1676_v2  ;;  %v1679_v4 = vpop.f32.mrb[30].mxu0  ;;  %v601_v7 = vsel %vm569_vm13, %v543_v62, %v585_v11 }
 0x130   :  { %v1680_v6 = vpop.f32.mrb[31].mxu0 }
 0x131   :  { %v602_v8 = vsel %vm570_vm14, %v546_v1, %v586_v3  ;;  %v454_v10 = vadd.f32 %v1678_v44, %v2194_v59  ;;  %v1681_v28 = vadd.f32 %v1680_v6, %v1679_v4 }
 0x132   :  { %v611_v12 = vpack.c.bf16 %v602_v8, %v601_v7 }
 0x133   :  { %v551_v13 = vadd.f32 %v2211_v24, %v454_v10  ;;  %v457_v14 = vadd.f32 %v1681_v28, %v2194_v59  ;;  %v1931_v59 = vld [vmem:[%s2442_s1 + $0x8] sm:$0xff]   ;;  %v1932_v24 = vld [vmem:[%s2442_s1 + $0x10] sm:$0xff]  }
 0x134   :  { %1766 = vmatprep.mubr.msk.bf16.mxu1 %vm338_vm0, %v611_v12 }
 0x135   :  { %v587_v34 = vmul.f32 0.01, %v551_v13  ;;  %v554_v16 = vadd.f32 %v2215_v30, %v457_v14  ;;  %vm571_vm15 = vcmp.ge.f32.partialorder %v551_v13, 0.0  ;;  %v1933_v30 = vld [vmem:[%s2442_s1 + $0x18] sm:$0xff]  }
 0x137   :  { %vm572_vm1 = vcmp.ge.f32.partialorder %v554_v16, 0.0  ;;  %v588_v17 = vmul.f32 0.01, %v554_v16  ;;  %v603_v18 = vsel %vm571_vm15, %v551_v13, %v587_v34 }
 0x139   :  { %v604_v55 = vsel %vm572_vm1, %v554_v16, %v588_v17 }
 0x13a   :  { %v612_v20 = vpack.c.bf16 %v604_v55, %v603_v18 }
 0x13c   :  { %1767 = vmatmul.mubr.msk.bf16.gmra.mrb[28].mxu1 %vm338_vm0, %v612_v20 }
 0x13d   :  { %1778 = vmatprep.mubr.msk.bf16.mxu1 %vm845_vm2, %v1930_v19 }
 0x144   :  { %1779 = vmatmul.mubr.msk.bf16.vlgmr.msra.gmra.mrb[16].mxu1 %vm845_vm2, %v1931_v59 }
 0x145   :  { %1782 = vmatprep.mubr.msk.bf16.mxu1 %vm845_vm2, %v1932_v24  ;;  %1834 = vmatpush3.bf16.msra.mxu1 %v2150_v45  ;;  %v1935_v45 = vld [vmem:[%s2442_s1 + $0x28] sm:$0xff]  }
 0x146   :  { %1827 = vmatprep.subr.bf16.mxu1 %v2155_v46 }
 0x149   :  { %1835 = vmatpush3.bf16.msra.mxu1 %v2155_v46  ;;  %v1937_v46 = vld [vmem:[%s2442_s1 + $0x38] sm:$0xff]  }
 0x14a   :  { %1828 = vmatprep.subr.bf16.mxu1 %v2163_v47 }
 0x14c   :  { %1783 = vmatmul.mubr.msk.bf16.gmra.mrb[20].mxu1 %vm845_vm2, %v1933_v30 }
 0x14d   :  { %1786 = vmatprep.mubr.msk.bf16.mxu1 %vm845_vm2, %v1934_v21  ;;  %1836 = vmatpush3.bf16.msra.mxu1 %v2163_v47  ;;  %v1944_v47 = vld [vmem:[%s2443_s7 + $0x30] sm:$0xff]  }
 0x14e   :  { %1829 = vmatprep.subr.bf16.mxu1 %v2170_v48  ;;  %1806 = vmatprep.subr.bf16.mxu0 %v1944_v47 }
 0x14f   :  { %1807 = vmatpush3.bf16.msra.mxu0 %v1944_v47 }
 0x151   :  { %1837 = vmatpush3.bf16.msra.mxu1 %v2170_v48  ;;  %v1945_v48 = vld [vmem:[%s2443_s7 + $0x38] sm:$0xff]  }
 0x152   :  { %1830 = vmatprep.subr.bf16.mxu1 %v2177_v49  ;;  %1808 = vmatprep.subr.bf16.mxu0 %v1945_v48 }
 0x153   :  { %1809 = vmatpush3.bf16.msra.mxu0 %v1945_v48 }
 0x154   :  { %1787 = vmatmul.mubr.msk.bf16.gmra.mrb[24].mxu1 %vm845_vm2, %v1935_v45 }
 0x155   :  { %1790 = vmatprep.mubr.msk.bf16.mxu1 %vm845_vm2, %v1936_v60  ;;  %1838 = vmatpush3.bf16.msra.mxu1 %v2177_v49  ;;  %v2311_v49 = vld [vmem:[%s2445_s5] ss:$0 sm:$0xff] }
 0x156   :  { %1831 = vmatprep.subr.bf16.mxu1 %v2184_v52 }
 0x159   :  { %1839 = vmatpush3.bf16.msra.mxu1 %v2184_v52 }
 0x15a   :  { %1832 = vmatprep.subr.bf16.mxu1 %v1944_v47 }
 0x15c   :  { %1791 = vmatmul.mubr.msk.bf16.gmra.mrb[28].mxu1 %vm845_vm2, %v1937_v46 }
 0x15d   :  { %1840 = vmatpush3.bf16.msra.mxu1 %v1944_v47 }
 0x15e   :  { %1833 = vmatprep.subr.bf16.mxu1 %v1945_v48 }
 0x161   :  { %1841 = vmatpush3.bf16.msra.mxu1 %v1945_v48 }
 0x217   :  { %v1780_v52 = vpop.f32.mrb[16].mxu1 }
 0x218   :  { %v1842_v22 = vadd.f32 %v1780_v52, %v2311_v49  ;;  %v904_v23 = vpop.f32.mrb[17].mxu1 }
 0x219   :  { %v1843_v25 = vadd.f32 %v2311_v49, %v904_v23  ;;  %v1781_v26 = vpop.f32.mrb[18].mxu1 }
 0x21a   :  { %v1001_v27 = vmul.f32 0.01, %v1842_v22  ;;  %v1844_v29 = vadd.f32 %v1781_v26, %v2311_v49  ;;  %v907_v31 = vpop.f32.mrb[19].mxu1  ;;  %vm985_vm0 = vcmp.ge.f32.partialorder %v1842_v22, 0.0 }
 0x21b   :  { %v999_v32 = vmul.f32 0.01, %v1843_v25  ;;  %v1845_v33 = vadd.f32 %v2311_v49, %v907_v31  ;;  %vm983_vm3 = vcmp.ge.f32.partialorder %v1843_v25, 0.0 }
 0x21c   :  { %vm986_vm4 = vcmp.ge.f32.partialorder %v1844_v29, 0.0  ;;  %v1002_v35 = vmul.f32 0.01, %v1844_v29  ;;  %v1017_v37 = vsel %vm985_vm0, %v1842_v22, %v1001_v27 }
 0x21d   :  { %vm984_vm5 = vcmp.ge.f32.partialorder %v1845_v33, 0.0  ;;  %v1000_v36 = vmul.f32 0.01, %v1845_v33  ;;  %v1015_v40 = vsel %vm983_vm3, %v1843_v25, %v999_v32 }
 0x21e   :  { %v1018_v9 = vsel %vm986_vm4, %v1844_v29, %v1002_v35  ;;  %vm1391_vm4 = vcmask 257024  }
 0x21f   :  { %v1032_v38 = vpack.c.bf16 %v1018_v9, %v1017_v37  ;;  %v1784_v39 = vpop.f32.mrb[20].mxu1  ;;  %v1016_v15 = vsel %vm984_vm5, %v1845_v33, %v1000_v36 }
 0x220   :  { %v1846_v41 = vadd.f32 %v1784_v39, %v2311_v49  ;;  %v920_v42 = vpop.f32.mrb[21].mxu1  ;;  %v1031_v43 = vpack.c.bf16 %v1016_v15, %v1015_v40 }
 0x221   :  { %1611 = vst [vmem:[%s2446_s9 + $0x8] sm:$0xff] %v1032_v38   ;;  %v1847_v50 = vadd.f32 %v2311_v49, %v920_v42  ;;  %v1785_v51 = vpop.f32.mrb[22].mxu1 }
 0x222   :  { %v1005_v53 = vmul.f32 0.01, %v1846_v41  ;;  %v1848_v54 = vadd.f32 %v1785_v51, %v2311_v49  ;;  %v923_v56 = vpop.f32.mrb[23].mxu1  ;;  %1575 = vst [vmem:[%s2446_s9] sm:$0xff] %v1031_v43   ;;  %1810 = vmatprep.mubr.bf16.mxu0 %v1031_v43  ;;  %vm989_vm6 = vcmp.ge.f32.partialorder %v1846_v41, 0.0 }
 0x223   :  { %v1003_v58 = vmul.f32 0.01, %v1847_v50  ;;  %v1849_v61 = vadd.f32 %v2311_v49, %v923_v56  ;;  %1811 = vmatmul.mubr.bf16.vlgmr.msra.gmra.mrb[32].mxu0 %v1032_v38  ;;  %vm987_vm7 = vcmp.ge.f32.partialorder %v1847_v50, 0.0 }
 0x224   :  { %vm990_vm8 = vcmp.ge.f32.partialorder %v1848_v54, 0.0  ;;  %v1006_v5 = vmul.f32 0.01, %v1848_v54  ;;  %v1021_v62 = vsel %vm989_vm6, %v1846_v41, %v1005_v53 }
 0x225   :  { %vm988_vm9 = vcmp.ge.f32.partialorder %v1849_v61, 0.0  ;;  %v1004_v57 = vmul.f32 0.01, %v1849_v61  ;;  %v1019_v1 = vsel %vm987_vm7, %v1847_v50, %v1003_v58 }
 0x226   :  { %v1022_v0 = vsel %vm990_vm8, %v1848_v54, %v1006_v5 }
 0x227   :  { %v1788_v11 = vpop.f32.mrb[24].mxu1  ;;  %v1020_v2 = vsel %vm988_vm9, %v1849_v61, %v1004_v57  ;;  %v1034_v63 = vpack.c.bf16 %v1022_v0, %v1021_v62 }
 0x228   :  { %v1850_v3 = vadd.f32 %v1788_v11, %v2311_v49  ;;  %v936_v44 = vpop.f32.mrb[25].mxu1  ;;  %v1033_v4 = vpack.c.bf16 %v1020_v2, %v1019_v1 }
 0x229   :  { %v1851_v6 = vadd.f32 %v2311_v49, %v936_v44  ;;  %v1789_v7 = vpop.f32.mrb[26].mxu1  ;;  %1613 = vst [vmem:[%s2446_s9 + $0x18] sm:$0xff] %v1034_v63  }
 0x22a   :  { %v1009_v8 = vmul.f32 0.01, %v1850_v3  ;;  %v1852_v10 = vadd.f32 %v1789_v7, %v2311_v49  ;;  %v939_v28 = vpop.f32.mrb[27].mxu1  ;;  %1612 = vst [vmem:[%s2446_s9 + $0x10] sm:$0xff] %v1033_v4   ;;  %1814 = vmatprep.mubr.bf16.mxu0 %v1033_v4  ;;  %vm993_vm10 = vcmp.ge.f32.partialorder %v1850_v3, 0.0 }
 0x22b   :  { %v1007_v12 = vmul.f32 0.01, %v1851_v6  ;;  %v1853_v13 = vadd.f32 %v2311_v49, %v939_v28  ;;  %1815 = vmatmul.mubr.bf16.gmra.mrb[36].mxu0 %v1034_v63  ;;  %vm991_vm11 = vcmp.ge.f32.partialorder %v1851_v6, 0.0 }
 0x22c   :  { %vm994_vm12 = vcmp.ge.f32.partialorder %v1852_v10, 0.0  ;;  %v1010_v14 = vmul.f32 0.01, %v1852_v10  ;;  %v1025_v16 = vsel %vm993_vm10, %v1850_v3, %v1009_v8 }
 0x22d   :  { %vm992_vm13 = vcmp.ge.f32.partialorder %v1853_v13, 0.0  ;;  %v1008_v34 = vmul.f32 0.01, %v1853_v13  ;;  %v1023_v55 = vsel %vm991_vm11, %v1851_v6, %v1007_v12 }
 0x22e   :  { %v1026_v17 = vsel %vm994_vm12, %v1852_v10, %v1010_v14 }
 0x22f   :  { %v1792_v18 = vpop.f32.mrb[28].mxu1  ;;  %v1024_v19 = vsel %vm992_vm13, %v1853_v13, %v1008_v34  ;;  %v1036_v20 = vpack.c.bf16 %v1026_v17, %v1025_v16 }
 0x230   :  { %v1854_v59 = vadd.f32 %v1792_v18, %v2311_v49  ;;  %v952_v24 = vpop.f32.mrb[29].mxu1  ;;  %v1035_v30 = vpack.c.bf16 %v1024_v19, %v1023_v55 }
 0x231   :  { %v1855_v21 = vadd.f32 %v2311_v49, %v952_v24  ;;  %v1793_v45 = vpop.f32.mrb[30].mxu1  ;;  %1615 = vst [vmem:[%s2446_s9 + $0x28] sm:$0xff] %v1036_v20  }
 0x232   :  { %v1013_v60 = vmul.f32 0.01, %v1854_v59  ;;  %v1856_v46 = vadd.f32 %v1793_v45, %v2311_v49  ;;  %v955_v47 = vpop.f32.mrb[31].mxu1  ;;  %1614 = vst [vmem:[%s2446_s9 + $0x20] sm:$0xff] %v1035_v30   ;;  %1818 = vmatprep.mubr.bf16.mxu0 %v1035_v30  ;;  %vm997_vm14 = vcmp.ge.f32.partialorder %v1854_v59, 0.0 }
 0x233   :  { %v1011_v48 = vmul.f32 0.01, %v1855_v21  ;;  %v1857_v52 = vadd.f32 %v2311_v49, %v955_v47  ;;  %1819 = vmatmul.mubr.bf16.gmra.mrb[40].mxu0 %v1036_v20  ;;  %vm995_vm15 = vcmp.ge.f32.partialorder %v1855_v21, 0.0  ;;  %v2356_v49 = vld [vmem:[%s2447_s8] ss:$0 sm:$0xff] }
 0x234   :  { %vm998_vm1 = vcmp.ge.f32.partialorder %v1856_v46, 0.0  ;;  %v1014_v22 = vmul.f32 0.01, %v1856_v46  ;;  %v1029_v25 = vsel %vm997_vm14, %v1854_v59, %v1013_v60 }
 0x235   :  { %vm996_vm2 = vcmp.ge.f32.partialorder %v1857_v52, 0.0  ;;  %v1012_v23 = vmul.f32 0.01, %v1857_v52  ;;  %v1027_v29 = vsel %vm995_vm15, %v1855_v21, %v1011_v48 }
 0x236   :  { %v1030_v26 = vsel %vm998_vm1, %v1856_v46, %v1014_v22 }
 0x237   :  { %v1038_v27 = vpack.c.bf16 %v1030_v26, %v1029_v25  ;;  %v1028_v31 = vsel %vm996_vm2, %v1857_v52, %v1012_v23 }
 0x238   :  { %v1037_v32 = vpack.c.bf16 %v1028_v31, %v1027_v29 }
 0x239   :  { %1617 = vst [vmem:[%s2446_s9 + $0x38] sm:$0xff] %v1038_v27  }
 0x23a   :  { %1616 = vst [vmem:[%s2446_s9 + $0x30] sm:$0xff] %v1037_v32   ;;  %1822 = vmatprep.mubr.bf16.mxu1 %v1037_v32 }
 0x23b   :  { %1823 = vmatmul.mubr.bf16.vlgmr.msra.gmra.mrb[32].mxu1 %v1038_v27 }
 0x2f6   :  { %v1812_v33 = vpop.f32.mrb[32].mxu0 }
 0x2f7   :  { %v1225_v35 = vadd.f32 %v1812_v33, %v2356_v49  ;;  %v1216_v36 = vpop.f32.mrb[33].mxu0 }
 0x2f8   :  { %v1217_v37 = vadd.f32 %v2356_v49, %v1216_v36  ;;  %v1813_v9 = vpop.f32.mrb[34].mxu0 }
 0x2f9   :  { %vm1281_vm0 = vcmp.ge.f32.partialorder %v1225_v35, 0.0  ;;  %v1297_v38 = vmul.f32 0.01, %v1225_v35  ;;  %v1228_v39 = vadd.f32 %v1813_v9, %v2356_v49  ;;  %v1219_v40 = vpop.f32.mrb[35].mxu0 }
 0x2fa   :  { %vm1279_vm3 = vcmp.ge.f32.partialorder %v1217_v37, 0.0  ;;  %v1295_v15 = vmul.f32 0.01, %v1217_v37  ;;  %v1220_v41 = vadd.f32 %v2356_v49, %v1219_v40 }
 0x2fb   :  { %v1313_v42 = vsel %vm1281_vm0, %v1225_v35, %v1297_v38  ;;  %vm1282_vm5 = vcmp.ge.f32.partialorder %v1228_v39, 0.0  ;;  %v1298_v43 = vmul.f32 0.01, %v1228_v39 }
 0x2fc   :  { %v1557_v50 = vpack.c.bf16 %v1313_v42, %v1313_v42  ;;  %v1311_v51 = vsel %vm1279_vm3, %v1217_v37, %v1295_v15  ;;  %vm1280_vm6 = vcmp.ge.f32.partialorder %v1220_v41, 0.0  ;;  %v1296_v53 = vmul.f32 0.01, %v1220_v41 }
 0x2fd   :  { %v1555_v54 = vpack.c.bf16 %v1311_v51, %v1311_v51  ;;  %v1314_v56 = vsel %vm1282_vm5, %v1228_v39, %v1298_v43 }
 0x2fe   :  { %1394 = vst.msk [vmem:[%s2448_s10 + $0x8] sm:$0xf] %vm1391_vm4, %v1557_v50  ;;  %v1558_v58 = vpack.c.bf16 %v1314_v56, %v1314_v56  ;;  %v1312_v61 = vsel %vm1280_vm6, %v1220_v41, %v1296_v53  ;;  %v1816_v5 = vpop.f32.mrb[36].mxu0 }
 0x2ff   :  { %1392 = vst.msk [vmem:[%s2448_s10] sm:$0xf] %vm1391_vm4, %v1555_v54  ;;  %v1556_v57 = vpack.c.bf16 %v1312_v61, %v1312_v61  ;;  %v1241_v62 = vadd.f32 %v1816_v5, %v2356_v49  ;;  %v1232_v0 = vpop.f32.mrb[37].mxu0 }
 0x300   :  { %1395 = vst.msk [vmem:[%s2448_s10 + $0xc] sm:$0xf] %vm1391_vm4, %v1558_v58  ;;  %v1233_v11 = vadd.f32 %v2356_v49, %v1232_v0  ;;  %v1817_v1 = vpop.f32.mrb[38].mxu0 }
 0x301   :  { %1393 = vst.msk [vmem:[%s2448_s10 + $0x4] sm:$0xf] %vm1391_vm4, %v1556_v57  ;;  %vm1285_vm7 = vcmp.ge.f32.partialorder %v1241_v62, 0.0  ;;  %v1301_v2 = vmul.f32 0.01, %v1241_v62  ;;  %v1244_v63 = vadd.f32 %v1817_v1, %v2356_v49  ;;  %v1235_v3 = vpop.f32.mrb[39].mxu0 }
 0x302   :  { %vm1283_vm8 = vcmp.ge.f32.partialorder %v1233_v11, 0.0  ;;  %v1299_v44 = vmul.f32 0.01, %v1233_v11  ;;  %v1236_v4 = vadd.f32 %v2356_v49, %v1235_v3 }
 0x303   :  { %v1317_v6 = vsel %vm1285_vm7, %v1241_v62, %v1301_v2  ;;  %vm1286_vm9 = vcmp.ge.f32.partialorder %v1244_v63, 0.0  ;;  %v1302_v7 = vmul.f32 0.01, %v1244_v63 }
 0x304   :  { %v1561_v8 = vpack.c.bf16 %v1317_v6, %v1317_v6  ;;  %v1315_v10 = vsel %vm1283_vm8, %v1233_v11, %v1299_v44  ;;  %vm1284_vm10 = vcmp.ge.f32.partialorder %v1236_v4, 0.0  ;;  %v1300_v28 = vmul.f32 0.01, %v1236_v4 }
 0x305   :  { %v1559_v12 = vpack.c.bf16 %v1315_v10, %v1315_v10  ;;  %v1318_v13 = vsel %vm1286_vm9, %v1244_v63, %v1302_v7 }
 0x306   :  { %1398 = vst.msk [vmem:[%s2448_s10 + $0x18] sm:$0xf] %vm1391_vm4, %v1561_v8  ;;  %v1562_v14 = vpack.c.bf16 %v1318_v13, %v1318_v13  ;;  %v1316_v34 = vsel %vm1284_vm10, %v1236_v4, %v1300_v28  ;;  %v1820_v16 = vpop.f32.mrb[40].mxu0 }
 0x307   :  { %1396 = vst.msk [vmem:[%s2448_s10 + $0x10] sm:$0xf] %vm1391_vm4, %v1559_v12  ;;  %v1560_v17 = vpack.c.bf16 %v1316_v34, %v1316_v34  ;;  %v1257_v18 = vadd.f32 %v1820_v16, %v2356_v49  ;;  %v1248_v55 = vpop.f32.mrb[41].mxu0 }
 0x308   :  { %1399 = vst.msk [vmem:[%s2448_s10 + $0x1c] sm:$0xf] %vm1391_vm4, %v1562_v14  ;;  %v1249_v19 = vadd.f32 %v2356_v49, %v1248_v55  ;;  %v1821_v20 = vpop.f32.mrb[42].mxu0 }
 0x309   :  { %1397 = vst.msk [vmem:[%s2448_s10 + $0x14] sm:$0xf] %vm1391_vm4, %v1560_v17  ;;  %vm1289_vm11 = vcmp.ge.f32.partialorder %v1257_v18, 0.0  ;;  %v1305_v59 = vmul.f32 0.01, %v1257_v18  ;;  %v1260_v24 = vadd.f32 %v1821_v20, %v2356_v49  ;;  %v1251_v30 = vpop.f32.mrb[43].mxu0 }
 0x30a   :  { %vm1287_vm12 = vcmp.ge.f32.partialorder %v1249_v19, 0.0  ;;  %v1303_v21 = vmul.f32 0.01, %v1249_v19  ;;  %v1252_v45 = vadd.f32 %v2356_v49, %v1251_v30 }
 0x30b   :  { %v1321_v60 = vsel %vm1289_vm11, %v1257_v18, %v1305_v59  ;;  %vm1290_vm13 = vcmp.ge.f32.partialorder %v1260_v24, 0.0  ;;  %v1306_v46 = vmul.f32 0.01, %v1260_v24 }
 0x30c   :  { %v1565_v47 = vpack.c.bf16 %v1321_v60, %v1321_v60  ;;  %v1319_v48 = vsel %vm1287_vm12, %v1249_v19, %v1303_v21  ;;  %vm1288_vm14 = vcmp.ge.f32.partialorder %v1252_v45, 0.0  ;;  %v1304_v52 = vmul.f32 0.01, %v1252_v45 }
 0x30d   :  { %v1563_v22 = vpack.c.bf16 %v1319_v48, %v1319_v48  ;;  %v1322_v23 = vsel %vm1290_vm13, %v1260_v24, %v1306_v46 }
 0x30e   :  { %1402 = vst.msk [vmem:[%s2448_s10 + $0x28] sm:$0xf] %vm1391_vm4, %v1565_v47  ;;  %v1566_v25 = vpack.c.bf16 %v1322_v23, %v1322_v23  ;;  %v1320_v26 = vsel %vm1288_vm14, %v1252_v45, %v1304_v52  ;;  %v1824_v27 = vpop.f32.mrb[32].mxu1 }
 0x30f   :  { %1400 = vst.msk [vmem:[%s2448_s10 + $0x20] sm:$0xf] %vm1391_vm4, %v1563_v22  ;;  %v1564_v29 = vpack.c.bf16 %v1320_v26, %v1320_v26  ;;  %v1273_v31 = vadd.f32 %v1824_v27, %v2356_v49  ;;  %v1264_v32 = vpop.f32.mrb[33].mxu1 }
 0x310   :  { %1403 = vst.msk [vmem:[%s2448_s10 + $0x2c] sm:$0xf] %vm1391_vm4, %v1566_v25  ;;  %v1265_v33 = vadd.f32 %v2356_v49, %v1264_v32  ;;  %v1825_v35 = vpop.f32.mrb[34].mxu1 }
 0x311   :  { %1401 = vst.msk [vmem:[%s2448_s10 + $0x24] sm:$0xf] %vm1391_vm4, %v1564_v29  ;;  %vm1293_vm15 = vcmp.ge.f32.partialorder %v1273_v31, 0.0  ;;  %v1309_v36 = vmul.f32 0.01, %v1273_v31  ;;  %v1276_v37 = vadd.f32 %v1825_v35, %v2356_v49  ;;  %v1267_v9 = vpop.f32.mrb[35].mxu1 }
 0x312   :  { %vm1291_vm1 = vcmp.ge.f32.partialorder %v1265_v33, 0.0  ;;  %v1307_v38 = vmul.f32 0.01, %v1265_v33  ;;  %v1268_v39 = vadd.f32 %v2356_v49, %v1267_v9 }
 0x313   :  { %v1325_v40 = vsel %vm1293_vm15, %v1273_v31, %v1309_v36  ;;  %vm1294_vm2 = vcmp.ge.f32.partialorder %v1276_v37, 0.0  ;;  %v1310_v15 = vmul.f32 0.01, %v1276_v37 }
 0x314   :  { %v1569_v41 = vpack.c.bf16 %v1325_v40, %v1325_v40  ;;  %v1323_v42 = vsel %vm1291_vm1, %v1265_v33, %v1307_v38  ;;  %vm1292_vm0 = vcmp.ge.f32.partialorder %v1268_v39, 0.0  ;;  %v1308_v43 = vmul.f32 0.01, %v1268_v39 }
 0x315   :  { %v1567_v50 = vpack.c.bf16 %v1323_v42, %v1323_v42  ;;  %v1326_v51 = vsel %vm1294_vm2, %v1276_v37, %v1310_v15 }
 0x316   :  { %1406 = vst.msk [vmem:[%s2448_s10 + $0x38] sm:$0xf] %vm1391_vm4, %v1569_v41  ;;  %v1570_v53 = vpack.c.bf16 %v1326_v51, %v1326_v51  ;;  %v1324_v54 = vsel %vm1292_vm0, %v1268_v39, %v1308_v43 }
 0x317   :  { %1404 = vst.msk [vmem:[%s2448_s10 + $0x30] sm:$0xf] %vm1391_vm4, %v1567_v50  ;;  %v1568_v49 = vpack.c.bf16 %v1324_v54, %v1324_v54 }
 0x318   :  { %1407 = vst.msk [vmem:[%s2448_s10 + $0x3c] sm:$0xf] %vm1391_vm4, %v1570_v53 }
 0x319   :  { %1405 = vst.msk [vmem:[%s2448_s10 + $0x34] sm:$0xf] %vm1391_vm4, %v1568_v49 }

// kernel: resnet_forward.19
= control target key start
LH: loop header
LB: loop body
LE: loop exit
PB: predicated region body
PF: predicated region fallthrough
CT: control target
= control target key end

     0   :  { %vm335_vm0 = vcmask 261120   ;;  %s2119_s2 = inlined_call_operand.vmem [shape: bf16[288,32], index: 2, kind: input, shape index: {}]   ;;  %s2120_s0 = inlined_call_operand.vmem [shape: bf16[128,288], index: 0, kind: input, shape index: {}]   ;;  %s2121_s4 = inlined_call_operand.vmem [shape: bf16[32,128], index: 4, kind: input, shape index: {}]   ;;  %s2122_s6 = inlined_call_operand.vmem [shape: bf16[128,32], index: 6, kind: input, shape index: {}]   ;;  %s2123_s3 = inlined_call_operand.vmem [shape: f32[1,32], index: 3, kind: input, shape index: {}]   ;;  %s2124_s1 = inlined_call_operand.vmem [shape: bf16[128,128], index: 1, kind: input, shape index: {}]   ;;  %s2125_s5 = inlined_call_operand.vmem [shape: f32[1,128], index: 5, kind: input, shape index: {}]   ;;  %s2126_s8 = inlined_call_operand.vmem [shape: bf16[128,128], index: 8, kind: output, shape index: {0}]   ;;  %s2127_s7 = inlined_call_operand.vmem [shape: f32[1,32], index: 7, kind: input, shape index: {}]   ;;  %s2128_s9 = inlined_call_operand.vmem [shape: bf16[128,32], index: 9, kind: output, shape index: {1}]  }
   0x1   :  { %v1628_v0 = vld [vmem:[%s2119_s2 + $0x40] sm:$0xff]   ;;  %v1630_v2 = vld [vmem:[%s2119_s2 + $0x48] sm:$0xff]   ;;  %v1632_v4 = vld [vmem:[%s2119_s2 + $0x50] sm:$0xff]  }
   0x2   :  { %v1629_v1 = vld [vmem:[%s2119_s2] sm:$0xff]   ;;  %1456 = vmatprep.subr.bf16.mxu0 %v1628_v0  ;;  %v1631_v3 = vld [vmem:[%s2119_s2 + $0x8] sm:$0xff]   ;;  %v1633_v5 = vld [vmem:[%s2119_s2 + $0x10] sm:$0xff]  }
   0x3   :  { %1457 = vmatpush3.bf16.msra.mxu0 %v1629_v1  ;;  %v1634_v6 = vld [vmem:[%s2119_s2 + $0x58] sm:$0xff]   ;;  %v1636_v8 = vld [vmem:[%s2119_s2 + $0x60] sm:$0xff]   ;;  %v1638_v11 = vld [vmem:[%s2119_s2 + $0x68] sm:$0xff]  }
   0x4   :  { %1458 = vmatprep.subr.bf16.mxu0 %v1630_v2  ;;  %v1635_v7 = vld [vmem:[%s2119_s2 + $0x18] sm:$0xff]   ;;  %v1637_v9 = vld [vmem:[%s2119_s2 + $0x20] sm:$0xff]   ;;  %v1639_v12 = vld [vmem:[%s2119_s2 + $0x28] sm:$0xff]  }
   0x5   :  { %v1643_v10 = vld [vmem:[%s2119_s2 + $0x80] sm:$0xff]   ;;  %v1640_v13 = vld [vmem:[%s2119_s2 + $0x70] sm:$0xff]   ;;  %v1648_v15 = vld [vmem:[%s2119_s2 + $0x88] sm:$0xff]  }
   0x6   :  { %1556 = vmatprep.subr.bf16.mxu1 %v1643_v10  ;;  %v1647_v14 = vld [vmem:[%s2120_s0 + $0x4] ss:$12 sps:$4 sm:$0xff]   ;;  %v1649_v16 = vld [vmem:[%s2120_s0 + $0x8] ss:$12 sps:$4 sm:$0xff]   ;;  %v1650_v17 = vld [vmem:[%s2120_s0 + $0x20] ss:$12 sps:$4 sm:$0xff]  }
   0x7   :  { %1459 = vmatpush3.bf16.msra.mxu0 %v1631_v3  ;;  %1557 = vmatpush3.bf16.msra.mxu1 %v1643_v10  ;;  %v1641_v18 = vld [vmem:[%s2119_s2 + $0x30] sm:$0xff]   ;;  %v1642_v19 = vld [vmem:[%s2119_s2 + $0x78] sm:$0xff]   ;;  %v1645_v22 = vld [vmem:[%s2120_s0] ss:$12 sps:$4 sm:$0xff]  }
   0x8   :  { %1460 = vmatprep.subr.bf16.mxu0 %v1632_v4  ;;  %392 = vmatprep.mubr.bf16.mxu0 %v1647_v14  ;;  %v1657_v20 = vld [vmem:[%s2120_s0 + $0x38] ss:$12 sps:$4 sm:$0xff]   ;;  %v1658_v23 = vld [vmem:[%s2120_s0 + $0x50] ss:$12 sps:$4 sm:$0xff]   ;;  %v1665_v24 = vld [vmem:[%s2120_s0 + $0x68] ss:$12 sps:$4 sm:$0xff]  }
   0x9   :  { %1558 = vmatprep.subr.bf16.mxu1 %v1648_v15  ;;  %1560 = vmatprep.mubr.msk.bf16.mxu1 %vm335_vm0, %v1649_v16  ;;  %v1644_v21 = vld [vmem:[%s2119_s2 + $0x38] sm:$0xff]   ;;  %v1666_v26 = vld [vmem:[%s2120_s0 + $0x80] ss:$12 sps:$4 sm:$0xff]   ;;  %v1661_v33 = vld [vmem:[%s2120_s0 + $0x48] ss:$12 sps:$4 sm:$0xff]  }
   0xa   :  { %v1651_v25 = vld [vmem:[%s2120_s0 + $0x1c] ss:$12 sps:$4 sm:$0xff]   ;;  %v1653_v27 = vld [vmem:[%s2120_s0 + $0x18] ss:$12 sps:$4 sm:$0xff]   ;;  %v1654_v29 = vld [vmem:[%s2120_s0 + $0x34] ss:$12 sps:$4 sm:$0xff]  }
   0xb   :  { %1461 = vmatpush3.bf16.msra.mxu0 %v1633_v5  ;;  %1559 = vmatpush3.bf16.msra.mxu1 %v1648_v15  ;;  %v1673_v28 = vld [vmem:[%s2120_s0 + $0x98] ss:$12 sps:$4 sm:$0xff]   ;;  %v1674_v30 = vld [vmem:[%s2120_s0 + $0xb0] ss:$12 sps:$4 sm:$0xff]   ;;  %v1664_v35 = vld [vmem:[%s2120_s0 + $0x60] ss:$12 sps:$4 sm:$0xff]  }
   0xc   :  { %1462 = vmatprep.subr.bf16.mxu0 %v1634_v6  ;;  %v1656_v31 = vld [vmem:[%s2120_s0 + $0x30] ss:$12 sps:$4 sm:$0xff]   ;;  %v1659_v32 = vld [vmem:[%s2120_s0 + $0x4c] ss:$12 sps:$4 sm:$0xff]   ;;  %v1670_v38 = vld [vmem:[%s2120_s0 + $0x94] ss:$12 sps:$4 sm:$0xff]  }
   0xd   :  { %v1662_v34 = vld [vmem:[%s2120_s0 + $0x64] ss:$12 sps:$4 sm:$0xff]   ;;  %v1667_v36 = vld [vmem:[%s2120_s0 + $0x7c] ss:$12 sps:$4 sm:$0xff]   ;;  %v1675_v40 = vld [vmem:[%s2120_s0 + $0xac] ss:$12 sps:$4 sm:$0xff]  }
   0xe   :  { %1561 = vmatmul.mubr.msk.bf16.vlgmr.msra.gmra.mrb[0].mxu1 %vm335_vm0, %v1650_v17  ;;  %v1669_v37 = vld [vmem:[%s2120_s0 + $0x78] ss:$12 sps:$4 sm:$0xff]   ;;  %v1672_v39 = vld [vmem:[%s2120_s0 + $0x90] ss:$12 sps:$4 sm:$0xff]   ;;  %v1677_v41 = vld [vmem:[%s2120_s0 + $0xa8] ss:$12 sps:$4 sm:$0xff]  }
   0xf   :  { %1463 = vmatpush3.bf16.msra.mxu0 %v1635_v7  ;;  %1564 = vmatprep.mubr.msk.bf16.mxu1 %vm335_vm0, %v1657_v20  ;;  %v1678_v42 = vld [vmem:[%s2121_s4] sm:$0xff]   ;;  %v1679_v43 = vld [vmem:[%s2121_s4 + $0x8] sm:$0xff]  }
  0x10   :  { %1464 = vmatprep.subr.bf16.mxu0 %v1636_v8  ;;  %1576 = vmatprep.subr.bf16.mxu1 %v1678_v42  ;;  %v1881_v44 = vld [vmem:[%s2122_s6] sm:$0xff]  }
  0x11   :  { %1577 = vmatpush3.bf16.msra.mxu1 %v1678_v42  ;;  %v1889_v53 = vld [vmem:[%s2123_s3] ss:$0 sm:$0xff]  ;;  %v1682_v42 = vld [vmem:[%s2122_s6 + $0x10] sm:$0xff]  }
  0x12   :  { %1578 = vmatprep.subr.bf16.mxu1 %v1679_v43 }
  0x13   :  { %1465 = vmatpush3.bf16.msra.mxu0 %v1637_v9 }
  0x14   :  { %1466 = vmatprep.subr.bf16.mxu0 %v1638_v11 }
  0x15   :  { %1579 = vmatpush3.bf16.msra.mxu1 %v1679_v43 }
  0x16   :  { %1565 = vmatmul.mubr.msk.bf16.gmra.mrb[4].mxu1 %vm335_vm0, %v1658_v23  ;;  %1596 = vmatprep.subr.bf16.mxu1 %v1881_v44 }
  0x17   :  { %1467 = vmatpush3.bf16.msra.mxu0 %v1639_v12  ;;  %1568 = vmatprep.mubr.msk.bf16.mxu1 %vm335_vm0, %v1665_v24 }
  0x18   :  { %1468 = vmatprep.subr.bf16.mxu0 %v1640_v13 }
  0x1b   :  { %1469 = vmatpush3.bf16.msra.mxu0 %v1641_v18 }
  0x1c   :  { %1470 = vmatprep.subr.bf16.mxu0 %v1642_v19 }
  0x1e   :  { %1569 = vmatmul.mubr.msk.bf16.gmra.mrb[8].mxu1 %vm335_vm0, %v1666_v26 }
  0x1f   :  { %1471 = vmatpush3.bf16.msra.mxu0 %v1644_v21  ;;  %1572 = vmatprep.mubr.msk.bf16.mxu1 %vm335_vm0, %v1673_v28 }
  0x22   :  { %393 = vmatmul.mubr.bf16.vlgmr.msra.gmra.mrb[0].mxu0 %v1645_v22 }
  0x23   :  { %400 = vmatprep.mubr.bf16.mxu0 %v1651_v25 }
  0x26   :  { %1573 = vmatmul.mubr.msk.bf16.gmra.mrb[12].mxu1 %vm335_vm0, %v1674_v30 }
  0x2a   :  { %401 = vmatmul.mubr.bf16.gmra.mrb[4].mxu0 %v1653_v27 }
  0x2b   :  { %408 = vmatprep.mubr.bf16.mxu0 %v1654_v29 }
  0x32   :  { %409 = vmatmul.mubr.bf16.gmra.mrb[8].mxu0 %v1656_v31 }
  0x33   :  { %416 = vmatprep.mubr.bf16.mxu0 %v1659_v32 }
  0x3a   :  { %417 = vmatmul.mubr.bf16.gmra.mrb[12].mxu0 %v1661_v33 }
  0x3b   :  { %424 = vmatprep.mubr.bf16.mxu0 %v1662_v34 }
  0x42   :  { %425 = vmatmul.mubr.bf16.gmra.mrb[16].mxu0 %v1664_v35  ;;  %v1681_v35 = vld [vmem:[%s2122_s6 + $0x8] sm:$0xff]  }
  0x43   :  { %432 = vmatprep.mubr.bf16.mxu0 %v1667_v36 }
  0x4a   :  { %433 = vmatmul.mubr.bf16.gmra.mrb[20].mxu0 %v1669_v37 }
  0x4b   :  { %440 = vmatprep.mubr.bf16.mxu0 %v1670_v38 }
  0x52   :  { %441 = vmatmul.mubr.bf16.gmra.mrb[24].mxu0 %v1672_v39 }
  0x53   :  { %448 = vmatprep.mubr.bf16.mxu0 %v1675_v40 }
  0x5a   :  { %449 = vmatmul.mubr.bf16.gmra.mrb[28].mxu0 %v1677_v41 }
  0xe1   :  { %v1562_v45 = vpop.f32.mrb[0].mxu1 }
  0xe2   :  { %v491_v46 = vpop.f32.mrb[1].mxu1 }
  0xe3   :  { %v1563_v47 = vpop.f32.mrb[2].mxu1 }
  0xe4   :  { %v494_v48 = vpop.f32.mrb[3].mxu1 }
  0xe9   :  { %v1884_v49 = vpop.f32.mrb[4].mxu1 }
  0xea   :  { %v507_v51 = vpop.f32.mrb[5].mxu1 }
  0xeb   :  { %v1891_v54 = vpop.f32.mrb[6].mxu1 }
  0xec   :  { %v510_v57 = vpop.f32.mrb[7].mxu1 }
  0xf1   :  { %v1895_v63 = vpop.f32.mrb[8].mxu1 }
  0xf2   :  { %v1897_v3 = vpop.f32.mrb[9].mxu1 }
  0xf3   :  { %v1899_v5 = vpop.f32.mrb[10].mxu1 }
  0xf4   :  { %v1901_v9 = vpop.f32.mrb[11].mxu1 }
  0xf5   :  { %v1472_v50 = vpop.f32.mrb[0].mxu0 }
  0xf6   :  { %v1473_v52 = vpop.f32.mrb[1].mxu0 }
  0xf7   :  { %v1474_v55 = vadd.f32 %v1473_v52, %v1472_v50  ;;  %v1475_v56 = vpop.f32.mrb[2].mxu0 }
  0xf8   :  { %v1476_v58 = vpop.f32.mrb[3].mxu0 }
  0xf9   :  { %v1477_v59 = vadd.f32 %v1476_v58, %v1475_v56  ;;  %v395_v60 = vadd.f32 %v1474_v55, %v1889_v53  ;;  %v1906_v18 = vpop.f32.mrb[12].mxu1 }
  0xfa   :  { %v1908_v22 = vpop.f32.mrb[13].mxu1 }
  0xfb   :  { %v492_v61 = vadd.f32 %v491_v46, %v395_v60  ;;  %v398_v62 = vadd.f32 %v1477_v59, %v1889_v53  ;;  %v1910_v24 = vpop.f32.mrb[14].mxu1 }
  0xfc   :  { %v1912_v28 = vpop.f32.mrb[15].mxu1 }
  0xfd   :  { %v570_v0 = vmul.f32 0.01, %v492_v61  ;;  %v495_v1 = vadd.f32 %v494_v48, %v398_v62  ;;  %v1478_v2 = vpop.f32.mrb[4].mxu0  ;;  %vm554_vm1 = vcmp.ge.f32.partialorder %v492_v61, 0.0  ;;  %v1684_v62 = vld [vmem:[%s2122_s6 + $0x20] sm:$0xff]  }
  0xfe   :  { %v1479_v4 = vpop.f32.mrb[5].mxu0 }
  0xff   :  { %vm555_vm2 = vcmp.ge.f32.partialorder %v495_v1, 0.0  ;;  %v571_v6 = vmul.f32 0.01, %v495_v1  ;;  %v1480_v7 = vadd.f32 %v1479_v4, %v1478_v2  ;;  %v1481_v8 = vpop.f32.mrb[6].mxu0  ;;  %v586_v11 = vsel %vm554_vm1, %v492_v61, %v570_v0 }
 0x100   :  { %v1482_v10 = vpop.f32.mrb[7].mxu0 }
 0x101   :  { %v587_v12 = vsel %vm555_vm2, %v495_v1, %v571_v6  ;;  %v403_v13 = vadd.f32 %v1480_v7, %v1889_v53  ;;  %v1483_v14 = vadd.f32 %v1482_v10, %v1481_v8 }
 0x102   :  { %v602_v15 = vpack.c.bf16 %v587_v12, %v586_v11 }
 0x103   :  { %v500_v16 = vadd.f32 %v1562_v45, %v403_v13  ;;  %v406_v17 = vadd.f32 %v1483_v14, %v1889_v53 }
 0x104   :  { %1580 = vmatprep.mubr.msk.bf16.mxu1 %vm335_vm0, %v602_v15 }
 0x105   :  { %v572_v19 = vmul.f32 0.01, %v500_v16  ;;  %v503_v20 = vadd.f32 %v1563_v47, %v406_v17  ;;  %v1484_v21 = vpop.f32.mrb[8].mxu0  ;;  %vm556_vm3 = vcmp.ge.f32.partialorder %v500_v16, 0.0 }
 0x106   :  { %v1485_v23 = vpop.f32.mrb[9].mxu0 }
 0x107   :  { %vm557_vm4 = vcmp.ge.f32.partialorder %v503_v20, 0.0  ;;  %v573_v25 = vmul.f32 0.01, %v503_v20  ;;  %v1486_v26 = vadd.f32 %v1485_v23, %v1484_v21  ;;  %v1487_v27 = vpop.f32.mrb[10].mxu0  ;;  %v588_v30 = vsel %vm556_vm3, %v500_v16, %v572_v19 }
 0x108   :  { %v1488_v29 = vpop.f32.mrb[11].mxu0 }
 0x109   :  { %v589_v31 = vsel %vm557_vm4, %v503_v20, %v573_v25  ;;  %v1489_v32 = vadd.f32 %v1488_v29, %v1487_v27  ;;  %v411_v33 = vadd.f32 %v1486_v26, %v1889_v53 }
 0x10a   :  { %v603_v34 = vpack.c.bf16 %v589_v31, %v588_v30 }
 0x10b   :  { %v508_v36 = vadd.f32 %v507_v51, %v411_v33  ;;  %v414_v37 = vadd.f32 %v1489_v32, %v1889_v53 }
 0x10c   :  { %1581 = vmatmul.mubr.msk.bf16.vlgmr.msra.gmra.mrb[16].mxu1 %vm335_vm0, %v603_v34 }
 0x10d   :  { %v574_v38 = vmul.f32 0.01, %v508_v36  ;;  %v511_v39 = vadd.f32 %v510_v57, %v414_v37  ;;  %v1490_v40 = vpop.f32.mrb[12].mxu0  ;;  %1597 = vmatpush3.bf16.msra.mxu1 %v1881_v44  ;;  %vm558_vm5 = vcmp.ge.f32.partialorder %v508_v36, 0.0  ;;  %v1683_v44 = vld [vmem:[%s2122_s6 + $0x18] sm:$0xff]  }
 0x10e   :  { %v1491_v41 = vpop.f32.mrb[13].mxu0  ;;  %1598 = vmatprep.subr.bf16.mxu1 %v1681_v35 }
 0x10f   :  { %vm559_vm6 = vcmp.ge.f32.partialorder %v511_v39, 0.0  ;;  %v575_v43 = vmul.f32 0.01, %v511_v39  ;;  %v1492_v45 = vadd.f32 %v1491_v41, %v1490_v40  ;;  %v1493_v46 = vpop.f32.mrb[14].mxu0  ;;  %v590_v48 = vsel %vm558_vm5, %v508_v36, %v574_v38 }
 0x110   :  { %v1494_v47 = vpop.f32.mrb[15].mxu0 }
 0x111   :  { %v591_v50 = vsel %vm559_vm6, %v511_v39, %v575_v43  ;;  %v419_v51 = vadd.f32 %v1492_v45, %v1889_v53  ;;  %v1495_v52 = vadd.f32 %v1494_v47, %v1493_v46  ;;  %1599 = vmatpush3.bf16.msra.mxu1 %v1681_v35 }
 0x112   :  { %v604_v55 = vpack.c.bf16 %v591_v50, %v590_v48  ;;  %1600 = vmatprep.subr.bf16.mxu1 %v1682_v42 }
 0x113   :  { %v516_v56 = vadd.f32 %v1884_v49, %v419_v51  ;;  %v422_v57 = vadd.f32 %v1495_v52, %v1889_v53 }
 0x114   :  { %1584 = vmatprep.mubr.msk.bf16.mxu1 %vm335_vm0, %v604_v55 }
 0x115   :  { %v576_v58 = vmul.f32 0.01, %v516_v56  ;;  %v519_v59 = vadd.f32 %v1891_v54, %v422_v57  ;;  %v1496_v60 = vpop.f32.mrb[16].mxu0  ;;  %1601 = vmatpush3.bf16.msra.mxu1 %v1682_v42  ;;  %vm560_vm7 = vcmp.ge.f32.partialorder %v516_v56, 0.0 }
 0x116   :  { %v1497_v61 = vpop.f32.mrb[17].mxu0  ;;  %1602 = vmatprep.subr.bf16.mxu1 %v1683_v44 }
 0x117   :  { %vm561_vm8 = vcmp.ge.f32.partialorder %v519_v59, 0.0  ;;  %v577_v0 = vmul.f32 0.01, %v519_v59  ;;  %v1498_v1 = vadd.f32 %v1497_v61, %v1496_v60  ;;  %v1499_v49 = vpop.f32.mrb[18].mxu0  ;;  %v592_v7 = vsel %vm560_vm7, %v516_v56, %v576_v58 }
 0x118   :  { %v1500_v2 = vpop.f32.mrb[19].mxu0 }
 0x119   :  { %v1501_v4 = vadd.f32 %v1500_v2, %v1499_v49  ;;  %v427_v6 = vadd.f32 %v1498_v1, %v1889_v53  ;;  %v593_v8 = vsel %vm561_vm8, %v519_v59, %v577_v0  ;;  %1603 = vmatpush3.bf16.msra.mxu1 %v1683_v44  ;;  %v1685_v1 = vld [vmem:[%s2122_s6 + $0x28] sm:$0xff]   ;;  %v1371_v49 = vld [vmem:[%s2124_s1] sm:$0xff]  }
 0x11a   :  { %v605_v54 = vpack.c.bf16 %v593_v8, %v592_v7  ;;  %1604 = vmatprep.subr.bf16.mxu1 %v1684_v62  ;;  %v1974_v2 = vld [vmem:[%s2125_s5] ss:$0 sm:$0xff]  ;;  %v1372_v7 = vunpack.c.l.bf16 %v1371_v49 }
 0x11b   :  { %v524_v10 = vadd.f32 %v1897_v3, %v427_v6  ;;  %v430_v11 = vadd.f32 %v1501_v4, %v1889_v53 }
 0x11c   :  { %1585 = vmatmul.mubr.msk.bf16.gmra.mrb[20].mxu1 %vm335_vm0, %v605_v54 }
 0x11d   :  { %v578_v12 = vmul.f32 0.01, %v524_v10  ;;  %v527_v13 = vadd.f32 %v1901_v9, %v430_v11  ;;  %v1502_v14 = vpop.f32.mrb[20].mxu0  ;;  %1605 = vmatpush3.bf16.msra.mxu1 %v1684_v62  ;;  %vm562_vm9 = vcmp.ge.f32.partialorder %v524_v10, 0.0 }
 0x11e   :  { %v1503_v15 = vpop.f32.mrb[21].mxu0  ;;  %1606 = vmatprep.subr.bf16.mxu1 %v1685_v1 }
 0x11f   :  { %vm563_vm10 = vcmp.ge.f32.partialorder %v527_v13, 0.0  ;;  %v579_v16 = vmul.f32 0.01, %v527_v13  ;;  %v1504_v17 = vadd.f32 %v1503_v15, %v1502_v14  ;;  %v1505_v19 = vpop.f32.mrb[22].mxu0  ;;  %v594_v21 = vsel %vm562_vm9, %v524_v10, %v578_v12 }
 0x120   :  { %v1506_v20 = vpop.f32.mrb[23].mxu0 }
 0x121   :  { %v595_v23 = vsel %vm563_vm10, %v527_v13, %v579_v16  ;;  %v435_v3 = vadd.f32 %v1504_v17, %v1889_v53  ;;  %v1507_v25 = vadd.f32 %v1506_v20, %v1505_v19  ;;  %1607 = vmatpush3.bf16.msra.mxu1 %v1685_v1  ;;  %v1373_v13 = vunpack.c.h.bf16 %v1371_v49 }
 0x122   :  { %v606_v26 = vpack.c.bf16 %v595_v23, %v594_v21 }
 0x123   :  { %v532_v27 = vadd.f32 %v1895_v63, %v435_v3  ;;  %v438_v29 = vadd.f32 %v1507_v25, %v1889_v53 }
 0x124   :  { %1588 = vmatprep.mubr.msk.bf16.mxu1 %vm335_vm0, %v606_v26 }
 0x125   :  { %v580_v9 = vmul.f32 0.01, %v532_v27  ;;  %v535_v30 = vadd.f32 %v1899_v5, %v438_v29  ;;  %v1508_v31 = vpop.f32.mrb[24].mxu0  ;;  %vm564_vm11 = vcmp.ge.f32.partialorder %v532_v27, 0.0 }
 0x126   :  { %v1509_v32 = vpop.f32.mrb[25].mxu0 }
 0x127   :  { %vm565_vm12 = vcmp.ge.f32.partialorder %v535_v30, 0.0  ;;  %v581_v33 = vmul.f32 0.01, %v535_v30  ;;  %v1510_v34 = vadd.f32 %v1509_v32, %v1508_v31  ;;  %v1511_v35 = vpop.f32.mrb[26].mxu0  ;;  %v596_v39 = vsel %vm564_vm11, %v532_v27, %v580_v9 }
 0x128   :  { %v1512_v36 = vpop.f32.mrb[27].mxu0 }
 0x129   :  { %v1513_v37 = vadd.f32 %v1512_v36, %v1511_v35  ;;  %v443_v38 = vadd.f32 %v1510_v34, %v1889_v53  ;;  %v597_v63 = vsel %vm565_vm12, %v535_v30, %v581_v33  ;;  %v1444_v33 = vld [vmem:[%s2124_s1 + $0x18] sm:$0xff]   ;;  %v1443_v34 = vld [vmem:[%s2124_s1 + $0x10] sm:$0xff]  }
 0x12a   :  { %v607_v40 = vpack.c.bf16 %v597_v63, %v596_v39  ;;  %v1384_v35 = vunpack.c.l.bf16 %v1444_v33  ;;  %v1385_v63 = vunpack.c.h.bf16 %v1444_v33 }
 0x12b   :  { %v540_v41 = vadd.f32 %v1908_v22, %v443_v38  ;;  %v446_v42 = vadd.f32 %v1513_v37, %v1889_v53  ;;  %v1380_v37 = vunpack.c.l.bf16 %v1443_v34 }
 0x12c   :  { %1589 = vmatmul.mubr.msk.bf16.gmra.mrb[24].mxu1 %vm335_vm0, %v607_v40 }
 0x12d   :  { %v582_v5 = vmul.f32 0.01, %v540_v41  ;;  %v543_v43 = vadd.f32 %v1912_v28, %v446_v42  ;;  %v1514_v45 = vpop.f32.mrb[28].mxu0  ;;  %vm566_vm13 = vcmp.ge.f32.partialorder %v540_v41, 0.0  ;;  %v1381_v42 = vunpack.c.h.bf16 %v1443_v34 }
 0x12e   :  { %v1515_v46 = vpop.f32.mrb[29].mxu0 }
 0x12f   :  { %vm567_vm14 = vcmp.ge.f32.partialorder %v543_v43, 0.0  ;;  %v583_v47 = vmul.f32 0.01, %v543_v43  ;;  %v1516_v48 = vadd.f32 %v1515_v46, %v1514_v45  ;;  %v1517_v50 = vpop.f32.mrb[30].mxu0  ;;  %v598_v52 = vsel %vm566_vm13, %v540_v41, %v582_v5 }
 0x130   :  { %v1518_v51 = vpop.f32.mrb[31].mxu0 }
 0x131   :  { %v599_v55 = vsel %vm567_vm14, %v543_v43, %v583_v47  ;;  %v451_v44 = vadd.f32 %v1516_v48, %v1889_v53  ;;  %v1519_v22 = vadd.f32 %v1518_v51, %v1517_v50 }
 0x132   :  { %v608_v56 = vpack.c.bf16 %v599_v55, %v598_v52 }
 0x133   :  { %v548_v57 = vadd.f32 %v1906_v18, %v451_v44  ;;  %v454_v58 = vadd.f32 %v1519_v22, %v1889_v53  ;;  %v1686_v53 = vld [vmem:[%s2122_s6 + $0x30] sm:$0xff]   ;;  %v1687_v18 = vld [vmem:[%s2122_s6 + $0x38] sm:$0xff]  }
 0x134   :  { %1592 = vmatprep.mubr.msk.bf16.mxu1 %vm335_vm0, %v608_v56  ;;  %1608 = vmatprep.subr.bf16.mxu1 %v1686_v53 }
 0x135   :  { %v584_v28 = vmul.f32 0.01, %v548_v57  ;;  %v551_v59 = vadd.f32 %v1910_v24, %v454_v58  ;;  %vm568_vm15 = vcmp.ge.f32.partialorder %v548_v57, 0.0  ;;  %1609 = vmatpush3.bf16.msra.mxu1 %v1686_v53  ;;  %v1442_v24 = vld [vmem:[%s2124_s1 + $0x8] sm:$0xff]  }
 0x136   :  { %1610 = vmatprep.subr.bf16.mxu1 %v1687_v18  ;;  %v1376_v4 = vunpack.c.l.bf16 %v1442_v24  ;;  %v1377_v10 = vunpack.c.h.bf16 %v1442_v24 }
 0x137   :  { %vm569_vm1 = vcmp.ge.f32.partialorder %v551_v59, 0.0  ;;  %v585_v60 = vmul.f32 0.01, %v551_v59  ;;  %v600_v61 = vsel %vm568_vm15, %v548_v57, %v584_v28 }
 0x139   :  { %v601_v62 = vsel %vm569_vm1, %v551_v59, %v585_v60  ;;  %1611 = vmatpush3.bf16.msra.mxu1 %v1687_v18  ;;  %v1446_v60 = vld [vmem:[%s2124_s1 + $0x28] sm:$0xff]  }
 0x13a   :  { %v609_v0 = vpack.c.bf16 %v601_v62, %v600_v61  ;;  %v1445_v61 = vld [vmem:[%s2124_s1 + $0x20] sm:$0xff]   ;;  %v1392_v62 = vunpack.c.l.bf16 %v1446_v60  ;;  %v1393_v24 = vunpack.c.h.bf16 %v1446_v60 }
 0x13b   :  { %v1388_v1 = vunpack.c.l.bf16 %v1445_v61 }
 0x13c   :  { %1593 = vmatmul.mubr.msk.bf16.gmra.mrb[28].mxu1 %vm335_vm0, %v609_v0 }
 0x1df   :  { %v1582_v6 = vpop.f32.mrb[16].mxu1 }
 0x1e0   :  { %v700_v8 = vadd.f32 %v1582_v6, %v1974_v2  ;;  %v691_v54 = vpop.f32.mrb[17].mxu1  ;;  %v1389_v6 = vunpack.c.h.bf16 %v1445_v61 }
 0x1e1   :  { %v692_v11 = vadd.f32 %v1974_v2, %v691_v54  ;;  %v1583_v12 = vpop.f32.mrb[18].mxu1 }
 0x1e2   :  { %v788_v14 = vadd.f32 %v1376_v4, %v700_v8  ;;  %v703_v15 = vadd.f32 %v1583_v12, %v1974_v2  ;;  %v694_v16 = vpop.f32.mrb[19].mxu1 }
 0x1e3   :  { %v786_v17 = vadd.f32 %v1372_v7, %v692_v11  ;;  %v695_v19 = vadd.f32 %v1974_v2, %v694_v16 }
 0x1e4   :  { %v820_v20 = vmul.f32 0.01, %v788_v14  ;;  %v789_v21 = vadd.f32 %v1377_v10, %v703_v15  ;;  %vm804_vm0 = vcmp.ge.f32.partialorder %v788_v14, 0.0 }
 0x1e5   :  { %v818_v23 = vmul.f32 0.01, %v786_v17  ;;  %v787_v3 = vadd.f32 %v1373_v13, %v695_v19  ;;  %vm802_vm2 = vcmp.ge.f32.partialorder %v786_v17, 0.0 }
 0x1e6   :  { %vm805_vm3 = vcmp.ge.f32.partialorder %v789_v21, 0.0  ;;  %v821_v25 = vmul.f32 0.01, %v789_v21  ;;  %v836_v27 = vsel %vm804_vm0, %v788_v14, %v820_v20 }
 0x1e7   :  { %vm803_vm4 = vcmp.ge.f32.partialorder %v787_v3, 0.0  ;;  %v819_v26 = vmul.f32 0.01, %v787_v3  ;;  %v834_v30 = vsel %vm802_vm2, %v786_v17, %v818_v23 }
 0x1e8   :  { %v837_v29 = vsel %vm805_vm3, %v789_v21, %v821_v25  ;;  %vm1210_vm3 = vcmask 257024  }
 0x1e9   :  { %v851_v9 = vpack.c.bf16 %v837_v29, %v836_v27  ;;  %v835_v31 = vsel %vm803_vm4, %v787_v3, %v819_v26  ;;  %v1448_v26 = vld [vmem:[%s2124_s1 + $0x38] sm:$0xff]   ;;  %v1447_v27 = vld [vmem:[%s2124_s1 + $0x30] sm:$0xff]  }
 0x1ea   :  { %v850_v32 = vpack.c.bf16 %v835_v31, %v834_v30  ;;  %v1400_v29 = vunpack.c.l.bf16 %v1448_v26  ;;  %v1396_v30 = vunpack.c.l.bf16 %v1447_v27  ;;  %v1401_v33 = vunpack.c.h.bf16 %v1448_v26 }
 0x1eb   :  { %1449 = vst [vmem:[%s2126_s8 + $0x8] sm:$0xff] %v851_v9  }
 0x1ec   :  { %1406 = vst [vmem:[%s2126_s8] sm:$0xff] %v850_v32   ;;  %1612 = vmatprep.mubr.bf16.mxu1 %v850_v32 }
 0x1ed   :  { %1613 = vmatmul.mubr.bf16.vlgmr.msra.gmra.mrb[32].mxu1 %v851_v9 }
 0x1ef   :  { %v1586_v36 = vpop.f32.mrb[20].mxu1 }
 0x1f0   :  { %v716_v38 = vadd.f32 %v1586_v36, %v1974_v2  ;;  %v707_v39 = vpop.f32.mrb[21].mxu1  ;;  %v1397_v36 = vunpack.c.h.bf16 %v1447_v27 }
 0x1f1   :  { %v708_v40 = vadd.f32 %v1974_v2, %v707_v39  ;;  %v1587_v41 = vpop.f32.mrb[22].mxu1 }
 0x1f2   :  { %v792_v5 = vadd.f32 %v1384_v35, %v716_v38  ;;  %v719_v43 = vadd.f32 %v1587_v41, %v1974_v2  ;;  %v710_v45 = vpop.f32.mrb[23].mxu1 }
 0x1f3   :  { %v790_v46 = vadd.f32 %v1380_v37, %v708_v40  ;;  %v711_v47 = vadd.f32 %v1974_v2, %v710_v45 }
 0x1f4   :  { %v824_v48 = vmul.f32 0.01, %v792_v5  ;;  %v793_v50 = vadd.f32 %v1385_v63, %v719_v43  ;;  %vm808_vm5 = vcmp.ge.f32.partialorder %v792_v5, 0.0 }
 0x1f5   :  { %v822_v51 = vmul.f32 0.01, %v790_v46  ;;  %v791_v52 = vadd.f32 %v1381_v42, %v711_v47  ;;  %vm806_vm6 = vcmp.ge.f32.partialorder %v790_v46, 0.0 }
 0x1f6   :  { %vm809_vm7 = vcmp.ge.f32.partialorder %v793_v50, 0.0  ;;  %v825_v55 = vmul.f32 0.01, %v793_v50  ;;  %v840_v22 = vsel %vm808_vm5, %v792_v5, %v824_v48 }
 0x1f7   :  { %vm807_vm8 = vcmp.ge.f32.partialorder %v791_v52, 0.0  ;;  %v823_v44 = vmul.f32 0.01, %v791_v52  ;;  %v838_v57 = vsel %vm806_vm6, %v790_v46, %v822_v51 }
 0x1f8   :  { %v841_v56 = vsel %vm809_vm7, %v793_v50, %v825_v55 }
 0x1f9   :  { %v839_v58 = vsel %vm807_vm8, %v791_v52, %v823_v44  ;;  %v853_v28 = vpack.c.bf16 %v841_v56, %v840_v22 }
 0x1fa   :  { %v852_v59 = vpack.c.bf16 %v839_v58, %v838_v57 }
 0x1fb   :  { %1451 = vst [vmem:[%s2126_s8 + $0x18] sm:$0xff] %v853_v28  }
 0x1fc   :  { %1450 = vst [vmem:[%s2126_s8 + $0x10] sm:$0xff] %v852_v59   ;;  %1616 = vmatprep.mubr.bf16.mxu1 %v852_v59 }
 0x1fd   :  { %1617 = vmatmul.mubr.bf16.gmra.mrb[36].mxu1 %v853_v28 }
 0x1ff   :  { %v1590_v0 = vpop.f32.mrb[24].mxu1 }
 0x200   :  { %v732_v53 = vadd.f32 %v1590_v0, %v1974_v2  ;;  %v723_v18 = vpop.f32.mrb[25].mxu1 }
 0x201   :  { %v724_v49 = vadd.f32 %v1974_v2, %v723_v18  ;;  %v1591_v4 = vpop.f32.mrb[26].mxu1 }
 0x202   :  { %v796_v7 = vadd.f32 %v1392_v62, %v732_v53  ;;  %v735_v8 = vadd.f32 %v1591_v4, %v1974_v2  ;;  %v726_v54 = vpop.f32.mrb[27].mxu1 }
 0x203   :  { %v794_v10 = vadd.f32 %v1388_v1, %v724_v49  ;;  %v727_v11 = vadd.f32 %v1974_v2, %v726_v54 }
 0x204   :  { %v828_v12 = vmul.f32 0.01, %v796_v7  ;;  %v797_v13 = vadd.f32 %v1393_v24, %v735_v8  ;;  %vm812_vm9 = vcmp.ge.f32.partialorder %v796_v7, 0.0 }
 0x205   :  { %v826_v14 = vmul.f32 0.01, %v794_v10  ;;  %v795_v15 = vadd.f32 %v1389_v6, %v727_v11  ;;  %vm810_vm10 = vcmp.ge.f32.partialorder %v794_v10, 0.0 }
 0x206   :  { %vm813_vm11 = vcmp.ge.f32.partialorder %v797_v13, 0.0  ;;  %v829_v16 = vmul.f32 0.01, %v797_v13  ;;  %v844_v19 = vsel %vm812_vm9, %v796_v7, %v828_v12 }
 0x207   :  { %vm811_vm12 = vcmp.ge.f32.partialorder %v795_v15, 0.0  ;;  %v827_v17 = vmul.f32 0.01, %v795_v15  ;;  %v842_v21 = vsel %vm810_vm10, %v794_v10, %v826_v14 }
 0x208   :  { %v845_v20 = vsel %vm813_vm11, %v797_v13, %v829_v16 }
 0x209   :  { %v843_v23 = vsel %vm811_vm12, %v795_v15, %v827_v17  ;;  %v855_v3 = vpack.c.bf16 %v845_v20, %v844_v19 }
 0x20a   :  { %v854_v25 = vpack.c.bf16 %v843_v23, %v842_v21 }
 0x20b   :  { %1453 = vst [vmem:[%s2126_s8 + $0x28] sm:$0xff] %v855_v3  }
 0x20c   :  { %1452 = vst [vmem:[%s2126_s8 + $0x20] sm:$0xff] %v854_v25   ;;  %1620 = vmatprep.mubr.bf16.mxu1 %v854_v25 }
 0x20d   :  { %1621 = vmatmul.mubr.bf16.gmra.mrb[40].mxu1 %v855_v3 }
 0x20f   :  { %v1594_v9 = vpop.f32.mrb[28].mxu1 }
 0x210   :  { %v748_v31 = vadd.f32 %v1594_v9, %v1974_v2  ;;  %v739_v32 = vpop.f32.mrb[29].mxu1 }
 0x211   :  { %v740_v34 = vadd.f32 %v1974_v2, %v739_v32  ;;  %v1595_v35 = vpop.f32.mrb[30].mxu1 }
 0x212   :  { %v800_v37 = vadd.f32 %v1400_v29, %v748_v31  ;;  %v751_v38 = vadd.f32 %v1595_v35, %v1974_v2  ;;  %v742_v39 = vpop.f32.mrb[31].mxu1 }
 0x213   :  { %v798_v63 = vadd.f32 %v1396_v30, %v740_v34  ;;  %v743_v40 = vadd.f32 %v1974_v2, %v742_v39  ;;  %v2037_v2 = vld [vmem:[%s2127_s7] ss:$0 sm:$0xff] }
 0x214   :  { %v832_v41 = vmul.f32 0.01, %v800_v37  ;;  %v801_v42 = vadd.f32 %v1401_v33, %v751_v38  ;;  %vm816_vm13 = vcmp.ge.f32.partialorder %v800_v37, 0.0 }
 0x215   :  { %v830_v5 = vmul.f32 0.01, %v798_v63  ;;  %v799_v43 = vadd.f32 %v1397_v36, %v743_v40  ;;  %vm814_vm14 = vcmp.ge.f32.partialorder %v798_v63, 0.0 }
 0x216   :  { %vm817_vm15 = vcmp.ge.f32.partialorder %v801_v42, 0.0  ;;  %v833_v45 = vmul.f32 0.01, %v801_v42  ;;  %v848_v47 = vsel %vm816_vm13, %v800_v37, %v832_v41 }
 0x217   :  { %vm815_vm1 = vcmp.ge.f32.partialorder %v799_v43, 0.0  ;;  %v831_v46 = vmul.f32 0.01, %v799_v43  ;;  %v846_v50 = vsel %vm814_vm14, %v798_v63, %v830_v5 }
 0x218   :  { %v849_v48 = vsel %vm817_vm15, %v801_v42, %v833_v45 }
 0x219   :  { %v847_v51 = vsel %vm815_vm1, %v799_v43, %v831_v46  ;;  %v857_v52 = vpack.c.bf16 %v849_v48, %v848_v47 }
 0x21a   :  { %v856_v55 = vpack.c.bf16 %v847_v51, %v846_v50 }
 0x21b   :  { %1455 = vst [vmem:[%s2126_s8 + $0x38] sm:$0xff] %v857_v52  }
 0x21c   :  { %1454 = vst [vmem:[%s2126_s8 + $0x30] sm:$0xff] %v856_v55   ;;  %1624 = vmatprep.mubr.bf16.mxu1 %v856_v55 }
 0x21d   :  { %1625 = vmatmul.mubr.bf16.gmra.mrb[44].mxu1 %v857_v52 }
 0x2c0   :  { %v1614_v44 = vpop.f32.mrb[32].mxu1 }
 0x2c1   :  { %v1044_v22 = vadd.f32 %v1614_v44, %v2037_v2  ;;  %v1035_v56 = vpop.f32.mrb[33].mxu1 }
 0x2c2   :  { %v1036_v57 = vadd.f32 %v2037_v2, %v1035_v56  ;;  %v1615_v58 = vpop.f32.mrb[34].mxu1 }
 0x2c3   :  { %vm1100_vm0 = vcmp.ge.f32.partialorder %v1044_v22, 0.0  ;;  %v1116_v28 = vmul.f32 0.01, %v1044_v22  ;;  %v1047_v59 = vadd.f32 %v1615_v58, %v2037_v2  ;;  %v1038_v60 = vpop.f32.mrb[35].mxu1 }
 0x2c4   :  { %vm1098_vm2 = vcmp.ge.f32.partialorder %v1036_v57, 0.0  ;;  %v1114_v61 = vmul.f32 0.01, %v1036_v57  ;;  %v1039_v62 = vadd.f32 %v2037_v2, %v1038_v60 }
 0x2c5   :  { %v1132_v0 = vsel %vm1100_vm0, %v1044_v22, %v1116_v28  ;;  %vm1101_vm4 = vcmp.ge.f32.partialorder %v1047_v59, 0.0  ;;  %v1117_v1 = vmul.f32 0.01, %v1047_v59 }
 0x2c6   :  { %v1356_v53 = vpack.c.bf16 %v1132_v0, %v1132_v0  ;;  %v1130_v18 = vsel %vm1098_vm2, %v1036_v57, %v1114_v61  ;;  %vm1099_vm5 = vcmp.ge.f32.partialorder %v1039_v62, 0.0  ;;  %v1115_v24 = vmul.f32 0.01, %v1039_v62 }
 0x2c7   :  { %v1354_v49 = vpack.c.bf16 %v1130_v18, %v1130_v18  ;;  %v1133_v4 = vsel %vm1101_vm4, %v1047_v59, %v1117_v1 }
 0x2c8   :  { %1213 = vst.msk [vmem:[%s2128_s9 + $0x8] sm:$0xf] %vm1210_vm3, %v1356_v53  ;;  %v1357_v6 = vpack.c.bf16 %v1133_v4, %v1133_v4  ;;  %v1131_v7 = vsel %vm1099_vm5, %v1039_v62, %v1115_v24 }
 0x2c9   :  { %1211 = vst.msk [vmem:[%s2128_s9] sm:$0xf] %vm1210_vm3, %v1354_v49  ;;  %v1355_v8 = vpack.c.bf16 %v1131_v7, %v1131_v7 }
 0x2ca   :  { %1214 = vst.msk [vmem:[%s2128_s9 + $0xc] sm:$0xf] %vm1210_vm3, %v1357_v6 }
 0x2cb   :  { %1212 = vst.msk [vmem:[%s2128_s9 + $0x4] sm:$0xf] %vm1210_vm3, %v1355_v8 }
 0x2d0   :  { %v1618_v54 = vpop.f32.mrb[36].mxu1 }
 0x2d1   :  { %v1060_v10 = vadd.f32 %v1618_v54, %v2037_v2  ;;  %v1051_v11 = vpop.f32.mrb[37].mxu1 }
 0x2d2   :  { %v1052_v12 = vadd.f32 %v2037_v2, %v1051_v11  ;;  %v1619_v13 = vpop.f32.mrb[38].mxu1 }
 0x2d3   :  { %vm1104_vm6 = vcmp.ge.f32.partialorder %v1060_v10, 0.0  ;;  %v1120_v14 = vmul.f32 0.01, %v1060_v10  ;;  %v1063_v15 = vadd.f32 %v1619_v13, %v2037_v2  ;;  %v1054_v16 = vpop.f32.mrb[39].mxu1 }
 0x2d4   :  { %vm1102_vm7 = vcmp.ge.f32.partialorder %v1052_v12, 0.0  ;;  %v1118_v17 = vmul.f32 0.01, %v1052_v12  ;;  %v1055_v19 = vadd.f32 %v2037_v2, %v1054_v16 }
 0x2d5   :  { %v1136_v20 = vsel %vm1104_vm6, %v1060_v10, %v1120_v14  ;;  %vm1105_vm8 = vcmp.ge.f32.partialorder %v1063_v15, 0.0  ;;  %v1121_v21 = vmul.f32 0.01, %v1063_v15 }
 0x2d6   :  { %v1360_v23 = vpack.c.bf16 %v1136_v20, %v1136_v20  ;;  %v1134_v3 = vsel %vm1102_vm7, %v1052_v12, %v1118_v17  ;;  %vm1103_vm9 = vcmp.ge.f32.partialorder %v1055_v19, 0.0  ;;  %v1119_v25 = vmul.f32 0.01, %v1055_v19 }
 0x2d7   :  { %v1358_v26 = vpack.c.bf16 %v1134_v3, %v1134_v3  ;;  %v1137_v27 = vsel %vm1105_vm8, %v1063_v15, %v1121_v21 }
 0x2d8   :  { %1217 = vst.msk [vmem:[%s2128_s9 + $0x18] sm:$0xf] %vm1210_vm3, %v1360_v23  ;;  %v1361_v29 = vpack.c.bf16 %v1137_v27, %v1137_v27  ;;  %v1135_v9 = vsel %vm1103_vm9, %v1055_v19, %v1119_v25 }
 0x2d9   :  { %1215 = vst.msk [vmem:[%s2128_s9 + $0x10] sm:$0xf] %vm1210_vm3, %v1358_v26  ;;  %v1359_v30 = vpack.c.bf16 %v1135_v9, %v1135_v9 }
 0x2da   :  { %1218 = vst.msk [vmem:[%s2128_s9 + $0x1c] sm:$0xf] %vm1210_vm3, %v1361_v29 }
 0x2db   :  { %1216 = vst.msk [vmem:[%s2128_s9 + $0x14] sm:$0xf] %vm1210_vm3, %v1359_v30 }
 0x2e0   :  { %v1622_v31 = vpop.f32.mrb[40].mxu1 }
 0x2e1   :  { %v1076_v32 = vadd.f32 %v1622_v31, %v2037_v2  ;;  %v1067_v33 = vpop.f32.mrb[41].mxu1 }
 0x2e2   :  { %v1068_v34 = vadd.f32 %v2037_v2, %v1067_v33  ;;  %v1623_v35 = vpop.f32.mrb[42].mxu1 }
 0x2e3   :  { %vm1108_vm10 = vcmp.ge.f32.partialorder %v1076_v32, 0.0  ;;  %v1124_v36 = vmul.f32 0.01, %v1076_v32  ;;  %v1079_v37 = vadd.f32 %v1623_v35, %v2037_v2  ;;  %v1070_v38 = vpop.f32.mrb[43].mxu1 }
 0x2e4   :  { %vm1106_vm11 = vcmp.ge.f32.partialorder %v1068_v34, 0.0  ;;  %v1122_v39 = vmul.f32 0.01, %v1068_v34  ;;  %v1071_v63 = vadd.f32 %v2037_v2, %v1070_v38 }
 0x2e5   :  { %v1140_v40 = vsel %vm1108_vm10, %v1076_v32, %v1124_v36  ;;  %vm1109_vm12 = vcmp.ge.f32.partialorder %v1079_v37, 0.0  ;;  %v1125_v41 = vmul.f32 0.01, %v1079_v37 }
 0x2e6   :  { %v1364_v42 = vpack.c.bf16 %v1140_v40, %v1140_v40  ;;  %v1138_v5 = vsel %vm1106_vm11, %v1068_v34, %v1122_v39  ;;  %vm1107_vm13 = vcmp.ge.f32.partialorder %v1071_v63, 0.0  ;;  %v1123_v43 = vmul.f32 0.01, %v1071_v63 }
 0x2e7   :  { %v1362_v45 = vpack.c.bf16 %v1138_v5, %v1138_v5  ;;  %v1141_v46 = vsel %vm1109_vm12, %v1079_v37, %v1125_v41 }
 0x2e8   :  { %1221 = vst.msk [vmem:[%s2128_s9 + $0x28] sm:$0xf] %vm1210_vm3, %v1364_v42  ;;  %v1365_v47 = vpack.c.bf16 %v1141_v46, %v1141_v46  ;;  %v1139_v48 = vsel %vm1107_vm13, %v1071_v63, %v1123_v43 }
 0x2e9   :  { %1219 = vst.msk [vmem:[%s2128_s9 + $0x20] sm:$0xf] %vm1210_vm3, %v1362_v45  ;;  %v1363_v50 = vpack.c.bf16 %v1139_v48, %v1139_v48 }
 0x2ea   :  { %1222 = vst.msk [vmem:[%s2128_s9 + $0x2c] sm:$0xf] %vm1210_vm3, %v1365_v47 }
 0x2eb   :  { %1220 = vst.msk [vmem:[%s2128_s9 + $0x24] sm:$0xf] %vm1210_vm3, %v1363_v50 }
 0x2f0   :  { %v1626_v51 = vpop.f32.mrb[44].mxu1 }
 0x2f1   :  { %v1092_v52 = vadd.f32 %v1626_v51, %v2037_v2  ;;  %v1083_v55 = vpop.f32.mrb[45].mxu1 }
 0x2f2   :  { %v1084_v44 = vadd.f32 %v2037_v2, %v1083_v55  ;;  %v1627_v22 = vpop.f32.mrb[46].mxu1 }
 0x2f3   :  { %vm1112_vm14 = vcmp.ge.f32.partialorder %v1092_v52, 0.0  ;;  %v1128_v56 = vmul.f32 0.01, %v1092_v52  ;;  %v1095_v57 = vadd.f32 %v1627_v22, %v2037_v2  ;;  %v1086_v58 = vpop.f32.mrb[47].mxu1 }
 0x2f4   :  { %vm1110_vm15 = vcmp.ge.f32.partialorder %v1084_v44, 0.0  ;;  %v1126_v28 = vmul.f32 0.01, %v1084_v44  ;;  %v1087_v59 = vadd.f32 %v2037_v2, %v1086_v58 }
 0x2f5   :  { %v1144_v60 = vsel %vm1112_vm14, %v1092_v52, %v1128_v56  ;;  %vm1113_vm1 = vcmp.ge.f32.partialorder %v1095_v57, 0.0  ;;  %v1129_v61 = vmul.f32 0.01, %v1095_v57 }
 0x2f6   :  { %v1368_v62 = vpack.c.bf16 %v1144_v60, %v1144_v60  ;;  %v1142_v0 = vsel %vm1110_vm15, %v1084_v44, %v1126_v28  ;;  %vm1111_vm0 = vcmp.ge.f32.partialorder %v1087_v59, 0.0  ;;  %v1127_v1 = vmul.f32 0.01, %v1087_v59 }
 0x2f7   :  { %v1366_v53 = vpack.c.bf16 %v1142_v0, %v1142_v0  ;;  %v1145_v18 = vsel %vm1113_vm1, %v1095_v57, %v1129_v61 }
 0x2f8   :  { %1225 = vst.msk [vmem:[%s2128_s9 + $0x38] sm:$0xf] %vm1210_vm3, %v1368_v62  ;;  %v1369_v24 = vpack.c.bf16 %v1145_v18, %v1145_v18  ;;  %v1143_v49 = vsel %vm1111_vm0, %v1087_v59, %v1127_v1 }
 0x2f9   :  { %1223 = vst.msk [vmem:[%s2128_s9 + $0x30] sm:$0xf] %vm1210_vm3, %v1366_v53  ;;  %v1367_v2 = vpack.c.bf16 %v1143_v49, %v1143_v49 }
 0x2fa   :  { %1226 = vst.msk [vmem:[%s2128_s9 + $0x3c] sm:$0xf] %vm1210_vm3, %v1369_v24 }
 0x2fb   :  { %1224 = vst.msk [vmem:[%s2128_s9 + $0x34] sm:$0xf] %vm1210_vm3, %v1367_v2 }

// kernel: resnet_forward.21
= control target key start
LH: loop header
LB: loop body
LE: loop exit
PB: predicated region body
PF: predicated region fallthrough
CT: control target
= control target key end

     0   :  { %vm335_vm0 = vcmask 261120   ;;  %s2119_s2 = inlined_call_operand.vmem [shape: bf16[288,32], index: 2, kind: input, shape index: {}]   ;;  %s2120_s0 = inlined_call_operand.vmem [shape: bf16[128,288], index: 0, kind: input, shape index: {}]   ;;  %s2121_s4 = inlined_call_operand.vmem [shape: bf16[32,128], index: 4, kind: input, shape index: {}]   ;;  %s2122_s6 = inlined_call_operand.vmem [shape: bf16[128,64], index: 6, kind: input, shape index: {}]   ;;  %s2123_s3 = inlined_call_operand.vmem [shape: f32[1,32], index: 3, kind: input, shape index: {}]   ;;  %s2124_s1 = inlined_call_operand.vmem [shape: bf16[128,128], index: 1, kind: input, shape index: {}]   ;;  %s2125_s5 = inlined_call_operand.vmem [shape: f32[1,128], index: 5, kind: input, shape index: {}]   ;;  %s2126_s8 = inlined_call_operand.vmem [shape: bf16[128,128], index: 8, kind: output, shape index: {0}]   ;;  %s2127_s7 = inlined_call_operand.vmem [shape: f32[1,64], index: 7, kind: input, shape index: {}]   ;;  %s2128_s9 = inlined_call_operand.vmem [shape: bf16[128,64], index: 9, kind: output, shape index: {1}]  }
   0x1   :  { %v1628_v0 = vld [vmem:[%s2119_s2 + $0x40] sm:$0xff]   ;;  %v1630_v2 = vld [vmem:[%s2119_s2 + $0x48] sm:$0xff]   ;;  %v1632_v4 = vld [vmem:[%s2119_s2 + $0x50] sm:$0xff]  }
   0x2   :  { %v1629_v1 = vld [vmem:[%s2119_s2] sm:$0xff]   ;;  %1456 = vmatprep.subr.bf16.mxu0 %v1628_v0  ;;  %v1631_v3 = vld [vmem:[%s2119_s2 + $0x8] sm:$0xff]   ;;  %v1633_v5 = vld [vmem:[%s2119_s2 + $0x10] sm:$0xff]  }
   0x3   :  { %1457 = vmatpush3.bf16.msra.mxu0 %v1629_v1  ;;  %v1634_v6 = vld [vmem:[%s2119_s2 + $0x58] sm:$0xff]   ;;  %v1636_v8 = vld [vmem:[%s2119_s2 + $0x60] sm:$0xff]   ;;  %v1638_v11 = vld [vmem:[%s2119_s2 + $0x68] sm:$0xff]  }
   0x4   :  { %1458 = vmatprep.subr.bf16.mxu0 %v1630_v2  ;;  %v1635_v7 = vld [vmem:[%s2119_s2 + $0x18] sm:$0xff]   ;;  %v1637_v9 = vld [vmem:[%s2119_s2 + $0x20] sm:$0xff]   ;;  %v1639_v12 = vld [vmem:[%s2119_s2 + $0x28] sm:$0xff]  }
   0x5   :  { %v1643_v10 = vld [vmem:[%s2119_s2 + $0x80] sm:$0xff]   ;;  %v1640_v13 = vld [vmem:[%s2119_s2 + $0x70] sm:$0xff]   ;;  %v1648_v15 = vld [vmem:[%s2119_s2 + $0x88] sm:$0xff]  }
   0x6   :  { %1556 = vmatprep.subr.bf16.mxu1 %v1643_v10  ;;  %v1647_v14 = vld [vmem:[%s2120_s0 + $0x4] ss:$12 sps:$4 sm:$0xff]   ;;  %v1649_v16 = vld [vmem:[%s2120_s0 + $0x8] ss:$12 sps:$4 sm:$0xff]   ;;  %v1650_v17 = vld [vmem:[%s2120_s0 + $0x20] ss:$12 sps:$4 sm:$0xff]  }
   0x7   :  { %1459 = vmatpush3.bf16.msra.mxu0 %v1631_v3  ;;  %1557 = vmatpush3.bf16.msra.mxu1 %v1643_v10  ;;  %v1641_v18 = vld [vmem:[%s2119_s2 + $0x30] sm:$0xff]   ;;  %v1642_v19 = vld [vmem:[%s2119_s2 + $0x78] sm:$0xff]   ;;  %v1645_v22 = vld [vmem:[%s2120_s0] ss:$12 sps:$4 sm:$0xff]  }
   0x8   :  { %1460 = vmatprep.subr.bf16.mxu0 %v1632_v4  ;;  %392 = vmatprep.mubr.bf16.mxu0 %v1647_v14  ;;  %v1657_v20 = vld [vmem:[%s2120_s0 + $0x38] ss:$12 sps:$4 sm:$0xff]   ;;  %v1658_v23 = vld [vmem:[%s2120_s0 + $0x50] ss:$12 sps:$4 sm:$0xff]   ;;  %v1665_v24 = vld [vmem:[%s2120_s0 + $0x68] ss:$12 sps:$4 sm:$0xff]  }
   0x9   :  { %1558 = vmatprep.subr.bf16.mxu1 %v1648_v15  ;;  %1560 = vmatprep.mubr.msk.bf16.mxu1 %vm335_vm0, %v1649_v16  ;;  %v1644_v21 = vld [vmem:[%s2119_s2 + $0x38] sm:$0xff]   ;;  %v1666_v26 = vld [vmem:[%s2120_s0 + $0x80] ss:$12 sps:$4 sm:$0xff]   ;;  %v1661_v33 = vld [vmem:[%s2120_s0 + $0x48] ss:$12 sps:$4 sm:$0xff]  }
   0xa   :  { %v1651_v25 = vld [vmem:[%s2120_s0 + $0x1c] ss:$12 sps:$4 sm:$0xff]   ;;  %v1653_v27 = vld [vmem:[%s2120_s0 + $0x18] ss:$12 sps:$4 sm:$0xff]   ;;  %v1654_v29 = vld [vmem:[%s2120_s0 + $0x34] ss:$12 sps:$4 sm:$0xff]  }
   0xb   :  { %1461 = vmatpush3.bf16.msra.mxu0 %v1633_v5  ;;  %1559 = vmatpush3.bf16.msra.mxu1 %v1648_v15  ;;  %v1673_v28 = vld [vmem:[%s2120_s0 + $0x98] ss:$12 sps:$4 sm:$0xff]   ;;  %v1674_v30 = vld [vmem:[%s2120_s0 + $0xb0] ss:$12 sps:$4 sm:$0xff]   ;;  %v1664_v35 = vld [vmem:[%s2120_s0 + $0x60] ss:$12 sps:$4 sm:$0xff]  }
   0xc   :  { %1462 = vmatprep.subr.bf16.mxu0 %v1634_v6  ;;  %v1656_v31 = vld [vmem:[%s2120_s0 + $0x30] ss:$12 sps:$4 sm:$0xff]   ;;  %v1659_v32 = vld [vmem:[%s2120_s0 + $0x4c] ss:$12 sps:$4 sm:$0xff]   ;;  %v1670_v38 = vld [vmem:[%s2120_s0 + $0x94] ss:$12 sps:$4 sm:$0xff]  }
   0xd   :  { %v1662_v34 = vld [vmem:[%s2120_s0 + $0x64] ss:$12 sps:$4 sm:$0xff]   ;;  %v1667_v36 = vld [vmem:[%s2120_s0 + $0x7c] ss:$12 sps:$4 sm:$0xff]   ;;  %v1675_v40 = vld [vmem:[%s2120_s0 + $0xac] ss:$12 sps:$4 sm:$0xff]  }
   0xe   :  { %1561 = vmatmul.mubr.msk.bf16.vlgmr.msra.gmra.mrb[0].mxu1 %vm335_vm0, %v1650_v17  ;;  %v1669_v37 = vld [vmem:[%s2120_s0 + $0x78] ss:$12 sps:$4 sm:$0xff]   ;;  %v1672_v39 = vld [vmem:[%s2120_s0 + $0x90] ss:$12 sps:$4 sm:$0xff]   ;;  %v1677_v41 = vld [vmem:[%s2120_s0 + $0xa8] ss:$12 sps:$4 sm:$0xff]  }
   0xf   :  { %1463 = vmatpush3.bf16.msra.mxu0 %v1635_v7  ;;  %1564 = vmatprep.mubr.msk.bf16.mxu1 %vm335_vm0, %v1657_v20  ;;  %v1678_v42 = vld [vmem:[%s2121_s4] sm:$0xff]   ;;  %v1679_v43 = vld [vmem:[%s2121_s4 + $0x8] sm:$0xff]  }
  0x10   :  { %1464 = vmatprep.subr.bf16.mxu0 %v1636_v8  ;;  %1576 = vmatprep.subr.bf16.mxu1 %v1678_v42  ;;  %v1881_v44 = vld [vmem:[%s2122_s6] sm:$0xff]  }
  0x11   :  { %1577 = vmatpush3.bf16.msra.mxu1 %v1678_v42  ;;  %v1889_v53 = vld [vmem:[%s2123_s3] ss:$0 sm:$0xff]  ;;  %v1682_v42 = vld [vmem:[%s2122_s6 + $0x10] sm:$0xff]  }
  0x12   :  { %1578 = vmatprep.subr.bf16.mxu1 %v1679_v43 }
  0x13   :  { %1465 = vmatpush3.bf16.msra.mxu0 %v1637_v9 }
  0x14   :  { %1466 = vmatprep.subr.bf16.mxu0 %v1638_v11 }
  0x15   :  { %1579 = vmatpush3.bf16.msra.mxu1 %v1679_v43 }
  0x16   :  { %1565 = vmatmul.mubr.msk.bf16.gmra.mrb[4].mxu1 %vm335_vm0, %v1658_v23  ;;  %1596 = vmatprep.subr.bf16.mxu1 %v1881_v44 }
  0x17   :  { %1467 = vmatpush3.bf16.msra.mxu0 %v1639_v12  ;;  %1568 = vmatprep.mubr.msk.bf16.mxu1 %vm335_vm0, %v1665_v24 }
  0x18   :  { %1468 = vmatprep.subr.bf16.mxu0 %v1640_v13 }
  0x1b   :  { %1469 = vmatpush3.bf16.msra.mxu0 %v1641_v18 }
  0x1c   :  { %1470 = vmatprep.subr.bf16.mxu0 %v1642_v19 }
  0x1e   :  { %1569 = vmatmul.mubr.msk.bf16.gmra.mrb[8].mxu1 %vm335_vm0, %v1666_v26 }
  0x1f   :  { %1471 = vmatpush3.bf16.msra.mxu0 %v1644_v21  ;;  %1572 = vmatprep.mubr.msk.bf16.mxu1 %vm335_vm0, %v1673_v28 }
  0x22   :  { %393 = vmatmul.mubr.bf16.vlgmr.msra.gmra.mrb[0].mxu0 %v1645_v22 }
  0x23   :  { %400 = vmatprep.mubr.bf16.mxu0 %v1651_v25 }
  0x26   :  { %1573 = vmatmul.mubr.msk.bf16.gmra.mrb[12].mxu1 %vm335_vm0, %v1674_v30 }
  0x2a   :  { %401 = vmatmul.mubr.bf16.gmra.mrb[4].mxu0 %v1653_v27 }
  0x2b   :  { %408 = vmatprep.mubr.bf16.mxu0 %v1654_v29 }
  0x32   :  { %409 = vmatmul.mubr.bf16.gmra.mrb[8].mxu0 %v1656_v31 }
  0x33   :  { %416 = vmatprep.mubr.bf16.mxu0 %v1659_v32 }
  0x3a   :  { %417 = vmatmul.mubr.bf16.gmra.mrb[12].mxu0 %v1661_v33 }
  0x3b   :  { %424 = vmatprep.mubr.bf16.mxu0 %v1662_v34 }
  0x42   :  { %425 = vmatmul.mubr.bf16.gmra.mrb[16].mxu0 %v1664_v35  ;;  %v1681_v35 = vld [vmem:[%s2122_s6 + $0x8] sm:$0xff]  }
  0x43   :  { %432 = vmatprep.mubr.bf16.mxu0 %v1667_v36 }
  0x4a   :  { %433 = vmatmul.mubr.bf16.gmra.mrb[20].mxu0 %v1669_v37 }
  0x4b   :  { %440 = vmatprep.mubr.bf16.mxu0 %v1670_v38 }
  0x52   :  { %441 = vmatmul.mubr.bf16.gmra.mrb[24].mxu0 %v1672_v39 }
  0x53   :  { %448 = vmatprep.mubr.bf16.mxu0 %v1675_v40 }
  0x5a   :  { %449 = vmatmul.mubr.bf16.gmra.mrb[28].mxu0 %v1677_v41 }
  0xe1   :  { %v1562_v45 = vpop.f32.mrb[0].mxu1 }
  0xe2   :  { %v491_v46 = vpop.f32.mrb[1].mxu1 }
  0xe3   :  { %v1563_v47 = vpop.f32.mrb[2].mxu1 }
  0xe4   :  { %v494_v48 = vpop.f32.mrb[3].mxu1 }
  0xe9   :  { %v1884_v49 = vpop.f32.mrb[4].mxu1 }
  0xea   :  { %v507_v51 = vpop.f32.mrb[5].mxu1 }
  0xeb   :  { %v1891_v54 = vpop.f32.mrb[6].mxu1 }
  0xec   :  { %v510_v57 = vpop.f32.mrb[7].mxu1 }
  0xf1   :  { %v1895_v63 = vpop.f32.mrb[8].mxu1 }
  0xf2   :  { %v1897_v3 = vpop.f32.mrb[9].mxu1 }
  0xf3   :  { %v1899_v5 = vpop.f32.mrb[10].mxu1 }
  0xf4   :  { %v1901_v9 = vpop.f32.mrb[11].mxu1 }
  0xf5   :  { %v1472_v50 = vpop.f32.mrb[0].mxu0 }
  0xf6   :  { %v1473_v52 = vpop.f32.mrb[1].mxu0 }
  0xf7   :  { %v1474_v55 = vadd.f32 %v1473_v52, %v1472_v50  ;;  %v1475_v56 = vpop.f32.mrb[2].mxu0 }
  0xf8   :  { %v1476_v58 = vpop.f32.mrb[3].mxu0 }
  0xf9   :  { %v1477_v59 = vadd.f32 %v1476_v58, %v1475_v56  ;;  %v395_v60 = vadd.f32 %v1474_v55, %v1889_v53  ;;  %v1906_v18 = vpop.f32.mrb[12].mxu1 }
  0xfa   :  { %v1908_v22 = vpop.f32.mrb[13].mxu1 }
  0xfb   :  { %v492_v61 = vadd.f32 %v491_v46, %v395_v60  ;;  %v398_v62 = vadd.f32 %v1477_v59, %v1889_v53  ;;  %v1910_v24 = vpop.f32.mrb[14].mxu1 }
  0xfc   :  { %v1912_v28 = vpop.f32.mrb[15].mxu1 }
  0xfd   :  { %v570_v0 = vmul.f32 0.01, %v492_v61  ;;  %v495_v1 = vadd.f32 %v494_v48, %v398_v62  ;;  %v1478_v2 = vpop.f32.mrb[4].mxu0  ;;  %vm554_vm1 = vcmp.ge.f32.partialorder %v492_v61, 0.0  ;;  %v1684_v62 = vld [vmem:[%s2122_s6 + $0x20] sm:$0xff]  }
  0xfe   :  { %v1479_v4 = vpop.f32.mrb[5].mxu0 }
  0xff   :  { %vm555_vm2 = vcmp.ge.f32.partialorder %v495_v1, 0.0  ;;  %v571_v6 = vmul.f32 0.01, %v495_v1  ;;  %v1480_v7 = vadd.f32 %v1479_v4, %v1478_v2  ;;  %v1481_v8 = vpop.f32.mrb[6].mxu0  ;;  %v586_v11 = vsel %vm554_vm1, %v492_v61, %v570_v0 }
 0x100   :  { %v1482_v10 = vpop.f32.mrb[7].mxu0 }
 0x101   :  { %v587_v12 = vsel %vm555_vm2, %v495_v1, %v571_v6  ;;  %v403_v13 = vadd.f32 %v1480_v7, %v1889_v53  ;;  %v1483_v14 = vadd.f32 %v1482_v10, %v1481_v8 }
 0x102   :  { %v602_v15 = vpack.c.bf16 %v587_v12, %v586_v11 }
 0x103   :  { %v500_v16 = vadd.f32 %v1562_v45, %v403_v13  ;;  %v406_v17 = vadd.f32 %v1483_v14, %v1889_v53 }
 0x104   :  { %1580 = vmatprep.mubr.msk.bf16.mxu1 %vm335_vm0, %v602_v15 }
 0x105   :  { %v572_v19 = vmul.f32 0.01, %v500_v16  ;;  %v503_v20 = vadd.f32 %v1563_v47, %v406_v17  ;;  %v1484_v21 = vpop.f32.mrb[8].mxu0  ;;  %vm556_vm3 = vcmp.ge.f32.partialorder %v500_v16, 0.0 }
 0x106   :  { %v1485_v23 = vpop.f32.mrb[9].mxu0 }
 0x107   :  { %vm557_vm4 = vcmp.ge.f32.partialorder %v503_v20, 0.0  ;;  %v573_v25 = vmul.f32 0.01, %v503_v20  ;;  %v1486_v26 = vadd.f32 %v1485_v23, %v1484_v21  ;;  %v1487_v27 = vpop.f32.mrb[10].mxu0  ;;  %v588_v30 = vsel %vm556_vm3, %v500_v16, %v572_v19 }
 0x108   :  { %v1488_v29 = vpop.f32.mrb[11].mxu0 }
 0x109   :  { %v589_v31 = vsel %vm557_vm4, %v503_v20, %v573_v25  ;;  %v1489_v32 = vadd.f32 %v1488_v29, %v1487_v27  ;;  %v411_v33 = vadd.f32 %v1486_v26, %v1889_v53 }
 0x10a   :  { %v603_v34 = vpack.c.bf16 %v589_v31, %v588_v30 }
 0x10b   :  { %v508_v36 = vadd.f32 %v507_v51, %v411_v33  ;;  %v414_v37 = vadd.f32 %v1489_v32, %v1889_v53 }
 0x10c   :  { %1581 = vmatmul.mubr.msk.bf16.vlgmr.msra.gmra.mrb[16].mxu1 %vm335_vm0, %v603_v34 }
 0x10d   :  { %v574_v38 = vmul.f32 0.01, %v508_v36  ;;  %v511_v39 = vadd.f32 %v510_v57, %v414_v37  ;;  %v1490_v40 = vpop.f32.mrb[12].mxu0  ;;  %1597 = vmatpush3.bf16.msra.mxu1 %v1881_v44  ;;  %vm558_vm5 = vcmp.ge.f32.partialorder %v508_v36, 0.0  ;;  %v1683_v44 = vld [vmem:[%s2122_s6 + $0x18] sm:$0xff]  }
 0x10e   :  { %v1491_v41 = vpop.f32.mrb[13].mxu0  ;;  %1598 = vmatprep.subr.bf16.mxu1 %v1681_v35 }
 0x10f   :  { %vm559_vm6 = vcmp.ge.f32.partialorder %v511_v39, 0.0  ;;  %v575_v43 = vmul.f32 0.01, %v511_v39  ;;  %v1492_v45 = vadd.f32 %v1491_v41, %v1490_v40  ;;  %v1493_v46 = vpop.f32.mrb[14].mxu0  ;;  %v590_v48 = vsel %vm558_vm5, %v508_v36, %v574_v38 }
 0x110   :  { %v1494_v47 = vpop.f32.mrb[15].mxu0 }
 0x111   :  { %v591_v50 = vsel %vm559_vm6, %v511_v39, %v575_v43  ;;  %v419_v51 = vadd.f32 %v1492_v45, %v1889_v53  ;;  %v1495_v52 = vadd.f32 %v1494_v47, %v1493_v46  ;;  %1599 = vmatpush3.bf16.msra.mxu1 %v1681_v35 }
 0x112   :  { %v604_v55 = vpack.c.bf16 %v591_v50, %v590_v48  ;;  %1600 = vmatprep.subr.bf16.mxu1 %v1682_v42 }
 0x113   :  { %v516_v56 = vadd.f32 %v1884_v49, %v419_v51  ;;  %v422_v57 = vadd.f32 %v1495_v52, %v1889_v53 }
 0x114   :  { %1584 = vmatprep.mubr.msk.bf16.mxu1 %vm335_vm0, %v604_v55 }
 0x115   :  { %v576_v58 = vmul.f32 0.01, %v516_v56  ;;  %v519_v59 = vadd.f32 %v1891_v54, %v422_v57  ;;  %v1496_v60 = vpop.f32.mrb[16].mxu0  ;;  %1601 = vmatpush3.bf16.msra.mxu1 %v1682_v42  ;;  %vm560_vm7 = vcmp.ge.f32.partialorder %v516_v56, 0.0 }
 0x116   :  { %v1497_v61 = vpop.f32.mrb[17].mxu0  ;;  %1602 = vmatprep.subr.bf16.mxu1 %v1683_v44 }
 0x117   :  { %vm561_vm8 = vcmp.ge.f32.partialorder %v519_v59, 0.0  ;;  %v577_v0 = vmul.f32 0.01, %v519_v59  ;;  %v1498_v1 = vadd.f32 %v1497_v61, %v1496_v60  ;;  %v1499_v49 = vpop.f32.mrb[18].mxu0  ;;  %v592_v7 = vsel %vm560_vm7, %v516_v56, %v576_v58 }
 0x118   :  { %v1500_v2 = vpop.f32.mrb[19].mxu0 }
 0x119   :  { %v1501_v4 = vadd.f32 %v1500_v2, %v1499_v49  ;;  %v427_v6 = vadd.f32 %v1498_v1, %v1889_v53  ;;  %v593_v8 = vsel %vm561_vm8, %v519_v59, %v577_v0  ;;  %1603 = vmatpush3.bf16.msra.mxu1 %v1683_v44  ;;  %v1685_v1 = vld [vmem:[%s2122_s6 + $0x28] sm:$0xff]   ;;  %v1371_v49 = vld [vmem:[%s2124_s1] sm:$0xff]  }
 0x11a   :  { %v605_v54 = vpack.c.bf16 %v593_v8, %v592_v7  ;;  %1604 = vmatprep.subr.bf16.mxu1 %v1684_v62  ;;  %v1974_v2 = vld [vmem:[%s2125_s5] ss:$0 sm:$0xff]  ;;  %v1372_v7 = vunpack.c.l.bf16 %v1371_v49 }
 0x11b   :  { %v524_v10 = vadd.f32 %v1897_v3, %v427_v6  ;;  %v430_v11 = vadd.f32 %v1501_v4, %v1889_v53 }
 0x11c   :  { %1585 = vmatmul.mubr.msk.bf16.gmra.mrb[20].mxu1 %vm335_vm0, %v605_v54 }
 0x11d   :  { %v578_v12 = vmul.f32 0.01, %v524_v10  ;;  %v527_v13 = vadd.f32 %v1901_v9, %v430_v11  ;;  %v1502_v14 = vpop.f32.mrb[20].mxu0  ;;  %1605 = vmatpush3.bf16.msra.mxu1 %v1684_v62  ;;  %vm562_vm9 = vcmp.ge.f32.partialorder %v524_v10, 0.0 }
 0x11e   :  { %v1503_v15 = vpop.f32.mrb[21].mxu0  ;;  %1606 = vmatprep.subr.bf16.mxu1 %v1685_v1 }
 0x11f   :  { %vm563_vm10 = vcmp.ge.f32.partialorder %v527_v13, 0.0  ;;  %v579_v16 = vmul.f32 0.01, %v527_v13  ;;  %v1504_v17 = vadd.f32 %v1503_v15, %v1502_v14  ;;  %v1505_v19 = vpop.f32.mrb[22].mxu0  ;;  %v594_v21 = vsel %vm562_vm9, %v524_v10, %v578_v12 }
 0x120   :  { %v1506_v20 = vpop.f32.mrb[23].mxu0 }
 0x121   :  { %v595_v23 = vsel %vm563_vm10, %v527_v13, %v579_v16  ;;  %v435_v3 = vadd.f32 %v1504_v17, %v1889_v53  ;;  %v1507_v25 = vadd.f32 %v1506_v20, %v1505_v19  ;;  %1607 = vmatpush3.bf16.msra.mxu1 %v1685_v1  ;;  %v1373_v13 = vunpack.c.h.bf16 %v1371_v49 }
 0x122   :  { %v606_v26 = vpack.c.bf16 %v595_v23, %v594_v21 }
 0x123   :  { %v532_v27 = vadd.f32 %v1895_v63, %v435_v3  ;;  %v438_v29 = vadd.f32 %v1507_v25, %v1889_v53 }
 0x124   :  { %1588 = vmatprep.mubr.msk.bf16.mxu1 %vm335_vm0, %v606_v26 }
 0x125   :  { %v580_v9 = vmul.f32 0.01, %v532_v27  ;;  %v535_v30 = vadd.f32 %v1899_v5, %v438_v29  ;;  %v1508_v31 = vpop.f32.mrb[24].mxu0  ;;  %vm564_vm11 = vcmp.ge.f32.partialorder %v532_v27, 0.0 }
 0x126   :  { %v1509_v32 = vpop.f32.mrb[25].mxu0 }
 0x127   :  { %vm565_vm12 = vcmp.ge.f32.partialorder %v535_v30, 0.0  ;;  %v581_v33 = vmul.f32 0.01, %v535_v30  ;;  %v1510_v34 = vadd.f32 %v1509_v32, %v1508_v31  ;;  %v1511_v35 = vpop.f32.mrb[26].mxu0  ;;  %v596_v39 = vsel %vm564_vm11, %v532_v27, %v580_v9 }
 0x128   :  { %v1512_v36 = vpop.f32.mrb[27].mxu0 }
 0x129   :  { %v1513_v37 = vadd.f32 %v1512_v36, %v1511_v35  ;;  %v443_v38 = vadd.f32 %v1510_v34, %v1889_v53  ;;  %v597_v63 = vsel %vm565_vm12, %v535_v30, %v581_v33  ;;  %v1444_v33 = vld [vmem:[%s2124_s1 + $0x18] sm:$0xff]   ;;  %v1443_v34 = vld [vmem:[%s2124_s1 + $0x10] sm:$0xff]  }
 0x12a   :  { %v607_v40 = vpack.c.bf16 %v597_v63, %v596_v39  ;;  %v1384_v35 = vunpack.c.l.bf16 %v1444_v33  ;;  %v1385_v63 = vunpack.c.h.bf16 %v1444_v33 }
 0x12b   :  { %v540_v41 = vadd.f32 %v1908_v22, %v443_v38  ;;  %v446_v42 = vadd.f32 %v1513_v37, %v1889_v53  ;;  %v1380_v37 = vunpack.c.l.bf16 %v1443_v34 }
 0x12c   :  { %1589 = vmatmul.mubr.msk.bf16.gmra.mrb[24].mxu1 %vm335_vm0, %v607_v40 }
 0x12d   :  { %v582_v5 = vmul.f32 0.01, %v540_v41  ;;  %v543_v43 = vadd.f32 %v1912_v28, %v446_v42  ;;  %v1514_v45 = vpop.f32.mrb[28].mxu0  ;;  %vm566_vm13 = vcmp.ge.f32.partialorder %v540_v41, 0.0  ;;  %v1381_v42 = vunpack.c.h.bf16 %v1443_v34 }
 0x12e   :  { %v1515_v46 = vpop.f32.mrb[29].mxu0 }
 0x12f   :  { %vm567_vm14 = vcmp.ge.f32.partialorder %v543_v43, 0.0  ;;  %v583_v47 = vmul.f32 0.01, %v543_v43  ;;  %v1516_v48 = vadd.f32 %v1515_v46, %v1514_v45  ;;  %v1517_v50 = vpop.f32.mrb[30].mxu0  ;;  %v598_v52 = vsel %vm566_vm13, %v540_v41, %v582_v5 }
 0x130   :  { %v1518_v51 = vpop.f32.mrb[31].mxu0 }
 0x131   :  { %v599_v55 = vsel %vm567_vm14, %v543_v43, %v583_v47  ;;  %v451_v44 = vadd.f32 %v1516_v48, %v1889_v53  ;;  %v1519_v22 = vadd.f32 %v1518_v51, %v1517_v50 }
 0x132   :  { %v608_v56 = vpack.c.bf16 %v599_v55, %v598_v52 }
 0x133   :  { %v548_v57 = vadd.f32 %v1906_v18, %v451_v44  ;;  %v454_v58 = vadd.f32 %v1519_v22, %v1889_v53  ;;  %v1686_v53 = vld [vmem:[%s2122_s6 + $0x30] sm:$0xff]   ;;  %v1687_v18 = vld [vmem:[%s2122_s6 + $0x38] sm:$0xff]  }
 0x134   :  { %1592 = vmatprep.mubr.msk.bf16.mxu1 %vm335_vm0, %v608_v56  ;;  %1608 = vmatprep.subr.bf16.mxu1 %v1686_v53 }
 0x135   :  { %v584_v28 = vmul.f32 0.01, %v548_v57  ;;  %v551_v59 = vadd.f32 %v1910_v24, %v454_v58  ;;  %vm568_vm15 = vcmp.ge.f32.partialorder %v548_v57, 0.0  ;;  %1609 = vmatpush3.bf16.msra.mxu1 %v1686_v53  ;;  %v1442_v24 = vld [vmem:[%s2124_s1 + $0x8] sm:$0xff]  }
 0x136   :  { %1610 = vmatprep.subr.bf16.mxu1 %v1687_v18  ;;  %v1376_v4 = vunpack.c.l.bf16 %v1442_v24  ;;  %v1377_v10 = vunpack.c.h.bf16 %v1442_v24 }
 0x137   :  { %vm569_vm1 = vcmp.ge.f32.partialorder %v551_v59, 0.0  ;;  %v585_v60 = vmul.f32 0.01, %v551_v59  ;;  %v600_v61 = vsel %vm568_vm15, %v548_v57, %v584_v28 }
 0x139   :  { %v601_v62 = vsel %vm569_vm1, %v551_v59, %v585_v60  ;;  %1611 = vmatpush3.bf16.msra.mxu1 %v1687_v18  ;;  %v1446_v60 = vld [vmem:[%s2124_s1 + $0x28] sm:$0xff]  }
 0x13a   :  { %v609_v0 = vpack.c.bf16 %v601_v62, %v600_v61  ;;  %v1445_v61 = vld [vmem:[%s2124_s1 + $0x20] sm:$0xff]   ;;  %v1392_v62 = vunpack.c.l.bf16 %v1446_v60  ;;  %v1393_v24 = vunpack.c.h.bf16 %v1446_v60 }
 0x13b   :  { %v1388_v1 = vunpack.c.l.bf16 %v1445_v61 }
 0x13c   :  { %1593 = vmatmul.mubr.msk.bf16.gmra.mrb[28].mxu1 %vm335_vm0, %v609_v0 }
 0x1df   :  { %v1582_v6 = vpop.f32.mrb[16].mxu1 }
 0x1e0   :  { %v700_v8 = vadd.f32 %v1582_v6, %v1974_v2  ;;  %v691_v54 = vpop.f32.mrb[17].mxu1  ;;  %v1389_v6 = vunpack.c.h.bf16 %v1445_v61 }
 0x1e1   :  { %v692_v11 = vadd.f32 %v1974_v2, %v691_v54  ;;  %v1583_v12 = vpop.f32.mrb[18].mxu1 }
 0x1e2   :  { %v788_v14 = vadd.f32 %v1376_v4, %v700_v8  ;;  %v703_v15 = vadd.f32 %v1583_v12, %v1974_v2  ;;  %v694_v16 = vpop.f32.mrb[19].mxu1 }
 0x1e3   :  { %v786_v17 = vadd.f32 %v1372_v7, %v692_v11  ;;  %v695_v19 = vadd.f32 %v1974_v2, %v694_v16 }
 0x1e4   :  { %v820_v20 = vmul.f32 0.01, %v788_v14  ;;  %v789_v21 = vadd.f32 %v1377_v10, %v703_v15  ;;  %vm804_vm0 = vcmp.ge.f32.partialorder %v788_v14, 0.0 }
 0x1e5   :  { %v818_v23 = vmul.f32 0.01, %v786_v17  ;;  %v787_v3 = vadd.f32 %v1373_v13, %v695_v19  ;;  %vm802_vm2 = vcmp.ge.f32.partialorder %v786_v17, 0.0 }
 0x1e6   :  { %vm805_vm3 = vcmp.ge.f32.partialorder %v789_v21, 0.0  ;;  %v821_v25 = vmul.f32 0.01, %v789_v21  ;;  %v836_v27 = vsel %vm804_vm0, %v788_v14, %v820_v20 }
 0x1e7   :  { %vm803_vm4 = vcmp.ge.f32.partialorder %v787_v3, 0.0  ;;  %v819_v26 = vmul.f32 0.01, %v787_v3  ;;  %v834_v30 = vsel %vm802_vm2, %v786_v17, %v818_v23 }
 0x1e8   :  { %v837_v29 = vsel %vm805_vm3, %v789_v21, %v821_v25  ;;  %vm1210_vm3 = vcmask 519168  }
 0x1e9   :  { %v851_v9 = vpack.c.bf16 %v837_v29, %v836_v27  ;;  %v835_v31 = vsel %vm803_vm4, %v787_v3, %v819_v26  ;;  %v1448_v26 = vld [vmem:[%s2124_s1 + $0x38] sm:$0xff]   ;;  %v1447_v27 = vld [vmem:[%s2124_s1 + $0x30] sm:$0xff]  }
 0x1ea   :  { %v850_v32 = vpack.c.bf16 %v835_v31, %v834_v30  ;;  %v1400_v29 = vunpack.c.l.bf16 %v1448_v26  ;;  %v1396_v30 = vunpack.c.l.bf16 %v1447_v27  ;;  %v1401_v33 = vunpack.c.h.bf16 %v1448_v26 }
 0x1eb   :  { %1449 = vst [vmem:[%s2126_s8 + $0x8] sm:$0xff] %v851_v9  }
 0x1ec   :  { %1406 = vst [vmem:[%s2126_s8] sm:$0xff] %v850_v32   ;;  %1612 = vmatprep.mubr.bf16.mxu1 %v850_v32 }
 0x1ed   :  { %1613 = vmatmul.mubr.bf16.vlgmr.msra.gmra.mrb[32].mxu1 %v851_v9 }
 0x1ef   :  { %v1586_v36 = vpop.f32.mrb[20].mxu1 }
 0x1f0   :  { %v716_v38 = vadd.f32 %v1586_v36, %v1974_v2  ;;  %v707_v39 = vpop.f32.mrb[21].mxu1  ;;  %v1397_v36 = vunpack.c.h.bf16 %v1447_v27 }
 0x1f1   :  { %v708_v40 = vadd.f32 %v1974_v2, %v707_v39  ;;  %v1587_v41 = vpop.f32.mrb[22].mxu1 }
 0x1f2   :  { %v792_v5 = vadd.f32 %v1384_v35, %v716_v38  ;;  %v719_v43 = vadd.f32 %v1587_v41, %v1974_v2  ;;  %v710_v45 = vpop.f32.mrb[23].mxu1 }
 0x1f3   :  { %v790_v46 = vadd.f32 %v1380_v37, %v708_v40  ;;  %v711_v47 = vadd.f32 %v1974_v2, %v710_v45 }
 0x1f4   :  { %v824_v48 = vmul.f32 0.01, %v792_v5  ;;  %v793_v50 = vadd.f32 %v1385_v63, %v719_v43  ;;  %vm808_vm5 = vcmp.ge.f32.partialorder %v792_v5, 0.0 }
 0x1f5   :  { %v822_v51 = vmul.f32 0.01, %v790_v46  ;;  %v791_v52 = vadd.f32 %v1381_v42, %v711_v47  ;;  %vm806_vm6 = vcmp.ge.f32.partialorder %v790_v46, 0.0 }
 0x1f6   :  { %vm809_vm7 = vcmp.ge.f32.partialorder %v793_v50, 0.0  ;;  %v825_v55 = vmul.f32 0.01, %v793_v50  ;;  %v840_v22 = vsel %vm808_vm5, %v792_v5, %v824_v48 }
 0x1f7   :  { %vm807_vm8 = vcmp.ge.f32.partialorder %v791_v52, 0.0  ;;  %v823_v44 = vmul.f32 0.01, %v791_v52  ;;  %v838_v57 = vsel %vm806_vm6, %v790_v46, %v822_v51 }
 0x1f8   :  { %v841_v56 = vsel %vm809_vm7, %v793_v50, %v825_v55 }
 0x1f9   :  { %v839_v58 = vsel %vm807_vm8, %v791_v52, %v823_v44  ;;  %v853_v28 = vpack.c.bf16 %v841_v56, %v840_v22 }
 0x1fa   :  { %v852_v59 = vpack.c.bf16 %v839_v58, %v838_v57 }
 0x1fb   :  { %1451 = vst [vmem:[%s2126_s8 + $0x18] sm:$0xff] %v853_v28  }
 0x1fc   :  { %1450 = vst [vmem:[%s2126_s8 + $0x10] sm:$0xff] %v852_v59   ;;  %1616 = vmatprep.mubr.bf16.mxu1 %v852_v59 }
 0x1fd   :  { %1617 = vmatmul.mubr.bf16.gmra.mrb[36].mxu1 %v853_v28 }
 0x1ff   :  { %v1590_v0 = vpop.f32.mrb[24].mxu1 }
 0x200   :  { %v732_v53 = vadd.f32 %v1590_v0, %v1974_v2  ;;  %v723_v18 = vpop.f32.mrb[25].mxu1 }
 0x201   :  { %v724_v49 = vadd.f32 %v1974_v2, %v723_v18  ;;  %v1591_v4 = vpop.f32.mrb[26].mxu1 }
 0x202   :  { %v796_v7 = vadd.f32 %v1392_v62, %v732_v53  ;;  %v735_v8 = vadd.f32 %v1591_v4, %v1974_v2  ;;  %v726_v54 = vpop.f32.mrb[27].mxu1 }
 0x203   :  { %v794_v10 = vadd.f32 %v1388_v1, %v724_v49  ;;  %v727_v11 = vadd.f32 %v1974_v2, %v726_v54 }
 0x204   :  { %v828_v12 = vmul.f32 0.01, %v796_v7  ;;  %v797_v13 = vadd.f32 %v1393_v24, %v735_v8  ;;  %vm812_vm9 = vcmp.ge.f32.partialorder %v796_v7, 0.0 }
 0x205   :  { %v826_v14 = vmul.f32 0.01, %v794_v10  ;;  %v795_v15 = vadd.f32 %v1389_v6, %v727_v11  ;;  %vm810_vm10 = vcmp.ge.f32.partialorder %v794_v10, 0.0 }
 0x206   :  { %vm813_vm11 = vcmp.ge.f32.partialorder %v797_v13, 0.0  ;;  %v829_v16 = vmul.f32 0.01, %v797_v13  ;;  %v844_v19 = vsel %vm812_vm9, %v796_v7, %v828_v12 }
 0x207   :  { %vm811_vm12 = vcmp.ge.f32.partialorder %v795_v15, 0.0  ;;  %v827_v17 = vmul.f32 0.01, %v795_v15  ;;  %v842_v21 = vsel %vm810_vm10, %v794_v10, %v826_v14 }
 0x208   :  { %v845_v20 = vsel %vm813_vm11, %v797_v13, %v829_v16 }
 0x209   :  { %v843_v23 = vsel %vm811_vm12, %v795_v15, %v827_v17  ;;  %v855_v3 = vpack.c.bf16 %v845_v20, %v844_v19 }
 0x20a   :  { %v854_v25 = vpack.c.bf16 %v843_v23, %v842_v21 }
 0x20b   :  { %1453 = vst [vmem:[%s2126_s8 + $0x28] sm:$0xff] %v855_v3  }
 0x20c   :  { %1452 = vst [vmem:[%s2126_s8 + $0x20] sm:$0xff] %v854_v25   ;;  %1620 = vmatprep.mubr.bf16.mxu1 %v854_v25 }
 0x20d   :  { %1621 = vmatmul.mubr.bf16.gmra.mrb[40].mxu1 %v855_v3 }
 0x20f   :  { %v1594_v9 = vpop.f32.mrb[28].mxu1 }
 0x210   :  { %v748_v31 = vadd.f32 %v1594_v9, %v1974_v2  ;;  %v739_v32 = vpop.f32.mrb[29].mxu1 }
 0x211   :  { %v740_v34 = vadd.f32 %v1974_v2, %v739_v32  ;;  %v1595_v35 = vpop.f32.mrb[30].mxu1 }
 0x212   :  { %v800_v37 = vadd.f32 %v1400_v29, %v748_v31  ;;  %v751_v38 = vadd.f32 %v1595_v35, %v1974_v2  ;;  %v742_v39 = vpop.f32.mrb[31].mxu1 }
 0x213   :  { %v798_v63 = vadd.f32 %v1396_v30, %v740_v34  ;;  %v743_v40 = vadd.f32 %v1974_v2, %v742_v39  ;;  %v2037_v2 = vld [vmem:[%s2127_s7] ss:$0 sm:$0xff] }
 0x214   :  { %v832_v41 = vmul.f32 0.01, %v800_v37  ;;  %v801_v42 = vadd.f32 %v1401_v33, %v751_v38  ;;  %vm816_vm13 = vcmp.ge.f32.partialorder %v800_v37, 0.0 }
 0x215   :  { %v830_v5 = vmul.f32 0.01, %v798_v63  ;;  %v799_v43 = vadd.f32 %v1397_v36, %v743_v40  ;;  %vm814_vm14 = vcmp.ge.f32.partialorder %v798_v63, 0.0 }
 0x216   :  { %vm817_vm15 = vcmp.ge.f32.partialorder %v801_v42, 0.0  ;;  %v833_v45 = vmul.f32 0.01, %v801_v42  ;;  %v848_v47 = vsel %vm816_vm13, %v800_v37, %v832_v41 }
 0x217   :  { %vm815_vm1 = vcmp.ge.f32.partialorder %v799_v43, 0.0  ;;  %v831_v46 = vmul.f32 0.01, %v799_v43  ;;  %v846_v50 = vsel %vm814_vm14, %v798_v63, %v830_v5 }
 0x218   :  { %v849_v48 = vsel %vm817_vm15, %v801_v42, %v833_v45 }
 0x219   :  { %v847_v51 = vsel %vm815_vm1, %v799_v43, %v831_v46  ;;  %v857_v52 = vpack.c.bf16 %v849_v48, %v848_v47 }
 0x21a   :  { %v856_v55 = vpack.c.bf16 %v847_v51, %v846_v50 }
 0x21b   :  { %1455 = vst [vmem:[%s2126_s8 + $0x38] sm:$0xff] %v857_v52  }
 0x21c   :  { %1454 = vst [vmem:[%s2126_s8 + $0x30] sm:$0xff] %v856_v55   ;;  %1624 = vmatprep.mubr.bf16.mxu1 %v856_v55 }
 0x21d   :  { %1625 = vmatmul.mubr.bf16.gmra.mrb[44].mxu1 %v857_v52 }
 0x2c0   :  { %v1614_v44 = vpop.f32.mrb[32].mxu1 }
 0x2c1   :  { %v1044_v22 = vadd.f32 %v1614_v44, %v2037_v2  ;;  %v1035_v56 = vpop.f32.mrb[33].mxu1 }
 0x2c2   :  { %v1036_v57 = vadd.f32 %v2037_v2, %v1035_v56  ;;  %v1615_v58 = vpop.f32.mrb[34].mxu1 }
 0x2c3   :  { %vm1100_vm0 = vcmp.ge.f32.partialorder %v1044_v22, 0.0  ;;  %v1116_v28 = vmul.f32 0.01, %v1044_v22  ;;  %v1047_v59 = vadd.f32 %v1615_v58, %v2037_v2  ;;  %v1038_v60 = vpop.f32.mrb[35].mxu1 }
 0x2c4   :  { %vm1098_vm2 = vcmp.ge.f32.partialorder %v1036_v57, 0.0  ;;  %v1114_v61 = vmul.f32 0.01, %v1036_v57  ;;  %v1039_v62 = vadd.f32 %v2037_v2, %v1038_v60 }
 0x2c5   :  { %v1132_v0 = vsel %vm1100_vm0, %v1044_v22, %v1116_v28  ;;  %vm1101_vm4 = vcmp.ge.f32.partialorder %v1047_v59, 0.0  ;;  %v1117_v1 = vmul.f32 0.01, %v1047_v59 }
 0x2c6   :  { %v1356_v53 = vpack.c.bf16 %v1132_v0, %v1132_v0  ;;  %v1130_v18 = vsel %vm1098_vm2, %v1036_v57, %v1114_v61  ;;  %vm1099_vm5 = vcmp.ge.f32.partialorder %v1039_v62, 0.0  ;;  %v1115_v24 = vmul.f32 0.01, %v1039_v62 }
 0x2c7   :  { %v1354_v49 = vpack.c.bf16 %v1130_v18, %v1130_v18  ;;  %v1133_v4 = vsel %vm1101_vm4, %v1047_v59, %v1117_v1 }
 0x2c8   :  { %1213 = vst.msk [vmem:[%s2128_s9 + $0x8] sm:$0xf] %vm1210_vm3, %v1356_v53  ;;  %v1357_v6 = vpack.c.bf16 %v1133_v4, %v1133_v4  ;;  %v1131_v7 = vsel %vm1099_vm5, %v1039_v62, %v1115_v24 }
 0x2c9   :  { %1211 = vst.msk [vmem:[%s2128_s9] sm:$0xf] %vm1210_vm3, %v1354_v49  ;;  %v1355_v8 = vpack.c.bf16 %v1131_v7, %v1131_v7 }
 0x2ca   :  { %1214 = vst.msk [vmem:[%s2128_s9 + $0xc] sm:$0xf] %vm1210_vm3, %v1357_v6 }
 0x2cb   :  { %1212 = vst.msk [vmem:[%s2128_s9 + $0x4] sm:$0xf] %vm1210_vm3, %v1355_v8 }
 0x2d0   :  { %v1618_v54 = vpop.f32.mrb[36].mxu1 }
 0x2d1   :  { %v1060_v10 = vadd.f32 %v1618_v54, %v2037_v2  ;;  %v1051_v11 = vpop.f32.mrb[37].mxu1 }
 0x2d2   :  { %v1052_v12 = vadd.f32 %v2037_v2, %v1051_v11  ;;  %v1619_v13 = vpop.f32.mrb[38].mxu1 }
 0x2d3   :  { %vm1104_vm6 = vcmp.ge.f32.partialorder %v1060_v10, 0.0  ;;  %v1120_v14 = vmul.f32 0.01, %v1060_v10  ;;  %v1063_v15 = vadd.f32 %v1619_v13, %v2037_v2  ;;  %v1054_v16 = vpop.f32.mrb[39].mxu1 }
 0x2d4   :  { %vm1102_vm7 = vcmp.ge.f32.partialorder %v1052_v12, 0.0  ;;  %v1118_v17 = vmul.f32 0.01, %v1052_v12  ;;  %v1055_v19 = vadd.f32 %v2037_v2, %v1054_v16 }
 0x2d5   :  { %v1136_v20 = vsel %vm1104_vm6, %v1060_v10, %v1120_v14  ;;  %vm1105_vm8 = vcmp.ge.f32.partialorder %v1063_v15, 0.0  ;;  %v1121_v21 = vmul.f32 0.01, %v1063_v15 }
 0x2d6   :  { %v1360_v23 = vpack.c.bf16 %v1136_v20, %v1136_v20  ;;  %v1134_v3 = vsel %vm1102_vm7, %v1052_v12, %v1118_v17  ;;  %vm1103_vm9 = vcmp.ge.f32.partialorder %v1055_v19, 0.0  ;;  %v1119_v25 = vmul.f32 0.01, %v1055_v19 }
 0x2d7   :  { %v1358_v26 = vpack.c.bf16 %v1134_v3, %v1134_v3  ;;  %v1137_v27 = vsel %vm1105_vm8, %v1063_v15, %v1121_v21 }
 0x2d8   :  { %1217 = vst.msk [vmem:[%s2128_s9 + $0x18] sm:$0xf] %vm1210_vm3, %v1360_v23  ;;  %v1361_v29 = vpack.c.bf16 %v1137_v27, %v1137_v27  ;;  %v1135_v9 = vsel %vm1103_vm9, %v1055_v19, %v1119_v25 }
 0x2d9   :  { %1215 = vst.msk [vmem:[%s2128_s9 + $0x10] sm:$0xf] %vm1210_vm3, %v1358_v26  ;;  %v1359_v30 = vpack.c.bf16 %v1135_v9, %v1135_v9 }
 0x2da   :  { %1218 = vst.msk [vmem:[%s2128_s9 + $0x1c] sm:$0xf] %vm1210_vm3, %v1361_v29 }
 0x2db   :  { %1216 = vst.msk [vmem:[%s2128_s9 + $0x14] sm:$0xf] %vm1210_vm3, %v1359_v30 }
 0x2e0   :  { %v1622_v31 = vpop.f32.mrb[40].mxu1 }
 0x2e1   :  { %v1076_v32 = vadd.f32 %v1622_v31, %v2037_v2  ;;  %v1067_v33 = vpop.f32.mrb[41].mxu1 }
 0x2e2   :  { %v1068_v34 = vadd.f32 %v2037_v2, %v1067_v33  ;;  %v1623_v35 = vpop.f32.mrb[42].mxu1 }
 0x2e3   :  { %vm1108_vm10 = vcmp.ge.f32.partialorder %v1076_v32, 0.0  ;;  %v1124_v36 = vmul.f32 0.01, %v1076_v32  ;;  %v1079_v37 = vadd.f32 %v1623_v35, %v2037_v2  ;;  %v1070_v38 = vpop.f32.mrb[43].mxu1 }
 0x2e4   :  { %vm1106_vm11 = vcmp.ge.f32.partialorder %v1068_v34, 0.0  ;;  %v1122_v39 = vmul.f32 0.01, %v1068_v34  ;;  %v1071_v63 = vadd.f32 %v2037_v2, %v1070_v38 }
 0x2e5   :  { %v1140_v40 = vsel %vm1108_vm10, %v1076_v32, %v1124_v36  ;;  %vm1109_vm12 = vcmp.ge.f32.partialorder %v1079_v37, 0.0  ;;  %v1125_v41 = vmul.f32 0.01, %v1079_v37 }
 0x2e6   :  { %v1364_v42 = vpack.c.bf16 %v1140_v40, %v1140_v40  ;;  %v1138_v5 = vsel %vm1106_vm11, %v1068_v34, %v1122_v39  ;;  %vm1107_vm13 = vcmp.ge.f32.partialorder %v1071_v63, 0.0  ;;  %v1123_v43 = vmul.f32 0.01, %v1071_v63 }
 0x2e7   :  { %v1362_v45 = vpack.c.bf16 %v1138_v5, %v1138_v5  ;;  %v1141_v46 = vsel %vm1109_vm12, %v1079_v37, %v1125_v41 }
 0x2e8   :  { %1221 = vst.msk [vmem:[%s2128_s9 + $0x28] sm:$0xf] %vm1210_vm3, %v1364_v42  ;;  %v1365_v47 = vpack.c.bf16 %v1141_v46, %v1141_v46  ;;  %v1139_v48 = vsel %vm1107_vm13, %v1071_v63, %v1123_v43 }
 0x2e9   :  { %1219 = vst.msk [vmem:[%s2128_s9 + $0x20] sm:$0xf] %vm1210_vm3, %v1362_v45  ;;  %v1363_v50 = vpack.c.bf16 %v1139_v48, %v1139_v48 }
 0x2ea   :  { %1222 = vst.msk [vmem:[%s2128_s9 + $0x2c] sm:$0xf] %vm1210_vm3, %v1365_v47 }
 0x2eb   :  { %1220 = vst.msk [vmem:[%s2128_s9 + $0x24] sm:$0xf] %vm1210_vm3, %v1363_v50 }
 0x2f0   :  { %v1626_v51 = vpop.f32.mrb[44].mxu1 }
 0x2f1   :  { %v1092_v52 = vadd.f32 %v1626_v51, %v2037_v2  ;;  %v1083_v55 = vpop.f32.mrb[45].mxu1 }
 0x2f2   :  { %v1084_v44 = vadd.f32 %v2037_v2, %v1083_v55  ;;  %v1627_v22 = vpop.f32.mrb[46].mxu1 }
 0x2f3   :  { %vm1112_vm14 = vcmp.ge.f32.partialorder %v1092_v52, 0.0  ;;  %v1128_v56 = vmul.f32 0.01, %v1092_v52  ;;  %v1095_v57 = vadd.f32 %v1627_v22, %v2037_v2  ;;  %v1086_v58 = vpop.f32.mrb[47].mxu1 }
 0x2f4   :  { %vm1110_vm15 = vcmp.ge.f32.partialorder %v1084_v44, 0.0  ;;  %v1126_v28 = vmul.f32 0.01, %v1084_v44  ;;  %v1087_v59 = vadd.f32 %v2037_v2, %v1086_v58 }
 0x2f5   :  { %v1144_v60 = vsel %vm1112_vm14, %v1092_v52, %v1128_v56  ;;  %vm1113_vm1 = vcmp.ge.f32.partialorder %v1095_v57, 0.0  ;;  %v1129_v61 = vmul.f32 0.01, %v1095_v57 }
 0x2f6   :  { %v1368_v62 = vpack.c.bf16 %v1144_v60, %v1144_v60  ;;  %v1142_v0 = vsel %vm1110_vm15, %v1084_v44, %v1126_v28  ;;  %vm1111_vm0 = vcmp.ge.f32.partialorder %v1087_v59, 0.0  ;;  %v1127_v1 = vmul.f32 0.01, %v1087_v59 }
 0x2f7   :  { %v1366_v53 = vpack.c.bf16 %v1142_v0, %v1142_v0  ;;  %v1145_v18 = vsel %vm1113_vm1, %v1095_v57, %v1129_v61 }
 0x2f8   :  { %1225 = vst.msk [vmem:[%s2128_s9 + $0x38] sm:$0xf] %vm1210_vm3, %v1368_v62  ;;  %v1369_v24 = vpack.c.bf16 %v1145_v18, %v1145_v18  ;;  %v1143_v49 = vsel %vm1111_vm0, %v1087_v59, %v1127_v1 }
 0x2f9   :  { %1223 = vst.msk [vmem:[%s2128_s9 + $0x30] sm:$0xf] %vm1210_vm3, %v1366_v53  ;;  %v1367_v2 = vpack.c.bf16 %v1143_v49, %v1143_v49 }
 0x2fa   :  { %1226 = vst.msk [vmem:[%s2128_s9 + $0x3c] sm:$0xf] %vm1210_vm3, %v1369_v24 }
 0x2fb   :  { %1224 = vst.msk [vmem:[%s2128_s9 + $0x34] sm:$0xf] %vm1210_vm3, %v1367_v2 }

// kernel: resnet_forward.22
= control target key start
LH: loop header
LB: loop body
LE: loop exit
PB: predicated region body
PF: predicated region fallthrough
CT: control target
= control target key end

     0   :  { %vm392_vm0 = vcmask 523264   ;;  %v1462_v55 = vmov 0   ;;  %vm1116_vm14 = vcmask 519168   ;;  %s1827_s2 = inlined_call_operand.vmem [shape: bf16[576,64], index: 2, kind: input, shape index: {}]   ;;  %s1828_s0 = inlined_call_operand.vmem [shape: bf16[32,576], index: 0, kind: input, shape index: {}]   ;;  %s1829_s4 = inlined_call_operand.vmem [shape: bf16[64,256], index: 4, kind: input, shape index: {}]   ;;  %s1830_s6 = inlined_call_operand.vmem [shape: bf16[128,256], index: 6, kind: input, shape index: {}]   ;;  %s1831_s1 = inlined_call_operand.vmem [shape: bf16[32,128], index: 1, kind: input, shape index: {}]   ;;  %s1832_s7 = inlined_call_operand.vmem [shape: bf16[256,64], index: 7, kind: input, shape index: {}]   ;;  %s1833_s3 = inlined_call_operand.vmem [shape: f32[1,64], index: 3, kind: input, shape index: {}]   ;;  %s1834_s5 = inlined_call_operand.vmem [shape: f32[1,256], index: 5, kind: input, shape index: {}]   ;;  %s1835_s9 = inlined_call_operand.vmem [shape: bf16[32,256], index: 9, kind: output, shape index: {0}]   ;;  %s1836_s8 = inlined_call_operand.vmem [shape: f32[1,64], index: 8, kind: input, shape index: {}]   ;;  %s1837_s10 = inlined_call_operand.vmem [shape: bf16[32,64], index: 10, kind: output, shape index: {1}]  }
   0x1   :  { %v1358_v0 = vld [vmem:[%s1827_s2 + $0x40] sm:$0xff]   ;;  %v1362_v4 = vld [vmem:[%s1827_s2 + $0x48] sm:$0xff]   ;;  %v1366_v8 = vld [vmem:[%s1827_s2 + $0x50] sm:$0xff]  }
   0x2   :  { %v1359_v1 = vld [vmem:[%s1827_s2] sm:$0xff]   ;;  %1239 = vmatprep.subr.bf16.mxu0 %v1358_v0  ;;  %v1363_v5 = vld [vmem:[%s1827_s2 + $0x8] sm:$0xff]   ;;  %v1367_v9 = vld [vmem:[%s1827_s2 + $0x10] sm:$0xff]  }
   0x3   :  { %v1360_v2 = vld [vmem:[%s1827_s2 + $0xc0] sm:$0xff]   ;;  %1240 = vmatpush3.bf16.msra.mxu0 %v1359_v1  ;;  %v1364_v6 = vld [vmem:[%s1827_s2 + $0xc8] sm:$0xff]   ;;  %v1368_v10 = vld [vmem:[%s1827_s2 + $0xd0] sm:$0xff]  }
   0x4   :  { %v1361_v3 = vld [vmem:[%s1827_s2 + $0x80] sm:$0xff]   ;;  %1267 = vmatprep.subr.bf16.mxu1 %v1360_v2  ;;  %1241 = vmatprep.subr.bf16.mxu0 %v1362_v4  ;;  %v1365_v7 = vld [vmem:[%s1827_s2 + $0x88] sm:$0xff]   ;;  %v1369_v11 = vld [vmem:[%s1827_s2 + $0x90] sm:$0xff]  }
   0x5   :  { %1268 = vmatpush3.bf16.msra.mxu1 %v1361_v3  ;;  %v1370_v12 = vld [vmem:[%s1827_s2 + $0x58] sm:$0xff]   ;;  %v1374_v16 = vld [vmem:[%s1827_s2 + $0x60] sm:$0xff]   ;;  %v1378_v20 = vld [vmem:[%s1827_s2 + $0x68] sm:$0xff]  }
   0x6   :  { %1269 = vmatprep.subr.bf16.mxu1 %v1364_v6  ;;  %v1371_v13 = vld [vmem:[%s1827_s2 + $0x18] sm:$0xff]   ;;  %v1375_v17 = vld [vmem:[%s1827_s2 + $0x20] sm:$0xff]   ;;  %v1379_v21 = vld [vmem:[%s1827_s2 + $0x28] sm:$0xff]  }
   0x7   :  { %1242 = vmatpush3.bf16.msra.mxu0 %v1363_v5  ;;  %v1372_v14 = vld [vmem:[%s1827_s2 + $0xd8] sm:$0xff]   ;;  %v1376_v18 = vld [vmem:[%s1827_s2 + $0xe0] sm:$0xff]   ;;  %v1380_v22 = vld [vmem:[%s1827_s2 + $0xe8] sm:$0xff]  }
   0x8   :  { %1243 = vmatprep.subr.bf16.mxu0 %v1366_v8  ;;  %v1373_v15 = vld [vmem:[%s1827_s2 + $0x98] sm:$0xff]   ;;  %v1377_v19 = vld [vmem:[%s1827_s2 + $0xa0] sm:$0xff]   ;;  %v1381_v23 = vld [vmem:[%s1827_s2 + $0xa8] sm:$0xff]  }
   0x9   :  { %1270 = vmatpush3.bf16.msra.mxu1 %v1365_v7  ;;  %v1382_v24 = vld [vmem:[%s1827_s2 + $0x70] sm:$0xff]   ;;  %v1386_v28 = vld [vmem:[%s1827_s2 + $0x78] sm:$0xff]   ;;  %v1393_v34 = vld [vmem:[%s1827_s2 + $0x100] sm:$0xff]  }
   0xa   :  { %1271 = vmatprep.subr.bf16.mxu1 %v1368_v10  ;;  %v1383_v25 = vld [vmem:[%s1827_s2 + $0x30] sm:$0xff]   ;;  %v1387_v29 = vld [vmem:[%s1827_s2 + $0x38] sm:$0xff]   ;;  %v1396_v36 = vld [vmem:[%s1828_s0 + $0xc] ss:$20 sps:$4 sm:$0xff]  }
   0xb   :  { %1244 = vmatpush3.bf16.msra.mxu0 %v1367_v9  ;;  %v1384_v26 = vld [vmem:[%s1827_s2 + $0xf0] sm:$0xff]   ;;  %v1388_v30 = vld [vmem:[%s1827_s2 + $0xf8] sm:$0xff]   ;;  %v1397_v37 = vld [vmem:[%s1827_s2 + $0x108] sm:$0xff]   ;;  %480 = vmatprep.mubr.bf16.mxu1 %v1396_v36 }
   0xc   :  { %1245 = vmatprep.subr.bf16.mxu0 %v1370_v12  ;;  %v1385_v27 = vld [vmem:[%s1827_s2 + $0xb0] sm:$0xff]   ;;  %v1391_v32 = vld [vmem:[%s1828_s0 + $0x4] ss:$20 sps:$4 sm:$0xff]   ;;  %v1394_v35 = vld [vmem:[%s1828_s0 + $0x8] ss:$20 sps:$4 sm:$0xff]  }
   0xd   :  { %1272 = vmatpush3.bf16.msra.mxu1 %v1369_v11  ;;  %v1389_v31 = vld [vmem:[%s1828_s0] ss:$20 sps:$4 sm:$0xff]   ;;  %v1392_v33 = vld [vmem:[%s1827_s2 + $0xb8] sm:$0xff]   ;;  %431 = vmatprep.mubr.bf16.mxu0 %v1391_v32  ;;  %v1404_v42 = vld [vmem:[%s1828_s0 + $0x30] ss:$20 sps:$4 sm:$0xff]  }
   0xe   :  { %1273 = vmatprep.subr.bf16.mxu1 %v1372_v14  ;;  %v1398_v38 = vld [vmem:[%s1828_s0 + $0x2c] ss:$20 sps:$4 sm:$0xff]   ;;  %v1400_v39 = vld [vmem:[%s1828_s0 + $0x28] ss:$20 sps:$4 sm:$0xff]   ;;  %v1401_v40 = vld [vmem:[%s1827_s2 + $0x110] sm:$0xff]  }
   0xf   :  { %1246 = vmatpush3.bf16.msra.mxu0 %v1371_v13  ;;  %v1402_v41 = vld [vmem:[%s1828_s0 + $0x34] ss:$20 sps:$4 sm:$0xff]   ;;  %v1405_v43 = vld [vmem:[%s1827_s2 + $0x118] sm:$0xff]   ;;  %v1406_v44 = vld [vmem:[%s1828_s0 + $0x10] ss:$20 sps:$4 sm:$0xff]  }
  0x10   :  { %1247 = vmatprep.subr.bf16.mxu0 %v1374_v16  ;;  %v1407_v45 = vld [vmem:[%s1828_s0 + $0x38] ss:$20 sps:$4 sm:$0xff]   ;;  %v1408_v47 = vld [vmem:[%s1829_s4] ss:$8 sps:$4 sm:$0xff]   ;;  %v1413_v48 = vld [vmem:[%s1829_s4 + $0x14] ss:$8 sps:$4 sm:$0xff]  }
  0x11   :  { %1274 = vmatpush3.bf16.msra.mxu1 %v1373_v15  ;;  %v1410_v46 = vld [vmem:[%s1829_s4 + $0x4] ss:$8 sps:$4 sm:$0xff]   ;;  %v1411_v49 = vld [vmem:[%s1829_s4 + $0x10] ss:$8 sps:$4 sm:$0xff]   ;;  %v1414_v51 = vld [vmem:[%s1829_s4 + $0x20] ss:$8 sps:$4 sm:$0xff]  }
  0x12   :  { %1275 = vmatprep.subr.bf16.mxu1 %v1376_v18  ;;  %v1416_v50 = vld [vmem:[%s1829_s4 + $0x24] ss:$8 sps:$4 sm:$0xff]   ;;  %v1419_v52 = vld [vmem:[%s1829_s4 + $0x34] ss:$8 sps:$4 sm:$0xff]   ;;  %v1417_v53 = vld [vmem:[%s1829_s4 + $0x30] ss:$8 sps:$4 sm:$0xff]  }
  0x13   :  { %1248 = vmatpush3.bf16.msra.mxu0 %v1375_v17  ;;  %v1422_v54 = vld [vmem:[%s1830_s6 + $0x4] ss:$8 sps:$4 sm:$0xff]   ;;  %v1450_v60 = vld [vmem:[%s1832_s7 + $0x50] sm:$0xff]   ;;  %v1452_v62 = vld [vmem:[%s1832_s7 + $0x58] sm:$0xff]  }
  0x14   :  { %1249 = vmatprep.subr.bf16.mxu0 %v1378_v20  ;;  %v1446_v56 = vld [vmem:[%s1832_s7 + $0x40] sm:$0xff]   ;;  %v1448_v58 = vld [vmem:[%s1832_s7 + $0x48] sm:$0xff]   ;;  %v1451_v61 = vld [vmem:[%s1832_s7 + $0x10] sm:$0xff]  }
  0x15   :  { %1276 = vmatpush3.bf16.msra.mxu1 %v1377_v19  ;;  %v1447_v57 = vld [vmem:[%s1832_s7] sm:$0xff]   ;;  %v1449_v59 = vld [vmem:[%s1832_s7 + $0x8] sm:$0xff]   ;;  %v1453_v63 = vld [vmem:[%s1832_s7 + $0x18] sm:$0xff]  }
  0x16   :  { %1277 = vmatprep.subr.bf16.mxu1 %v1380_v22  ;;  %v1454_v0 = vld [vmem:[%s1832_s7 + $0x60] sm:$0xff]  }
  0x17   :  { %1250 = vmatpush3.bf16.msra.mxu0 %v1379_v21  ;;  %v1455_v1 = vld [vmem:[%s1832_s7 + $0x20] sm:$0xff]  }
  0x18   :  { %1251 = vmatprep.subr.bf16.mxu0 %v1382_v24  ;;  %v1129_v3 = vld [vmem:[%s1833_s3] ss:$0 sm:$0xff] }
  0x19   :  { %1278 = vmatpush3.bf16.msra.mxu1 %v1381_v23 }
  0x1a   :  { %1279 = vmatprep.subr.bf16.mxu1 %v1384_v26 }
  0x1b   :  { %1252 = vmatpush3.bf16.msra.mxu0 %v1383_v25 }
  0x1c   :  { %1253 = vmatprep.subr.bf16.mxu0 %v1386_v28 }
  0x1d   :  { %1280 = vmatpush3.bf16.msra.mxu1 %v1385_v27 }
  0x1e   :  { %1281 = vmatprep.subr.bf16.mxu1 %v1388_v30 }
  0x1f   :  { %1254 = vmatpush3.bf16.msra.mxu0 %v1387_v29 }
  0x20   :  { %1329 = vmatprep.subr.bf16.mxu0 %v1393_v34 }
  0x21   :  { %1282 = vmatpush3.bf16.msra.mxu1 %v1392_v33 }
  0x22   :  { %432 = vmatmul.mubr.bf16.vlgmr.msra.gmra.mrb[0].mxu0 %v1389_v31  ;;  %626 = vmatprep.subr.bf16.mxu1 %v1410_v46 }
  0x23   :  { %1330 = vmatpush3.bf16.msra.mxu0 %v1393_v34  ;;  %439 = vmatprep.mubr.bf16.mxu0 %v1398_v38 }
  0x24   :  { %481 = vmatmul.mubr.bf16.vlgmr.msra.gmra.mrb[0].mxu1 %v1394_v35  ;;  %1331 = vmatprep.subr.bf16.mxu0 %v1397_v37 }
  0x25   :  { %488 = vmatprep.mubr.bf16.mxu1 %v1402_v41  ;;  %627 = vmatpush1.bf16.msra.mxu1 %v1408_v47 }
  0x26   :  { %628 = vmatprep.subr.bf16.mxu1 %v1413_v48 }
  0x27   :  { %1332 = vmatpush3.bf16.msra.mxu0 %v1397_v37 }
  0x28   :  { %1333 = vmatprep.subr.bf16.mxu0 %v1401_v40 }
  0x29   :  { %629 = vmatpush1.bf16.msra.mxu1 %v1411_v49 }
  0x2a   :  { %440 = vmatmul.mubr.bf16.gmra.mrb[4].mxu0 %v1400_v39  ;;  %630 = vmatprep.subr.bf16.mxu1 %v1416_v50 }
  0x2b   :  { %1337 = vmatprep.mubr.msk.bf16.mxu0 %vm392_vm0, %v1406_v44  ;;  %1334 = vmatpush3.bf16.msra.mxu0 %v1401_v40 }
  0x2c   :  { %489 = vmatmul.mubr.bf16.gmra.mrb[4].mxu1 %v1404_v42  ;;  %1335 = vmatprep.subr.bf16.mxu0 %v1405_v43 }
  0x2d   :  { %631 = vmatpush1.bf16.msra.mxu1 %v1414_v51  ;;  %658 = vmatprep.mubr.bf16.mxu1 %v1462_v55 }
  0x2e   :  { %632 = vmatprep.subr.bf16.mxu1 %v1419_v52  ;;  %v1420_v52 = vld [vmem:[%s1830_s6] ss:$8 sps:$4 sm:$0xff]  }
  0x2f   :  { %1336 = vmatpush3.bf16.msra.mxu0 %v1405_v43 }
  0x30   :  { %1301 = vmatprep.subr.bf16.mxu0 %v1446_v56  ;;  %v1423_v56 = vld [vmem:[%s1830_s6 + $0x10] ss:$8 sps:$4 sm:$0xff]  }
  0x31   :  { %633 = vmatpush1.bf16.msra.mxu1 %v1417_v53 }
  0x32   :  { %1338 = vmatmul.mubr.msk.bf16.vlgmr.msra.gmra.mrb[8].mxu0 %vm392_vm0, %v1407_v45  ;;  %791 = vmatprep.subr.bf16.mxu1 %v1422_v54  ;;  %v1425_v54 = vld [vmem:[%s1830_s6 + $0x14] ss:$8 sps:$4 sm:$0xff]  }
  0x33   :  { %1302 = vmatpush3.bf16.msra.mxu0 %v1447_v57  ;;  %v1428_v57 = vld [vmem:[%s1830_s6 + $0x24] ss:$8 sps:$4 sm:$0xff]  }
  0x34   :  { %1303 = vmatprep.subr.bf16.mxu0 %v1448_v58  ;;  %v1426_v58 = vld [vmem:[%s1830_s6 + $0x20] ss:$8 sps:$4 sm:$0xff]  }
  0x37   :  { %1304 = vmatpush3.bf16.msra.mxu0 %v1449_v59  ;;  %v1431_v59 = vld [vmem:[%s1830_s6 + $0x34] ss:$8 sps:$4 sm:$0xff]  }
  0x38   :  { %1305 = vmatprep.subr.bf16.mxu0 %v1450_v60  ;;  %v1429_v60 = vld [vmem:[%s1830_s6 + $0x30] ss:$8 sps:$4 sm:$0xff]  }
  0x3b   :  { %1306 = vmatpush3.bf16.msra.mxu0 %v1451_v61  ;;  %v1434_v61 = vld [vmem:[%s1830_s6 + $0x44] ss:$8 sps:$4 sm:$0xff]  }
  0x3c   :  { %1307 = vmatprep.subr.bf16.mxu0 %v1452_v62  ;;  %v1432_v62 = vld [vmem:[%s1830_s6 + $0x40] ss:$8 sps:$4 sm:$0xff]  }
  0x3f   :  { %1308 = vmatpush3.bf16.msra.mxu0 %v1453_v63  ;;  %v1437_v63 = vld [vmem:[%s1830_s6 + $0x54] ss:$8 sps:$4 sm:$0xff]  }
  0x40   :  { %1309 = vmatprep.subr.bf16.mxu0 %v1454_v0  ;;  %v1435_v0 = vld [vmem:[%s1830_s6 + $0x50] ss:$8 sps:$4 sm:$0xff]  }
  0x43   :  { %1310 = vmatpush3.bf16.msra.mxu0 %v1455_v1  ;;  %v1440_v1 = vld [vmem:[%s1830_s6 + $0x64] ss:$8 sps:$4 sm:$0xff]  }
  0xf5   :  { %v1255_v2 = vpop.f32.mrb[0].mxu0 }
  0xf6   :  { %v1256_v4 = vpop.f32.mrb[1].mxu0 }
  0xf7   :  { %v1257_v5 = vadd.f32 %v1256_v4, %v1255_v2  ;;  %v1258_v6 = vpop.f32.mrb[2].mxu0  ;;  %v1283_v7 = vpop.f32.mrb[0].mxu1  ;;  %v1438_v2 = vld [vmem:[%s1830_s6 + $0x60] ss:$8 sps:$4 sm:$0xff]   ;;  %v1441_v4 = vld [vmem:[%s1830_s6 + $0x70] ss:$8 sps:$4 sm:$0xff]  }
  0xf8   :  { %v1259_v8 = vpop.f32.mrb[3].mxu0  ;;  %v1284_v11 = vpop.f32.mrb[1].mxu1 }
  0xf9   :  { %v434_v9 = vadd.f32 %v1257_v5, %v1129_v3  ;;  %v1260_v10 = vadd.f32 %v1259_v8, %v1258_v6  ;;  %v1285_v12 = vadd.f32 %v1284_v11, %v1283_v7  ;;  %v1286_v13 = vpop.f32.mrb[2].mxu1  ;;  %v1444_v5 = vld [vmem:[%s1831_s1] sm:$0xff]   ;;  %v1445_v6 = vld [vmem:[%s1831_s1 + $0x8] sm:$0xff]   ;;  %v1461_v11 = vld [vmem:[%s1832_s7 + $0x38] sm:$0xff]  }
  0xfa   :  { %v1287_v15 = vpop.f32.mrb[3].mxu1  ;;  %v1456_v7 = vld [vmem:[%s1832_s7 + $0x68] sm:$0xff]  }
  0xfb   :  { %v437_v14 = vadd.f32 %v1260_v10, %v1129_v3  ;;  %v1288_v16 = vadd.f32 %v1287_v15, %v1286_v13  ;;  %v483_v17 = vadd.f32 %v1285_v12, %v434_v9  ;;  %v1457_v8 = vld [vmem:[%s1832_s7 + $0x28] sm:$0xff]   ;;  %1311 = vmatprep.subr.bf16.mxu0 %v1456_v7  ;;  %v1458_v9 = vld [vmem:[%s1832_s7 + $0x70] sm:$0xff]   ;;  %v1460_v10 = vld [vmem:[%s1832_s7 + $0x78] sm:$0xff]   ;;  %v570_v12 = vlaneseq }
  0xfc   :  { %1312 = vmatpush3.bf16.msra.mxu0 %v1457_v8  ;;  %v568_v15 = vld [vmem:[%s1834_s5] sm:$0x3] }
  0xfd   :  { %v1261_v18 = vpop.f32.mrb[4].mxu0  ;;  %v486_v20 = vadd.f32 %v1288_v16, %v437_v14  ;;  %1313 = vmatprep.subr.bf16.mxu0 %v1458_v9  ;;  %v571_v13 = vshrl.u32 %v570_v12, 7 }
  0xfe   :  { %v1262_v19 = vpop.f32.mrb[5].mxu0 }
  0xff   :  { %v1263_v21 = vadd.f32 %v1262_v19, %v1261_v18  ;;  %v1264_v22 = vpop.f32.mrb[6].mxu0  ;;  %v1289_v23 = vpop.f32.mrb[4].mxu1  ;;  %v572_v14 = vsub.s32 0, %v571_v13  ;;  %v576_v16 = vsub.s32 1, %v571_v13 }
 0x100   :  { %v1265_v24 = vpop.f32.mrb[7].mxu0  ;;  %v1290_v27 = vpop.f32.mrb[5].mxu1 }
 0x101   :  { %v442_v25 = vadd.f32 %v1263_v21, %v1129_v3  ;;  %v1266_v26 = vadd.f32 %v1265_v24, %v1264_v22  ;;  %v1291_v28 = vadd.f32 %v1290_v27, %v1289_v23  ;;  %v1292_v29 = vpop.f32.mrb[6].mxu1  ;;  %v577_v18 = vrot.slane %v568_v15, %v576_v16 }
 0x102   :  { %v1293_v31 = vpop.f32.mrb[7].mxu1 }
 0x103   :  { %v445_v30 = vadd.f32 %v1266_v26, %v1129_v3  ;;  %v1294_v32 = vadd.f32 %v1293_v31, %v1292_v29  ;;  %v491_v33 = vadd.f32 %v1291_v28, %v442_v25  ;;  %v1443_v3 = vld [vmem:[%s1830_s6 + $0x74] ss:$8 sps:$4 sm:$0xff]  }
 0x105   :  { %v1339_v34 = vpop.f32.mrb[8].mxu0  ;;  %v494_v35 = vadd.f32 %v1294_v32, %v445_v30 }
 0x106   :  { %v540_v36 = vadd.f32 %v1339_v34, %v491_v33  ;;  %v531_v37 = vpop.f32.mrb[9].mxu0 }
 0x107   :  { %v532_v38 = vadd.f32 %v531_v37, %v483_v17  ;;  %v1340_v39 = vpop.f32.mrb[10].mxu0  ;;  %v573_v17 = vrot.slane %v568_v15, %v572_v14 }
 0x108   :  { %v552_v40 = vmul.f32 0.01, %v540_v36  ;;  %v543_v41 = vadd.f32 %v1340_v39, %v494_v35  ;;  %v534_v42 = vpop.f32.mrb[11].mxu0  ;;  %vm548_vm1 = vcmp.ge.f32.partialorder %v540_v36, 0.0 }
 0x109   :  { %v550_v43 = vmul.f32 0.01, %v532_v38  ;;  %v535_v44 = vadd.f32 %v534_v42, %v486_v20  ;;  %vm546_vm2 = vcmp.ge.f32.partialorder %v532_v38, 0.0 }
 0x10a   :  { %vm549_vm3 = vcmp.ge.f32.partialorder %v543_v41, 0.0  ;;  %v553_v45 = vmul.f32 0.01, %v543_v41  ;;  %v556_v47 = vsel %vm548_vm1, %v540_v36, %v552_v40 }
 0x10b   :  { %vm547_vm4 = vcmp.ge.f32.partialorder %v535_v44, 0.0  ;;  %v551_v46 = vmul.f32 0.01, %v535_v44  ;;  %v554_v49 = vsel %vm546_vm2, %v532_v38, %v550_v43 }
 0x10c   :  { %v557_v48 = vsel %vm549_vm3, %v543_v41, %v553_v45 }
 0x10d   :  { %v559_v50 = vpack.c.bf16 %v557_v48, %v556_v47  ;;  %v555_v51 = vsel %vm547_vm4, %v535_v44, %v551_v46 }
 0x10e   :  { %v558_v53 = vpack.c.bf16 %v555_v51, %v554_v49 }
 0x110   :  { %1186 = vmatmul.mubr.msk.bf16.vlgmr.msra.gmra.mrb[8].mxu1 %vm392_vm0, %v558_v53 }
 0x111   :  { %792 = vmatpush1.bf16.msra.mxu1 %v1420_v52  ;;  %668 = vmatprep.mubr.bf16.mxu1 %v1462_v55 }
 0x112   :  { %793 = vmatprep.subr.bf16.mxu1 %v1425_v54 }
 0x115   :  { %794 = vmatpush1.bf16.msra.mxu1 %v1423_v56 }
 0x116   :  { %795 = vmatprep.subr.bf16.mxu1 %v1428_v57 }
 0x118   :  { %1187 = vmatmul.mubr.msk.bf16.gmra.mrb[12].mxu1 %vm392_vm0, %v559_v50 }
 0x119   :  { %796 = vmatpush1.bf16.msra.mxu1 %v1426_v58  ;;  %823 = vmatprep.mubr.bf16.mxu1 %v1462_v55 }
 0x11a   :  { %797 = vmatprep.subr.bf16.mxu1 %v1431_v59 }
 0x11d   :  { %798 = vmatpush1.bf16.msra.mxu1 %v1429_v60 }
 0x11e   :  { %799 = vmatprep.subr.bf16.mxu1 %v1434_v61  ;;  %v1210_v61 = vld [vmem:[%s1836_s8] ss:$0 sm:$0xff] }
 0x121   :  { %800 = vmatpush1.bf16.msra.mxu1 %v1432_v62 }
 0x122   :  { %801 = vmatprep.subr.bf16.mxu1 %v1437_v63 }
 0x125   :  { %802 = vmatpush1.bf16.msra.mxu1 %v1435_v0 }
 0x126   :  { %803 = vmatprep.subr.bf16.mxu1 %v1440_v1 }
 0x129   :  { %804 = vmatpush1.bf16.msra.mxu1 %v1438_v2 }
 0x12a   :  { %805 = vmatprep.subr.bf16.mxu1 %v1443_v3 }
 0x12d   :  { %806 = vmatpush1.bf16.msra.mxu1 %v1441_v4 }
 0x130   :  { %824 = vmatmul.mubr.bf16.vlgmr.msra.gmra.mrb[8].mxu1 %v1444_v5 }
 0x131   :  { %833 = vmatprep.mubr.bf16.mxu1 %v1462_v55  ;;  %v1459_v55 = vld [vmem:[%s1832_s7 + $0x30] sm:$0xff]  }
 0x132   :  { %1314 = vmatpush3.bf16.msra.mxu0 %v1459_v55 }
 0x133   :  { %1315 = vmatprep.subr.bf16.mxu0 %v1460_v10 }
 0x136   :  { %1316 = vmatpush3.bf16.msra.mxu0 %v1461_v11 }
 0x138   :  { %834 = vmatmul.mubr.bf16.gmra.mrb[12].mxu1 %v1445_v6 }
 0x203   :  { %v825_v19 = vpop.f32.mrb[8].mxu1 }
 0x204   :  { %v1341_v20 = vadd.f32 %v825_v19, %v573_v17  ;;  %v827_v21 = vpop.f32.mrb[9].mxu1 }
 0x205   :  { %v1342_v22 = vadd.f32 %v827_v21, %v577_v18  ;;  %v829_v23 = vpop.f32.mrb[10].mxu1 }
 0x206   :  { %vm852_vm5 = vcmp.ge.f32.partialorder %v1341_v20, 0.0  ;;  %v860_v24 = vmul.f32 0.01, %v1341_v20  ;;  %v1343_v25 = vadd.f32 %v829_v23, %v573_v17  ;;  %v831_v26 = vpop.f32.mrb[11].mxu1 }
 0x207   :  { %vm853_vm6 = vcmp.ge.f32.partialorder %v1342_v22, 0.0  ;;  %v861_v27 = vmul.f32 0.01, %v1342_v22  ;;  %v1344_v28 = vadd.f32 %v831_v26, %v577_v18 }
 0x208   :  { %v868_v29 = vsel %vm852_vm5, %v1341_v20, %v860_v24  ;;  %vm854_vm7 = vcmp.ge.f32.partialorder %v1343_v25, 0.0  ;;  %v862_v30 = vmul.f32 0.01, %v1343_v25 }
 0x209   :  { %vm855_vm8 = vcmp.ge.f32.partialorder %v1344_v28, 0.0  ;;  %v863_v31 = vmul.f32 0.01, %v1344_v28  ;;  %v869_v32 = vsel %vm853_vm6, %v1342_v22, %v861_v27 }
 0x20a   :  { %v870_v33 = vsel %vm854_vm7, %v1343_v25, %v862_v30  ;;  %v1231_v34 = vpack.c.bf16 %v869_v32, %v868_v29 }
 0x20b   :  { %v876_v35 = vpack.c.bf16 %v870_v33, %v868_v29  ;;  %v835_v36 = vpop.f32.mrb[12].mxu1  ;;  %v871_v37 = vsel %vm855_vm8, %v1344_v28, %v863_v31 }
 0x20c   :  { %v1345_v38 = vadd.f32 %v835_v36, %v573_v17  ;;  %v837_v39 = vpop.f32.mrb[13].mxu1  ;;  %v877_v40 = vpack.c.bf16 %v871_v37, %v869_v32  ;;  %v1232_v41 = vpack.c.bf16 %v871_v37, %v870_v33  ;;  %900 = vst [vmem:[%s1835_s9] sm:$0xff] %v1231_v34 }
 0x20d   :  { %v1346_v42 = vadd.f32 %v837_v39, %v577_v18  ;;  %v839_v43 = vpop.f32.mrb[14].mxu1 }
 0x20e   :  { %vm856_vm9 = vcmp.ge.f32.partialorder %v1345_v38, 0.0  ;;  %v864_v44 = vmul.f32 0.01, %v1345_v38  ;;  %v1347_v45 = vadd.f32 %v839_v43, %v573_v17  ;;  %v841_v46 = vpop.f32.mrb[15].mxu1  ;;  %901 = vst [vmem:[%s1835_s9 + $0x8] sm:$0xff] %v1232_v41  ;;  %1071 = vmatprep.mubr.bf16.mxu0 %v877_v40 }
 0x20f   :  { %vm857_vm10 = vcmp.ge.f32.partialorder %v1346_v42, 0.0  ;;  %v865_v47 = vmul.f32 0.01, %v1346_v42  ;;  %v1348_v48 = vadd.f32 %v841_v46, %v577_v18  ;;  %1072 = vmatmul.mubr.bf16.vlgmr.msra.gmra.mrb[12].mxu0 %v876_v35 }
 0x210   :  { %vm858_vm11 = vcmp.ge.f32.partialorder %v1347_v45, 0.0  ;;  %v866_v49 = vmul.f32 0.01, %v1347_v45  ;;  %v872_v50 = vsel %vm856_vm9, %v1345_v38, %v864_v44 }
 0x211   :  { %vm859_vm12 = vcmp.ge.f32.partialorder %v1348_v48, 0.0  ;;  %v867_v51 = vmul.f32 0.01, %v1348_v48  ;;  %v873_v52 = vsel %vm857_vm10, %v1346_v42, %v865_v47 }
 0x212   :  { %v874_v53 = vsel %vm858_vm11, %v1347_v45, %v866_v49  ;;  %v1233_v54 = vpack.c.bf16 %v873_v52, %v872_v50 }
 0x213   :  { %v875_v56 = vsel %vm859_vm12, %v1348_v48, %v867_v51  ;;  %v878_v57 = vpack.c.bf16 %v874_v53, %v872_v50 }
 0x214   :  { %v879_v58 = vpack.c.bf16 %v875_v56, %v873_v52  ;;  %v1234_v59 = vpack.c.bf16 %v875_v56, %v874_v53  ;;  %902 = vst [vmem:[%s1835_s9 + $0x10] sm:$0xff] %v1233_v54 }
 0x216   :  { %1079 = vmatprep.mubr.bf16.mxu0 %v879_v58  ;;  %903 = vst [vmem:[%s1835_s9 + $0x18] sm:$0xff] %v1234_v59 }
 0x217   :  { %1080 = vmatmul.mubr.bf16.gmra.mrb[16].mxu0 %v878_v57 }
 0x2e2   :  { %v1317_v60 = vpop.f32.mrb[12].mxu0 }
 0x2e3   :  { %v1318_v62 = vpop.f32.mrb[13].mxu0 }
 0x2e4   :  { %v1319_v63 = vadd.f32 %v1318_v62, %v1317_v60  ;;  %v1320_v0 = vpop.f32.mrb[14].mxu0 }
 0x2e5   :  { %v1321_v1 = vpop.f32.mrb[15].mxu0 }
 0x2e6   :  { %v1074_v2 = vadd.f32 %v1319_v63, %v1210_v61  ;;  %v1322_v3 = vadd.f32 %v1321_v1, %v1320_v0 }
 0x2e8   :  { %vm1088_vm13 = vcmp.ge.f32.partialorder %v1074_v2, 0.0  ;;  %v1092_v4 = vmul.f32 0.01, %v1074_v2  ;;  %v1077_v5 = vadd.f32 %v1322_v3, %v1210_v61 }
 0x2ea   :  { %v1096_v6 = vsel %vm1088_vm13, %v1074_v2, %v1092_v4  ;;  %vm1089_vm15 = vcmp.ge.f32.partialorder %v1077_v5, 0.0  ;;  %v1093_v7 = vmul.f32 0.01, %v1077_v5  ;;  %v1323_v8 = vpop.f32.mrb[16].mxu0 }
 0x2eb   :  { %v1235_v9 = vpack.c.bf16 %v1096_v6, %v1096_v6  ;;  %v1324_v55 = vpop.f32.mrb[17].mxu0 }
 0x2ec   :  { %v1097_v10 = vsel %vm1089_vm15, %v1077_v5, %v1093_v7  ;;  %v1325_v11 = vadd.f32 %v1324_v55, %v1323_v8  ;;  %v1326_v12 = vpop.f32.mrb[18].mxu0 }
 0x2ed   :  { %1117 = vst.msk [vmem:[%s1837_s10] sm:$0xf] %vm1116_vm14, %v1235_v9  ;;  %v1236_v13 = vpack.c.bf16 %v1097_v10, %v1097_v10  ;;  %v1327_v14 = vpop.f32.mrb[19].mxu0 }
 0x2ee   :  { %v1082_v15 = vadd.f32 %v1325_v11, %v1210_v61  ;;  %v1328_v16 = vadd.f32 %v1327_v14, %v1326_v12 }
 0x2ef   :  { %1118 = vst.msk [vmem:[%s1837_s10 + $0x4] sm:$0xf] %vm1116_vm14, %v1236_v13 }
 0x2f0   :  { %vm1090_vm0 = vcmp.ge.f32.partialorder %v1082_v15, 0.0  ;;  %v1094_v17 = vmul.f32 0.01, %v1082_v15  ;;  %v1085_v18 = vadd.f32 %v1328_v16, %v1210_v61 }
 0x2f2   :  { %v1098_v19 = vsel %vm1090_vm0, %v1082_v15, %v1094_v17  ;;  %vm1091_vm1 = vcmp.ge.f32.partialorder %v1085_v18, 0.0  ;;  %v1095_v20 = vmul.f32 0.01, %v1085_v18 }
 0x2f3   :  { %v1237_v21 = vpack.c.bf16 %v1098_v19, %v1098_v19 }
 0x2f4   :  { %v1099_v22 = vsel %vm1091_vm1, %v1085_v18, %v1095_v20 }
 0x2f5   :  { %1119 = vst.msk [vmem:[%s1837_s10 + $0x8] sm:$0xf] %vm1116_vm14, %v1237_v21  ;;  %v1238_v23 = vpack.c.bf16 %v1099_v22, %v1099_v22 }
 0x2f7   :  { %1120 = vst.msk [vmem:[%s1837_s10 + $0xc] sm:$0xf] %vm1116_vm14, %v1238_v23 }

// kernel: resnet_forward.23
= control target key start
LH: loop header
LB: loop body
LE: loop exit
PB: predicated region body
PF: predicated region fallthrough
CT: control target
= control target key end

     0   :  { %vm389_vm0 = vcmask 523264   ;;  %v1246_v54 = vmov 0   ;;  %vm960_vm14 = vcmask 519168   ;;  %s1562_s2 = inlined_call_operand.vmem [shape: bf16[576,64], index: 2, kind: input, shape index: {}]   ;;  %s1563_s0 = inlined_call_operand.vmem [shape: bf16[32,576], index: 0, kind: input, shape index: {}]   ;;  %s1564_s4 = inlined_call_operand.vmem [shape: bf16[64,256], index: 4, kind: input, shape index: {}]   ;;  %s1565_s6 = inlined_call_operand.vmem [shape: bf16[256,64], index: 6, kind: input, shape index: {}]   ;;  %s1566_s3 = inlined_call_operand.vmem [shape: f32[1,64], index: 3, kind: input, shape index: {}]   ;;  %s1567_s5 = inlined_call_operand.vmem [shape: f32[1,256], index: 5, kind: input, shape index: {}]   ;;  %s1568_s1 = inlined_call_operand.vmem [shape: bf16[32,256], index: 1, kind: input, shape index: {}]   ;;  %s1569_s8 = inlined_call_operand.vmem [shape: bf16[32,256], index: 8, kind: output, shape index: {0}]   ;;  %s1570_s7 = inlined_call_operand.vmem [shape: f32[1,64], index: 7, kind: input, shape index: {}]   ;;  %s1571_s9 = inlined_call_operand.vmem [shape: bf16[32,64], index: 9, kind: output, shape index: {1}]  }
   0x1   :  { %v1168_v0 = vld [vmem:[%s1562_s2 + $0x40] sm:$0xff]   ;;  %v1172_v4 = vld [vmem:[%s1562_s2 + $0x48] sm:$0xff]   ;;  %v1176_v8 = vld [vmem:[%s1562_s2 + $0x50] sm:$0xff]  }
   0x2   :  { %v1169_v1 = vld [vmem:[%s1562_s2 + $0xc0] sm:$0xff]   ;;  %1065 = vmatprep.subr.bf16.mxu0 %v1168_v0  ;;  %v1173_v5 = vld [vmem:[%s1562_s2 + $0xc8] sm:$0xff]   ;;  %v1177_v9 = vld [vmem:[%s1562_s2 + $0xd0] sm:$0xff]  }
   0x3   :  { %v1170_v2 = vld [vmem:[%s1562_s2] sm:$0xff]   ;;  %1093 = vmatprep.subr.bf16.mxu1 %v1169_v1  ;;  %v1174_v6 = vld [vmem:[%s1562_s2 + $0x8] sm:$0xff]   ;;  %v1178_v10 = vld [vmem:[%s1562_s2 + $0x10] sm:$0xff]  }
   0x4   :  { %v1171_v3 = vld [vmem:[%s1562_s2 + $0x80] sm:$0xff]   ;;  %1066 = vmatpush3.bf16.msra.mxu0 %v1170_v2  ;;  %v1175_v7 = vld [vmem:[%s1562_s2 + $0x88] sm:$0xff]   ;;  %v1179_v11 = vld [vmem:[%s1562_s2 + $0x90] sm:$0xff]  }
   0x5   :  { %1094 = vmatpush3.bf16.msra.mxu1 %v1171_v3  ;;  %1067 = vmatprep.subr.bf16.mxu0 %v1172_v4  ;;  %v1180_v12 = vld [vmem:[%s1562_s2 + $0x58] sm:$0xff]   ;;  %v1184_v16 = vld [vmem:[%s1562_s2 + $0x60] sm:$0xff]   ;;  %v1188_v20 = vld [vmem:[%s1562_s2 + $0x68] sm:$0xff]  }
   0x6   :  { %1095 = vmatprep.subr.bf16.mxu1 %v1173_v5  ;;  %v1181_v13 = vld [vmem:[%s1562_s2 + $0xd8] sm:$0xff]   ;;  %v1185_v17 = vld [vmem:[%s1562_s2 + $0xe0] sm:$0xff]   ;;  %v1189_v21 = vld [vmem:[%s1562_s2 + $0xe8] sm:$0xff]  }
   0x7   :  { %v1182_v14 = vld [vmem:[%s1562_s2 + $0x18] sm:$0xff]   ;;  %v1186_v18 = vld [vmem:[%s1562_s2 + $0x20] sm:$0xff]   ;;  %v1190_v22 = vld [vmem:[%s1562_s2 + $0x28] sm:$0xff]  }
   0x8   :  { %1068 = vmatpush3.bf16.msra.mxu0 %v1174_v6  ;;  %v1183_v15 = vld [vmem:[%s1562_s2 + $0x98] sm:$0xff]   ;;  %v1187_v19 = vld [vmem:[%s1562_s2 + $0xa0] sm:$0xff]   ;;  %v1191_v23 = vld [vmem:[%s1562_s2 + $0xa8] sm:$0xff]  }
   0x9   :  { %1096 = vmatpush3.bf16.msra.mxu1 %v1175_v7  ;;  %1069 = vmatprep.subr.bf16.mxu0 %v1176_v8  ;;  %v1192_v24 = vld [vmem:[%s1562_s2 + $0x70] sm:$0xff]   ;;  %v1196_v28 = vld [vmem:[%s1562_s2 + $0x78] sm:$0xff]   ;;  %v1205_v35 = vld [vmem:[%s1563_s0 + $0xc] ss:$20 sps:$4 sm:$0xff]  }
   0xa   :  { %1097 = vmatprep.subr.bf16.mxu1 %v1177_v9  ;;  %v1193_v25 = vld [vmem:[%s1562_s2 + $0xf0] sm:$0xff]   ;;  %v1197_v29 = vld [vmem:[%s1562_s2 + $0xf8] sm:$0xff]   ;;  %v1206_v36 = vld [vmem:[%s1562_s2 + $0x100] sm:$0xff]   ;;  %477 = vmatprep.mubr.bf16.mxu1 %v1205_v35 }
   0xb   :  { %v1194_v26 = vld [vmem:[%s1562_s2 + $0x30] sm:$0xff]   ;;  %v1198_v30 = vld [vmem:[%s1562_s2 + $0x38] sm:$0xff]   ;;  %v1207_v37 = vld [vmem:[%s1562_s2 + $0x108] sm:$0xff]  }
   0xc   :  { %1070 = vmatpush3.bf16.msra.mxu0 %v1178_v10  ;;  %v1195_v27 = vld [vmem:[%s1562_s2 + $0xb0] sm:$0xff]   ;;  %v1199_v31 = vld [vmem:[%s1562_s2 + $0xb8] sm:$0xff]   ;;  %v1208_v38 = vld [vmem:[%s1563_s0 + $0x2c] ss:$20 sps:$4 sm:$0xff]  }
   0xd   :  { %1098 = vmatpush3.bf16.msra.mxu1 %v1179_v11  ;;  %1071 = vmatprep.subr.bf16.mxu0 %v1180_v12  ;;  %v1200_v32 = vld [vmem:[%s1563_s0] ss:$20 sps:$4 sm:$0xff]   ;;  %v1202_v33 = vld [vmem:[%s1563_s0 + $0x4] ss:$20 sps:$4 sm:$0xff]   ;;  %v1203_v34 = vld [vmem:[%s1563_s0 + $0x8] ss:$20 sps:$4 sm:$0xff]  }
   0xe   :  { %1099 = vmatprep.subr.bf16.mxu1 %v1181_v13  ;;  %428 = vmatprep.mubr.bf16.mxu0 %v1202_v33  ;;  %v1210_v39 = vld [vmem:[%s1563_s0 + $0x34] ss:$20 sps:$4 sm:$0xff]   ;;  %v1213_v42 = vld [vmem:[%s1563_s0 + $0x30] ss:$20 sps:$4 sm:$0xff]   ;;  %v1215_v44 = vld [vmem:[%s1562_s2 + $0x118] sm:$0xff]  }
   0xf   :  { %v1212_v40 = vld [vmem:[%s1563_s0 + $0x28] ss:$20 sps:$4 sm:$0xff]   ;;  %v1214_v41 = vld [vmem:[%s1562_s2 + $0x110] sm:$0xff]   ;;  %v1217_v45 = vld [vmem:[%s1563_s0 + $0x38] ss:$20 sps:$4 sm:$0xff]  }
  0x10   :  { %1072 = vmatpush3.bf16.msra.mxu0 %v1182_v14  ;;  %v1216_v43 = vld [vmem:[%s1563_s0 + $0x10] ss:$20 sps:$4 sm:$0xff]   ;;  %v1218_v47 = vld [vmem:[%s1564_s4] ss:$8 sps:$4 sm:$0xff]   ;;  %v1223_v49 = vld [vmem:[%s1564_s4 + $0x14] ss:$8 sps:$4 sm:$0xff]  }
  0x11   :  { %1100 = vmatpush3.bf16.msra.mxu1 %v1183_v15  ;;  %1073 = vmatprep.subr.bf16.mxu0 %v1184_v16  ;;  %v1220_v46 = vld [vmem:[%s1564_s4 + $0x4] ss:$8 sps:$4 sm:$0xff]   ;;  %v1221_v48 = vld [vmem:[%s1564_s4 + $0x10] ss:$8 sps:$4 sm:$0xff]   ;;  %v1224_v51 = vld [vmem:[%s1564_s4 + $0x20] ss:$8 sps:$4 sm:$0xff]  }
  0x12   :  { %1101 = vmatprep.subr.bf16.mxu1 %v1185_v17  ;;  %v1226_v50 = vld [vmem:[%s1564_s4 + $0x24] ss:$8 sps:$4 sm:$0xff]   ;;  %v1229_v52 = vld [vmem:[%s1564_s4 + $0x34] ss:$8 sps:$4 sm:$0xff]   ;;  %v1227_v53 = vld [vmem:[%s1564_s4 + $0x30] ss:$8 sps:$4 sm:$0xff]  }
  0x13   :  { %v1230_v55 = vld [vmem:[%s1565_s6 + $0x40] sm:$0xff]   ;;  %v1232_v57 = vld [vmem:[%s1565_s6 + $0x48] sm:$0xff]   ;;  %v1234_v59 = vld [vmem:[%s1565_s6 + $0x50] sm:$0xff]  }
  0x14   :  { %1074 = vmatpush3.bf16.msra.mxu0 %v1186_v18  ;;  %v1231_v56 = vld [vmem:[%s1565_s6] sm:$0xff]   ;;  %v1233_v58 = vld [vmem:[%s1565_s6 + $0x8] sm:$0xff]   ;;  %v1235_v60 = vld [vmem:[%s1565_s6 + $0x10] sm:$0xff]  }
  0x15   :  { %1102 = vmatpush3.bf16.msra.mxu1 %v1187_v19  ;;  %1075 = vmatprep.subr.bf16.mxu0 %v1188_v20  ;;  %v1236_v61 = vld [vmem:[%s1565_s6 + $0x58] sm:$0xff]   ;;  %v1238_v63 = vld [vmem:[%s1565_s6 + $0x60] sm:$0xff]  }
  0x16   :  { %1103 = vmatprep.subr.bf16.mxu1 %v1189_v21  ;;  %v1237_v62 = vld [vmem:[%s1565_s6 + $0x18] sm:$0xff]   ;;  %v1239_v0 = vld [vmem:[%s1565_s6 + $0x20] sm:$0xff]  }
  0x17   :  { %v973_v3 = vld [vmem:[%s1566_s3] ss:$0 sm:$0xff] }
  0x18   :  { %1076 = vmatpush3.bf16.msra.mxu0 %v1190_v22 }
  0x19   :  { %1104 = vmatpush3.bf16.msra.mxu1 %v1191_v23  ;;  %1077 = vmatprep.subr.bf16.mxu0 %v1192_v24 }
  0x1a   :  { %1105 = vmatprep.subr.bf16.mxu1 %v1193_v25 }
  0x1c   :  { %1078 = vmatpush3.bf16.msra.mxu0 %v1194_v26 }
  0x1d   :  { %1106 = vmatpush3.bf16.msra.mxu1 %v1195_v27  ;;  %1079 = vmatprep.subr.bf16.mxu0 %v1196_v28 }
  0x1e   :  { %1107 = vmatprep.subr.bf16.mxu1 %v1197_v29 }
  0x20   :  { %1080 = vmatpush3.bf16.msra.mxu0 %v1198_v30 }
  0x21   :  { %1108 = vmatpush3.bf16.msra.mxu1 %v1199_v31  ;;  %1127 = vmatprep.subr.bf16.mxu0 %v1230_v55  ;;  %v1242_v55 = vld [vmem:[%s1565_s6 + $0x70] sm:$0xff]  }
  0x22   :  { %1155 = vmatprep.subr.bf16.mxu1 %v1206_v36 }
  0x23   :  { %429 = vmatmul.mubr.bf16.vlgmr.msra.gmra.mrb[0].mxu0 %v1200_v32 }
  0x24   :  { %478 = vmatmul.mubr.bf16.vlgmr.msra.gmra.mrb[0].mxu1 %v1203_v34  ;;  %436 = vmatprep.mubr.bf16.mxu0 %v1208_v38 }
  0x25   :  { %1156 = vmatpush3.bf16.msra.mxu1 %v1206_v36  ;;  %485 = vmatprep.mubr.bf16.mxu1 %v1210_v39 }
  0x26   :  { %1157 = vmatprep.subr.bf16.mxu1 %v1207_v37  ;;  %1128 = vmatpush3.bf16.msra.mxu0 %v1231_v56  ;;  %v1244_v56 = vld [vmem:[%s1565_s6 + $0x78] sm:$0xff]  }
  0x27   :  { %1129 = vmatprep.subr.bf16.mxu0 %v1232_v57  ;;  %v1245_v57 = vld [vmem:[%s1565_s6 + $0x38] sm:$0xff]  }
  0x29   :  { %1158 = vmatpush3.bf16.msra.mxu1 %v1207_v37 }
  0x2a   :  { %1159 = vmatprep.subr.bf16.mxu1 %v1214_v41  ;;  %1130 = vmatpush3.bf16.msra.mxu0 %v1233_v58  ;;  %v567_v58 = vlaneseq }
  0x2b   :  { %437 = vmatmul.mubr.bf16.gmra.mrb[4].mxu0 %v1212_v40  ;;  %1131 = vmatprep.subr.bf16.mxu0 %v1234_v59 }
  0x2c   :  { %486 = vmatmul.mubr.bf16.gmra.mrb[4].mxu1 %v1213_v42  ;;  %v568_v59 = vshrl.u32 %v567_v58, 7 }
  0x2d   :  { %1160 = vmatpush3.bf16.msra.mxu1 %v1214_v41  ;;  %1163 = vmatprep.mubr.msk.bf16.mxu1 %vm389_vm0, %v1216_v43 }
  0x2e   :  { %1161 = vmatprep.subr.bf16.mxu1 %v1215_v44  ;;  %1132 = vmatpush3.bf16.msra.mxu0 %v1235_v60  ;;  %v569_v60 = vsub.s32 0, %v568_v59 }
  0x2f   :  { %1133 = vmatprep.subr.bf16.mxu0 %v1236_v61  ;;  %v565_v61 = vld [vmem:[%s1567_s5] sm:$0x3] }
  0x31   :  { %1162 = vmatpush3.bf16.msra.mxu1 %v1215_v44 }
  0x32   :  { %623 = vmatprep.subr.bf16.mxu1 %v1220_v46  ;;  %1134 = vmatpush3.bf16.msra.mxu0 %v1237_v62  ;;  %v573_v62 = vsub.s32 1, %v568_v59 }
  0x33   :  { %1135 = vmatprep.subr.bf16.mxu0 %v1238_v63  ;;  %v676_v63 = vld [vmem:[%s1568_s1] sm:$0xff] }
  0x34   :  { %1164 = vmatmul.mubr.msk.bf16.vlgmr.msra.gmra.mrb[8].mxu1 %vm389_vm0, %v1217_v45 }
  0x35   :  { %624 = vmatpush1.bf16.msra.mxu1 %v1218_v47  ;;  %655 = vmatprep.mubr.bf16.mxu1 %v1246_v54 }
  0x36   :  { %625 = vmatprep.subr.bf16.mxu1 %v1223_v49  ;;  %1136 = vmatpush3.bf16.msra.mxu0 %v1239_v0  ;;  %v570_v0 = vrot.slane %v565_v61, %v569_v60 }
  0x39   :  { %626 = vmatpush1.bf16.msra.mxu1 %v1221_v48 }
  0x3a   :  { %627 = vmatprep.subr.bf16.mxu1 %v1226_v50 }
  0x3d   :  { %628 = vmatpush1.bf16.msra.mxu1 %v1224_v51 }
  0x3e   :  { %629 = vmatprep.subr.bf16.mxu1 %v1229_v52  ;;  %v1240_v52 = vld [vmem:[%s1565_s6 + $0x68] sm:$0xff]  }
  0x3f   :  { %1137 = vmatprep.subr.bf16.mxu0 %v1240_v52 }
  0x41   :  { %630 = vmatpush1.bf16.msra.mxu1 %v1227_v53  ;;  %v1241_v53 = vld [vmem:[%s1565_s6 + $0x28] sm:$0xff]  }
  0x42   :  { %1138 = vmatpush3.bf16.msra.mxu0 %v1241_v53 }
  0x43   :  { %1139 = vmatprep.subr.bf16.mxu0 %v1242_v55 }
  0xf6   :  { %v1081_v1 = vpop.f32.mrb[0].mxu0 }
  0xf7   :  { %v1109_v2 = vpop.f32.mrb[0].mxu1  ;;  %v1082_v4 = vpop.f32.mrb[1].mxu0 }
  0xf8   :  { %v1083_v5 = vadd.f32 %v1082_v4, %v1081_v1  ;;  %v1110_v6 = vpop.f32.mrb[1].mxu1  ;;  %v1084_v7 = vpop.f32.mrb[2].mxu0  ;;  %v574_v1 = vrot.slane %v565_v61, %v573_v62  ;;  %v1036_v62 = vld [vmem:[%s1570_s7] ss:$0 sm:$0xff] }
  0xf9   :  { %v1111_v8 = vadd.f32 %v1110_v6, %v1109_v2  ;;  %v1112_v9 = vpop.f32.mrb[2].mxu1  ;;  %v1085_v10 = vpop.f32.mrb[3].mxu0  ;;  %v677_v2 = vld [vmem:[%s1568_s1 + $0x8] sm:$0xff] }
  0xfa   :  { %v431_v11 = vadd.f32 %v1083_v5, %v973_v3  ;;  %v1086_v12 = vadd.f32 %v1085_v10, %v1084_v7  ;;  %v1113_v13 = vpop.f32.mrb[3].mxu1  ;;  %v681_v5 = vunpack.c.h.bf16 %v676_v63 }
  0xfb   :  { %v1114_v14 = vadd.f32 %v1113_v13, %v1112_v9 }
  0xfc   :  { %v434_v15 = vadd.f32 %v1086_v12, %v973_v3  ;;  %v480_v16 = vadd.f32 %v1111_v8, %v431_v11  ;;  %v682_v8 = vunpack.c.l.bf16 %v677_v2  ;;  %v683_v11 = vunpack.c.h.bf16 %v677_v2 }
  0xfe   :  { %v1087_v17 = vpop.f32.mrb[4].mxu0  ;;  %v483_v18 = vadd.f32 %v1114_v14, %v434_v15 }
  0xff   :  { %v1115_v19 = vpop.f32.mrb[4].mxu1  ;;  %v1088_v20 = vpop.f32.mrb[5].mxu0 }
 0x100   :  { %v1089_v21 = vadd.f32 %v1088_v20, %v1087_v17  ;;  %v1116_v22 = vpop.f32.mrb[5].mxu1  ;;  %v1090_v23 = vpop.f32.mrb[6].mxu0  ;;  %v678_v17 = vld [vmem:[%s1568_s1 + $0x10] sm:$0xff] }
 0x101   :  { %v1117_v24 = vadd.f32 %v1116_v22, %v1115_v19  ;;  %v1118_v25 = vpop.f32.mrb[6].mxu1  ;;  %v1091_v26 = vpop.f32.mrb[7].mxu0  ;;  %v679_v22 = vld [vmem:[%s1568_s1 + $0x18] sm:$0xff] }
 0x102   :  { %v439_v27 = vadd.f32 %v1089_v21, %v973_v3  ;;  %v1092_v28 = vadd.f32 %v1091_v26, %v1090_v23  ;;  %v1119_v29 = vpop.f32.mrb[7].mxu1 }
 0x103   :  { %v1120_v30 = vadd.f32 %v1119_v29, %v1118_v25 }
 0x104   :  { %v442_v31 = vadd.f32 %v1092_v28, %v973_v3  ;;  %v488_v32 = vadd.f32 %v1117_v24, %v439_v27  ;;  %v680_v3 = vunpack.c.l.bf16 %v676_v63  ;;  %v684_v24 = vunpack.c.l.bf16 %v678_v17 }
 0x105   :  { %v685_v28 = vunpack.c.h.bf16 %v678_v17 }
 0x106   :  { %v491_v33 = vadd.f32 %v1120_v30, %v442_v31 }
 0x107   :  { %v1165_v34 = vpop.f32.mrb[8].mxu1 }
 0x108   :  { %v537_v35 = vadd.f32 %v1165_v34, %v488_v32  ;;  %v528_v36 = vpop.f32.mrb[9].mxu1  ;;  %v686_v32 = vunpack.c.l.bf16 %v679_v22 }
 0x109   :  { %v529_v37 = vadd.f32 %v528_v36, %v480_v16  ;;  %v1166_v38 = vpop.f32.mrb[10].mxu1 }
 0x10a   :  { %v549_v39 = vmul.f32 0.01, %v537_v35  ;;  %v540_v40 = vadd.f32 %v1166_v38, %v491_v33  ;;  %v531_v41 = vpop.f32.mrb[11].mxu1  ;;  %vm545_vm1 = vcmp.ge.f32.partialorder %v537_v35, 0.0 }
 0x10b   :  { %v547_v42 = vmul.f32 0.01, %v529_v37  ;;  %v532_v43 = vadd.f32 %v531_v41, %v483_v18  ;;  %vm543_vm2 = vcmp.ge.f32.partialorder %v529_v37, 0.0 }
 0x10c   :  { %vm546_vm3 = vcmp.ge.f32.partialorder %v540_v40, 0.0  ;;  %v550_v44 = vmul.f32 0.01, %v540_v40  ;;  %v553_v46 = vsel %vm545_vm1, %v537_v35, %v549_v39 }
 0x10d   :  { %vm544_vm4 = vcmp.ge.f32.partialorder %v532_v43, 0.0  ;;  %v548_v45 = vmul.f32 0.01, %v532_v43  ;;  %v551_v48 = vsel %vm543_vm2, %v529_v37, %v547_v42  ;;  %v687_v37 = vunpack.c.h.bf16 %v679_v22 }
 0x10e   :  { %v554_v47 = vsel %vm546_vm3, %v540_v40, %v550_v44 }
 0x10f   :  { %v556_v49 = vpack.c.bf16 %v554_v47, %v553_v46  ;;  %v552_v50 = vsel %vm544_vm4, %v532_v43, %v548_v45 }
 0x110   :  { %v555_v51 = vpack.c.bf16 %v552_v50, %v551_v48 }
 0x112   :  { %1030 = vmatmul.mubr.msk.bf16.vlgmr.msra.gmra.mrb[12].mxu1 %vm389_vm0, %v555_v51 }
 0x113   :  { %665 = vmatprep.mubr.bf16.mxu1 %v1246_v54  ;;  %v1243_v54 = vld [vmem:[%s1565_s6 + $0x30] sm:$0xff]  }
 0x114   :  { %1140 = vmatpush3.bf16.msra.mxu0 %v1243_v54 }
 0x115   :  { %1141 = vmatprep.subr.bf16.mxu0 %v1244_v56 }
 0x118   :  { %1142 = vmatpush3.bf16.msra.mxu0 %v1245_v57 }
 0x11a   :  { %1031 = vmatmul.mubr.msk.bf16.gmra.mrb[16].mxu1 %vm389_vm0, %v556_v49 }
 0x1e5   :  { %v657_v4 = vpop.f32.mrb[12].mxu1 }
 0x1e6   :  { %v658_v6 = vadd.f32 %v657_v4, %v570_v0  ;;  %v659_v7 = vpop.f32.mrb[13].mxu1 }
 0x1e7   :  { %v660_v9 = vadd.f32 %v659_v7, %v574_v1  ;;  %v661_v10 = vpop.f32.mrb[14].mxu1 }
 0x1e8   :  { %v688_v12 = vadd.f32 %v680_v3, %v658_v6  ;;  %v662_v13 = vadd.f32 %v661_v10, %v570_v0  ;;  %v663_v14 = vpop.f32.mrb[15].mxu1 }
 0x1e9   :  { %v689_v15 = vadd.f32 %v681_v5, %v660_v9  ;;  %v664_v16 = vadd.f32 %v663_v14, %v574_v1 }
 0x1ea   :  { %vm696_vm5 = vcmp.ge.f32.partialorder %v688_v12, 0.0  ;;  %v704_v18 = vmul.f32 0.01, %v688_v12  ;;  %v690_v19 = vadd.f32 %v682_v8, %v662_v13 }
 0x1eb   :  { %vm697_vm6 = vcmp.ge.f32.partialorder %v689_v15, 0.0  ;;  %v705_v20 = vmul.f32 0.01, %v689_v15  ;;  %v691_v21 = vadd.f32 %v683_v11, %v664_v16 }
 0x1ec   :  { %vm698_vm7 = vcmp.ge.f32.partialorder %v690_v19, 0.0  ;;  %v706_v23 = vmul.f32 0.01, %v690_v19  ;;  %v712_v25 = vsel %vm696_vm5, %v688_v12, %v704_v18 }
 0x1ed   :  { %vm699_vm8 = vcmp.ge.f32.partialorder %v691_v21, 0.0  ;;  %v707_v26 = vmul.f32 0.01, %v691_v21  ;;  %v667_v27 = vpop.f32.mrb[16].mxu1  ;;  %v713_v29 = vsel %vm697_vm6, %v689_v15, %v705_v20 }
 0x1ee   :  { %v668_v30 = vadd.f32 %v667_v27, %v570_v0  ;;  %v669_v31 = vpop.f32.mrb[17].mxu1  ;;  %v714_v33 = vsel %vm698_vm7, %v690_v19, %v706_v23  ;;  %v1057_v34 = vpack.c.bf16 %v713_v29, %v712_v25 }
 0x1ef   :  { %v670_v35 = vadd.f32 %v669_v31, %v574_v1  ;;  %v671_v36 = vpop.f32.mrb[18].mxu1  ;;  %v715_v38 = vsel %vm699_vm8, %v691_v21, %v707_v26  ;;  %v720_v39 = vpack.c.bf16 %v714_v33, %v712_v25 }
 0x1f0   :  { %v692_v40 = vadd.f32 %v684_v24, %v668_v30  ;;  %v672_v41 = vadd.f32 %v671_v36, %v570_v0  ;;  %v673_v42 = vpop.f32.mrb[19].mxu1  ;;  %v721_v43 = vpack.c.bf16 %v715_v38, %v713_v29  ;;  %v1058_v44 = vpack.c.bf16 %v715_v38, %v714_v33  ;;  %744 = vst [vmem:[%s1569_s8] sm:$0xff] %v1057_v34 }
 0x1f1   :  { %v693_v45 = vadd.f32 %v685_v28, %v670_v35  ;;  %v674_v46 = vadd.f32 %v673_v42, %v574_v1 }
 0x1f2   :  { %vm700_vm9 = vcmp.ge.f32.partialorder %v692_v40, 0.0  ;;  %v708_v47 = vmul.f32 0.01, %v692_v40  ;;  %v694_v48 = vadd.f32 %v686_v32, %v672_v41  ;;  %745 = vst [vmem:[%s1569_s8 + $0x8] sm:$0xff] %v1058_v44  ;;  %915 = vmatprep.mubr.bf16.mxu0 %v721_v43 }
 0x1f3   :  { %vm701_vm10 = vcmp.ge.f32.partialorder %v693_v45, 0.0  ;;  %v709_v49 = vmul.f32 0.01, %v693_v45  ;;  %v695_v50 = vadd.f32 %v687_v37, %v674_v46  ;;  %916 = vmatmul.mubr.bf16.vlgmr.msra.gmra.mrb[8].mxu0 %v720_v39 }
 0x1f4   :  { %vm702_vm11 = vcmp.ge.f32.partialorder %v694_v48, 0.0  ;;  %v710_v51 = vmul.f32 0.01, %v694_v48  ;;  %v716_v52 = vsel %vm700_vm9, %v692_v40, %v708_v47 }
 0x1f5   :  { %vm703_vm12 = vcmp.ge.f32.partialorder %v695_v50, 0.0  ;;  %v711_v53 = vmul.f32 0.01, %v695_v50  ;;  %v717_v55 = vsel %vm701_vm10, %v693_v45, %v709_v49 }
 0x1f6   :  { %v718_v54 = vsel %vm702_vm11, %v694_v48, %v710_v51  ;;  %v1059_v56 = vpack.c.bf16 %v717_v55, %v716_v52 }
 0x1f7   :  { %v719_v57 = vsel %vm703_vm12, %v695_v50, %v711_v53  ;;  %v722_v58 = vpack.c.bf16 %v718_v54, %v716_v52 }
 0x1f8   :  { %v723_v59 = vpack.c.bf16 %v719_v57, %v717_v55  ;;  %v1060_v60 = vpack.c.bf16 %v719_v57, %v718_v54  ;;  %746 = vst [vmem:[%s1569_s8 + $0x10] sm:$0xff] %v1059_v56 }
 0x1fa   :  { %923 = vmatprep.mubr.bf16.mxu0 %v723_v59  ;;  %747 = vst [vmem:[%s1569_s8 + $0x18] sm:$0xff] %v1060_v60 }
 0x1fb   :  { %924 = vmatmul.mubr.bf16.gmra.mrb[12].mxu0 %v722_v58 }
 0x2c6   :  { %v1143_v61 = vpop.f32.mrb[8].mxu0 }
 0x2c7   :  { %v1144_v63 = vpop.f32.mrb[9].mxu0 }
 0x2c8   :  { %v1145_v0 = vadd.f32 %v1144_v63, %v1143_v61  ;;  %v1146_v1 = vpop.f32.mrb[10].mxu0 }
 0x2c9   :  { %v1147_v2 = vpop.f32.mrb[11].mxu0 }
 0x2ca   :  { %v918_v3 = vadd.f32 %v1145_v0, %v1036_v62  ;;  %v1148_v4 = vadd.f32 %v1147_v2, %v1146_v1 }
 0x2cc   :  { %vm932_vm13 = vcmp.ge.f32.partialorder %v918_v3, 0.0  ;;  %v936_v5 = vmul.f32 0.01, %v918_v3  ;;  %v921_v6 = vadd.f32 %v1148_v4, %v1036_v62 }
 0x2ce   :  { %v940_v7 = vsel %vm932_vm13, %v918_v3, %v936_v5  ;;  %vm933_vm15 = vcmp.ge.f32.partialorder %v921_v6, 0.0  ;;  %v937_v8 = vmul.f32 0.01, %v921_v6  ;;  %v1149_v9 = vpop.f32.mrb[12].mxu0 }
 0x2cf   :  { %v1061_v10 = vpack.c.bf16 %v940_v7, %v940_v7  ;;  %v1150_v11 = vpop.f32.mrb[13].mxu0 }
 0x2d0   :  { %v941_v12 = vsel %vm933_vm15, %v921_v6, %v937_v8  ;;  %v1151_v13 = vadd.f32 %v1150_v11, %v1149_v9  ;;  %v1152_v14 = vpop.f32.mrb[14].mxu0 }
 0x2d1   :  { %961 = vst.msk [vmem:[%s1571_s9] sm:$0xf] %vm960_vm14, %v1061_v10  ;;  %v1062_v15 = vpack.c.bf16 %v941_v12, %v941_v12  ;;  %v1153_v16 = vpop.f32.mrb[15].mxu0 }
 0x2d2   :  { %v926_v17 = vadd.f32 %v1151_v13, %v1036_v62  ;;  %v1154_v18 = vadd.f32 %v1153_v16, %v1152_v14 }
 0x2d3   :  { %962 = vst.msk [vmem:[%s1571_s9 + $0x4] sm:$0xf] %vm960_vm14, %v1062_v15 }
 0x2d4   :  { %vm934_vm0 = vcmp.ge.f32.partialorder %v926_v17, 0.0  ;;  %v938_v19 = vmul.f32 0.01, %v926_v17  ;;  %v929_v20 = vadd.f32 %v1154_v18, %v1036_v62 }
 0x2d6   :  { %v942_v21 = vsel %vm934_vm0, %v926_v17, %v938_v19  ;;  %vm935_vm1 = vcmp.ge.f32.partialorder %v929_v20, 0.0  ;;  %v939_v22 = vmul.f32 0.01, %v929_v20 }
 0x2d7   :  { %v1063_v23 = vpack.c.bf16 %v942_v21, %v942_v21 }
 0x2d8   :  { %v943_v24 = vsel %vm935_vm1, %v929_v20, %v939_v22 }
 0x2d9   :  { %963 = vst.msk [vmem:[%s1571_s9 + $0x8] sm:$0xf] %vm960_vm14, %v1063_v23  ;;  %v1064_v25 = vpack.c.bf16 %v943_v24, %v943_v24 }
 0x2db   :  { %964 = vst.msk [vmem:[%s1571_s9 + $0xc] sm:$0xf] %vm960_vm14, %v1064_v25 }

// kernel: resnet_forward.25
= control target key start
LH: loop header
LB: loop body
LE: loop exit
PB: predicated region body
PF: predicated region fallthrough
CT: control target
= control target key end

     0   :  { %vm384_vm0 = vcmask 523264   ;;  %v1003_v54 = vmov 0   ;;  %vm716_vm13 = vcmask 261120   ;;  %s1239_s2 = inlined_call_operand.vmem [shape: bf16[576,64], index: 2, kind: input, shape index: {}]   ;;  %s1240_s0 = inlined_call_operand.vmem [shape: bf16[32,576], index: 0, kind: input, shape index: {}]   ;;  %s1241_s4 = inlined_call_operand.vmem [shape: bf16[64,256], index: 4, kind: input, shape index: {}]   ;;  %s1242_s3 = inlined_call_operand.vmem [shape: f32[1,64], index: 3, kind: input, shape index: {}]   ;;  %s1243_s5 = inlined_call_operand.vmem [shape: f32[1,256], index: 5, kind: input, shape index: {}]   ;;  %s1244_s1 = inlined_call_operand.vmem [shape: bf16[32,256], index: 1, kind: input, shape index: {}]   ;;  %s1245_s6 = inlined_call_operand.vmem [shape: f32[8,32], index: 6, kind: input, shape index: {}]   ;;  %s1246_s7 = inlined_call_operand.vmem [shape: f32[8,256], index: 7, kind: output, shape index: {}]  }
   0x1   :  { %v941_v0 = vld [vmem:[%s1239_s2 + $0x40] sm:$0xff]   ;;  %v945_v4 = vld [vmem:[%s1239_s2 + $0x48] sm:$0xff]   ;;  %v949_v8 = vld [vmem:[%s1239_s2 + $0x50] sm:$0xff]  }
   0x2   :  { %v942_v1 = vld [vmem:[%s1239_s2] sm:$0xff]   ;;  %857 = vmatprep.subr.bf16.mxu0 %v941_v0  ;;  %v946_v5 = vld [vmem:[%s1239_s2 + $0x8] sm:$0xff]   ;;  %v950_v9 = vld [vmem:[%s1239_s2 + $0x10] sm:$0xff]  }
   0x3   :  { %v943_v2 = vld [vmem:[%s1239_s2 + $0xc0] sm:$0xff]   ;;  %858 = vmatpush3.bf16.msra.mxu0 %v942_v1  ;;  %v947_v6 = vld [vmem:[%s1239_s2 + $0xc8] sm:$0xff]   ;;  %v951_v10 = vld [vmem:[%s1239_s2 + $0xd0] sm:$0xff]  }
   0x4   :  { %v944_v3 = vld [vmem:[%s1239_s2 + $0x80] sm:$0xff]   ;;  %885 = vmatprep.subr.bf16.mxu1 %v943_v2  ;;  %859 = vmatprep.subr.bf16.mxu0 %v945_v4  ;;  %v948_v7 = vld [vmem:[%s1239_s2 + $0x88] sm:$0xff]   ;;  %v952_v11 = vld [vmem:[%s1239_s2 + $0x90] sm:$0xff]  }
   0x5   :  { %886 = vmatpush3.bf16.msra.mxu1 %v944_v3  ;;  %v953_v12 = vld [vmem:[%s1239_s2 + $0x58] sm:$0xff]   ;;  %v957_v16 = vld [vmem:[%s1239_s2 + $0x60] sm:$0xff]   ;;  %v961_v20 = vld [vmem:[%s1239_s2 + $0x68] sm:$0xff]  }
   0x6   :  { %887 = vmatprep.subr.bf16.mxu1 %v947_v6  ;;  %v954_v13 = vld [vmem:[%s1239_s2 + $0x18] sm:$0xff]   ;;  %v958_v17 = vld [vmem:[%s1239_s2 + $0x20] sm:$0xff]   ;;  %v962_v21 = vld [vmem:[%s1239_s2 + $0x28] sm:$0xff]  }
   0x7   :  { %860 = vmatpush3.bf16.msra.mxu0 %v946_v5  ;;  %v955_v14 = vld [vmem:[%s1239_s2 + $0xd8] sm:$0xff]   ;;  %v959_v18 = vld [vmem:[%s1239_s2 + $0xe0] sm:$0xff]   ;;  %v963_v22 = vld [vmem:[%s1239_s2 + $0xe8] sm:$0xff]  }
   0x8   :  { %861 = vmatprep.subr.bf16.mxu0 %v949_v8  ;;  %v956_v15 = vld [vmem:[%s1239_s2 + $0x98] sm:$0xff]   ;;  %v960_v19 = vld [vmem:[%s1239_s2 + $0xa0] sm:$0xff]   ;;  %v964_v23 = vld [vmem:[%s1239_s2 + $0xa8] sm:$0xff]  }
   0x9   :  { %888 = vmatpush3.bf16.msra.mxu1 %v948_v7  ;;  %v965_v24 = vld [vmem:[%s1239_s2 + $0x70] sm:$0xff]   ;;  %v969_v28 = vld [vmem:[%s1239_s2 + $0x78] sm:$0xff]   ;;  %v976_v34 = vld [vmem:[%s1239_s2 + $0x100] sm:$0xff]  }
   0xa   :  { %889 = vmatprep.subr.bf16.mxu1 %v951_v10  ;;  %v966_v25 = vld [vmem:[%s1239_s2 + $0x30] sm:$0xff]   ;;  %v970_v29 = vld [vmem:[%s1239_s2 + $0x38] sm:$0xff]   ;;  %v979_v36 = vld [vmem:[%s1240_s0 + $0xc] ss:$20 sps:$4 sm:$0xff]  }
   0xb   :  { %862 = vmatpush3.bf16.msra.mxu0 %v950_v9  ;;  %v967_v26 = vld [vmem:[%s1239_s2 + $0xf0] sm:$0xff]   ;;  %v971_v30 = vld [vmem:[%s1239_s2 + $0xf8] sm:$0xff]   ;;  %v980_v37 = vld [vmem:[%s1239_s2 + $0x108] sm:$0xff]   ;;  %472 = vmatprep.mubr.bf16.mxu1 %v979_v36 }
   0xc   :  { %863 = vmatprep.subr.bf16.mxu0 %v953_v12  ;;  %v968_v27 = vld [vmem:[%s1239_s2 + $0xb0] sm:$0xff]   ;;  %v974_v32 = vld [vmem:[%s1240_s0 + $0x4] ss:$20 sps:$4 sm:$0xff]   ;;  %v977_v35 = vld [vmem:[%s1240_s0 + $0x8] ss:$20 sps:$4 sm:$0xff]  }
   0xd   :  { %890 = vmatpush3.bf16.msra.mxu1 %v952_v11  ;;  %v972_v31 = vld [vmem:[%s1240_s0] ss:$20 sps:$4 sm:$0xff]   ;;  %v975_v33 = vld [vmem:[%s1239_s2 + $0xb8] sm:$0xff]   ;;  %423 = vmatprep.mubr.bf16.mxu0 %v974_v32  ;;  %v987_v42 = vld [vmem:[%s1240_s0 + $0x30] ss:$20 sps:$4 sm:$0xff]  }
   0xe   :  { %891 = vmatprep.subr.bf16.mxu1 %v955_v14  ;;  %v981_v38 = vld [vmem:[%s1240_s0 + $0x2c] ss:$20 sps:$4 sm:$0xff]   ;;  %v983_v39 = vld [vmem:[%s1240_s0 + $0x28] ss:$20 sps:$4 sm:$0xff]   ;;  %v984_v40 = vld [vmem:[%s1239_s2 + $0x110] sm:$0xff]  }
   0xf   :  { %864 = vmatpush3.bf16.msra.mxu0 %v954_v13  ;;  %v985_v41 = vld [vmem:[%s1240_s0 + $0x34] ss:$20 sps:$4 sm:$0xff]   ;;  %v988_v43 = vld [vmem:[%s1239_s2 + $0x118] sm:$0xff]   ;;  %v989_v44 = vld [vmem:[%s1240_s0 + $0x10] ss:$20 sps:$4 sm:$0xff]  }
  0x10   :  { %865 = vmatprep.subr.bf16.mxu0 %v957_v16  ;;  %v990_v45 = vld [vmem:[%s1240_s0 + $0x38] ss:$20 sps:$4 sm:$0xff]   ;;  %v991_v47 = vld [vmem:[%s1241_s4] ss:$8 sps:$4 sm:$0xff]   ;;  %v996_v48 = vld [vmem:[%s1241_s4 + $0x14] ss:$8 sps:$4 sm:$0xff]  }
  0x11   :  { %892 = vmatpush3.bf16.msra.mxu1 %v956_v15  ;;  %v993_v46 = vld [vmem:[%s1241_s4 + $0x4] ss:$8 sps:$4 sm:$0xff]   ;;  %v994_v49 = vld [vmem:[%s1241_s4 + $0x10] ss:$8 sps:$4 sm:$0xff]   ;;  %v997_v51 = vld [vmem:[%s1241_s4 + $0x20] ss:$8 sps:$4 sm:$0xff]  }
  0x12   :  { %893 = vmatprep.subr.bf16.mxu1 %v959_v18  ;;  %v999_v50 = vld [vmem:[%s1241_s4 + $0x24] ss:$8 sps:$4 sm:$0xff]   ;;  %v1002_v52 = vld [vmem:[%s1241_s4 + $0x34] ss:$8 sps:$4 sm:$0xff]   ;;  %v1000_v53 = vld [vmem:[%s1241_s4 + $0x30] ss:$8 sps:$4 sm:$0xff]  }
  0x13   :  { %866 = vmatpush3.bf16.msra.mxu0 %v958_v17  ;;  %v797_v56 = vld [vmem:[%s1242_s3] ss:$0 sm:$0xff] }
  0x14   :  { %867 = vmatprep.subr.bf16.mxu0 %v961_v20 }
  0x15   :  { %894 = vmatpush3.bf16.msra.mxu1 %v960_v19 }
  0x16   :  { %895 = vmatprep.subr.bf16.mxu1 %v963_v22 }
  0x17   :  { %868 = vmatpush3.bf16.msra.mxu0 %v962_v21 }
  0x18   :  { %869 = vmatprep.subr.bf16.mxu0 %v965_v24 }
  0x19   :  { %896 = vmatpush3.bf16.msra.mxu1 %v964_v23 }
  0x1a   :  { %897 = vmatprep.subr.bf16.mxu1 %v967_v26 }
  0x1b   :  { %870 = vmatpush3.bf16.msra.mxu0 %v966_v25 }
  0x1c   :  { %871 = vmatprep.subr.bf16.mxu0 %v969_v28 }
  0x1d   :  { %898 = vmatpush3.bf16.msra.mxu1 %v968_v27 }
  0x1e   :  { %899 = vmatprep.subr.bf16.mxu1 %v971_v30 }
  0x1f   :  { %872 = vmatpush3.bf16.msra.mxu0 %v970_v29 }
  0x20   :  { %919 = vmatprep.subr.bf16.mxu0 %v976_v34 }
  0x21   :  { %900 = vmatpush3.bf16.msra.mxu1 %v975_v33 }
  0x22   :  { %424 = vmatmul.mubr.bf16.vlgmr.msra.gmra.mrb[0].mxu0 %v972_v31  ;;  %618 = vmatprep.subr.bf16.mxu1 %v993_v46  ;;  %v560_v46 = vld [vmem:[%s1243_s5] sm:$0x3] }
  0x23   :  { %920 = vmatpush3.bf16.msra.mxu0 %v976_v34  ;;  %431 = vmatprep.mubr.bf16.mxu0 %v981_v38 }
  0x24   :  { %473 = vmatmul.mubr.bf16.vlgmr.msra.gmra.mrb[0].mxu1 %v977_v35  ;;  %921 = vmatprep.subr.bf16.mxu0 %v980_v37 }
  0x25   :  { %480 = vmatprep.mubr.bf16.mxu1 %v985_v41  ;;  %619 = vmatpush1.bf16.msra.mxu1 %v991_v47 }
  0x26   :  { %620 = vmatprep.subr.bf16.mxu1 %v996_v48  ;;  %v671_v48 = vld [vmem:[%s1244_s1] sm:$0xff] }
  0x27   :  { %922 = vmatpush3.bf16.msra.mxu0 %v980_v37 }
  0x28   :  { %923 = vmatprep.subr.bf16.mxu0 %v984_v40 }
  0x29   :  { %621 = vmatpush1.bf16.msra.mxu1 %v994_v49 }
  0x2a   :  { %432 = vmatmul.mubr.bf16.gmra.mrb[4].mxu0 %v983_v39  ;;  %622 = vmatprep.subr.bf16.mxu1 %v999_v50 }
  0x2b   :  { %927 = vmatprep.mubr.msk.bf16.mxu0 %vm384_vm0, %v989_v44  ;;  %924 = vmatpush3.bf16.msra.mxu0 %v984_v40 }
  0x2c   :  { %481 = vmatmul.mubr.bf16.gmra.mrb[4].mxu1 %v987_v42  ;;  %925 = vmatprep.subr.bf16.mxu0 %v988_v43  ;;  %v1004_v42 = vmov 0.0  }
  0x2d   :  { %623 = vmatpush1.bf16.msra.mxu1 %v997_v51  ;;  %650 = vmatprep.mubr.bf16.mxu1 %v1003_v54  ;;  %v672_v51 = vld [vmem:[%s1244_s1 + $0x8] sm:$0xff] }
  0x2e   :  { %624 = vmatprep.subr.bf16.mxu1 %v1002_v52  ;;  %v675_v52 = vunpack.c.l.bf16 %v671_v48 }
  0x2f   :  { %926 = vmatpush3.bf16.msra.mxu0 %v988_v43  ;;  %v562_v43 = vlaneseq }
  0x31   :  { %625 = vmatpush1.bf16.msra.mxu1 %v1000_v53  ;;  %v563_v44 = vshrl.u32 %v562_v43, 7 }
  0x32   :  { %928 = vmatmul.mubr.msk.bf16.vlgmr.msra.gmra.mrb[8].mxu0 %vm384_vm0, %v990_v45 }
  0x33   :  { %784 = vmatprep.mubr.f32.mxu0 %v1004_v42  ;;  %v564_v45 = vsub.s32 0, %v563_v44  ;;  %v568_v47 = vsub.s32 1, %v563_v44  ;;  %v715_v42 = vld [vmem:[%s1245_s6] sm:$0xff] }
  0x35   :  { %v565_v49 = vrot.slane %v560_v46, %v564_v45  ;;  %v569_v50 = vrot.slane %v560_v46, %v568_v47 }
  0xf5   :  { %v873_v55 = vpop.f32.mrb[0].mxu0 }
  0xf6   :  { %v874_v57 = vpop.f32.mrb[1].mxu0 }
  0xf7   :  { %v875_v58 = vadd.f32 %v874_v57, %v873_v55  ;;  %v876_v59 = vpop.f32.mrb[2].mxu0  ;;  %v901_v60 = vpop.f32.mrb[0].mxu1  ;;  %v677_v57 = vunpack.c.l.bf16 %v672_v51 }
  0xf8   :  { %v877_v61 = vpop.f32.mrb[3].mxu0  ;;  %v902_v0 = vpop.f32.mrb[1].mxu1 }
  0xf9   :  { %v426_v62 = vadd.f32 %v875_v58, %v797_v56  ;;  %v878_v63 = vadd.f32 %v877_v61, %v876_v59  ;;  %v903_v1 = vadd.f32 %v902_v0, %v901_v60  ;;  %v904_v2 = vpop.f32.mrb[2].mxu1  ;;  %v678_v60 = vunpack.c.h.bf16 %v672_v51 }
  0xfa   :  { %v905_v4 = vpop.f32.mrb[3].mxu1 }
  0xfb   :  { %v429_v3 = vadd.f32 %v878_v63, %v797_v56  ;;  %v906_v5 = vadd.f32 %v905_v4, %v904_v2  ;;  %v475_v6 = vadd.f32 %v903_v1, %v426_v62  ;;  %v673_v2 = vld [vmem:[%s1244_s1 + $0x10] sm:$0xff] }
  0xfd   :  { %v879_v7 = vpop.f32.mrb[4].mxu0  ;;  %v478_v9 = vadd.f32 %v906_v5, %v429_v3  ;;  %v674_v5 = vld [vmem:[%s1244_s1 + $0x18] sm:$0xff] }
  0xfe   :  { %v880_v8 = vpop.f32.mrb[5].mxu0 }
  0xff   :  { %v881_v10 = vadd.f32 %v880_v8, %v879_v7  ;;  %v882_v11 = vpop.f32.mrb[6].mxu0  ;;  %v907_v12 = vpop.f32.mrb[4].mxu1 }
 0x100   :  { %v883_v13 = vpop.f32.mrb[7].mxu0  ;;  %v908_v16 = vpop.f32.mrb[5].mxu1 }
 0x101   :  { %v434_v14 = vadd.f32 %v881_v10, %v797_v56  ;;  %v884_v15 = vadd.f32 %v883_v13, %v882_v11  ;;  %v909_v17 = vadd.f32 %v908_v16, %v907_v12  ;;  %v910_v18 = vpop.f32.mrb[6].mxu1  ;;  %v680_v12 = vunpack.c.h.bf16 %v673_v2 }
 0x102   :  { %v911_v20 = vpop.f32.mrb[7].mxu1  ;;  %v681_v13 = vunpack.c.l.bf16 %v674_v5 }
 0x103   :  { %v437_v19 = vadd.f32 %v884_v15, %v797_v56  ;;  %v912_v21 = vadd.f32 %v911_v20, %v910_v18  ;;  %v483_v22 = vadd.f32 %v909_v17, %v434_v14  ;;  %v682_v18 = vunpack.c.h.bf16 %v674_v5 }
 0x105   :  { %v929_v23 = vpop.f32.mrb[8].mxu0  ;;  %v486_v24 = vadd.f32 %v912_v21, %v437_v19 }
 0x106   :  { %v532_v25 = vadd.f32 %v929_v23, %v483_v22  ;;  %v523_v26 = vpop.f32.mrb[9].mxu0 }
 0x107   :  { %v524_v27 = vadd.f32 %v523_v26, %v475_v6  ;;  %v930_v28 = vpop.f32.mrb[10].mxu0 }
 0x108   :  { %v544_v29 = vmul.f32 0.01, %v532_v25  ;;  %v535_v30 = vadd.f32 %v930_v28, %v486_v24  ;;  %v526_v31 = vpop.f32.mrb[11].mxu0  ;;  %vm540_vm1 = vcmp.ge.f32.partialorder %v532_v25, 0.0 }
 0x109   :  { %v542_v32 = vmul.f32 0.01, %v524_v27  ;;  %v527_v33 = vadd.f32 %v526_v31, %v478_v9  ;;  %vm538_vm2 = vcmp.ge.f32.partialorder %v524_v27, 0.0  ;;  %v679_v9 = vunpack.c.l.bf16 %v673_v2 }
 0x10a   :  { %vm541_vm3 = vcmp.ge.f32.partialorder %v535_v30, 0.0  ;;  %v545_v34 = vmul.f32 0.01, %v535_v30  ;;  %v548_v36 = vsel %vm540_vm1, %v532_v25, %v544_v29 }
 0x10b   :  { %vm539_vm4 = vcmp.ge.f32.partialorder %v527_v33, 0.0  ;;  %v543_v35 = vmul.f32 0.01, %v527_v33  ;;  %v546_v38 = vsel %vm538_vm2, %v524_v27, %v542_v32 }
 0x10c   :  { %v549_v37 = vsel %vm541_vm3, %v535_v30, %v545_v34 }
 0x10d   :  { %v551_v39 = vpack.c.bf16 %v549_v37, %v548_v36  ;;  %v547_v40 = vsel %vm539_vm4, %v527_v33, %v543_v35 }
 0x10e   :  { %v550_v41 = vpack.c.bf16 %v547_v40, %v546_v38 }
 0x110   :  { %854 = vmatmul.mubr.msk.bf16.vlgmr.msra.gmra.mrb[8].mxu1 %vm384_vm0, %v550_v41 }
 0x111   :  { %660 = vmatprep.mubr.bf16.mxu1 %v1003_v54  ;;  %v676_v54 = vunpack.c.h.bf16 %v671_v48 }
 0x118   :  { %855 = vmatmul.mubr.msk.bf16.gmra.mrb[12].mxu1 %vm384_vm0, %v551_v39 }
 0x1e3   :  { %v652_v53 = vpop.f32.mrb[8].mxu1 }
 0x1e4   :  { %v653_v55 = vadd.f32 %v652_v53, %v565_v49  ;;  %v654_v56 = vpop.f32.mrb[9].mxu1 }
 0x1e5   :  { %v655_v58 = vadd.f32 %v654_v56, %v569_v50  ;;  %v656_v59 = vpop.f32.mrb[10].mxu1 }
 0x1e6   :  { %v683_v61 = vadd.f32 %v675_v52, %v653_v55  ;;  %v657_v62 = vadd.f32 %v656_v59, %v565_v49  ;;  %v658_v63 = vpop.f32.mrb[11].mxu1 }
 0x1e7   :  { %v684_v0 = vadd.f32 %v676_v54, %v655_v58  ;;  %v659_v1 = vadd.f32 %v658_v63, %v569_v50 }
 0x1e8   :  { %v699_v3 = vmul.f32 0.01, %v683_v61  ;;  %v685_v4 = vadd.f32 %v677_v57, %v657_v62  ;;  %vm691_vm5 = vcmp.ge.f32.partialorder %v683_v61, 0.0 }
 0x1e9   :  { %v700_v6 = vmul.f32 0.01, %v684_v0  ;;  %v686_v7 = vadd.f32 %v678_v60, %v659_v1  ;;  %vm692_vm6 = vcmp.ge.f32.partialorder %v684_v0, 0.0 }
 0x1ea   :  { %vm693_vm7 = vcmp.ge.f32.partialorder %v685_v4, 0.0  ;;  %v701_v8 = vmul.f32 0.01, %v685_v4  ;;  %v707_v14 = vsel %vm691_vm5, %v683_v61, %v699_v3 }
 0x1eb   :  { %vm694_vm8 = vcmp.ge.f32.partialorder %v686_v7, 0.0  ;;  %v702_v10 = vmul.f32 0.01, %v686_v7  ;;  %v662_v11 = vpop.f32.mrb[12].mxu1  ;;  %v708_v21 = vsel %vm692_vm6, %v684_v0, %v700_v6 }
 0x1ec   :  { %v709_v15 = vsel %vm693_vm7, %v685_v4, %v701_v8  ;;  %v663_v16 = vadd.f32 %v662_v11, %v565_v49  ;;  %v664_v17 = vpop.f32.mrb[13].mxu1 }
 0x1ed   :  { %v665_v19 = vadd.f32 %v664_v17, %v569_v50  ;;  %v666_v20 = vpop.f32.mrb[14].mxu1  ;;  %v710_v22 = vsel %vm694_vm8, %v686_v7, %v702_v10  ;;  %v933_v23 = vpack.c.bf16 %v709_v15, %v707_v14 }
 0x1ee   :  { %v687_v24 = vadd.f32 %v679_v9, %v663_v16  ;;  %v667_v25 = vadd.f32 %v666_v20, %v565_v49  ;;  %v668_v26 = vpop.f32.mrb[15].mxu1  ;;  %v931_v27 = vpack.c.bf16 %v710_v22, %v708_v21 }
 0x1ef   :  { %v688_v28 = vadd.f32 %v680_v12, %v665_v19  ;;  %v669_v29 = vadd.f32 %v668_v26, %v569_v50 }
 0x1f0   :  { %v703_v30 = vmul.f32 0.01, %v687_v24  ;;  %v689_v31 = vadd.f32 %v681_v13, %v667_v25  ;;  %932 = vmatprep.subr.bf16.mxu0 %v931_v27  ;;  %vm695_vm9 = vcmp.ge.f32.partialorder %v687_v24, 0.0 }
 0x1f1   :  { %v704_v32 = vmul.f32 0.01, %v688_v28  ;;  %v690_v33 = vadd.f32 %v682_v18, %v669_v29  ;;  %934 = vmatpush1.bf16.msra.mxu0 %v933_v23  ;;  %vm696_vm10 = vcmp.ge.f32.partialorder %v688_v28, 0.0 }
 0x1f2   :  { %vm697_vm11 = vcmp.ge.f32.partialorder %v689_v31, 0.0  ;;  %v705_v34 = vmul.f32 0.01, %v689_v31  ;;  %v711_v36 = vsel %vm695_vm9, %v687_v24, %v703_v30 }
 0x1f3   :  { %vm698_vm12 = vcmp.ge.f32.partialorder %v690_v33, 0.0  ;;  %v706_v35 = vmul.f32 0.01, %v690_v33  ;;  %v712_v38 = vsel %vm696_vm10, %v688_v28, %v704_v32 }
 0x1f4   :  { %v713_v37 = vsel %vm697_vm11, %v689_v31, %v705_v34 }
 0x1f5   :  { %v714_v39 = vsel %vm698_vm12, %v690_v33, %v706_v35  ;;  %v937_v40 = vpack.c.bf16 %v713_v37, %v711_v36 }
 0x1f6   :  { %v935_v41 = vpack.c.bf16 %v714_v39, %v712_v38 }
 0x1f8   :  { %936 = vmatprep.subr.bf16.mxu0 %v935_v41 }
 0x1f9   :  { %938 = vmatpush1.bf16.msra.mxu0 %v937_v40 }
 0x1fc   :  { %856 = vmatmul.mubr.msk.f32.vlgmr.msra.gmra.mrb[12].mxu0 %vm716_vm13, %v715_v42 }
 0x2cf   :  { %v786_v43 = vpop.f32.mrb[12].mxu0 }
 0x2d0   :  { %791 = vst [vmem:[%s1246_s7] sm:$0xff] %v786_v43  ;;  %v788_v44 = vpop.f32.mrb[13].mxu0 }
 0x2d1   :  { %792 = vst [vmem:[%s1246_s7 + $0x8] sm:$0xff] %v788_v44 }

</bundles_post_ra>
